<compile_context>
chip_gen: v7x
topology: tpu7x:2x2x1
jax: 0.10.0
libtpu: 0.0.40
codegen_flags: <defaults>
</compile_context>

<pallas_src>
import functools

import numpy as np
import jax
import jax.numpy as jnp
from jax.experimental import pallas as pl
from jax.experimental.pallas import tpu as pltpu


def _round_up(x, m):
    return ((x + m - 1) // m) * m


# ------------------------------ Fused kernel ------------------------------- #
def _mlp_kernel(x_ref, w1_ref, b1_ref, w2_ref, b2_ref, w3_ref, b3_ref,
                x1_ref, x2_ref, x3_ref):
    # x_ref : (bm, d_in)       bf16 batch tile
    # wK_ref: (in, out)        bf16 weights (resident across the batch grid)
    # bK_ref: (1, out)         f32 biases
    # xK_ref: (bm, out)        outputs for this batch tile
    x = x_ref[...]

    h1 = jnp.dot(x, w1_ref[...], preferred_element_type=jnp.float32) + b1_ref[...]
    h1 = jnp.maximum(h1, 0.0)
    x1_ref[...] = h1.astype(x1_ref.dtype)

    h2 = jnp.dot(h1.astype(w2_ref.dtype), w2_ref[...],
                 preferred_element_type=jnp.float32) + b2_ref[...]
    h2 = jnp.maximum(h2, 0.0)
    x2_ref[...] = h2.astype(x2_ref.dtype)

    h3 = jnp.dot(h2.astype(w3_ref.dtype), w3_ref[...],
                 preferred_element_type=jnp.float32) + b3_ref[...]
    x3_ref[...] = h3.astype(x3_ref.dtype)


# --------------------------- One-time weight prep --------------------------- #
def prepare_mlp_params(params, *, compute_dtype=jnp.bfloat16):
    """Hoisted out of the per-call path: cast weights to the MXU compute dtype,
    zero-pad the final output dim up to a multiple of 128 lanes, and reshape
    biases to (1, out).  Call once at init; feed the result to mlp_forward.

    params = (w1, b1, w2, b2, w3, b3) with weights stored as
    (in_features, out_features), i.e. the transpose of PyTorch Linear.weight.
    Returns (prepped_arrays_tuple, d_out).
    """
    w1, b1, w2, b2, w3, b3 = params
    hu = w1.shape[1]
    d_out = w3.shape[1]
    d_out_p = _round_up(d_out, 128)

    w3p = jnp.zeros((hu, d_out_p), w3.dtype).at[:, :d_out].set(w3)
    b3p = jnp.zeros((d_out_p,), b3.dtype).at[:d_out].set(b3)

    prepped = (
        w1.astype(compute_dtype),
        b1.reshape(1, hu).astype(jnp.float32),
        w2.astype(compute_dtype),
        b2.reshape(1, hu).astype(jnp.float32),
        w3p.astype(compute_dtype),
        b3p.reshape(1, d_out_p).astype(jnp.float32),
    )
    return prepped, d_out


# -------------------------------- Wrapper ---------------------------------- #
def mlp_forward(x, prepped, *, d_out, block_b=256,
                activations_dtype=jnp.float32, compute_dtype=jnp.bfloat16):
    """PyTorch-equivalent MLP.forward on pre-prepared params.

    x: (B, d_in) f32.  prepped: output of prepare_mlp_params (already bf16 /
    padded / reshaped).  Returns (x1, x2, x3) matching the module's
    `return (x1, x2, x3)`, in `activations_dtype` (default f32).
    """
    w1, b1, w2, b2, w3, b3 = prepped
    B, d_in = x.shape
    hu = w1.shape[1]
    d_out_p = w3.shape[1]

    # Batch tiling: one grid step for small batches (weights DMA'd once, zero
    # per-step overhead); bm=block_b tiles for large batches.
    if B <= 256:
        bm = _round_up(B, 16)
    else:
        bm = block_b
    B_p = _round_up(B, bm)

    xp = x
    if B_p != B:
        xp = jnp.zeros((B_p, d_in), x.dtype).at[:B].set(x)
    xp = xp.astype(compute_dtype)

    grid = (B_p // bm,)
    x1, x2, x3 = pl.pallas_call(
        _mlp_kernel,
        out_shape=(
            jax.ShapeDtypeStruct((B_p, hu), activations_dtype),
            jax.ShapeDtypeStruct((B_p, hu), activations_dtype),
            jax.ShapeDtypeStruct((B_p, d_out_p), activations_dtype),
        ),
        grid=grid,
        in_specs=[
            pl.BlockSpec((bm, d_in), lambda i: (i, 0)),       # x batch tile
            pl.BlockSpec((d_in, hu), lambda i: (0, 0)),       # w1 (resident)
            pl.BlockSpec((1, hu), lambda i: (0, 0)),          # b1
            pl.BlockSpec((hu, hu), lambda i: (0, 0)),         # w2 (resident)
            pl.BlockSpec((1, hu), lambda i: (0, 0)),          # b2
            pl.BlockSpec((hu, d_out_p), lambda i: (0, 0)),    # w3 (resident)
            pl.BlockSpec((1, d_out_p), lambda i: (0, 0)),     # b3
        ],
        out_specs=(
            pl.BlockSpec((bm, hu), lambda i: (i, 0)),
            pl.BlockSpec((bm, hu), lambda i: (i, 0)),
            pl.BlockSpec((bm, d_out_p), lambda i: (i, 0)),
        ),
        compiler_params=pltpu.CompilerParams(
            dimension_semantics=("parallel",),
        ),
    )(xp, w1, b1, w2, b2, w3, b3)

    return x1[:B], x2[:B], x3[:B, :d_out]


# ---------------------------------- Main ------------------------------------ #
if __name__ == "__main__":
    key = jax.random.PRNGKey(0)
    B, input_dim, output_dim, hu = 32, 32, 10, 1600  # hu matches module default

    kx, kw1, kb1, kw2, kb2, kw3, kb3 = jax.random.split(key, 7)

    def init_linear(kw, kb, fan_in, fan_out):
        # PyTorch default Linear init: U(-1/sqrt(fan_in), 1/sqrt(fan_in)).
        # Stored as (in, out) == PyTorch weight transposed.
        bound = 1.0 / np.sqrt(fan_in)
        w = jax.random.uniform(kw, (fan_in, fan_out), jnp.float32, -bound, bound)
        b = jax.random.uniform(kb, (fan_out,), jnp.float32, -bound, bound)
        return w, b

    w1, b1 = init_linear(kw1, kb1, input_dim, hu)
    w2, b2 = init_linear(kw2, kb2, hu, hu)
    w3, b3 = init_linear(kw3, kb3, hu, output_dim)
    params = (w1, b1, w2, b2, w3, b3)

    # One-time weight prep (cast/pad/reshape) — NOT in the per-call path.
    prepped, d_out = prepare_mlp_params(params)
    prepped = jax.block_until_ready(prepped)

    fwd = jax.jit(functools.partial(mlp_forward, d_out=d_out))

    x = jax.random.normal(kx, (B, input_dim), jnp.float32)

    x1, x2, x3 = fwd(x, prepped)
    jax.block_until_ready((x1, x2, x3))

    assert x1.shape == (B, hu), x1.shape
    assert x2.shape == (B, hu), x2.shape
    assert x3.shape == (B, output_dim), x3.shape

    # Plain-JAX f32 reference (bf16 operands + f32 accumulation in the kernel
    # keep the error well inside this tolerance).
    r1 = jax.nn.relu(x @ w1 + b1)
    r2 = jax.nn.relu(r1 @ w2 + b2)
    r3 = r2 @ w3 + b3

    np.testing.assert_allclose(np.asarray(x1), np.asarray(r1), rtol=3e-2, atol=3e-2)
    np.testing.assert_allclose(np.asarray(x2), np.asarray(r2), rtol=3e-2, atol=3e-2)
    np.testing.assert_allclose(np.asarray(x3), np.asarray(r3), rtol=3e-2, atol=3e-2)

    print("KERNEL_OK")
</pallas_src>

<mosaic_0001>
module attributes {stable_mosaic.version = 11 : i64} {
  func.func @_mlp_kernel(%arg0: i32, %arg1: memref<32x32xbf16, #tpu.memory_space<vmem>>, %arg2: memref<32x1600xbf16, #tpu.memory_space<vmem>>, %arg3: memref<1x1600xf32, #tpu.memory_space<vmem>>, %arg4: memref<1600x1600xbf16, #tpu.memory_space<vmem>>, %arg5: memref<1x1600xf32, #tpu.memory_space<vmem>>, %arg6: memref<1600x128xbf16, #tpu.memory_space<vmem>>, %arg7: memref<1x128xf32, #tpu.memory_space<vmem>>, %arg8: memref<32x1600xf32, #tpu.memory_space<vmem>>, %arg9: memref<32x1600xf32, #tpu.memory_space<vmem>>, %arg10: memref<32x128xf32, #tpu.memory_space<vmem>>) attributes {dimension_semantics = [#tpu.dimension_semantics<parallel>], iteration_bounds = array<i64: 1>, scalar_prefetch = 0 : i64, scratch_operands = 0 : i64, tpu.core_type = #tpu.core_type<tc>, window_params = [{transform_indices = @transform_0, window_bounds = array<i64: 32, 32>}, {pipeline_mode = #tpu.pipeline_mode<synchronous>, transform_indices = @transform_1, window_bounds = array<i64: 32, 1600>}, {pipeline_mode = #tpu.pipeline_mode<synchronous>, transform_indices = @transform_2, window_bounds = array<i64: 1, 1600>}, {pipeline_mode = #tpu.pipeline_mode<synchronous>, transform_indices = @transform_3, window_bounds = array<i64: 1600, 1600>}, {pipeline_mode = #tpu.pipeline_mode<synchronous>, transform_indices = @transform_4, window_bounds = array<i64: 1, 1600>}, {pipeline_mode = #tpu.pipeline_mode<synchronous>, transform_indices = @transform_5, window_bounds = array<i64: 1600, 128>}, {pipeline_mode = #tpu.pipeline_mode<synchronous>, transform_indices = @transform_6, window_bounds = array<i64: 1, 128>}, {transform_indices = @transform_7, window_bounds = array<i64: 32, 1600>}, {transform_indices = @transform_8, window_bounds = array<i64: 32, 1600>}, {transform_indices = @transform_9, window_bounds = array<i64: 32, 128>}]} {
    %c0 = arith.constant 0 : index
    %c0_0 = arith.constant 0 : index
    %0 = vector.load %arg1[%c0, %c0_0] : memref<32x32xbf16, #tpu.memory_space<vmem>>, vector<32x32xbf16>
    %c0_1 = arith.constant 0 : index
    %c0_2 = arith.constant 0 : index
    %1 = vector.load %arg2[%c0_1, %c0_2] : memref<32x1600xbf16, #tpu.memory_space<vmem>>, vector<32x1600xbf16>
    %cst = arith.constant dense<0.000000e+00> : vector<32x1600xf32>
    %2 = tpu.matmul %0, %1, %cst {dimension_numbers = #tpu.dot_dimension_numbers<[1], [0], [0], [1], [0, 0, 1, 1], [], []>} : vector<32x32xbf16>, vector<32x1600xbf16>, vector<32x1600xf32> -> vector<32x1600xf32>
    %c0_3 = arith.constant 0 : index
    %c0_4 = arith.constant 0 : index
    %3 = vector.load %arg3[%c0_3, %c0_4] : memref<1x1600xf32, #tpu.memory_space<vmem>>, vector<1x1600xf32>
    %4 = vector.broadcast %3 : vector<1x1600xf32> to vector<32x1600xf32>
    %5 = arith.addf %2, %4 : vector<32x1600xf32>
    %cst_5 = arith.constant 0.000000e+00 : f32
    %6 = vector.broadcast %cst_5 : f32 to vector<32x1600xf32>
    %7 = arith.maximumf %5, %6 : vector<32x1600xf32>
    %c0_6 = arith.constant 0 : index
    %c0_7 = arith.constant 0 : index
    %8 = vector.load %arg8[%c0_6, %c0_7] : memref<32x1600xf32, #tpu.memory_space<vmem>>, vector<32x1600xf32>
    tpu.vector_store %arg8[%c0_6, %c0_7], %7 {strides = array<i32>} : memref<32x1600xf32, #tpu.memory_space<vmem>>, vector<32x1600xf32>,
    %9 = arith.truncf %7 : vector<32x1600xf32> to vector<32x1600xbf16>
    %c0_8 = arith.constant 0 : index
    %c0_9 = arith.constant 0 : index
    %10 = vector.load %arg4[%c0_8, %c0_9] : memref<1600x1600xbf16, #tpu.memory_space<vmem>>, vector<1600x1600xbf16>
    %cst_10 = arith.constant dense<0.000000e+00> : vector<32x1600xf32>
    %11 = tpu.matmul %9, %10, %cst_10 {dimension_numbers = #tpu.dot_dimension_numbers<[1], [0], [0], [1], [0, 0, 1, 1], [], []>} : vector<32x1600xbf16>, vector<1600x1600xbf16>, vector<32x1600xf32> -> vector<32x1600xf32>
    %c0_11 = arith.constant 0 : index
    %c0_12 = arith.constant 0 : index
    %12 = vector.load %arg5[%c0_11, %c0_12] : memref<1x1600xf32, #tpu.memory_space<vmem>>, vector<1x1600xf32>
    %13 = vector.broadcast %12 : vector<1x1600xf32> to vector<32x1600xf32>
    %14 = arith.addf %11, %13 : vector<32x1600xf32>
    %cst_13 = arith.constant 0.000000e+00 : f32
    %15 = vector.broadcast %cst_13 : f32 to vector<32x1600xf32>
    %16 = arith.maximumf %14, %15 : vector<32x1600xf32>
    %c0_14 = arith.constant 0 : index
    %c0_15 = arith.constant 0 : index
    %17 = vector.load %arg9[%c0_14, %c0_15] : memref<32x1600xf32, #tpu.memory_space<vmem>>, vector<32x1600xf32>
    tpu.vector_store %arg9[%c0_14, %c0_15], %16 {strides = array<i32>} : memref<32x1600xf32, #tpu.memory_space<vmem>>, vector<32x1600xf32>,
    %18 = arith.truncf %16 : vector<32x1600xf32> to vector<32x1600xbf16>
    %c0_16 = arith.constant 0 : index
    %c0_17 = arith.constant 0 : index
    %19 = vector.load %arg6[%c0_16, %c0_17] : memref<1600x128xbf16, #tpu.memory_space<vmem>>, vector<1600x128xbf16>
    %cst_18 = arith.constant dense<0.000000e+00> : vector<32x128xf32>
    %20 = tpu.matmul %18, %19, %cst_18 {dimension_numbers = #tpu.dot_dimension_numbers<[1], [0], [0], [1], [0, 0, 1, 1], [], []>} : vector<32x1600xbf16>, vector<1600x128xbf16>, vector<32x128xf32> -> vector<32x128xf32>
    %c0_19 = arith.constant 0 : index
    %c0_20 = arith.constant 0 : index
    %21 = vector.load %arg7[%c0_19, %c0_20] : memref<1x128xf32, #tpu.memory_space<vmem>>, vector<1x128xf32>
    %22 = vector.broadcast %21 : vector<1x128xf32> to vector<32x128xf32>
    %23 = arith.addf %20, %22 : vector<32x128xf32>
    %c0_21 = arith.constant 0 : index
    %c0_22 = arith.constant 0 : index
    %24 = vector.load %arg10[%c0_21, %c0_22] : memref<32x128xf32, #tpu.memory_space<vmem>>, vector<32x128xf32>
    tpu.vector_store %arg10[%c0_21, %c0_22], %23 {strides = array<i32>} : memref<32x128xf32, #tpu.memory_space<vmem>>, vector<32x128xf32>,
    return
  }
  func.func @transform_0(%arg0: i32) -> (i32, i32) {
    %c0_i32 = arith.constant 0 : i32
    %c0_i32_0 = arith.constant 0 : i32
    return %arg0, %c0_i32 : i32, i32
  }
  func.func @transform_1(%arg0: i32) -> (i32, i32) {
    %c0_i32 = arith.constant 0 : i32
    %c0_i32_0 = arith.constant 0 : i32
    %c0_i32_1 = arith.constant 0 : i32
    return %c0_i32, %c0_i32_0 : i32, i32
  }
  func.func @transform_2(%arg0: i32) -> (i32, i32) {
    %c0_i32 = arith.constant 0 : i32
    %c0_i32_0 = arith.constant 0 : i32
    %c0_i32_1 = arith.constant 0 : i32
    return %c0_i32, %c0_i32_0 : i32, i32
  }
  func.func @transform_3(%arg0: i32) -> (i32, i32) {
    %c0_i32 = arith.constant 0 : i32
    %c0_i32_0 = arith.constant 0 : i32
    %c0_i32_1 = arith.constant 0 : i32
    return %c0_i32, %c0_i32_0 : i32, i32
  }
  func.func @transform_4(%arg0: i32) -> (i32, i32) {
    %c0_i32 = arith.constant 0 : i32
    %c0_i32_0 = arith.constant 0 : i32
    %c0_i32_1 = arith.constant 0 : i32
    return %c0_i32, %c0_i32_0 : i32, i32
  }
  func.func @transform_5(%arg0: i32) -> (i32, i32) {
    %c0_i32 = arith.constant 0 : i32
    %c0_i32_0 = arith.constant 0 : i32
    %c0_i32_1 = arith.constant 0 : i32
    return %c0_i32, %c0_i32_0 : i32, i32
  }
  func.func @transform_6(%arg0: i32) -> (i32, i32) {
    %c0_i32 = arith.constant 0 : i32
    %c0_i32_0 = arith.constant 0 : i32
    %c0_i32_1 = arith.constant 0 : i32
    return %c0_i32, %c0_i32_0 : i32, i32
  }
  func.func @transform_7(%arg0: i32) -> (i32, i32) {
    %c0_i32 = arith.constant 0 : i32
    %c0_i32_0 = arith.constant 0 : i32
    return %arg0, %c0_i32 : i32, i32
  }
  func.func @transform_8(%arg0: i32) -> (i32, i32) {
    %c0_i32 = arith.constant 0 : i32
    %c0_i32_0 = arith.constant 0 : i32
    return %arg0, %c0_i32 : i32, i32
  }
  func.func @transform_9(%arg0: i32) -> (i32, i32) {
    %c0_i32 = arith.constant 0 : i32
    %c0_i32_0 = arith.constant 0 : i32
    return %arg0, %c0_i32 : i32, i32
  }
}

</mosaic_0001>

<bundles_post_ra>
// kernel: mlp_forward.1
= control target key start
LH: loop header
LB: loop body
LE: loop exit
PB: predicated region body
PF: predicated region fallthrough
CT: control target
= control target key end

     0   :  { %15 = vsyncpa [#allocation3], 0  ;;  %s17998_s0 = inlined_call_operand.vmem [shape: bf16[32,32], index: 0, kind: input, shape index: {}]   ;;  %s17999_s1 = inlined_call_operand.hbm [shape: bf16[32,1600], index: 1, kind: input, shape index: {}]   ;;  %s18000_s2 = inlined_call_operand.hbm [shape: f32[1,1600], index: 2, kind: input, shape index: {}]   ;;  %s18001_s3 = inlined_call_operand.hbm [shape: bf16[1600,1600], index: 3, kind: input, shape index: {}]   ;;  %s18002_s4 = inlined_call_operand.hbm [shape: f32[1,1600], index: 4, kind: input, shape index: {}]   ;;  %s18003_s5 = inlined_call_operand.hbm [shape: bf16[1600,128], index: 5, kind: input, shape index: {}]   ;;  %s18004_s6 = inlined_call_operand.hbm [shape: f32[1,128], index: 6, kind: input, shape index: {}]   ;;  %s18005_s7 = inlined_call_operand.hbm [shape: f32[32,1600], index: 7, kind: output, shape index: {0}]   ;;  %s18006_s8 = inlined_call_operand.hbm [shape: f32[32,1600], index: 8, kind: output, shape index: {1}]   ;;  %s18007_s9 = inlined_call_operand.vmem [shape: f32[32,128], index: 9, kind: output, shape index: {2}]  }
   0x1   :  { %16 = vsyncpa [#allocation6], 0 }
   0x2   :  { %17 = vsyncpa [#allocation9], 0 }
   0x3   :  { %18 = vsyncpa [#allocation12], 0 }
   0x4   :  { %19 = vsyncpa [#allocation4], 0 }
   0x5   :  { %20 = vsyncpa [#allocation15], 0  ;;  %s17253_s30 = smov [#allocation5]   ;;  %s17254_s11 = smov [#allocation8]  }
   0x6   :  { %s41_s10 = sshll.u32 %s17253_s30, 4  ;;  %s63_s12 = sshll.u32 %s17254_s11, 4  ;;  %s42_s10 = int_to_ptr.vmem [resolvable:$true] %s41_s10  ;;  %s64_s12 = int_to_ptr.vmem [resolvable:$true] %s63_s12 }
   0x7   :  { %s17065_s15 = scalar_lea.hbm %s18000_s2, 208 }
   0x8   :  { %p17066_p0 = scmp.ne.s32.totalorder %s18000_s2, %s17065_s15  ;;  %p17069_p1 = scmp.lt.u32.totalorder %s17065_s15, %s18000_s2 }
   0xa   :  { %p17071_p2 = pnand %p17069_p1, %p17066_p0 }
   0xc   :  { %17074 = shalt.err (!%p17071_p2)
}
   0xd   :  { %s17075_s20 = scalar_lea.vmem %s42_s10, 208  ;;  %s17079_s21 = scalar_lea.vmem %s42_s10, 224 }
   0xe   :  { %p17076_p3 = scmp.ne.s32.totalorder %s42_s10, %s17075_s20  ;;  %p17080_p4 = scmp.lt.s32.totalorder %s42_s10, %s42_s10 }
   0xf   :  { %p17081_p5 = scmp.lt.s32.totalorder %s17079_s21, %s17075_s20 }
  0x11   :  { %p17082_p6 = por %p17081_p5, %p17080_p4 }
  0x13   :  { %p17083_p7 = pnand %p17082_p6, %p17076_p3 }
  0x15   :  { %17086 = shalt.err (!%p17083_p7)
}
  0x16   :  { %44 = dma.hbm_to_vmem [thread:$0]  %s18000_s2, 208, %s42_s10, [#allocation6]  }
  0x17   :  { %s17087_s26 = scalar_lea.hbm %s18002_s4, 208 }
  0x18   :  { %p17088_p8 = scmp.ne.s32.totalorder %s18002_s4, %s17087_s26  ;;  %p17091_p9 = scmp.lt.u32.totalorder %s17087_s26, %s18002_s4 }
  0x1a   :  { %p17093_p10 = pnand %p17091_p9, %p17088_p8 }
  0x1c   :  { %17096 = shalt.err (!%p17093_p10)
}
  0x1d   :  { %s17097_s11 = scalar_lea.vmem %s64_s12, 208  ;;  %s17101_s13 = scalar_lea.vmem %s64_s12, 224 }
  0x1e   :  { %p17098_p11 = scmp.ne.s32.totalorder %s64_s12, %s17097_s11  ;;  %p17102_p12 = scmp.lt.s32.totalorder %s64_s12, %s64_s12 }
  0x1f   :  { %p17103_p13 = scmp.lt.s32.totalorder %s17101_s13, %s17097_s11 }
  0x21   :  { %p17104_p0 = por %p17103_p13, %p17102_p12 }
  0x23   :  { %p17105_p1 = pnand %p17104_p0, %p17098_p11 }
  0x25   :  { %17108 = shalt.err (!%p17105_p1)
}
  0x26   :  { %66 = dma.hbm_to_vmem [thread:$0]  %s18002_s4, 208, %s64_s12, [#allocation9]  }
  0x27   :  { %s17255_s14 = smov [#allocation2]   ;;  %s17109_s18 = scalar_lea.hbm %s17999_s1, 3328 }
  0x28   :  { %s28_s15 = sshll.u32 %s17255_s14, 4  ;;  %p17110_p2 = scmp.ne.s32.totalorder %s17999_s1, %s17109_s18  ;;  %s29_s15 = int_to_ptr.vmem [resolvable:$true] %s28_s15 }
  0x29   :  { %p17113_p3 = scmp.lt.u32.totalorder %s17109_s18, %s17999_s1 }
  0x2b   :  { %p17115_p4 = pnand %p17113_p3, %p17110_p2 }
  0x2d   :  { %17118 = shalt.err (!%p17115_p4)
}
  0x2e   :  { %s17119_s23 = scalar_lea.vmem %s29_s15, 3328  ;;  %p17124_p6 = scmp.lt.s32.totalorder %s29_s15, %s29_s15 }
  0x2f   :  { %p17120_p5 = scmp.ne.s32.totalorder %s29_s15, %s17119_s23  ;;  %p17125_p7 = scmp.lt.s32.totalorder %s17119_s23, %s17119_s23 }
  0x31   :  { %p17126_p8 = por %p17125_p7, %p17124_p6 }
  0x33   :  { %p17127_p9 = pnand %p17126_p8, %p17120_p5 }
  0x35   :  { %17130 = shalt.err (!%p17127_p9)
}
  0x36   :  { %s17256_s4 = smov 832   ;;  %s17257_s12 = smov 52  }
  0x37   :  { %34 = dma.hbm_to_vmem [thread:$0]  %s17999_s1, 3328, %s29_s15, [#allocation3], %s17256_s4, %s17256_s4, %s17257_s12  }
  0x38   :  { %s17258_s26 = smov [#allocation7]   ;;  %s17259_s28 = smov [#allocation10]  }
  0x39   :  { %s50_s27 = sshll.u32 %s17258_s26, 4  ;;  %s72_s29 = sshll.u32 %s17259_s28, 4  ;;  %s51_s27 = int_to_ptr.vmem [resolvable:$true] %s50_s27  ;;  %s73_s29 = int_to_ptr.vmem [resolvable:$true] %s72_s29 }
  0x3a   :  { %s17131_s13 = scalar_lea.hbm %s18001_s3, 166400 }
  0x3b   :  { %p17132_p10 = scmp.ne.s32.totalorder %s18001_s3, %s17131_s13  ;;  %p17135_p11 = scmp.lt.u32.totalorder %s17131_s13, %s18001_s3 }
  0x3d   :  { %p17137_p12 = pnand %p17135_p11, %p17132_p10 }
  0x3f   :  { %17140 = shalt.err (!%p17137_p12)
}
  0x40   :  { %s17141_s1 = scalar_lea.vmem %s51_s27, 166400  ;;  %p17146_p0 = scmp.lt.s32.totalorder %s51_s27, %s51_s27 }
  0x41   :  { %p17142_p13 = scmp.ne.s32.totalorder %s51_s27, %s17141_s1  ;;  %p17147_p1 = scmp.lt.s32.totalorder %s17141_s1, %s17141_s1 }
  0x43   :  { %p17148_p2 = por %p17147_p1, %p17146_p0 }
  0x45   :  { %p17149_p3 = pnand %p17148_p2, %p17142_p13 }
  0x47   :  { %17152 = shalt.err (!%p17149_p3)
}
  0x48   :  { %56 = dma.hbm_to_vmem [thread:$0]  %s18001_s3, 166400, %s51_s27, [#allocation6], %s17256_s4, %s17256_s4, %s17257_s12  }
  0x49   :  { %s17153_s20 = scalar_lea.hbm %s18003_s5, 12800 }
  0x4a   :  { %p17154_p4 = scmp.ne.s32.totalorder %s18003_s5, %s17153_s20  ;;  %p17157_p5 = scmp.lt.u32.totalorder %s17153_s20, %s18003_s5 }
  0x4c   :  { %p17159_p6 = pnand %p17157_p5, %p17154_p4 }
  0x4e   :  { %17162 = shalt.err (!%p17159_p6)
}
  0x4f   :  { %s17163_s25 = scalar_lea.vmem %s73_s29, 12800  ;;  %p17168_p8 = scmp.lt.s32.totalorder %s73_s29, %s73_s29 }
  0x50   :  { %p17164_p7 = scmp.ne.s32.totalorder %s73_s29, %s17163_s25  ;;  %p17169_p9 = scmp.lt.s32.totalorder %s17163_s25, %s17163_s25 }
  0x52   :  { %p17170_p10 = por %p17169_p9, %p17168_p8 }
  0x54   :  { %p17171_p11 = pnand %p17170_p10, %p17164_p7 }
  0x56   :  { %17174 = shalt.err (!%p17171_p11)
}
  0x57   :  { %s17260_s3 = smov 64   ;;  %s17261_s4 = smov 4  }
  0x58   :  { %78 = dma.hbm_to_vmem [thread:$0]  %s18003_s5, 12800, %s73_s29, [#allocation9], %s17260_s3, %s17260_s3, %s17261_s4  }
  0x59   :  { %s17262_s27 = smov [#allocation11]   ;;  %s17175_s13 = scalar_lea.hbm %s18004_s6, 16 }
  0x5a   :  { %s85_s28 = sshll.u32 %s17262_s27, 4  ;;  %p17176_p12 = scmp.ne.s32.totalorder %s18004_s6, %s17175_s13  ;;  %s86_s28 = int_to_ptr.vmem [resolvable:$true] %s85_s28 }
  0x5b   :  { %p17179_p13 = scmp.lt.u32.totalorder %s17175_s13, %s18004_s6 }
  0x5d   :  { %p17181_p0 = pnand %p17179_p13, %p17176_p12 }
  0x5f   :  { %17184 = shalt.err (!%p17181_p0)
}
  0x60   :  { %s17185_s1 = scalar_lea.vmem %s86_s28, 16  ;;  %s17189_s5 = scalar_lea.vmem %s86_s28, 32 }
  0x61   :  { %p17186_p1 = scmp.ne.s32.totalorder %s86_s28, %s17185_s1  ;;  %p17190_p2 = scmp.lt.s32.totalorder %s86_s28, %s86_s28 }
  0x62   :  { %p17191_p3 = scmp.lt.s32.totalorder %s17189_s5, %s17185_s1 }
  0x64   :  { %p17192_p4 = por %p17191_p3, %p17190_p2 }
  0x66   :  { %p17193_p5 = pnand %p17192_p4, %p17186_p1 }
  0x68   :  { %17196 = shalt.err (!%p17193_p5)
}
  0x69   :  { %88 = dma.hbm_to_vmem [thread:$0]  %s18004_s6, 16, %s86_s28, [#allocation12]  }
  0x6a   :  { %17241 = dma.done.wait [#allocation3], 3328  }
  0x6b   :  { %17242 = vsyncadd [#allocation3], 4294963968 }
  0x6c   :  { %17243 = dma.done.wait [#allocation6], 166608  }
  0x6d   :  { %17244 = vsyncadd [#allocation6], 4294800688 }
  0x6e   :  { %17245 = dma.done.wait [#allocation9], 13008  }
  0x6f   :  { %17246 = vsyncadd [#allocation9], 4294954288 }
  0x70   :  { %17247 = dma.done.wait [#allocation12], 16  }
  0x71   :  { %17248 = vsyncadd [#allocation12], 4294967280  ;;  %v18011_v0 = vmov 0   ;;  %v15024_v1 = vld [vmem:[#allocation2 + $0x4] ss:$52 sps:$4 sm:$0xff]   ;;  %vm351_vm0 = vcmask 261120  }
  0x72   :  { %390 = vmatprep.mubr.bf16.mxu0 %v18011_v0  ;;  %443 = vmatprep.mubr.bf16.mxu1 %v18011_v0  ;;  %v15026_v2 = vld [vmem:[#allocation2] ss:$52 sps:$4 sm:$0xff]   ;;  %v15029_v4 = vld [vmem:[#allocation2 + $0x68] ss:$52 sps:$4 sm:$0xff]   ;;  %v15037_v9 = vld [vmem:[#allocation2 + $0x70] ss:$52 sps:$4 sm:$0xff]  }
  0x73   :  { %358 = vmatprep.subr.bf16.mxu0 %v15024_v1  ;;  %v15027_v3 = vld [vmem:[#allocation2 + $0x6c] ss:$52 sps:$4 sm:$0xff]   ;;  %v15034_v7 = vld [vmem:[#allocation2 + $0x8] ss:$52 sps:$4 sm:$0xff]   ;;  %v15038_v10 = vld [vmem:[#allocation2 + $0x10] ss:$52 sps:$4 sm:$0xff]  }
  0x74   :  { %359 = vmatpush1.bf16.msra.mxu0 %v15026_v2  ;;  %v17395_v5 = vld [vmem:[%s17998_s0] sm:$0xff]   ;;  %v15035_v8 = vld [vmem:[#allocation2 + $0x74] ss:$52 sps:$4 sm:$0xff]   ;;  %v15043_v12 = vld [vmem:[#allocation2 + $0x7c] ss:$52 sps:$4 sm:$0xff]   ;;  %vm789_vm1 = vcmask 523264  }
  0x75   :  { %360 = vmatprep.subr.bf16.mxu0 %v15027_v3  ;;  %v15032_v6 = vld [vmem:[#allocation2 + $0xc] ss:$52 sps:$4 sm:$0xff]   ;;  %v15040_v11 = vld [vmem:[#allocation2 + $0x14] ss:$52 sps:$4 sm:$0xff]   ;;  %v15046_v14 = vld [vmem:[#allocation2 + $0x1c] ss:$52 sps:$4 sm:$0xff]  }
  0x76   :  { %411 = vmatprep.subr.bf16.mxu1 %v15032_v6  ;;  %v15041_v13 = vld [vmem:[#allocation2 + $0x78] ss:$52 sps:$4 sm:$0xff]   ;;  %v15050_v19 = vld [vmem:[#allocation2 + $0x80] ss:$52 sps:$4 sm:$0xff]   ;;  %v15053_v23 = vld [vmem:[#allocation2 + $0x88] ss:$52 sps:$4 sm:$0xff]  }
  0x77   :  { %412 = vmatpush1.bf16.msra.mxu1 %v15034_v7  ;;  %v15044_v15 = vld [vmem:[#allocation2 + $0x18] ss:$52 sps:$4 sm:$0xff]   ;;  %v15047_v21 = vld [vmem:[#allocation2 + $0x20] ss:$52 sps:$4 sm:$0xff]   ;;  %v15056_v24 = vld [vmem:[#allocation2 + $0x28] ss:$52 sps:$4 sm:$0xff]  }
  0x78   :  { %361 = vmatpush1.bf16.msra.mxu0 %v15029_v4  ;;  %413 = vmatprep.subr.bf16.mxu1 %v15035_v8  ;;  %v15049_v16 = vld [vmem:[#allocation2 + $0x24] ss:$52 sps:$4 sm:$0xff]   ;;  %v17403_v18 = vld [vmem:[%s17998_s0 + $0x8] sm:$0xff]   ;;  %v15064_v30 = vld [vmem:[#allocation7] ss:$52 sps:$4 sm:$0xff]   ;;  %s17264_s0 = smov [#allocation13]  }
  0x79   :  { %464 = vmatprep.subr.bf16.mxu0 %v15040_v11  ;;  %v15052_v17 = vld [vmem:[#allocation2 + $0x84] ss:$52 sps:$4 sm:$0xff]   ;;  %v15058_v20 = vld [vmem:[#allocation2 + $0x2c] ss:$52 sps:$4 sm:$0xff]   ;;  %v15062_v26 = vld [vmem:[#allocation2 + $0x94] ss:$52 sps:$4 sm:$0xff]  }
  0x7a   :  { %v15055_v22 = vld [vmem:[#allocation2 + $0x8c] ss:$52 sps:$4 sm:$0xff]   ;;  %v15059_v25 = vld [vmem:[#allocation2 + $0x30] ss:$52 sps:$4 sm:$0xff]   ;;  %s12795_s20 = sshll.u32 %s17264_s0, 4  ;;  %s17265_s21 = smov [#allocation14]   ;;  %s12796_s20 = int_to_ptr.vmem [resolvable:$true] %s12795_s20 }
  0x7b   :  { %12858 = vmatmul.mubr.msk.bf16.vlgmr.msra.gmra.mrb[0].mxu0 %vm351_vm0, %v17395_v5  ;;  %414 = vmatpush1.bf16.msra.mxu1 %v15037_v9  ;;  %v15060_v27 = vld [vmem:[#allocation2 + $0x90] ss:$52 sps:$4 sm:$0xff]   ;;  %v15063_v29 = vld [vmem:[#allocation2 + $0x98] ss:$52 sps:$4 sm:$0xff]   ;;  %s12807_s22 = sshll.u32 %s17265_s21, 4  ;;  %s17197_s23 = scalar_lea.vmem %s12796_s20, 6656  ;;  %s17954_s22 = int_to_ptr.vmem [resolvable:$true] %s12807_s22 }
  0x7c   :  { %400 = vmatprep.mubr.bf16.mxu0 %v18011_v0  ;;  %465 = vmatpush1.bf16.msra.mxu0 %v15038_v10  ;;  %v15066_v28 = vld [vmem:[#allocation7 + $0x4] ss:$52 sps:$4 sm:$0xff]   ;;  %v15069_v31 = vld [vmem:[#allocation7 + $0xc] ss:$52 sps:$4 sm:$0xff]   ;;  %v15070_v33 = vld [vmem:[#allocation7 + $0x68] ss:$52 sps:$4 sm:$0xff]   ;;  %p17198_p6 = scmp.ne.s32.totalorder %s12796_s20, %s17197_s23  ;;  %p17202_p7 = scmp.lt.s32.totalorder %s12796_s20, %s12796_s20 }
  0x7d   :  { %466 = vmatprep.subr.bf16.mxu0 %v15043_v12  ;;  %517 = vmatprep.subr.bf16.mxu1 %v15046_v14  ;;  %v15072_v32 = vld [vmem:[#allocation7 + $0x6c] ss:$52 sps:$4 sm:$0xff]   ;;  %v15078_v34 = vld [vmem:[#allocation7 + $0xd4] ss:$52 sps:$4 sm:$0xff]   ;;  %v15076_v35 = vld [vmem:[#allocation7 + $0xd0] ss:$52 sps:$4 sm:$0xff]   ;;  %p17203_p8 = scmp.lt.s32.totalorder %s17197_s23, %s17197_s23 }
  0x7e   :  { %12860 = vmatmul.mubr.msk.bf16.vlgmr.msra.gmra.mrb[0].mxu1 %vm351_vm0, %v17395_v5  ;;  %v15084_v36 = vld [vmem:[#allocation7 + $0x13c] ss:$52 sps:$4 sm:$0xff]   ;;  %v15075_v38 = vld [vmem:[#allocation7 + $0x74] ss:$52 sps:$4 sm:$0xff]   ;;  %v15082_v39 = vld [vmem:[#allocation7 + $0x138] ss:$52 sps:$4 sm:$0xff]  }
  0x7f   :  { %453 = vmatprep.mubr.bf16.mxu1 %v18011_v0  ;;  %518 = vmatpush1.bf16.msra.mxu1 %v15044_v15  ;;  %v15067_v37 = vld [vmem:[#allocation7 + $0x8] ss:$52 sps:$4 sm:$0xff]   ;;  %v15073_v40 = vld [vmem:[#allocation7 + $0x70] ss:$52 sps:$4 sm:$0xff]   ;;  %v15088_v43 = vld [vmem:[#allocation7 + $0x1a0] ss:$52 sps:$4 sm:$0xff]   ;;  %p17204_p9 = por %p17203_p8, %p17202_p7 }
  0x80   :  { %467 = vmatpush1.bf16.msra.mxu0 %v15041_v13  ;;  %519 = vmatprep.subr.bf16.mxu1 %v15052_v17  ;;  %v15090_v41 = vld [vmem:[#allocation7 + $0x1a4] ss:$52 sps:$4 sm:$0xff]   ;;  %v15081_v42 = vld [vmem:[#allocation7 + $0xdc] ss:$52 sps:$4 sm:$0xff]   ;;  %v15096_v44 = vld [vmem:[#allocation7 + $0x20c] ss:$52 sps:$4 sm:$0xff]  }
  0x81   :  { %570 = vmatprep.subr.bf16.mxu0 %v15049_v16  ;;  %v15079_v45 = vld [vmem:[#allocation7 + $0xd8] ss:$52 sps:$4 sm:$0xff]   ;;  %v15094_v47 = vld [vmem:[#allocation7 + $0x208] ss:$52 sps:$4 sm:$0xff]   ;;  %v15085_v49 = vld [vmem:[#allocation7 + $0x140] ss:$52 sps:$4 sm:$0xff]   ;;  %p17205_p10 = pnand %p17204_p9, %p17198_p6 }
  0x82   :  { %v15087_v46 = vld [vmem:[#allocation7 + $0x144] ss:$52 sps:$4 sm:$0xff]   ;;  %v15102_v48 = vld [vmem:[#allocation7 + $0x274] ss:$52 sps:$4 sm:$0xff]   ;;  %v15093_v50 = vld [vmem:[#allocation7 + $0x1ac] ss:$52 sps:$4 sm:$0xff]  }
  0x83   :  { %12859 = vmatmul.mubr.msk.bf16.gmra.mrb[4].mxu0 %vm351_vm0, %v17403_v18  ;;  %520 = vmatpush1.bf16.msra.mxu1 %v15050_v19  ;;  %v15100_v51 = vld [vmem:[#allocation7 + $0x270] ss:$52 sps:$4 sm:$0xff]   ;;  %v15091_v53 = vld [vmem:[#allocation7 + $0x1a8] ss:$52 sps:$4 sm:$0xff]   ;;  %v15106_v55 = vld [vmem:[#allocation7 + $0x2d8] ss:$52 sps:$4 sm:$0xff]  }
  0x84   :  { %496 = vmatprep.mubr.bf16.mxu0 %v18011_v0  ;;  %623 = vmatprep.subr.bf16.mxu1 %v15058_v20  ;;  %v15108_v52 = vld [vmem:[#allocation7 + $0x2dc] ss:$52 sps:$4 sm:$0xff]   ;;  %v15099_v54 = vld [vmem:[#allocation7 + $0x214] ss:$52 sps:$4 sm:$0xff]   ;;  %v15114_v56 = vld [vmem:[#allocation7 + $0x344] ss:$52 sps:$4 sm:$0xff]  }
  0x85   :  { %v15097_v57 = vld [vmem:[#allocation7 + $0x210] ss:$52 sps:$4 sm:$0xff]   ;;  %v15112_v59 = vld [vmem:[#allocation7 + $0x340] ss:$52 sps:$4 sm:$0xff]   ;;  %v15103_v61 = vld [vmem:[#allocation7 + $0x278] ss:$52 sps:$4 sm:$0xff]  }
  0x86   :  { %12861 = vmatmul.mubr.msk.bf16.gmra.mrb[4].mxu1 %vm351_vm0, %v17403_v18  ;;  %v15105_v58 = vld [vmem:[#allocation7 + $0x27c] ss:$52 sps:$4 sm:$0xff]   ;;  %v15120_v60 = vld [vmem:[#allocation7 + $0x3ac] ss:$52 sps:$4 sm:$0xff]   ;;  %v15111_v62 = vld [vmem:[#allocation7 + $0x2e4] ss:$52 sps:$4 sm:$0xff]  }
  0x87   :  { %549 = vmatprep.mubr.bf16.mxu1 %v18011_v0  ;;  %v15118_v63 = vld [vmem:[#allocation7 + $0x3a8] ss:$52 sps:$4 sm:$0xff]   ;;  %v15109_v2 = vld [vmem:[#allocation7 + $0x2e0] ss:$52 sps:$4 sm:$0xff]   ;;  %v15124_v4 = vld [vmem:[#allocation7 + $0x410] ss:$52 sps:$4 sm:$0xff]  }
  0x88   :  { %v15126_v1 = vld [vmem:[#allocation7 + $0x414] ss:$52 sps:$4 sm:$0xff]   ;;  %v15117_v3 = vld [vmem:[#allocation7 + $0x34c] ss:$52 sps:$4 sm:$0xff]   ;;  %v15138_v9 = vld [vmem:[#allocation7 + $0x4e4] ss:$52 sps:$4 sm:$0xff]  }
  0x89   :  { %v15115_v6 = vld [vmem:[#allocation7 + $0x348] ss:$52 sps:$4 sm:$0xff]   ;;  %v15130_v8 = vld [vmem:[#allocation7 + $0x478] ss:$52 sps:$4 sm:$0xff]   ;;  %v15121_v10 = vld [vmem:[#allocation7 + $0x3b0] ss:$52 sps:$4 sm:$0xff]  }
  0x8a   :  { %v15123_v7 = vld [vmem:[#allocation7 + $0x3b4] ss:$52 sps:$4 sm:$0xff]   ;;  %v15129_v11 = vld [vmem:[#allocation7 + $0x41c] ss:$52 sps:$4 sm:$0xff]   ;;  %v15127_v13 = vld [vmem:[#allocation7 + $0x418] ss:$52 sps:$4 sm:$0xff]  }
  0x8b   :  { %12862 = vmatmul.mubr.msk.bf16.vlgmr.msra.gmra.mrb[8].mxu0 %vm351_vm0, %v17395_v5  ;;  %v15136_v12 = vld [vmem:[#allocation7 + $0x4e0] ss:$52 sps:$4 sm:$0xff]   ;;  %v15135_v15 = vld [vmem:[#allocation7 + $0x484] ss:$52 sps:$4 sm:$0xff]   ;;  %v15142_v16 = vld [vmem:[#allocation7 + $0x548] ss:$52 sps:$4 sm:$0xff]  }
  0x8c   :  { %571 = vmatpush1.bf16.msra.mxu0 %v15047_v21  ;;  %506 = vmatprep.mubr.bf16.mxu0 %v18011_v0  ;;  %v15144_v14 = vld [vmem:[#allocation7 + $0x54c] ss:$52 sps:$4 sm:$0xff]   ;;  %v15148_v20 = vld [vmem:[#allocation7 + $0x5b0] ss:$52 sps:$4 sm:$0xff]   ;;  %v15139_v21 = vld [vmem:[#allocation7 + $0x4e8] ss:$52 sps:$4 sm:$0xff]  }
  0x8d   :  { %572 = vmatprep.subr.bf16.mxu0 %v15055_v22  ;;  %v15133_v17 = vld [vmem:[#allocation7 + $0x480] ss:$52 sps:$4 sm:$0xff]   ;;  %v15156_v22 = vld [vmem:[#allocation7 + $0x61c] ss:$52 sps:$4 sm:$0xff]  }
  0x8e   :  { %12864 = vmatmul.mubr.msk.bf16.vlgmr.msra.gmra.mrb[8].mxu1 %vm351_vm0, %v17395_v5  ;;  %v15141_v19 = vld [vmem:[#allocation7 + $0x4ec] ss:$52 sps:$4 sm:$0xff]  }
  0x8f   :  { %624 = vmatpush1.bf16.msra.mxu1 %v15056_v24  ;;  %559 = vmatprep.mubr.bf16.mxu1 %v18011_v0  ;;  %v15154_v24 = vld [vmem:[#allocation7 + $0x618] ss:$52 sps:$4 sm:$0xff]  }
  0x90   :  { %573 = vmatpush1.bf16.msra.mxu0 %v15053_v23  ;;  %625 = vmatprep.subr.bf16.mxu1 %v15062_v26  ;;  %v15147_v23 = vld [vmem:[#allocation7 + $0x554] ss:$52 sps:$4 sm:$0xff]   ;;  %v15145_v26 = vld [vmem:[#allocation7 + $0x550] ss:$52 sps:$4 sm:$0xff]  }
  0x91   :  { %14641 = vmatprep.subr.bf16.mxu0 %v15059_v25 }
  0x93   :  { %12863 = vmatmul.mubr.msk.bf16.gmra.mrb[12].mxu0 %vm351_vm0, %v17403_v18  ;;  %626 = vmatpush1.bf16.msra.mxu1 %v15060_v27  ;;  %v15153_v27 = vld [vmem:[#allocation7 + $0x5bc] ss:$52 sps:$4 sm:$0xff]  }
  0x94   :  { %602 = vmatprep.mubr.bf16.mxu0 %v18011_v0  ;;  %8931 = vmatprep.subr.bf16.mxu1 %v15066_v28  ;;  %v15151_v28 = vld [vmem:[#allocation7 + $0x5b8] ss:$52 sps:$4 sm:$0xff]  }
  0x96   :  { %12865 = vmatmul.mubr.msk.bf16.gmra.mrb[12].mxu1 %vm351_vm0, %v17403_v18 }
  0x97   :  { %655 = vmatprep.mubr.bf16.mxu1 %v18011_v0 }
  0x9b   :  { %12866 = vmatmul.mubr.msk.bf16.vlgmr.msra.gmra.mrb[16].mxu0 %vm351_vm0, %v17395_v5 }
  0x9c   :  { %14642 = vmatpush3.bf16.msra.mxu0 %v15059_v25  ;;  %612 = vmatprep.mubr.bf16.mxu0 %v18011_v0  ;;  %v15162_v25 = vld [vmem:[#allocation7 + $0x684] ss:$52 sps:$4 sm:$0xff]  }
  0x9d   :  { %14643 = vmatprep.subr.bf16.mxu0 %v15063_v29 }
  0x9e   :  { %12868 = vmatmul.mubr.msk.bf16.vlgmr.msra.gmra.mrb[16].mxu1 %vm351_vm0, %v17395_v5 }
  0x9f   :  { %8932 = vmatpush1.bf16.msra.mxu1 %v15064_v30  ;;  %665 = vmatprep.mubr.bf16.mxu1 %v18011_v0  ;;  %v15157_v30 = vld [vmem:[#allocation7 + $0x620] ss:$52 sps:$4 sm:$0xff]  }
  0xa0   :  { %14644 = vmatpush3.bf16.msra.mxu0 %v15063_v29  ;;  %8933 = vmatprep.subr.bf16.mxu1 %v15072_v32  ;;  %v15159_v29 = vld [vmem:[#allocation7 + $0x624] ss:$52 sps:$4 sm:$0xff]   ;;  %v144_v32 = vlaneseq }
  0xa1   :  { %9302 = vmatprep.subr.bf16.mxu0 %v15069_v31  ;;  %v15165_v31 = vld [vmem:[#allocation7 + $0x68c] ss:$52 sps:$4 sm:$0xff]  }
  0xa3   :  { %12867 = vmatmul.mubr.msk.bf16.gmra.mrb[20].mxu0 %vm351_vm0, %v17403_v18  ;;  %8934 = vmatpush1.bf16.msra.mxu1 %v15070_v33  ;;  %v17440_v33 = vshrl.u32 %v144_v32, 7 }
  0xa4   :  { %14645 = vmatprep.mubr.msk.bf16.mxu0 %vm351_vm0, %v17395_v5  ;;  %8935 = vmatprep.subr.bf16.mxu1 %v15078_v34  ;;  %v15132_v5 = vld [vmem:[#allocation7 + $0x47c] ss:$52 sps:$4 sm:$0xff]  }
  0xa5   :  { %v17442_v34 = vld [vmem:[#allocation5] sm:$0xff] }
  0xa6   :  { %12869 = vmatmul.mubr.msk.bf16.gmra.mrb[20].mxu1 %vm351_vm0, %v17403_v18 }
  0xa7   :  { %8936 = vmatpush1.bf16.msra.mxu1 %v15076_v35  ;;  %v17445_v35 = vsub.s32 0, %v17440_v33 }
  0xa8   :  { %8937 = vmatprep.subr.bf16.mxu1 %v15084_v36  ;;  %v17448_v36 = vsub.s32 1, %v17440_v33 }
  0xa9   :  { %18018 = vst [vmem:[#allocation22_spill] sm:$0xff] %v17445_v35 }
  0xaa   :  { %18019 = vst [vmem:[#allocation23_spill] sm:$0xff] %v17448_v36 }
  0xab   :  { %14646 = vmatmul.mubr.msk.bf16.vlgmr.msra.gmra.mrb[24].mxu0 %vm351_vm0, %v17403_v18  ;;  %8938 = vmatpush1.bf16.msra.mxu1 %v15082_v39  ;;  %v15150_v18 = vld [vmem:[#allocation7 + $0x5b4] ss:$52 sps:$4 sm:$0xff]   ;;  %v17455_v39 = vsub.s32 2, %v17440_v33 }
  0xac   :  { %9303 = vmatpush1.bf16.msra.mxu0 %v15067_v37  ;;  %8939 = vmatprep.subr.bf16.mxu1 %v15090_v41  ;;  %v147_v37 = vrot.slane %v17442_v34, %v17445_v35 }
  0xad   :  { %9304 = vmatprep.subr.bf16.mxu0 %v15075_v38  ;;  %v151_v38 = vrot.slane %v17442_v34, %v17448_v36  ;;  %18020 = vst [vmem:[#allocation24_spill] sm:$0xff] %v17455_v39 }
  0xaf   :  { %8940 = vmatpush1.bf16.msra.mxu1 %v15088_v43 }
  0xb0   :  { %9305 = vmatpush1.bf16.msra.mxu0 %v15073_v40  ;;  %8941 = vmatprep.subr.bf16.mxu1 %v15096_v44  ;;  %v17458_v40 = vsub.s32 3, %v17440_v33 }
  0xb1   :  { %9306 = vmatprep.subr.bf16.mxu0 %v15081_v42 }
  0xb2   :  { %18021 = vst [vmem:[#allocation25_spill] sm:$0xff] %v17458_v40 }
  0xb3   :  { %8942 = vmatpush1.bf16.msra.mxu1 %v15094_v47 }
  0xb4   :  { %9307 = vmatpush1.bf16.msra.mxu0 %v15079_v45  ;;  %8943 = vmatprep.subr.bf16.mxu1 %v15102_v48 }
  0xb5   :  { %9308 = vmatprep.subr.bf16.mxu0 %v15087_v46  ;;  %v17462_v46 = vrot.slane %v17442_v34, %v17455_v39 }
  0xb7   :  { %8944 = vmatpush1.bf16.msra.mxu1 %v15100_v51 }
  0xb8   :  { %9309 = vmatpush1.bf16.msra.mxu0 %v15085_v49  ;;  %8945 = vmatprep.subr.bf16.mxu1 %v15108_v52 }
  0xb9   :  { %9310 = vmatprep.subr.bf16.mxu0 %v15093_v50  ;;  %v17466_v50 = vrot.slane %v17442_v34, %v17458_v40 }
  0xbb   :  { %8946 = vmatpush1.bf16.msra.mxu1 %v15106_v55 }
  0xbc   :  { %9311 = vmatpush1.bf16.msra.mxu0 %v15091_v53  ;;  %8947 = vmatprep.subr.bf16.mxu1 %v15114_v56  ;;  %v15160_v56 = vld [vmem:[#allocation7 + $0x680] ss:$52 sps:$4 sm:$0xff]  }
  0xbd   :  { %9312 = vmatprep.subr.bf16.mxu0 %v15099_v54 }
  0xbf   :  { %8948 = vmatpush1.bf16.msra.mxu1 %v15112_v59 }
  0xc0   :  { %9313 = vmatpush1.bf16.msra.mxu0 %v15097_v57  ;;  %8949 = vmatprep.subr.bf16.mxu1 %v15120_v60  ;;  %v15163_v57 = vld [vmem:[#allocation7 + $0x688] ss:$52 sps:$4 sm:$0xff]  }
  0xc1   :  { %9314 = vmatprep.subr.bf16.mxu0 %v15105_v58 }
  0xc3   :  { %8950 = vmatpush1.bf16.msra.mxu1 %v15118_v63 }
  0xc4   :  { %9315 = vmatpush1.bf16.msra.mxu0 %v15103_v61  ;;  %8951 = vmatprep.subr.bf16.mxu1 %v15126_v1  ;;  %v15168_v61 = vld [vmem:[#allocation7 + $0x6ec] ss:$52 sps:$4 sm:$0xff]  }
  0xc5   :  { %9316 = vmatprep.subr.bf16.mxu0 %v15111_v62 }
  0xc7   :  { %8952 = vmatpush1.bf16.msra.mxu1 %v15124_v4 }
  0xc8   :  { %9317 = vmatpush1.bf16.msra.mxu0 %v15109_v2  ;;  %8953 = vmatprep.subr.bf16.mxu1 %v15132_v5 }
  0xc9   :  { %9318 = vmatprep.subr.bf16.mxu0 %v15117_v3 }
  0xcb   :  { %8954 = vmatpush1.bf16.msra.mxu1 %v15130_v8 }
  0xcc   :  { %9319 = vmatpush1.bf16.msra.mxu0 %v15115_v6  ;;  %8955 = vmatprep.subr.bf16.mxu1 %v15138_v9  ;;  %v15171_v6 = vld [vmem:[#allocation7 + $0x6f4] ss:$52 sps:$4 sm:$0xff]  }
  0xcd   :  { %9320 = vmatprep.subr.bf16.mxu0 %v15123_v7 }
  0xcf   :  { %8956 = vmatpush1.bf16.msra.mxu1 %v15136_v12 }
  0xd0   :  { %9321 = vmatpush1.bf16.msra.mxu0 %v15121_v10  ;;  %8957 = vmatprep.subr.bf16.mxu1 %v15144_v14 }
  0xd1   :  { %9322 = vmatprep.subr.bf16.mxu0 %v15129_v11  ;;  %v17477_v11 = vsub.s32 4, %v17440_v33 }
  0xd3   :  { %8958 = vmatpush1.bf16.msra.mxu1 %v15142_v16  ;;  %18022 = vst [vmem:[#allocation26_spill] sm:$0xff] %v17477_v11 }
  0xd4   :  { %9323 = vmatpush1.bf16.msra.mxu0 %v15127_v13  ;;  %8959 = vmatprep.subr.bf16.mxu1 %v15150_v18 }
  0xd5   :  { %9324 = vmatprep.subr.bf16.mxu0 %v15135_v15  ;;  %v18009_v15 = vsub.s32 5, %v17440_v33 }
  0xd7   :  { %8960 = vmatpush1.bf16.msra.mxu1 %v15148_v20  ;;  %v15166_v20 = vld [vmem:[#allocation7 + $0x6e8] ss:$52 sps:$4 sm:$0xff]  }
  0xd8   :  { %9325 = vmatpush1.bf16.msra.mxu0 %v15133_v17  ;;  %8961 = vmatprep.subr.bf16.mxu1 %v15156_v22 }
  0xd9   :  { %9326 = vmatprep.subr.bf16.mxu0 %v15141_v19 }
  0xdb   :  { %8962 = vmatpush1.bf16.msra.mxu1 %v15154_v24 }
  0xdc   :  { %9327 = vmatpush1.bf16.msra.mxu0 %v15139_v21  ;;  %8984 = vmatprep.subr.bf16.mxu1 %v15162_v25  ;;  %v15169_v21 = vld [vmem:[#allocation7 + $0x6f0] ss:$52 sps:$4 sm:$0xff]   ;;  %v15174_v25 = vld [vmem:[#allocation7 + $0x754] ss:$52 sps:$4 sm:$0xff]  }
  0xdd   :  { %9328 = vmatprep.subr.bf16.mxu0 %v15147_v23 }
  0xe0   :  { %9329 = vmatpush1.bf16.msra.mxu0 %v15145_v26  ;;  %v15177_v26 = vld [vmem:[#allocation7 + $0x75c] ss:$52 sps:$4 sm:$0xff]  }
  0xe1   :  { %9330 = vmatprep.subr.bf16.mxu0 %v15153_v27 }
  0xe4   :  { %9331 = vmatpush1.bf16.msra.mxu0 %v15151_v28 }
  0xe5   :  { %9332 = vmatprep.subr.bf16.mxu0 %v15159_v29 }
  0xe8   :  { %9333 = vmatpush1.bf16.msra.mxu0 %v15157_v30  ;;  %v17490_v30 = vrot.slane %v17442_v34, %v17477_v11 }
  0xe9   :  { %9355 = vmatprep.subr.bf16.mxu0 %v15165_v31  ;;  %v15172_v31 = vld [vmem:[#allocation7 + $0x750] ss:$52 sps:$4 sm:$0xff]  }
 0x14e   :  { %v392_v41 = vpop.f32.mrb[0].mxu0 }
 0x14f   :  { %v393_v42 = vadd.f32 %v392_v41, %v147_v37  ;;  %v394_v43 = vpop.f32.mrb[1].mxu0  ;;  %v17496_v41 = vrot.slane %v17442_v34, %v18009_v15 }
 0x150   :  { %v395_v44 = vadd.f32 %v394_v43, %v151_v38  ;;  %v396_v45 = vpop.f32.mrb[2].mxu0 }
 0x151   :  { %v725_v47 = vmax.f32 %v393_v42, 0.0  ;;  %v397_v48 = vadd.f32 %v396_v45, %v147_v37  ;;  %v398_v49 = vpop.f32.mrb[3].mxu0  ;;  %v445_v54 = vpop.f32.mrb[0].mxu1  ;;  %v18010_v42 = vsub.s32 6, %v17440_v33 }
 0x152   :  { %v726_v51 = vmax.f32 %v395_v44, 0.0  ;;  %v399_v52 = vadd.f32 %v398_v49, %v151_v38  ;;  %v446_v58 = vadd.f32 %v445_v54, %v17462_v46  ;;  %v447_v59 = vpop.f32.mrb[1].mxu1 }
 0x153   :  { %777 = vst [vmem:[#allocation13] sm:$0xff] %v725_v47  ;;  %v738_v53 = vmax.f32 %v397_v48, 0.0  ;;  %v448_v62 = vadd.f32 %v447_v59, %v17466_v50  ;;  %v449_v63 = vpop.f32.mrb[2].mxu1  ;;  %v15175_v48 = vld [vmem:[#allocation7 + $0x758] ss:$52 sps:$4 sm:$0xff]  }
 0x154   :  { %778 = vst [vmem:[#allocation13 + $0x8] sm:$0xff] %v726_v51  ;;  %v739_v55 = vmax.f32 %v399_v52, 0.0  ;;  %v727_v3 = vmax.f32 %v446_v58, 0.0  ;;  %v450_v4 = vadd.f32 %v449_v63, %v17462_v46  ;;  %v451_v5 = vpop.f32.mrb[3].mxu1  ;;  %v15181_v63 = vld [vmem:[#allocation7 + $0x7c0] ss:$52 sps:$4 sm:$0xff]  }
 0x155   :  { %791 = vst [vmem:[#allocation13 + $0x68] sm:$0xff] %v738_v53  ;;  %v17469_v60 = vpack.c.bf16 %v738_v53, %v725_v47  ;;  %v728_v9 = vmax.f32 %v448_v62, 0.0  ;;  %v452_v10 = vadd.f32 %v451_v5, %v17466_v50  ;;  %v18008_v47 = vsub.s32 7, %v17440_v33  ;;  %v15178_v62 = vld [vmem:[#allocation7 + $0x7b8] ss:$52 sps:$4 sm:$0xff]  }
 0x156   :  { %792 = vst [vmem:[#allocation13 + $0x70] sm:$0xff] %v739_v55  ;;  %v17472_v1 = vpack.c.bf16 %v739_v55, %v726_v51  ;;  %v402_v2 = vpop.f32.mrb[4].mxu0  ;;  %779 = vst [vmem:[#allocation13 + $0x10] sm:$0xff] %v727_v3  ;;  %v740_v14 = vmax.f32 %v450_v4, 0.0  ;;  %v15180_v55 = vld [vmem:[#allocation7 + $0x7bc] ss:$52 sps:$4 sm:$0xff]   ;;  %v17514_v4 = vrot.slane %v17442_v34, %v18010_v42 }
 0x157   :  { %v403_v7 = vadd.f32 %v402_v2, %v147_v37  ;;  %v404_v8 = vpop.f32.mrb[5].mxu0  ;;  %780 = vst [vmem:[#allocation13 + $0x18] sm:$0xff] %v728_v9  ;;  %v741_v19 = vmax.f32 %v452_v10, 0.0  ;;  %v16000_v42 = vld [vmem:[#allocation7 + $0x16d0] ss:$52 sps:$4 sm:$0xff]  }
 0x158   :  { %8963 = vmatprep.mubr.bf16.mxu1 %v17472_v1  ;;  %9334 = vmatprep.mubr.bf16.mxu0 %v17472_v1  ;;  %v405_v12 = vadd.f32 %v404_v8, %v151_v38  ;;  %v406_v13 = vpop.f32.mrb[6].mxu0  ;;  %793 = vst [vmem:[#allocation13 + $0x78] sm:$0xff] %v740_v14  ;;  %v17484_v24 = vpack.c.bf16 %v740_v14, %v727_v3  ;;  %v15189_v14 = vld [vmem:[#allocation7 + $0x82c] ss:$52 sps:$4 sm:$0xff]  }
 0x159   :  { %8964 = vmatmul.mubr.bf16.vlgmr.msra.gmra.mrb[24].mxu1 %v17469_v60  ;;  %9335 = vmatmul.mubr.bf16.vlgmr.msra.gmra.mrb[28].mxu0 %v17469_v60  ;;  %v751_v16 = vmax.f32 %v403_v7, 0.0  ;;  %v407_v17 = vadd.f32 %v406_v13, %v147_v37  ;;  %v408_v18 = vpop.f32.mrb[7].mxu0  ;;  %794 = vst [vmem:[#allocation13 + $0x80] sm:$0xff] %v741_v19  ;;  %v17486_v28 = vpack.c.bf16 %v741_v19, %v728_v9  ;;  %v455_v29 = vpop.f32.mrb[4].mxu1  ;;  %v15186_v13 = vld [vmem:[#allocation7 + $0x824] ss:$52 sps:$4 sm:$0xff]  }
 0x15a   :  { %8985 = vmatpush1.bf16.msra.mxu1 %v15160_v56  ;;  %9356 = vmatpush1.bf16.msra.mxu0 %v15163_v57  ;;  %v752_v22 = vmax.f32 %v405_v12, 0.0  ;;  %v409_v23 = vadd.f32 %v408_v18, %v151_v38  ;;  %v456_v37 = vadd.f32 %v455_v29, %v17462_v46  ;;  %v457_v38 = vpop.f32.mrb[5].mxu1  ;;  %v15183_v56 = vld [vmem:[#allocation7 + $0x7c4] ss:$52 sps:$4 sm:$0xff]   ;;  %v17522_v8 = vrot.slane %v17442_v34, %v18008_v47  ;;  %v15184_v34 = vld [vmem:[#allocation7 + $0x820] ss:$52 sps:$4 sm:$0xff]  }
 0x15b   :  { %8986 = vmatprep.subr.bf16.mxu1 %v15168_v61  ;;  %9357 = vmatprep.subr.bf16.mxu0 %v15171_v6  ;;  %804 = vst [vmem:[#allocation13 + $0xd0] sm:$0xff] %v751_v16  ;;  %v764_v27 = vmax.f32 %v407_v17, 0.0  ;;  %v458_v44 = vadd.f32 %v457_v38, %v17466_v50  ;;  %v459_v45 = vpop.f32.mrb[6].mxu1  ;;  %v15192_v38 = vld [vmem:[#allocation7 + $0x88c] ss:$52 sps:$4 sm:$0xff]  }
 0x15c   :  { %805 = vst [vmem:[#allocation13 + $0xd8] sm:$0xff] %v752_v22  ;;  %v765_v32 = vmax.f32 %v409_v23, 0.0  ;;  %v753_v51 = vmax.f32 %v456_v37, 0.0  ;;  %v460_v52 = vadd.f32 %v459_v45, %v17462_v46  ;;  %v461_v53 = vpop.f32.mrb[7].mxu1 }
 0x15d   :  { %817 = vst [vmem:[#allocation13 + $0x138] sm:$0xff] %v764_v27  ;;  %v17499_v43 = vpack.c.bf16 %v764_v27, %v751_v16  ;;  %v754_v57 = vmax.f32 %v458_v44, 0.0  ;;  %v462_v58 = vadd.f32 %v461_v53, %v17466_v50  ;;  %v15195_v44 = vld [vmem:[#allocation7 + $0x894] ss:$52 sps:$4 sm:$0xff]  }
 0x15e   :  { %8987 = vmatpush1.bf16.msra.mxu1 %v15166_v20  ;;  %9358 = vmatpush1.bf16.msra.mxu0 %v15169_v21  ;;  %818 = vst [vmem:[#allocation13 + $0x140] sm:$0xff] %v765_v32  ;;  %v17503_v49 = vpack.c.bf16 %v765_v32, %v752_v22  ;;  %v498_v54 = vpop.f32.mrb[8].mxu0  ;;  %806 = vst [vmem:[#allocation13 + $0xe0] sm:$0xff] %v753_v51  ;;  %v766_v46 = vmax.f32 %v460_v52, 0.0 }
 0x15f   :  { %8988 = vmatprep.subr.bf16.mxu1 %v15174_v25  ;;  %9359 = vmatprep.subr.bf16.mxu0 %v15177_v26  ;;  %v499_v59 = vadd.f32 %v498_v54, %v17490_v30  ;;  %v500_v61 = vpop.f32.mrb[9].mxu0  ;;  %807 = vst [vmem:[#allocation13 + $0xe8] sm:$0xff] %v754_v57  ;;  %v767_v50 = vmax.f32 %v462_v58, 0.0  ;;  %v15187_v26 = vld [vmem:[#allocation7 + $0x828] ss:$52 sps:$4 sm:$0xff]  }
 0x160   :  { %8973 = vmatprep.mubr.bf16.mxu1 %v17503_v49  ;;  %9344 = vmatprep.mubr.bf16.mxu0 %v17503_v49  ;;  %v501_v2 = vadd.f32 %v500_v61, %v17496_v41  ;;  %v502_v3 = vpop.f32.mrb[10].mxu0  ;;  %819 = vst [vmem:[#allocation13 + $0x148] sm:$0xff] %v766_v46  ;;  %v17524_v9 = vpack.c.bf16 %v766_v46, %v753_v51 }
 0x161   :  { %8974 = vmatmul.mubr.bf16.gmra.mrb[28].mxu1 %v17499_v43  ;;  %9345 = vmatmul.mubr.bf16.gmra.mrb[32].mxu0 %v17499_v43  ;;  %v729_v5 = vmax.f32 %v499_v59, 0.0  ;;  %v503_v6 = vadd.f32 %v502_v3, %v17490_v30  ;;  %v504_v7 = vpop.f32.mrb[11].mxu0  ;;  %820 = vst [vmem:[#allocation13 + $0x150] sm:$0xff] %v767_v50  ;;  %v17527_v16 = vpack.c.bf16 %v767_v50, %v754_v57  ;;  %v551_v18 = vpop.f32.mrb[8].mxu1  ;;  %v15198_v50 = vld [vmem:[#allocation7 + $0x8f4] ss:$52 sps:$4 sm:$0xff]  }
 0x162   :  { %8989 = vmatpush1.bf16.msra.mxu1 %v15172_v31  ;;  %9360 = vmatpush1.bf16.msra.mxu0 %v15175_v48  ;;  %v730_v10 = vmax.f32 %v501_v2, 0.0  ;;  %v505_v12 = vadd.f32 %v504_v7, %v17496_v41  ;;  %v552_v20 = vadd.f32 %v551_v18, %v17514_v4  ;;  %v553_v21 = vpop.f32.mrb[9].mxu1 }
 0x163   :  { %8990 = vmatprep.subr.bf16.mxu1 %v15180_v55  ;;  %9361 = vmatprep.subr.bf16.mxu0 %v15183_v56  ;;  %781 = vst [vmem:[#allocation13 + $0x20] sm:$0xff] %v729_v5  ;;  %v742_v17 = vmax.f32 %v503_v6, 0.0  ;;  %v554_v23 = vadd.f32 %v553_v21, %v17522_v8  ;;  %v555_v25 = vpop.f32.mrb[10].mxu1  ;;  %v17541_v56 = vld [vmem:[#allocation5 + $0x8] sm:$0x1f] }
 0x164   :  { %9016 = vmatprep.mubr.bf16.mxu1 %v17486_v28  ;;  %9387 = vmatprep.mubr.bf16.mxu0 %v17486_v28  ;;  %782 = vst [vmem:[#allocation13 + $0x28] sm:$0xff] %v730_v10  ;;  %v743_v19 = vmax.f32 %v505_v12, 0.0  ;;  %v731_v31 = vmax.f32 %v552_v20, 0.0  ;;  %v556_v32 = vadd.f32 %v555_v25, %v17514_v4  ;;  %v557_v37 = vpop.f32.mrb[11].mxu1  ;;  %v17551_v7 = vrot.slane %v17541_v56, %v17445_v35  ;;  %v15196_v12 = vld [vmem:[#allocation7 + $0x8f0] ss:$52 sps:$4 sm:$0xff]  }
 0x165   :  { %795 = vst [vmem:[#allocation13 + $0x88] sm:$0xff] %v742_v17  ;;  %v17532_v22 = vpack.c.bf16 %v742_v17, %v729_v5  ;;  %v732_v51 = vmax.f32 %v554_v23, 0.0  ;;  %v558_v52 = vadd.f32 %v557_v37, %v17522_v8  ;;  %v15201_v5 = vld [vmem:[#allocation7 + $0x8fc] ss:$52 sps:$4 sm:$0xff]  }
 0x166   :  { %8991 = vmatpush1.bf16.msra.mxu1 %v15178_v62  ;;  %9362 = vmatpush1.bf16.msra.mxu0 %v15181_v63  ;;  %796 = vst [vmem:[#allocation13 + $0x90] sm:$0xff] %v743_v19  ;;  %v17535_v27 = vpack.c.bf16 %v743_v19, %v730_v10  ;;  %v508_v29 = vpop.f32.mrb[12].mxu0  ;;  %783 = vst [vmem:[#allocation13 + $0x30] sm:$0xff] %v731_v31  ;;  %v744_v55 = vmax.f32 %v556_v32, 0.0  ;;  %v15190_v62 = vld [vmem:[#allocation7 + $0x888] ss:$52 sps:$4 sm:$0xff]  }
 0x167   :  { %8992 = vmatprep.subr.bf16.mxu1 %v15186_v13  ;;  %9363 = vmatprep.subr.bf16.mxu0 %v15189_v14  ;;  %v509_v45 = vadd.f32 %v508_v29, %v17490_v30  ;;  %v510_v48 = vpop.f32.mrb[13].mxu0  ;;  %784 = vst [vmem:[#allocation13 + $0x38] sm:$0xff] %v732_v51  ;;  %v745_v61 = vmax.f32 %v558_v52, 0.0  ;;  %v15193_v63 = vld [vmem:[#allocation7 + $0x890] ss:$52 sps:$4 sm:$0xff]   ;;  %v17555_v14 = vrot.slane %v17541_v56, %v17448_v36 }
 0x168   :  { %v511_v53 = vadd.f32 %v510_v48, %v17496_v41  ;;  %v512_v54 = vpop.f32.mrb[14].mxu0  ;;  %797 = vst [vmem:[#allocation13 + $0x98] sm:$0xff] %v744_v55  ;;  %v17545_v3 = vpack.c.bf16 %v744_v55, %v731_v31  ;;  %v15199_v13 = vld [vmem:[#allocation7 + $0x8f8] ss:$52 sps:$4 sm:$0xff]   ;;  %v15204_v21 = vld [vmem:[#allocation7 + $0x95c] ss:$52 sps:$4 sm:$0xff]  }
 0x169   :  { %v755_v57 = vmax.f32 %v509_v45, 0.0  ;;  %v513_v58 = vadd.f32 %v512_v54, %v17490_v30  ;;  %v514_v59 = vpop.f32.mrb[15].mxu0  ;;  %798 = vst [vmem:[#allocation13 + $0xa0] sm:$0xff] %v745_v61  ;;  %v17547_v30 = vpack.c.bf16 %v745_v61, %v732_v51  ;;  %v561_v10 = vpop.f32.mrb[12].mxu1  ;;  %v15207_v32 = vld [vmem:[#allocation7 + $0x964] ss:$52 sps:$4 sm:$0xff]  }
 0x16a   :  { %8993 = vmatpush1.bf16.msra.mxu1 %v15184_v34  ;;  %9364 = vmatpush1.bf16.msra.mxu0 %v15187_v26  ;;  %v756_v46 = vmax.f32 %v511_v53, 0.0  ;;  %v515_v2 = vadd.f32 %v514_v59, %v17496_v41  ;;  %v562_v17 = vadd.f32 %v561_v10, %v17514_v4  ;;  %v563_v18 = vpop.f32.mrb[13].mxu1  ;;  %v17569_v53 = vrot.slane %v17541_v56, %v17455_v39  ;;  %v15205_v59 = vld [vmem:[#allocation7 + $0x960] ss:$52 sps:$4 sm:$0xff]  }
 0x16b   :  { %8994 = vmatprep.subr.bf16.mxu1 %v15192_v38  ;;  %9365 = vmatprep.subr.bf16.mxu0 %v15195_v44  ;;  %808 = vst [vmem:[#allocation13 + $0xf0] sm:$0xff] %v755_v57  ;;  %v768_v6 = vmax.f32 %v513_v58, 0.0  ;;  %v564_v19 = vadd.f32 %v563_v18, %v17522_v8  ;;  %v565_v20 = vpop.f32.mrb[14].mxu1  ;;  %v17574_v58 = vrot.slane %v17541_v56, %v17458_v40  ;;  %v15208_v10 = vld [vmem:[#allocation7 + $0x9c0] ss:$52 sps:$4 sm:$0xff]  }
 0x16c   :  { %809 = vst [vmem:[#allocation13 + $0xf8] sm:$0xff] %v756_v46  ;;  %v769_v41 = vmax.f32 %v515_v2, 0.0  ;;  %v757_v26 = vmax.f32 %v562_v17, 0.0  ;;  %v566_v29 = vadd.f32 %v565_v20, %v17514_v4  ;;  %v567_v31 = vpop.f32.mrb[15].mxu1  ;;  %v15213_v2 = vld [vmem:[#allocation7 + $0x9cc] ss:$52 sps:$4 sm:$0xff]  }
 0x16d   :  { %821 = vst [vmem:[#allocation13 + $0x158] sm:$0xff] %v768_v6  ;;  %v17558_v34 = vpack.c.bf16 %v768_v6, %v755_v57  ;;  %v758_v44 = vmax.f32 %v564_v19, 0.0  ;;  %v568_v45 = vadd.f32 %v567_v31, %v17522_v8  ;;  %v15202_v8 = vld [vmem:[#allocation7 + $0x958] ss:$52 sps:$4 sm:$0xff]   ;;  %v15211_v20 = vld [vmem:[#allocation7 + $0x9c8] ss:$52 sps:$4 sm:$0xff]  }
 0x16e   :  { %8995 = vmatpush1.bf16.msra.mxu1 %v15190_v62  ;;  %9366 = vmatpush1.bf16.msra.mxu0 %v15193_v63  ;;  %822 = vst [vmem:[#allocation13 + $0x160] sm:$0xff] %v769_v41  ;;  %v17561_v23 = vpack.c.bf16 %v769_v41, %v756_v46  ;;  %v604_v25 = vpop.f32.mrb[16].mxu0  ;;  %810 = vst [vmem:[#allocation13 + $0x100] sm:$0xff] %v757_v26  ;;  %v770_v52 = vmax.f32 %v566_v29, 0.0  ;;  %v15210_v46 = vld [vmem:[#allocation7 + $0x9c4] ss:$52 sps:$4 sm:$0xff]  }
 0x16f   :  { %8996 = vmatprep.subr.bf16.mxu1 %v15198_v50  ;;  %9367 = vmatprep.subr.bf16.mxu0 %v15201_v5  ;;  %v605_v37 = vadd.f32 %v604_v25, %v17551_v7  ;;  %v606_v38 = vpop.f32.mrb[17].mxu0  ;;  %811 = vst [vmem:[#allocation13 + $0x108] sm:$0xff] %v758_v44  ;;  %v771_v57 = vmax.f32 %v568_v45, 0.0 }
 0x170   :  { %v607_v48 = vadd.f32 %v606_v38, %v17555_v14  ;;  %v608_v51 = vpop.f32.mrb[18].mxu0  ;;  %823 = vst [vmem:[#allocation13 + $0x168] sm:$0xff] %v770_v52  ;;  %v17577_v63 = vpack.c.bf16 %v770_v52, %v757_v26 }
 0x171   :  { %v733_v4 = vmax.f32 %v605_v37, 0.0  ;;  %v609_v54 = vadd.f32 %v608_v51, %v17551_v7  ;;  %v610_v55 = vpop.f32.mrb[19].mxu0  ;;  %824 = vst [vmem:[#allocation13 + $0x170] sm:$0xff] %v771_v57  ;;  %v17579_v5 = vpack.c.bf16 %v771_v57, %v758_v44  ;;  %v657_v6 = vpop.f32.mrb[16].mxu1  ;;  %v15219_v37 = vld [vmem:[#allocation7 + $0xa34] ss:$52 sps:$4 sm:$0xff]  }
 0x172   :  { %8997 = vmatpush1.bf16.msra.mxu1 %v15196_v12  ;;  %9368 = vmatpush1.bf16.msra.mxu0 %v15199_v13  ;;  %v734_v61 = vmax.f32 %v607_v48, 0.0  ;;  %v611_v62 = vadd.f32 %v610_v55, %v17555_v14  ;;  %v658_v13 = vadd.f32 %v657_v6, %v17569_v53  ;;  %v659_v41 = vpop.f32.mrb[17].mxu1  ;;  %v15225_v6 = vld [vmem:[#allocation7 + $0xa9c] ss:$52 sps:$4 sm:$0xff]  }
 0x173   :  { %8998 = vmatprep.subr.bf16.mxu1 %v15204_v21  ;;  %9369 = vmatprep.subr.bf16.mxu0 %v15207_v32  ;;  %785 = vst [vmem:[#allocation13 + $0x40] sm:$0xff] %v733_v4  ;;  %v746_v50 = vmax.f32 %v609_v54, 0.0  ;;  %v660_v18 = vadd.f32 %v659_v41, %v17574_v58  ;;  %v661_v19 = vpop.f32.mrb[18].mxu1  ;;  %v15216_v32 = vld [vmem:[#allocation7 + $0xa2c] ss:$52 sps:$4 sm:$0xff]  }
 0x174   :  { %786 = vst [vmem:[#allocation13 + $0x48] sm:$0xff] %v734_v61  ;;  %v747_v12 = vmax.f32 %v611_v62, 0.0  ;;  %v735_v26 = vmax.f32 %v658_v13, 0.0  ;;  %v662_v29 = vadd.f32 %v661_v19, %v17569_v53  ;;  %v663_v31 = vpop.f32.mrb[19].mxu1 }
 0x175   :  { %799 = vst [vmem:[#allocation13 + $0xa8] sm:$0xff] %v746_v50  ;;  %v17582_v17 = vpack.c.bf16 %v746_v50, %v733_v4  ;;  %v736_v45 = vmax.f32 %v660_v18, 0.0  ;;  %v664_v48 = vadd.f32 %v663_v31, %v17574_v58  ;;  %v15222_v50 = vld [vmem:[#allocation7 + $0xa94] ss:$52 sps:$4 sm:$0xff]   ;;  %v15223_v18 = vld [vmem:[#allocation7 + $0xa98] ss:$52 sps:$4 sm:$0xff]  }
 0x176   :  { %8999 = vmatpush1.bf16.msra.mxu1 %v15202_v8  ;;  %9370 = vmatpush1.bf16.msra.mxu0 %v15205_v59  ;;  %800 = vst [vmem:[#allocation13 + $0xb0] sm:$0xff] %v747_v12  ;;  %v17585_v21 = vpack.c.bf16 %v747_v12, %v734_v61  ;;  %v614_v25 = vpop.f32.mrb[20].mxu0  ;;  %787 = vst [vmem:[#allocation13 + $0x50] sm:$0xff] %v735_v26  ;;  %v748_v4 = vmax.f32 %v662_v29, 0.0  ;;  %v15214_v59 = vld [vmem:[#allocation7 + $0xa28] ss:$52 sps:$4 sm:$0xff]  }
 0x177   :  { %9000 = vmatprep.subr.bf16.mxu1 %v15210_v46  ;;  %9371 = vmatprep.subr.bf16.mxu0 %v15213_v2  ;;  %v615_v38 = vadd.f32 %v614_v25, %v17551_v7  ;;  %v616_v44 = vpop.f32.mrb[21].mxu0  ;;  %788 = vst [vmem:[#allocation13 + $0x58] sm:$0xff] %v736_v45  ;;  %v749_v8 = vmax.f32 %v664_v48, 0.0  ;;  %v15217_v61 = vld [vmem:[#allocation7 + $0xa30] ss:$52 sps:$4 sm:$0xff]  }
 0x178   :  { %v617_v51 = vadd.f32 %v616_v44, %v17555_v14  ;;  %v618_v52 = vpop.f32.mrb[22].mxu0  ;;  %801 = vst [vmem:[#allocation13 + $0xb8] sm:$0xff] %v748_v4  ;;  %v17593_v2 = vpack.c.bf16 %v748_v4, %v735_v26  ;;  %v15228_v25 = vld [vmem:[#allocation7 + $0xafc] ss:$52 sps:$4 sm:$0xff]   ;;  %v15231_v26 = vld [vmem:[#allocation7 + $0xb04] ss:$52 sps:$4 sm:$0xff]  }
 0x179   :  { %v759_v54 = vmax.f32 %v615_v38, 0.0  ;;  %v619_v55 = vadd.f32 %v618_v52, %v17551_v7  ;;  %v620_v57 = vpop.f32.mrb[23].mxu0  ;;  %802 = vst [vmem:[#allocation13 + $0xc0] sm:$0xff] %v749_v8  ;;  %v17595_v7 = vpack.c.bf16 %v749_v8, %v736_v45  ;;  %v15226_v45 = vld [vmem:[#allocation7 + $0xaf8] ss:$52 sps:$4 sm:$0xff]  }
 0x17a   :  { %9001 = vmatpush1.bf16.msra.mxu1 %v15208_v10  ;;  %9372 = vmatpush1.bf16.msra.mxu0 %v15211_v20  ;;  %v760_v62 = vmax.f32 %v617_v51, 0.0  ;;  %v621_v46 = vadd.f32 %v620_v57, %v17555_v14  ;;  %v195_v10 = vrot.slane %v17541_v56, %v17477_v11  ;;  %v15220_v14 = vld [vmem:[#allocation7 + $0xa90] ss:$52 sps:$4 sm:$0xff]   ;;  %v15229_v48 = vld [vmem:[#allocation7 + $0xb00] ss:$52 sps:$4 sm:$0xff]  }
 0x17b   :  { %9002 = vmatprep.subr.bf16.mxu1 %v15216_v32  ;;  %9373 = vmatprep.subr.bf16.mxu0 %v15219_v37  ;;  %812 = vst [vmem:[#allocation13 + $0x110] sm:$0xff] %v759_v54  ;;  %v772_v12 = vmax.f32 %v619_v55, 0.0  ;;  %v15234_v4 = vld [vmem:[#allocation7 + $0xb64] ss:$52 sps:$4 sm:$0xff]  }
 0x17c   :  { %813 = vst [vmem:[#allocation13 + $0x118] sm:$0xff] %v760_v62  ;;  %v773_v13 = vmax.f32 %v621_v46, 0.0  ;;  %v15240_v46 = vld [vmem:[#allocation7 + $0xbcc] ss:$52 sps:$4 sm:$0xff]  }
 0x17d   :  { %825 = vst [vmem:[#allocation13 + $0x178] sm:$0xff] %v772_v12  ;;  %v17599_v41 = vpack.c.bf16 %v772_v12, %v759_v54  ;;  %v15237_v54 = vld [vmem:[#allocation7 + $0xb6c] ss:$52 sps:$4 sm:$0xff]   ;;  %v15241_v12 = vld [vmem:[#allocation7 + $0xbd0] ss:$52 sps:$4 sm:$0xff]  }
 0x17e   :  { %9003 = vmatpush1.bf16.msra.mxu1 %v15214_v59  ;;  %9374 = vmatpush1.bf16.msra.mxu0 %v15217_v61  ;;  %826 = vst [vmem:[#allocation13 + $0x180] sm:$0xff] %v773_v13  ;;  %v17601_v19 = vpack.c.bf16 %v773_v13, %v760_v62  ;;  %v14647_v20 = vpop.f32.mrb[24].mxu0  ;;  %v15232_v59 = vld [vmem:[#allocation7 + $0xb60] ss:$52 sps:$4 sm:$0xff]   ;;  %v15235_v61 = vld [vmem:[#allocation7 + $0xb68] ss:$52 sps:$4 sm:$0xff]  }
 0x17f   :  { %9004 = vmatprep.subr.bf16.mxu1 %v15222_v50  ;;  %9375 = vmatprep.subr.bf16.mxu0 %v15225_v6  ;;  %v719_v29 = vadd.f32 %v14647_v20, %v195_v10  ;;  %v710_v31 = vpop.f32.mrb[25].mxu0  ;;  %v15243_v50 = vld [vmem:[#allocation7 + $0xbd4] ss:$52 sps:$4 sm:$0xff]   ;;  %v15249_v13 = vld [vmem:[#allocation7 + $0xc3c] ss:$52 sps:$4 sm:$0xff]  }
 0x180   :  { %v711_v56 = vadd.f32 %v710_v31, %v195_v10  ;;  %v14648_v32 = vpop.f32.mrb[26].mxu0  ;;  %v15238_v6 = vld [vmem:[#allocation7 + $0xbc8] ss:$52 sps:$4 sm:$0xff]   ;;  %v15258_v31 = vld [vmem:[#allocation7 + $0xd04] ss:$52 sps:$4 sm:$0xff]  }
 0x181   :  { %v763_v37 = vmax.f32 %v719_v29, 0.0  ;;  %v722_v38 = vadd.f32 %v14648_v32, %v195_v10  ;;  %v713_v44 = vpop.f32.mrb[27].mxu0  ;;  %v15252_v20 = vld [vmem:[#allocation7 + $0xc9c] ss:$52 sps:$4 sm:$0xff]   ;;  %v15253_v29 = vld [vmem:[#allocation7 + $0xca0] ss:$52 sps:$4 sm:$0xff]  }
 0x182   :  { %9005 = vmatpush1.bf16.msra.mxu1 %v15220_v14  ;;  %9376 = vmatpush1.bf16.msra.mxu0 %v15223_v18  ;;  %v737_v51 = vmax.f32 %v711_v56, 0.0  ;;  %v714_v52 = vadd.f32 %v713_v44, %v195_v10  ;;  %v15246_v10 = vld [vmem:[#allocation7 + $0xc34] ss:$52 sps:$4 sm:$0xff]   ;;  %v15244_v14 = vld [vmem:[#allocation7 + $0xc30] ss:$52 sps:$4 sm:$0xff]  }
 0x183   :  { %9006 = vmatprep.subr.bf16.mxu1 %v15228_v25  ;;  %9377 = vmatprep.subr.bf16.mxu0 %v15231_v26  ;;  %816 = vst.msk [vmem:[#allocation13 + $0x130] sm:$0xff] %vm789_vm1, %v763_v37  ;;  %v776_v55 = vmax.f32 %v722_v38, 0.0  ;;  %v15247_v18 = vld [vmem:[#allocation7 + $0xc38] ss:$52 sps:$4 sm:$0xff]   ;;  %v15256_v32 = vld [vmem:[#allocation7 + $0xd00] ss:$52 sps:$4 sm:$0xff]  }
 0x184   :  { %790 = vst.msk [vmem:[#allocation13 + $0x60] sm:$0xff] %vm789_vm1, %v737_v51  ;;  %v750_v57 = vmax.f32 %v714_v52, 0.0  ;;  %v15255_v25 = vld [vmem:[#allocation7 + $0xca4] ss:$52 sps:$4 sm:$0xff]   ;;  %v15261_v56 = vld [vmem:[#allocation7 + $0xd0c] ss:$52 sps:$4 sm:$0xff]  }
 0x185   :  { %829 = vst.msk [vmem:[#allocation13 + $0x198] sm:$0xff] %vm789_vm1, %v776_v55  ;;  %v17606_v8 = vpack.c.bf16 %v776_v55, %v763_v37  ;;  %v15250_v26 = vld [vmem:[#allocation7 + $0xc98] ss:$52 sps:$4 sm:$0xff]   ;;  %v15259_v37 = vld [vmem:[#allocation7 + $0xd08] ss:$52 sps:$4 sm:$0xff]  }
 0x186   :  { %9007 = vmatpush1.bf16.msra.mxu1 %v15226_v45  ;;  %9378 = vmatpush1.bf16.msra.mxu0 %v15229_v48  ;;  %803 = vst.msk [vmem:[#allocation13 + $0xc8] sm:$0xff] %vm789_vm1, %v750_v57  ;;  %v17609_v62 = vpack.c.bf16 %v750_v57, %v737_v51  ;;  %v15264_v38 = vld [vmem:[#allocation7 + $0xd6c] ss:$52 sps:$4 sm:$0xff]   ;;  %v15267_v44 = vld [vmem:[#allocation7 + $0xd74] ss:$52 sps:$4 sm:$0xff]  }
 0x187   :  { %9008 = vmatprep.subr.bf16.mxu1 %v15234_v4  ;;  %9379 = vmatprep.subr.bf16.mxu0 %v15237_v54  ;;  %v15262_v45 = vld [vmem:[#allocation7 + $0xd68] ss:$52 sps:$4 sm:$0xff]   ;;  %v15265_v48 = vld [vmem:[#allocation7 + $0xd70] ss:$52 sps:$4 sm:$0xff]   ;;  %v15271_v54 = vld [vmem:[#allocation7 + $0xdd8] ss:$52 sps:$4 sm:$0xff]  }
 0x188   :  { %v15270_v51 = vld [vmem:[#allocation7 + $0xdd4] ss:$52 sps:$4 sm:$0xff]   ;;  %v15273_v52 = vld [vmem:[#allocation7 + $0xddc] ss:$52 sps:$4 sm:$0xff]   ;;  %v15279_v57 = vld [vmem:[#allocation7 + $0xe44] ss:$52 sps:$4 sm:$0xff]  }
 0x189   :  { %v15268_v4 = vld [vmem:[#allocation7 + $0xdd0] ss:$52 sps:$4 sm:$0xff]  }
 0x18a   :  { %9009 = vmatpush1.bf16.msra.mxu1 %v15232_v59  ;;  %9380 = vmatpush1.bf16.msra.mxu0 %v15235_v61  ;;  %v15276_v55 = vld [vmem:[#allocation7 + $0xe3c] ss:$52 sps:$4 sm:$0xff]   ;;  %v15274_v59 = vld [vmem:[#allocation7 + $0xe38] ss:$52 sps:$4 sm:$0xff]   ;;  %v15277_v61 = vld [vmem:[#allocation7 + $0xe40] ss:$52 sps:$4 sm:$0xff]  }
 0x18b   :  { %9010 = vmatprep.subr.bf16.mxu1 %v15240_v46  ;;  %9381 = vmatprep.subr.bf16.mxu0 %v15243_v50  ;;  %v667_v46 = vpop.f32.mrb[20].mxu1 }
 0x18c   :  { %v668_v50 = vadd.f32 %v667_v46, %v17569_v53  ;;  %v15306_v46 = vld [vmem:[#allocation7 + $0x1044] ss:$52 sps:$4 sm:$0xff]  }
 0x18e   :  { %9011 = vmatpush1.bf16.msra.mxu1 %v15238_v6  ;;  %9382 = vmatpush1.bf16.msra.mxu0 %v15241_v12  ;;  %v15282_v6 = vld [vmem:[#allocation7 + $0xea4] ss:$52 sps:$4 sm:$0xff]   ;;  %v15285_v12 = vld [vmem:[#allocation7 + $0xeac] ss:$52 sps:$4 sm:$0xff]  }
 0x18f   :  { %9012 = vmatprep.subr.bf16.mxu1 %v15246_v10  ;;  %9383 = vmatprep.subr.bf16.mxu0 %v15249_v13  ;;  %v669_v10 = vpop.f32.mrb[21].mxu1  ;;  %v15280_v13 = vld [vmem:[#allocation7 + $0xea0] ss:$52 sps:$4 sm:$0xff]  }
 0x192   :  { %9013 = vmatpush1.bf16.msra.mxu1 %v15244_v14  ;;  %9384 = vmatpush1.bf16.msra.mxu0 %v15247_v18  ;;  %v15283_v14 = vld [vmem:[#allocation7 + $0xea8] ss:$52 sps:$4 sm:$0xff]   ;;  %v761_v18 = vmax.f32 %v668_v50, 0.0  ;;  %v15309_v50 = vld [vmem:[#allocation7 + $0x104c] ss:$52 sps:$4 sm:$0xff]  }
 0x193   :  { %9014 = vmatprep.subr.bf16.mxu1 %v15252_v20  ;;  %9385 = vmatprep.subr.bf16.mxu0 %v15255_v25  ;;  %v670_v20 = vadd.f32 %v669_v10, %v17574_v58  ;;  %v671_v25 = vpop.f32.mrb[22].mxu1  ;;  %v15312_v10 = vld [vmem:[#allocation7 + $0x10ac] ss:$52 sps:$4 sm:$0xff]  }
 0x194   :  { %814 = vst [vmem:[#allocation13 + $0x120] sm:$0xff] %v761_v18 }
 0x196   :  { %9015 = vmatpush1.bf16.msra.mxu1 %v15250_v26  ;;  %9386 = vmatpush1.bf16.msra.mxu0 %v15253_v29  ;;  %v672_v26 = vadd.f32 %v671_v25, %v17569_v53  ;;  %v673_v29 = vpop.f32.mrb[23].mxu1  ;;  %v15321_v25 = vld [vmem:[#allocation7 + $0x111c] ss:$52 sps:$4 sm:$0xff]  }
 0x197   :  { %9037 = vmatprep.subr.bf16.mxu1 %v15258_v31  ;;  %9408 = vmatprep.subr.bf16.mxu0 %v15261_v56  ;;  %v762_v31 = vmax.f32 %v670_v20, 0.0  ;;  %v674_v56 = vadd.f32 %v673_v29, %v17574_v58  ;;  %v15294_v58 = vld [vmem:[#allocation7 + $0xf74] ss:$52 sps:$4 sm:$0xff]   ;;  %v15319_v29 = vld [vmem:[#allocation7 + $0x1118] ss:$52 sps:$4 sm:$0xff]  }
 0x198   :  { %v15318_v20 = vld [vmem:[#allocation7 + $0x1114] ss:$52 sps:$4 sm:$0xff]  }
 0x199   :  { %9017 = vmatmul.mubr.bf16.vlgmr.msra.gmra.mrb[24].mxu1 %v17484_v24  ;;  %9388 = vmatmul.mubr.bf16.vlgmr.msra.gmra.mrb[28].mxu0 %v17484_v24  ;;  %815 = vst [vmem:[#allocation13 + $0x128] sm:$0xff] %v762_v31 }
 0x19a   :  { %9038 = vmatpush1.bf16.msra.mxu1 %v15256_v32  ;;  %9409 = vmatpush1.bf16.msra.mxu0 %v15259_v37  ;;  %v15288_v32 = vld [vmem:[#allocation7 + $0xf0c] ss:$52 sps:$4 sm:$0xff]   ;;  %v15291_v37 = vld [vmem:[#allocation7 + $0xf14] ss:$52 sps:$4 sm:$0xff]  }
 0x19b   :  { %9039 = vmatprep.subr.bf16.mxu1 %v15264_v38  ;;  %9410 = vmatprep.subr.bf16.mxu0 %v15267_v44  ;;  %v774_v38 = vmax.f32 %v672_v26, 0.0  ;;  %v15286_v44 = vld [vmem:[#allocation7 + $0xf08] ss:$52 sps:$4 sm:$0xff]   ;;  %v15316_v26 = vld [vmem:[#allocation7 + $0x1110] ss:$52 sps:$4 sm:$0xff]  }
 0x19c   :  { %9026 = vmatprep.mubr.bf16.mxu1 %v17527_v16  ;;  %9397 = vmatprep.mubr.bf16.mxu0 %v17527_v16 }
 0x19d   :  { %827 = vst [vmem:[#allocation13 + $0x188] sm:$0xff] %v774_v38 }
 0x19e   :  { %9040 = vmatpush1.bf16.msra.mxu1 %v15262_v45  ;;  %9411 = vmatpush1.bf16.msra.mxu0 %v15265_v48  ;;  %v15289_v45 = vld [vmem:[#allocation7 + $0xf10] ss:$52 sps:$4 sm:$0xff]   ;;  %v775_v48 = vmax.f32 %v674_v56, 0.0 }
 0x19f   :  { %9041 = vmatprep.subr.bf16.mxu1 %v15270_v51  ;;  %9412 = vmatprep.subr.bf16.mxu0 %v15273_v52  ;;  %v17623_v51 = vpack.c.bf16 %v774_v38, %v761_v18  ;;  %v15297_v52 = vld [vmem:[#allocation7 + $0xf7c] ss:$52 sps:$4 sm:$0xff]   ;;  %v15327_v56 = vld [vmem:[#allocation7 + $0x1184] ss:$52 sps:$4 sm:$0xff]  }
 0x1a0   :  { %828 = vst [vmem:[#allocation13 + $0x190] sm:$0xff] %v775_v48  ;;  %v17625_v53 = vpack.c.bf16 %v775_v48, %v762_v31  ;;  %v15313_v18 = vld [vmem:[#allocation7 + $0x10b0] ss:$52 sps:$4 sm:$0xff]   ;;  %v15331_v48 = vld [vmem:[#allocation7 + $0x11e8] ss:$52 sps:$4 sm:$0xff]  }
 0x1a1   :  { %9027 = vmatmul.mubr.bf16.gmra.mrb[28].mxu1 %v17524_v9  ;;  %9398 = vmatmul.mubr.bf16.gmra.mrb[32].mxu0 %v17524_v9  ;;  %v15324_v31 = vld [vmem:[#allocation7 + $0x117c] ss:$52 sps:$4 sm:$0xff]   ;;  %v15330_v38 = vld [vmem:[#allocation7 + $0x11e4] ss:$52 sps:$4 sm:$0xff]  }
 0x1a2   :  { %9042 = vmatpush1.bf16.msra.mxu1 %v15268_v4  ;;  %9413 = vmatpush1.bf16.msra.mxu0 %v15271_v54  ;;  %v15292_v4 = vld [vmem:[#allocation7 + $0xf70] ss:$52 sps:$4 sm:$0xff]   ;;  %v15295_v54 = vld [vmem:[#allocation7 + $0xf78] ss:$52 sps:$4 sm:$0xff]  }
 0x1a3   :  { %9043 = vmatprep.subr.bf16.mxu1 %v15276_v55  ;;  %9414 = vmatprep.subr.bf16.mxu0 %v15279_v57  ;;  %v15300_v55 = vld [vmem:[#allocation7 + $0xfdc] ss:$52 sps:$4 sm:$0xff]   ;;  %v15303_v57 = vld [vmem:[#allocation7 + $0xfe4] ss:$52 sps:$4 sm:$0xff]  }
 0x1a4   :  { %9069 = vmatprep.mubr.bf16.mxu1 %v17535_v27  ;;  %9440 = vmatprep.mubr.bf16.mxu0 %v17535_v27 }
 0x1a6   :  { %9044 = vmatpush1.bf16.msra.mxu1 %v15274_v59  ;;  %9415 = vmatpush1.bf16.msra.mxu0 %v15277_v61  ;;  %v15298_v59 = vld [vmem:[#allocation7 + $0xfd8] ss:$52 sps:$4 sm:$0xff]   ;;  %v15301_v61 = vld [vmem:[#allocation7 + $0xfe0] ss:$52 sps:$4 sm:$0xff]  }
 0x1a7   :  { %9045 = vmatprep.subr.bf16.mxu1 %v15282_v6  ;;  %9416 = vmatprep.subr.bf16.mxu0 %v15285_v12  ;;  %v15304_v6 = vld [vmem:[#allocation7 + $0x1040] ss:$52 sps:$4 sm:$0xff]   ;;  %v15307_v12 = vld [vmem:[#allocation7 + $0x1048] ss:$52 sps:$4 sm:$0xff]  }
 0x1aa   :  { %9046 = vmatpush1.bf16.msra.mxu1 %v15280_v13  ;;  %9417 = vmatpush1.bf16.msra.mxu0 %v15283_v14  ;;  %v15315_v13 = vld [vmem:[#allocation7 + $0x10b4] ss:$52 sps:$4 sm:$0xff]  }
 0x1ab   :  { %9047 = vmatprep.subr.bf16.mxu1 %v15288_v32  ;;  %9418 = vmatprep.subr.bf16.mxu0 %v15291_v37  ;;  %v15310_v14 = vld [vmem:[#allocation7 + $0x10a8] ss:$52 sps:$4 sm:$0xff]   ;;  %v15322_v32 = vld [vmem:[#allocation7 + $0x1178] ss:$52 sps:$4 sm:$0xff]   ;;  %v15325_v37 = vld [vmem:[#allocation7 + $0x1180] ss:$52 sps:$4 sm:$0xff]  }
 0x1ae   :  { %9048 = vmatpush1.bf16.msra.mxu1 %v15286_v44  ;;  %9419 = vmatpush1.bf16.msra.mxu0 %v15289_v45  ;;  %v15333_v44 = vld [vmem:[#allocation7 + $0x11ec] ss:$52 sps:$4 sm:$0xff]  }
 0x1af   :  { %9049 = vmatprep.subr.bf16.mxu1 %v15294_v58  ;;  %9420 = vmatprep.subr.bf16.mxu0 %v15297_v52  ;;  %v15328_v45 = vld [vmem:[#allocation7 + $0x11e0] ss:$52 sps:$4 sm:$0xff]  }
 0x1b0   :  { %v15336_v58 = vld [vmem:[#allocation7 + $0x124c] ss:$52 sps:$4 sm:$0xff]   ;;  %v15339_v52 = vld [vmem:[#allocation7 + $0x1254] ss:$52 sps:$4 sm:$0xff]  }
 0x1b2   :  { %9050 = vmatpush1.bf16.msra.mxu1 %v15292_v4  ;;  %9421 = vmatpush1.bf16.msra.mxu0 %v15295_v54  ;;  %v15334_v4 = vld [vmem:[#allocation7 + $0x1248] ss:$52 sps:$4 sm:$0xff]   ;;  %v15337_v54 = vld [vmem:[#allocation7 + $0x1250] ss:$52 sps:$4 sm:$0xff]  }
 0x1b3   :  { %9051 = vmatprep.subr.bf16.mxu1 %v15300_v55  ;;  %9422 = vmatprep.subr.bf16.mxu0 %v15303_v57  ;;  %v15342_v55 = vld [vmem:[#allocation7 + $0x12b4] ss:$52 sps:$4 sm:$0xff]   ;;  %v15345_v57 = vld [vmem:[#allocation7 + $0x12bc] ss:$52 sps:$4 sm:$0xff]  }
 0x1b6   :  { %9052 = vmatpush1.bf16.msra.mxu1 %v15298_v59  ;;  %9423 = vmatpush1.bf16.msra.mxu0 %v15301_v61  ;;  %v15340_v59 = vld [vmem:[#allocation7 + $0x12b0] ss:$52 sps:$4 sm:$0xff]   ;;  %v15343_v61 = vld [vmem:[#allocation7 + $0x12b8] ss:$52 sps:$4 sm:$0xff]  }
 0x1b7   :  { %9053 = vmatprep.subr.bf16.mxu1 %v15306_v46  ;;  %9424 = vmatprep.subr.bf16.mxu0 %v15309_v50  ;;  %v15348_v46 = vld [vmem:[#allocation7 + $0x131c] ss:$52 sps:$4 sm:$0xff]   ;;  %v15351_v50 = vld [vmem:[#allocation7 + $0x1324] ss:$52 sps:$4 sm:$0xff]  }
 0x1ba   :  { %9054 = vmatpush1.bf16.msra.mxu1 %v15304_v6  ;;  %9425 = vmatpush1.bf16.msra.mxu0 %v15307_v12  ;;  %v15346_v6 = vld [vmem:[#allocation7 + $0x1318] ss:$52 sps:$4 sm:$0xff]   ;;  %v15349_v12 = vld [vmem:[#allocation7 + $0x1320] ss:$52 sps:$4 sm:$0xff]  }
 0x1bb   :  { %9055 = vmatprep.subr.bf16.mxu1 %v15312_v10  ;;  %9426 = vmatprep.subr.bf16.mxu0 %v15315_v13  ;;  %v15354_v10 = vld [vmem:[#allocation7 + $0x1384] ss:$52 sps:$4 sm:$0xff]   ;;  %v15357_v13 = vld [vmem:[#allocation7 + $0x138c] ss:$52 sps:$4 sm:$0xff]  }
 0x1be   :  { %9056 = vmatpush1.bf16.msra.mxu1 %v15310_v14  ;;  %9427 = vmatpush1.bf16.msra.mxu0 %v15313_v18  ;;  %v15352_v14 = vld [vmem:[#allocation7 + $0x1380] ss:$52 sps:$4 sm:$0xff]   ;;  %v15355_v18 = vld [vmem:[#allocation7 + $0x1388] ss:$52 sps:$4 sm:$0xff]  }
 0x1bf   :  { %9057 = vmatprep.subr.bf16.mxu1 %v15318_v20  ;;  %9428 = vmatprep.subr.bf16.mxu0 %v15321_v25  ;;  %v15360_v20 = vld [vmem:[#allocation7 + $0x13ec] ss:$52 sps:$4 sm:$0xff]   ;;  %v15363_v25 = vld [vmem:[#allocation7 + $0x13f4] ss:$52 sps:$4 sm:$0xff]  }
 0x1c2   :  { %9058 = vmatpush1.bf16.msra.mxu1 %v15316_v26  ;;  %9429 = vmatpush1.bf16.msra.mxu0 %v15319_v29  ;;  %v15358_v26 = vld [vmem:[#allocation7 + $0x13e8] ss:$52 sps:$4 sm:$0xff]   ;;  %v15361_v29 = vld [vmem:[#allocation7 + $0x13f0] ss:$52 sps:$4 sm:$0xff]  }
 0x1c3   :  { %9059 = vmatprep.subr.bf16.mxu1 %v15324_v31  ;;  %9430 = vmatprep.subr.bf16.mxu0 %v15327_v56  ;;  %v15366_v31 = vld [vmem:[#allocation7 + $0x1454] ss:$52 sps:$4 sm:$0xff]   ;;  %v15369_v56 = vld [vmem:[#allocation7 + $0x145c] ss:$52 sps:$4 sm:$0xff]  }
 0x1c6   :  { %9060 = vmatpush1.bf16.msra.mxu1 %v15322_v32  ;;  %9431 = vmatpush1.bf16.msra.mxu0 %v15325_v37  ;;  %v15364_v32 = vld [vmem:[#allocation7 + $0x1450] ss:$52 sps:$4 sm:$0xff]   ;;  %v15367_v37 = vld [vmem:[#allocation7 + $0x1458] ss:$52 sps:$4 sm:$0xff]  }
 0x1c7   :  { %9061 = vmatprep.subr.bf16.mxu1 %v15330_v38  ;;  %9432 = vmatprep.subr.bf16.mxu0 %v15333_v44  ;;  %v15372_v38 = vld [vmem:[#allocation7 + $0x14bc] ss:$52 sps:$4 sm:$0xff]   ;;  %v15375_v44 = vld [vmem:[#allocation7 + $0x14c4] ss:$52 sps:$4 sm:$0xff]  }
 0x1ca   :  { %9062 = vmatpush1.bf16.msra.mxu1 %v15328_v45  ;;  %9433 = vmatpush1.bf16.msra.mxu0 %v15331_v48  ;;  %v15370_v45 = vld [vmem:[#allocation7 + $0x14b8] ss:$52 sps:$4 sm:$0xff]   ;;  %v15373_v48 = vld [vmem:[#allocation7 + $0x14c0] ss:$52 sps:$4 sm:$0xff]  }
 0x1cb   :  { %9063 = vmatprep.subr.bf16.mxu1 %v15336_v58  ;;  %9434 = vmatprep.subr.bf16.mxu0 %v15339_v52  ;;  %v15378_v58 = vld [vmem:[#allocation7 + $0x1524] ss:$52 sps:$4 sm:$0xff]   ;;  %v15381_v52 = vld [vmem:[#allocation7 + $0x152c] ss:$52 sps:$4 sm:$0xff]  }
 0x1ce   :  { %9064 = vmatpush1.bf16.msra.mxu1 %v15334_v4  ;;  %9435 = vmatpush1.bf16.msra.mxu0 %v15337_v54  ;;  %v15376_v4 = vld [vmem:[#allocation7 + $0x1520] ss:$52 sps:$4 sm:$0xff]   ;;  %v15379_v54 = vld [vmem:[#allocation7 + $0x1528] ss:$52 sps:$4 sm:$0xff]  }
 0x1cf   :  { %9065 = vmatprep.subr.bf16.mxu1 %v15342_v55  ;;  %9436 = vmatprep.subr.bf16.mxu0 %v15345_v57  ;;  %v15384_v55 = vld [vmem:[#allocation7 + $0x158c] ss:$52 sps:$4 sm:$0xff]   ;;  %v15387_v57 = vld [vmem:[#allocation7 + $0x1594] ss:$52 sps:$4 sm:$0xff]  }
 0x1d2   :  { %9066 = vmatpush1.bf16.msra.mxu1 %v15340_v59  ;;  %9437 = vmatpush1.bf16.msra.mxu0 %v15343_v61  ;;  %v15382_v59 = vld [vmem:[#allocation7 + $0x1588] ss:$52 sps:$4 sm:$0xff]   ;;  %v15385_v61 = vld [vmem:[#allocation7 + $0x1590] ss:$52 sps:$4 sm:$0xff]  }
 0x1d3   :  { %9067 = vmatprep.subr.bf16.mxu1 %v15348_v46  ;;  %9438 = vmatprep.subr.bf16.mxu0 %v15351_v50  ;;  %v15390_v46 = vld [vmem:[#allocation7 + $0x15f4] ss:$52 sps:$4 sm:$0xff]   ;;  %v15393_v50 = vld [vmem:[#allocation7 + $0x15fc] ss:$52 sps:$4 sm:$0xff]  }
 0x1d6   :  { %9068 = vmatpush1.bf16.msra.mxu1 %v15346_v6  ;;  %9439 = vmatpush1.bf16.msra.mxu0 %v15349_v12  ;;  %v15388_v6 = vld [vmem:[#allocation7 + $0x15f0] ss:$52 sps:$4 sm:$0xff]   ;;  %v15391_v12 = vld [vmem:[#allocation7 + $0x15f8] ss:$52 sps:$4 sm:$0xff]  }
 0x1d7   :  { %9090 = vmatprep.subr.bf16.mxu1 %v15354_v10  ;;  %9461 = vmatprep.subr.bf16.mxu0 %v15357_v13  ;;  %v15396_v10 = vld [vmem:[#allocation7 + $0x165c] ss:$52 sps:$4 sm:$0xff]   ;;  %v15399_v13 = vld [vmem:[#allocation7 + $0x1664] ss:$52 sps:$4 sm:$0xff]  }
 0x1d9   :  { %9070 = vmatmul.mubr.bf16.vlgmr.msra.gmra.mrb[24].mxu1 %v17532_v22  ;;  %9441 = vmatmul.mubr.bf16.vlgmr.msra.gmra.mrb[28].mxu0 %v17532_v22 }
 0x1da   :  { %9091 = vmatpush1.bf16.msra.mxu1 %v15352_v14  ;;  %9462 = vmatpush1.bf16.msra.mxu0 %v15355_v18  ;;  %v15394_v14 = vld [vmem:[#allocation7 + $0x1658] ss:$52 sps:$4 sm:$0xff]   ;;  %v15397_v18 = vld [vmem:[#allocation7 + $0x1660] ss:$52 sps:$4 sm:$0xff]  }
 0x1db   :  { %9092 = vmatprep.subr.bf16.mxu1 %v15360_v20  ;;  %9463 = vmatprep.subr.bf16.mxu0 %v15363_v25  ;;  %v15402_v20 = vld [vmem:[#allocation7 + $0x16c4] ss:$52 sps:$4 sm:$0xff]   ;;  %v15405_v25 = vld [vmem:[#allocation7 + $0x16cc] ss:$52 sps:$4 sm:$0xff]  }
 0x1dc   :  { %9079 = vmatprep.mubr.bf16.mxu1 %v17561_v23  ;;  %9450 = vmatprep.mubr.bf16.mxu0 %v17561_v23 }
 0x1de   :  { %9093 = vmatpush1.bf16.msra.mxu1 %v15358_v26  ;;  %9464 = vmatpush1.bf16.msra.mxu0 %v15361_v29  ;;  %v15400_v26 = vld [vmem:[#allocation7 + $0x16c0] ss:$52 sps:$4 sm:$0xff]   ;;  %v15403_v29 = vld [vmem:[#allocation7 + $0x16c8] ss:$52 sps:$4 sm:$0xff]  }
 0x1df   :  { %9094 = vmatprep.subr.bf16.mxu1 %v15366_v31  ;;  %9465 = vmatprep.subr.bf16.mxu0 %v15369_v56  ;;  %v15408_v31 = vld [vmem:[#allocation7 + $0x172c] ss:$52 sps:$4 sm:$0xff]   ;;  %v15411_v56 = vld [vmem:[#allocation7 + $0x1734] ss:$52 sps:$4 sm:$0xff]  }
 0x1e1   :  { %9080 = vmatmul.mubr.bf16.gmra.mrb[28].mxu1 %v17558_v34  ;;  %9451 = vmatmul.mubr.bf16.gmra.mrb[32].mxu0 %v17558_v34 }
 0x1e2   :  { %9095 = vmatpush1.bf16.msra.mxu1 %v15364_v32  ;;  %9466 = vmatpush1.bf16.msra.mxu0 %v15367_v37  ;;  %v15406_v32 = vld [vmem:[#allocation7 + $0x1728] ss:$52 sps:$4 sm:$0xff]   ;;  %v15409_v37 = vld [vmem:[#allocation7 + $0x1730] ss:$52 sps:$4 sm:$0xff]  }
 0x1e3   :  { %9122 = vmatprep.mubr.bf16.mxu1 %v17547_v30  ;;  %9493 = vmatprep.mubr.bf16.mxu0 %v17547_v30 }
 0x1e4   :  { %9096 = vmatprep.subr.bf16.mxu1 %v15372_v38  ;;  %9467 = vmatprep.subr.bf16.mxu0 %v15375_v44  ;;  %v15414_v38 = vld [vmem:[#allocation7 + $0x1794] ss:$52 sps:$4 sm:$0xff]   ;;  %v15417_v44 = vld [vmem:[#allocation7 + $0x179c] ss:$52 sps:$4 sm:$0xff]  }
 0x1e6   :  { %9097 = vmatpush1.bf16.msra.mxu1 %v15370_v45  ;;  %9468 = vmatpush1.bf16.msra.mxu0 %v15373_v48  ;;  %v15412_v45 = vld [vmem:[#allocation7 + $0x1790] ss:$52 sps:$4 sm:$0xff]   ;;  %v15415_v48 = vld [vmem:[#allocation7 + $0x1798] ss:$52 sps:$4 sm:$0xff]  }
 0x1e7   :  { %9098 = vmatprep.subr.bf16.mxu1 %v15378_v58  ;;  %9469 = vmatprep.subr.bf16.mxu0 %v15381_v52  ;;  %v15420_v58 = vld [vmem:[#allocation7 + $0x17fc] ss:$52 sps:$4 sm:$0xff]   ;;  %v15423_v52 = vld [vmem:[#allocation7 + $0x1804] ss:$52 sps:$4 sm:$0xff]  }
 0x1ea   :  { %9099 = vmatpush1.bf16.msra.mxu1 %v15376_v4  ;;  %9470 = vmatpush1.bf16.msra.mxu0 %v15379_v54  ;;  %v15418_v4 = vld [vmem:[#allocation7 + $0x17f8] ss:$52 sps:$4 sm:$0xff]   ;;  %v15421_v54 = vld [vmem:[#allocation7 + $0x1800] ss:$52 sps:$4 sm:$0xff]  }
 0x1eb   :  { %9100 = vmatprep.subr.bf16.mxu1 %v15384_v55  ;;  %9471 = vmatprep.subr.bf16.mxu0 %v15387_v57  ;;  %v15426_v55 = vld [vmem:[#allocation7 + $0x1864] ss:$52 sps:$4 sm:$0xff]   ;;  %v15429_v57 = vld [vmem:[#allocation7 + $0x186c] ss:$52 sps:$4 sm:$0xff]  }
 0x1ee   :  { %9101 = vmatpush1.bf16.msra.mxu1 %v15382_v59  ;;  %9472 = vmatpush1.bf16.msra.mxu0 %v15385_v61  ;;  %v15424_v59 = vld [vmem:[#allocation7 + $0x1860] ss:$52 sps:$4 sm:$0xff]   ;;  %v15427_v61 = vld [vmem:[#allocation7 + $0x1868] ss:$52 sps:$4 sm:$0xff]  }
 0x1ef   :  { %9102 = vmatprep.subr.bf16.mxu1 %v15390_v46  ;;  %9473 = vmatprep.subr.bf16.mxu0 %v15393_v50  ;;  %v15432_v46 = vld [vmem:[#allocation7 + $0x18cc] ss:$52 sps:$4 sm:$0xff]   ;;  %v15435_v50 = vld [vmem:[#allocation7 + $0x18d4] ss:$52 sps:$4 sm:$0xff]  }
 0x1f2   :  { %9103 = vmatpush1.bf16.msra.mxu1 %v15388_v6  ;;  %9474 = vmatpush1.bf16.msra.mxu0 %v15391_v12  ;;  %v15430_v6 = vld [vmem:[#allocation7 + $0x18c8] ss:$52 sps:$4 sm:$0xff]   ;;  %v15433_v12 = vld [vmem:[#allocation7 + $0x18d0] ss:$52 sps:$4 sm:$0xff]  }
 0x1f3   :  { %9104 = vmatprep.subr.bf16.mxu1 %v15396_v10  ;;  %9475 = vmatprep.subr.bf16.mxu0 %v15399_v13  ;;  %v15438_v10 = vld [vmem:[#allocation7 + $0x1934] ss:$52 sps:$4 sm:$0xff]   ;;  %v15441_v13 = vld [vmem:[#allocation7 + $0x193c] ss:$52 sps:$4 sm:$0xff]  }
 0x1f6   :  { %9105 = vmatpush1.bf16.msra.mxu1 %v15394_v14  ;;  %9476 = vmatpush1.bf16.msra.mxu0 %v15397_v18  ;;  %v15436_v14 = vld [vmem:[#allocation7 + $0x1930] ss:$52 sps:$4 sm:$0xff]   ;;  %v15439_v18 = vld [vmem:[#allocation7 + $0x1938] ss:$52 sps:$4 sm:$0xff]  }
 0x1f7   :  { %9106 = vmatprep.subr.bf16.mxu1 %v15402_v20  ;;  %9477 = vmatprep.subr.bf16.mxu0 %v15405_v25  ;;  %v15444_v20 = vld [vmem:[#allocation7 + $0x199c] ss:$52 sps:$4 sm:$0xff]   ;;  %v15447_v25 = vld [vmem:[#allocation7 + $0x19a4] ss:$52 sps:$4 sm:$0xff]  }
 0x1fa   :  { %9107 = vmatpush1.bf16.msra.mxu1 %v15400_v26  ;;  %9478 = vmatpush1.bf16.msra.mxu0 %v15403_v29  ;;  %v15442_v26 = vld [vmem:[#allocation7 + $0x1998] ss:$52 sps:$4 sm:$0xff]   ;;  %v15445_v29 = vld [vmem:[#allocation7 + $0x19a0] ss:$52 sps:$4 sm:$0xff]  }
 0x1fb   :  { %9108 = vmatprep.subr.bf16.mxu1 %v15408_v31  ;;  %9479 = vmatprep.subr.bf16.mxu0 %v15411_v56  ;;  %v15450_v31 = vld [vmem:[#allocation7 + $0x1a04] ss:$52 sps:$4 sm:$0xff]   ;;  %v15453_v56 = vld [vmem:[#allocation7 + $0x1a0c] ss:$52 sps:$4 sm:$0xff]  }
 0x1fe   :  { %9109 = vmatpush1.bf16.msra.mxu1 %v15406_v32  ;;  %9480 = vmatpush1.bf16.msra.mxu0 %v15409_v37  ;;  %v15448_v32 = vld [vmem:[#allocation7 + $0x1a00] ss:$52 sps:$4 sm:$0xff]   ;;  %v15451_v37 = vld [vmem:[#allocation7 + $0x1a08] ss:$52 sps:$4 sm:$0xff]  }
 0x1ff   :  { %9110 = vmatprep.subr.bf16.mxu1 %v15414_v38  ;;  %9481 = vmatprep.subr.bf16.mxu0 %v15417_v44  ;;  %v15456_v38 = vld [vmem:[#allocation7 + $0x1a6c] ss:$52 sps:$4 sm:$0xff]   ;;  %v15459_v44 = vld [vmem:[#allocation7 + $0x1a74] ss:$52 sps:$4 sm:$0xff]  }
 0x202   :  { %9111 = vmatpush1.bf16.msra.mxu1 %v15412_v45  ;;  %9482 = vmatpush1.bf16.msra.mxu0 %v15415_v48  ;;  %v15454_v45 = vld [vmem:[#allocation7 + $0x1a68] ss:$52 sps:$4 sm:$0xff]   ;;  %v15457_v48 = vld [vmem:[#allocation7 + $0x1a70] ss:$52 sps:$4 sm:$0xff]  }
 0x203   :  { %9112 = vmatprep.subr.bf16.mxu1 %v15420_v58  ;;  %9483 = vmatprep.subr.bf16.mxu0 %v15423_v52  ;;  %v15462_v58 = vld [vmem:[#allocation7 + $0x1ad4] ss:$52 sps:$4 sm:$0xff]   ;;  %v15465_v52 = vld [vmem:[#allocation7 + $0x1adc] ss:$52 sps:$4 sm:$0xff]  }
 0x206   :  { %9113 = vmatpush1.bf16.msra.mxu1 %v15418_v4  ;;  %9484 = vmatpush1.bf16.msra.mxu0 %v15421_v54  ;;  %v15460_v4 = vld [vmem:[#allocation7 + $0x1ad0] ss:$52 sps:$4 sm:$0xff]   ;;  %v15463_v54 = vld [vmem:[#allocation7 + $0x1ad8] ss:$52 sps:$4 sm:$0xff]  }
 0x207   :  { %9114 = vmatprep.subr.bf16.mxu1 %v15426_v55  ;;  %9485 = vmatprep.subr.bf16.mxu0 %v15429_v57  ;;  %v15468_v55 = vld [vmem:[#allocation7 + $0x1b3c] ss:$52 sps:$4 sm:$0xff]   ;;  %v15471_v57 = vld [vmem:[#allocation7 + $0x1b44] ss:$52 sps:$4 sm:$0xff]  }
 0x20a   :  { %9115 = vmatpush1.bf16.msra.mxu1 %v15424_v59  ;;  %9486 = vmatpush1.bf16.msra.mxu0 %v15427_v61  ;;  %v15466_v59 = vld [vmem:[#allocation7 + $0x1b38] ss:$52 sps:$4 sm:$0xff]   ;;  %v15469_v61 = vld [vmem:[#allocation7 + $0x1b40] ss:$52 sps:$4 sm:$0xff]  }
 0x20b   :  { %9116 = vmatprep.subr.bf16.mxu1 %v15432_v46  ;;  %9487 = vmatprep.subr.bf16.mxu0 %v15435_v50  ;;  %v15474_v46 = vld [vmem:[#allocation7 + $0x1ba4] ss:$52 sps:$4 sm:$0xff]   ;;  %v15477_v50 = vld [vmem:[#allocation7 + $0x1bac] ss:$52 sps:$4 sm:$0xff]  }
 0x20e   :  { %9117 = vmatpush1.bf16.msra.mxu1 %v15430_v6  ;;  %9488 = vmatpush1.bf16.msra.mxu0 %v15433_v12  ;;  %v15472_v6 = vld [vmem:[#allocation7 + $0x1ba0] ss:$52 sps:$4 sm:$0xff]   ;;  %v15475_v12 = vld [vmem:[#allocation7 + $0x1ba8] ss:$52 sps:$4 sm:$0xff]  }
 0x20f   :  { %9118 = vmatprep.subr.bf16.mxu1 %v15438_v10  ;;  %9489 = vmatprep.subr.bf16.mxu0 %v15441_v13  ;;  %v15480_v10 = vld [vmem:[#allocation7 + $0x1c0c] ss:$52 sps:$4 sm:$0xff]   ;;  %v15483_v13 = vld [vmem:[#allocation7 + $0x1c14] ss:$52 sps:$4 sm:$0xff]  }
 0x212   :  { %9119 = vmatpush1.bf16.msra.mxu1 %v15436_v14  ;;  %9490 = vmatpush1.bf16.msra.mxu0 %v15439_v18  ;;  %v15478_v14 = vld [vmem:[#allocation7 + $0x1c08] ss:$52 sps:$4 sm:$0xff]   ;;  %v15481_v18 = vld [vmem:[#allocation7 + $0x1c10] ss:$52 sps:$4 sm:$0xff]  }
 0x213   :  { %9120 = vmatprep.subr.bf16.mxu1 %v15444_v20  ;;  %9491 = vmatprep.subr.bf16.mxu0 %v15447_v25  ;;  %v15486_v20 = vld [vmem:[#allocation7 + $0x1c74] ss:$52 sps:$4 sm:$0xff]   ;;  %v15489_v25 = vld [vmem:[#allocation7 + $0x1c7c] ss:$52 sps:$4 sm:$0xff]  }
 0x216   :  { %9121 = vmatpush1.bf16.msra.mxu1 %v15442_v26  ;;  %9492 = vmatpush1.bf16.msra.mxu0 %v15445_v29  ;;  %v15484_v26 = vld [vmem:[#allocation7 + $0x1c70] ss:$52 sps:$4 sm:$0xff]   ;;  %v15487_v29 = vld [vmem:[#allocation7 + $0x1c78] ss:$52 sps:$4 sm:$0xff]  }
 0x217   :  { %9143 = vmatprep.subr.bf16.mxu1 %v15450_v31  ;;  %9514 = vmatprep.subr.bf16.mxu0 %v15453_v56  ;;  %v15492_v31 = vld [vmem:[#allocation7 + $0x1cdc] ss:$52 sps:$4 sm:$0xff]   ;;  %v15495_v56 = vld [vmem:[#allocation7 + $0x1ce4] ss:$52 sps:$4 sm:$0xff]  }
 0x219   :  { %9123 = vmatmul.mubr.bf16.vlgmr.msra.gmra.mrb[24].mxu1 %v17545_v3  ;;  %9494 = vmatmul.mubr.bf16.vlgmr.msra.gmra.mrb[28].mxu0 %v17545_v3 }
 0x21a   :  { %9132 = vmatprep.mubr.bf16.mxu1 %v17579_v5  ;;  %9144 = vmatpush1.bf16.msra.mxu1 %v15448_v32  ;;  %v15490_v32 = vld [vmem:[#allocation7 + $0x1cd8] ss:$52 sps:$4 sm:$0xff]  }
 0x21b   :  { %9503 = vmatprep.mubr.bf16.mxu0 %v17579_v5  ;;  %9515 = vmatpush1.bf16.msra.mxu0 %v15451_v37  ;;  %v15493_v37 = vld [vmem:[#allocation7 + $0x1ce0] ss:$52 sps:$4 sm:$0xff]  }
 0x21c   :  { %9145 = vmatprep.subr.bf16.mxu1 %v15456_v38  ;;  %9516 = vmatprep.subr.bf16.mxu0 %v15459_v44  ;;  %v15498_v38 = vld [vmem:[#allocation7 + $0x1d44] ss:$52 sps:$4 sm:$0xff]   ;;  %v15501_v44 = vld [vmem:[#allocation7 + $0x1d4c] ss:$52 sps:$4 sm:$0xff]  }
 0x21e   :  { %9146 = vmatpush1.bf16.msra.mxu1 %v15454_v45  ;;  %v15496_v45 = vld [vmem:[#allocation7 + $0x1d40] ss:$52 sps:$4 sm:$0xff]  }
 0x21f   :  { %9517 = vmatpush1.bf16.msra.mxu0 %v15457_v48  ;;  %9147 = vmatprep.subr.bf16.mxu1 %v15462_v58  ;;  %v15499_v48 = vld [vmem:[#allocation7 + $0x1d48] ss:$52 sps:$4 sm:$0xff]   ;;  %v15504_v58 = vld [vmem:[#allocation7 + $0x1dac] ss:$52 sps:$4 sm:$0xff]  }
 0x220   :  { %9518 = vmatprep.subr.bf16.mxu0 %v15465_v52  ;;  %v15507_v52 = vld [vmem:[#allocation7 + $0x1db4] ss:$52 sps:$4 sm:$0xff]  }
 0x221   :  { %9133 = vmatmul.mubr.bf16.gmra.mrb[28].mxu1 %v17577_v63  ;;  %9504 = vmatmul.mubr.bf16.gmra.mrb[32].mxu0 %v17577_v63 }
 0x222   :  { %9148 = vmatpush1.bf16.msra.mxu1 %v15460_v4  ;;  %9175 = vmatprep.mubr.bf16.mxu1 %v17585_v21  ;;  %v15502_v4 = vld [vmem:[#allocation7 + $0x1da8] ss:$52 sps:$4 sm:$0xff]  }
 0x223   :  { %9519 = vmatpush1.bf16.msra.mxu0 %v15463_v54  ;;  %9546 = vmatprep.mubr.bf16.mxu0 %v17585_v21  ;;  %v15505_v54 = vld [vmem:[#allocation7 + $0x1db0] ss:$52 sps:$4 sm:$0xff]  }
 0x224   :  { %9149 = vmatprep.subr.bf16.mxu1 %v15468_v55  ;;  %9520 = vmatprep.subr.bf16.mxu0 %v15471_v57  ;;  %v15510_v55 = vld [vmem:[#allocation7 + $0x1e14] ss:$52 sps:$4 sm:$0xff]   ;;  %v15513_v57 = vld [vmem:[#allocation7 + $0x1e1c] ss:$52 sps:$4 sm:$0xff]  }
 0x226   :  { %9150 = vmatpush1.bf16.msra.mxu1 %v15466_v59  ;;  %v15508_v59 = vld [vmem:[#allocation7 + $0x1e10] ss:$52 sps:$4 sm:$0xff]  }
 0x227   :  { %9521 = vmatpush1.bf16.msra.mxu0 %v15469_v61  ;;  %9151 = vmatprep.subr.bf16.mxu1 %v15474_v46  ;;  %v15511_v61 = vld [vmem:[#allocation7 + $0x1e18] ss:$52 sps:$4 sm:$0xff]   ;;  %v15516_v46 = vld [vmem:[#allocation7 + $0x1e7c] ss:$52 sps:$4 sm:$0xff]  }
 0x228   :  { %9522 = vmatprep.subr.bf16.mxu0 %v15477_v50  ;;  %v15519_v50 = vld [vmem:[#allocation7 + $0x1e84] ss:$52 sps:$4 sm:$0xff]  }
 0x22a   :  { %9152 = vmatpush1.bf16.msra.mxu1 %v15472_v6  ;;  %v15514_v6 = vld [vmem:[#allocation7 + $0x1e78] ss:$52 sps:$4 sm:$0xff]  }
 0x22b   :  { %9523 = vmatpush1.bf16.msra.mxu0 %v15475_v12  ;;  %9153 = vmatprep.subr.bf16.mxu1 %v15480_v10  ;;  %v15517_v12 = vld [vmem:[#allocation7 + $0x1e80] ss:$52 sps:$4 sm:$0xff]   ;;  %v15522_v10 = vld [vmem:[#allocation7 + $0x1ee4] ss:$52 sps:$4 sm:$0xff]  }
 0x22c   :  { %9524 = vmatprep.subr.bf16.mxu0 %v15483_v13  ;;  %v15525_v13 = vld [vmem:[#allocation7 + $0x1eec] ss:$52 sps:$4 sm:$0xff]  }
 0x22e   :  { %9154 = vmatpush1.bf16.msra.mxu1 %v15478_v14  ;;  %v15520_v14 = vld [vmem:[#allocation7 + $0x1ee0] ss:$52 sps:$4 sm:$0xff]  }
 0x22f   :  { %9525 = vmatpush1.bf16.msra.mxu0 %v15481_v18  ;;  %9155 = vmatprep.subr.bf16.mxu1 %v15486_v20  ;;  %v15523_v18 = vld [vmem:[#allocation7 + $0x1ee8] ss:$52 sps:$4 sm:$0xff]   ;;  %v15528_v20 = vld [vmem:[#allocation7 + $0x1f4c] ss:$52 sps:$4 sm:$0xff]  }
 0x230   :  { %9526 = vmatprep.subr.bf16.mxu0 %v15489_v25  ;;  %v15531_v25 = vld [vmem:[#allocation7 + $0x1f54] ss:$52 sps:$4 sm:$0xff]  }
 0x232   :  { %9156 = vmatpush1.bf16.msra.mxu1 %v15484_v26  ;;  %v15526_v26 = vld [vmem:[#allocation7 + $0x1f48] ss:$52 sps:$4 sm:$0xff]  }
 0x233   :  { %9527 = vmatpush1.bf16.msra.mxu0 %v15487_v29  ;;  %9157 = vmatprep.subr.bf16.mxu1 %v15492_v31  ;;  %v15529_v29 = vld [vmem:[#allocation7 + $0x1f50] ss:$52 sps:$4 sm:$0xff]   ;;  %v15534_v31 = vld [vmem:[#allocation7 + $0x1fb4] ss:$52 sps:$4 sm:$0xff]  }
 0x234   :  { %9528 = vmatprep.subr.bf16.mxu0 %v15495_v56  ;;  %v15537_v56 = vld [vmem:[#allocation7 + $0x1fbc] ss:$52 sps:$4 sm:$0xff]  }
 0x236   :  { %9158 = vmatpush1.bf16.msra.mxu1 %v15490_v32  ;;  %v15532_v32 = vld [vmem:[#allocation7 + $0x1fb0] ss:$52 sps:$4 sm:$0xff]  }
 0x237   :  { %9529 = vmatpush1.bf16.msra.mxu0 %v15493_v37  ;;  %9159 = vmatprep.subr.bf16.mxu1 %v15498_v38  ;;  %v15535_v37 = vld [vmem:[#allocation7 + $0x1fb8] ss:$52 sps:$4 sm:$0xff]   ;;  %v15540_v38 = vld [vmem:[#allocation7 + $0x201c] ss:$52 sps:$4 sm:$0xff]  }
 0x238   :  { %9530 = vmatprep.subr.bf16.mxu0 %v15501_v44  ;;  %v15543_v44 = vld [vmem:[#allocation7 + $0x2024] ss:$52 sps:$4 sm:$0xff]  }
 0x23a   :  { %9160 = vmatpush1.bf16.msra.mxu1 %v15496_v45  ;;  %v15538_v45 = vld [vmem:[#allocation7 + $0x2018] ss:$52 sps:$4 sm:$0xff]  }
 0x23b   :  { %9531 = vmatpush1.bf16.msra.mxu0 %v15499_v48  ;;  %9161 = vmatprep.subr.bf16.mxu1 %v15504_v58  ;;  %v15541_v48 = vld [vmem:[#allocation7 + $0x2020] ss:$52 sps:$4 sm:$0xff]   ;;  %v15546_v58 = vld [vmem:[#allocation7 + $0x2084] ss:$52 sps:$4 sm:$0xff]  }
 0x23c   :  { %9532 = vmatprep.subr.bf16.mxu0 %v15507_v52  ;;  %v15549_v52 = vld [vmem:[#allocation7 + $0x208c] ss:$52 sps:$4 sm:$0xff]  }
 0x23e   :  { %9162 = vmatpush1.bf16.msra.mxu1 %v15502_v4  ;;  %v15544_v4 = vld [vmem:[#allocation7 + $0x2080] ss:$52 sps:$4 sm:$0xff]  }
 0x23f   :  { %9533 = vmatpush1.bf16.msra.mxu0 %v15505_v54  ;;  %9163 = vmatprep.subr.bf16.mxu1 %v15510_v55  ;;  %v15547_v54 = vld [vmem:[#allocation7 + $0x2088] ss:$52 sps:$4 sm:$0xff]   ;;  %v15552_v55 = vld [vmem:[#allocation7 + $0x20ec] ss:$52 sps:$4 sm:$0xff]  }
 0x240   :  { %9534 = vmatprep.subr.bf16.mxu0 %v15513_v57  ;;  %v15550_v57 = vld [vmem:[#allocation7 + $0x20e8] ss:$52 sps:$4 sm:$0xff]  }
 0x242   :  { %9164 = vmatpush1.bf16.msra.mxu1 %v15508_v59  ;;  %v15555_v59 = vld [vmem:[#allocation7 + $0x20f4] ss:$52 sps:$4 sm:$0xff]  }
 0x243   :  { %9535 = vmatpush1.bf16.msra.mxu0 %v15511_v61  ;;  %9165 = vmatprep.subr.bf16.mxu1 %v15516_v46  ;;  %v15553_v61 = vld [vmem:[#allocation7 + $0x20f0] ss:$52 sps:$4 sm:$0xff]   ;;  %v15558_v46 = vld [vmem:[#allocation7 + $0x2154] ss:$52 sps:$4 sm:$0xff]  }
 0x244   :  { %9536 = vmatprep.subr.bf16.mxu0 %v15519_v50  ;;  %v15556_v50 = vld [vmem:[#allocation7 + $0x2150] ss:$52 sps:$4 sm:$0xff]  }
 0x246   :  { %9166 = vmatpush1.bf16.msra.mxu1 %v15514_v6  ;;  %v15561_v6 = vld [vmem:[#allocation7 + $0x215c] ss:$52 sps:$4 sm:$0xff]  }
 0x247   :  { %9537 = vmatpush1.bf16.msra.mxu0 %v15517_v12  ;;  %9167 = vmatprep.subr.bf16.mxu1 %v15522_v10  ;;  %v15559_v12 = vld [vmem:[#allocation7 + $0x2158] ss:$52 sps:$4 sm:$0xff]   ;;  %v15564_v10 = vld [vmem:[#allocation7 + $0x21bc] ss:$52 sps:$4 sm:$0xff]  }
 0x248   :  { %9538 = vmatprep.subr.bf16.mxu0 %v15525_v13  ;;  %v15562_v13 = vld [vmem:[#allocation7 + $0x21b8] ss:$52 sps:$4 sm:$0xff]  }
 0x24a   :  { %9168 = vmatpush1.bf16.msra.mxu1 %v15520_v14  ;;  %v15567_v14 = vld [vmem:[#allocation7 + $0x21c4] ss:$52 sps:$4 sm:$0xff]  }
 0x24b   :  { %9539 = vmatpush1.bf16.msra.mxu0 %v15523_v18  ;;  %9169 = vmatprep.subr.bf16.mxu1 %v15528_v20  ;;  %v15565_v18 = vld [vmem:[#allocation7 + $0x21c0] ss:$52 sps:$4 sm:$0xff]   ;;  %v15570_v20 = vld [vmem:[#allocation7 + $0x2224] ss:$52 sps:$4 sm:$0xff]  }
 0x24c   :  { %9540 = vmatprep.subr.bf16.mxu0 %v15531_v25  ;;  %v15568_v25 = vld [vmem:[#allocation7 + $0x2220] ss:$52 sps:$4 sm:$0xff]  }
 0x24e   :  { %9170 = vmatpush1.bf16.msra.mxu1 %v15526_v26  ;;  %v15573_v26 = vld [vmem:[#allocation7 + $0x222c] ss:$52 sps:$4 sm:$0xff]  }
 0x24f   :  { %9541 = vmatpush1.bf16.msra.mxu0 %v15529_v29  ;;  %9171 = vmatprep.subr.bf16.mxu1 %v15534_v31  ;;  %v15571_v29 = vld [vmem:[#allocation7 + $0x2228] ss:$52 sps:$4 sm:$0xff]   ;;  %v15576_v31 = vld [vmem:[#allocation7 + $0x228c] ss:$52 sps:$4 sm:$0xff]  }
 0x250   :  { %9542 = vmatprep.subr.bf16.mxu0 %v15537_v56  ;;  %v15579_v56 = vld [vmem:[#allocation7 + $0x2294] ss:$52 sps:$4 sm:$0xff]  }
 0x252   :  { %9172 = vmatpush1.bf16.msra.mxu1 %v15532_v32  ;;  %v15574_v32 = vld [vmem:[#allocation7 + $0x2288] ss:$52 sps:$4 sm:$0xff]  }
 0x253   :  { %9543 = vmatpush1.bf16.msra.mxu0 %v15535_v37  ;;  %9173 = vmatprep.subr.bf16.mxu1 %v15540_v38  ;;  %v15577_v37 = vld [vmem:[#allocation7 + $0x2290] ss:$52 sps:$4 sm:$0xff]   ;;  %v15582_v38 = vld [vmem:[#allocation7 + $0x22f4] ss:$52 sps:$4 sm:$0xff]  }
 0x254   :  { %9544 = vmatprep.subr.bf16.mxu0 %v15543_v44  ;;  %v15585_v44 = vld [vmem:[#allocation7 + $0x22fc] ss:$52 sps:$4 sm:$0xff]  }
 0x256   :  { %9174 = vmatpush1.bf16.msra.mxu1 %v15538_v45  ;;  %v15580_v45 = vld [vmem:[#allocation7 + $0x22f0] ss:$52 sps:$4 sm:$0xff]  }
 0x257   :  { %9545 = vmatpush1.bf16.msra.mxu0 %v15541_v48  ;;  %9196 = vmatprep.subr.bf16.mxu1 %v15546_v58  ;;  %v15583_v48 = vld [vmem:[#allocation7 + $0x22f8] ss:$52 sps:$4 sm:$0xff]   ;;  %v15588_v58 = vld [vmem:[#allocation7 + $0x235c] ss:$52 sps:$4 sm:$0xff]  }
 0x258   :  { %9567 = vmatprep.subr.bf16.mxu0 %v15549_v52  ;;  %v15591_v52 = vld [vmem:[#allocation7 + $0x2364] ss:$52 sps:$4 sm:$0xff]  }
 0x259   :  { %9176 = vmatmul.mubr.bf16.vlgmr.msra.gmra.mrb[24].mxu1 %v17582_v17 }
 0x25a   :  { %9547 = vmatmul.mubr.bf16.vlgmr.msra.gmra.mrb[28].mxu0 %v17582_v17  ;;  %9185 = vmatprep.mubr.bf16.mxu1 %v17601_v19 }
 0x25b   :  { %9197 = vmatpush1.bf16.msra.mxu1 %v15544_v4  ;;  %9556 = vmatprep.mubr.bf16.mxu0 %v17601_v19  ;;  %v15586_v4 = vld [vmem:[#allocation7 + $0x2358] ss:$52 sps:$4 sm:$0xff]  }
 0x25c   :  { %9568 = vmatpush1.bf16.msra.mxu0 %v15547_v54  ;;  %9198 = vmatprep.subr.bf16.mxu1 %v15552_v55  ;;  %v15589_v54 = vld [vmem:[#allocation7 + $0x2360] ss:$52 sps:$4 sm:$0xff]   ;;  %v15594_v55 = vld [vmem:[#allocation7 + $0x23c4] ss:$52 sps:$4 sm:$0xff]  }
 0x25d   :  { %9569 = vmatprep.subr.bf16.mxu0 %v15555_v59  ;;  %v15592_v59 = vld [vmem:[#allocation7 + $0x23c0] ss:$52 sps:$4 sm:$0xff]  }
 0x25f   :  { %9199 = vmatpush1.bf16.msra.mxu1 %v15550_v57  ;;  %v15597_v57 = vld [vmem:[#allocation7 + $0x23cc] ss:$52 sps:$4 sm:$0xff]  }
 0x260   :  { %9570 = vmatpush1.bf16.msra.mxu0 %v15553_v61  ;;  %9200 = vmatprep.subr.bf16.mxu1 %v15558_v46  ;;  %v15595_v61 = vld [vmem:[#allocation7 + $0x23c8] ss:$52 sps:$4 sm:$0xff]   ;;  %v15600_v46 = vld [vmem:[#allocation7 + $0x242c] ss:$52 sps:$4 sm:$0xff]  }
 0x261   :  { %9186 = vmatmul.mubr.bf16.gmra.mrb[28].mxu1 %v17599_v41  ;;  %9571 = vmatprep.subr.bf16.mxu0 %v15561_v6  ;;  %v15598_v6 = vld [vmem:[#allocation7 + $0x2428] ss:$52 sps:$4 sm:$0xff]  }
 0x262   :  { %9557 = vmatmul.mubr.bf16.gmra.mrb[32].mxu0 %v17599_v41  ;;  %9228 = vmatprep.mubr.bf16.mxu1 %v17595_v7 }
 0x263   :  { %9201 = vmatpush1.bf16.msra.mxu1 %v15556_v50  ;;  %9599 = vmatprep.mubr.bf16.mxu0 %v17595_v7  ;;  %v15603_v50 = vld [vmem:[#allocation7 + $0x2434] ss:$52 sps:$4 sm:$0xff]  }
 0x264   :  { %9572 = vmatpush1.bf16.msra.mxu0 %v15559_v12  ;;  %9202 = vmatprep.subr.bf16.mxu1 %v15564_v10  ;;  %v15601_v12 = vld [vmem:[#allocation7 + $0x2430] ss:$52 sps:$4 sm:$0xff]   ;;  %v15606_v10 = vld [vmem:[#allocation7 + $0x2494] ss:$52 sps:$4 sm:$0xff]  }
 0x265   :  { %9573 = vmatprep.subr.bf16.mxu0 %v15567_v14  ;;  %v15604_v14 = vld [vmem:[#allocation7 + $0x2490] ss:$52 sps:$4 sm:$0xff]  }
 0x267   :  { %9203 = vmatpush1.bf16.msra.mxu1 %v15562_v13  ;;  %v15609_v13 = vld [vmem:[#allocation7 + $0x249c] ss:$52 sps:$4 sm:$0xff]  }
 0x268   :  { %9574 = vmatpush1.bf16.msra.mxu0 %v15565_v18  ;;  %9204 = vmatprep.subr.bf16.mxu1 %v15570_v20  ;;  %v15607_v18 = vld [vmem:[#allocation7 + $0x2498] ss:$52 sps:$4 sm:$0xff]   ;;  %v15612_v20 = vld [vmem:[#allocation7 + $0x24fc] ss:$52 sps:$4 sm:$0xff]  }
 0x269   :  { %9575 = vmatprep.subr.bf16.mxu0 %v15573_v26  ;;  %v15610_v26 = vld [vmem:[#allocation7 + $0x24f8] ss:$52 sps:$4 sm:$0xff]  }
 0x26b   :  { %9205 = vmatpush1.bf16.msra.mxu1 %v15568_v25  ;;  %v15615_v25 = vld [vmem:[#allocation7 + $0x2504] ss:$52 sps:$4 sm:$0xff]  }
 0x26c   :  { %9576 = vmatpush1.bf16.msra.mxu0 %v15571_v29  ;;  %9206 = vmatprep.subr.bf16.mxu1 %v15576_v31  ;;  %v15613_v29 = vld [vmem:[#allocation7 + $0x2500] ss:$52 sps:$4 sm:$0xff]   ;;  %v15618_v31 = vld [vmem:[#allocation7 + $0x2564] ss:$52 sps:$4 sm:$0xff]  }
 0x26d   :  { %9577 = vmatprep.subr.bf16.mxu0 %v15579_v56  ;;  %v15621_v56 = vld [vmem:[#allocation7 + $0x256c] ss:$52 sps:$4 sm:$0xff]  }
 0x26f   :  { %9207 = vmatpush1.bf16.msra.mxu1 %v15574_v32  ;;  %v15616_v32 = vld [vmem:[#allocation7 + $0x2560] ss:$52 sps:$4 sm:$0xff]  }
 0x270   :  { %9578 = vmatpush1.bf16.msra.mxu0 %v15577_v37  ;;  %9208 = vmatprep.subr.bf16.mxu1 %v15582_v38  ;;  %v15619_v37 = vld [vmem:[#allocation7 + $0x2568] ss:$52 sps:$4 sm:$0xff]   ;;  %v15624_v38 = vld [vmem:[#allocation7 + $0x25cc] ss:$52 sps:$4 sm:$0xff]  }
 0x271   :  { %9579 = vmatprep.subr.bf16.mxu0 %v15585_v44  ;;  %v15627_v44 = vld [vmem:[#allocation7 + $0x25d4] ss:$52 sps:$4 sm:$0xff]  }
 0x273   :  { %9209 = vmatpush1.bf16.msra.mxu1 %v15580_v45  ;;  %v15622_v45 = vld [vmem:[#allocation7 + $0x25c8] ss:$52 sps:$4 sm:$0xff]  }
 0x274   :  { %9580 = vmatpush1.bf16.msra.mxu0 %v15583_v48  ;;  %9210 = vmatprep.subr.bf16.mxu1 %v15588_v58  ;;  %v15625_v48 = vld [vmem:[#allocation7 + $0x25d0] ss:$52 sps:$4 sm:$0xff]   ;;  %v15630_v58 = vld [vmem:[#allocation7 + $0x2634] ss:$52 sps:$4 sm:$0xff]  }
 0x275   :  { %9581 = vmatprep.subr.bf16.mxu0 %v15591_v52  ;;  %v15633_v52 = vld [vmem:[#allocation7 + $0x263c] ss:$52 sps:$4 sm:$0xff]  }
 0x277   :  { %9211 = vmatpush1.bf16.msra.mxu1 %v15586_v4  ;;  %v15628_v4 = vld [vmem:[#allocation7 + $0x2630] ss:$52 sps:$4 sm:$0xff]  }
 0x278   :  { %9582 = vmatpush1.bf16.msra.mxu0 %v15589_v54  ;;  %9212 = vmatprep.subr.bf16.mxu1 %v15594_v55  ;;  %v15631_v54 = vld [vmem:[#allocation7 + $0x2638] ss:$52 sps:$4 sm:$0xff]   ;;  %v15636_v55 = vld [vmem:[#allocation7 + $0x269c] ss:$52 sps:$4 sm:$0xff]  }
 0x279   :  { %9583 = vmatprep.subr.bf16.mxu0 %v15597_v57  ;;  %v15639_v57 = vld [vmem:[#allocation7 + $0x26a4] ss:$52 sps:$4 sm:$0xff]  }
 0x27b   :  { %9213 = vmatpush1.bf16.msra.mxu1 %v15592_v59  ;;  %v15634_v59 = vld [vmem:[#allocation7 + $0x2698] ss:$52 sps:$4 sm:$0xff]  }
 0x27c   :  { %9584 = vmatpush1.bf16.msra.mxu0 %v15595_v61  ;;  %9214 = vmatprep.subr.bf16.mxu1 %v15600_v46  ;;  %v15637_v61 = vld [vmem:[#allocation7 + $0x26a0] ss:$52 sps:$4 sm:$0xff]   ;;  %v15642_v46 = vld [vmem:[#allocation7 + $0x2704] ss:$52 sps:$4 sm:$0xff]  }
 0x27d   :  { %9585 = vmatprep.subr.bf16.mxu0 %v15603_v50  ;;  %v15645_v50 = vld [vmem:[#allocation7 + $0x270c] ss:$52 sps:$4 sm:$0xff]  }
 0x27f   :  { %9215 = vmatpush1.bf16.msra.mxu1 %v15598_v6  ;;  %v15640_v6 = vld [vmem:[#allocation7 + $0x2700] ss:$52 sps:$4 sm:$0xff]  }
 0x280   :  { %9586 = vmatpush1.bf16.msra.mxu0 %v15601_v12  ;;  %9216 = vmatprep.subr.bf16.mxu1 %v15606_v10  ;;  %v15643_v12 = vld [vmem:[#allocation7 + $0x2708] ss:$52 sps:$4 sm:$0xff]   ;;  %v15648_v10 = vld [vmem:[#allocation7 + $0x276c] ss:$52 sps:$4 sm:$0xff]  }
 0x281   :  { %9587 = vmatprep.subr.bf16.mxu0 %v15609_v13  ;;  %v15646_v13 = vld [vmem:[#allocation7 + $0x2768] ss:$52 sps:$4 sm:$0xff]  }
 0x283   :  { %9217 = vmatpush1.bf16.msra.mxu1 %v15604_v14  ;;  %v15651_v14 = vld [vmem:[#allocation7 + $0x2774] ss:$52 sps:$4 sm:$0xff]  }
 0x284   :  { %9588 = vmatpush1.bf16.msra.mxu0 %v15607_v18  ;;  %9218 = vmatprep.subr.bf16.mxu1 %v15612_v20  ;;  %v15649_v18 = vld [vmem:[#allocation7 + $0x2770] ss:$52 sps:$4 sm:$0xff]   ;;  %v15654_v20 = vld [vmem:[#allocation7 + $0x27d4] ss:$52 sps:$4 sm:$0xff]  }
 0x285   :  { %9589 = vmatprep.subr.bf16.mxu0 %v15615_v25  ;;  %v15652_v25 = vld [vmem:[#allocation7 + $0x27d0] ss:$52 sps:$4 sm:$0xff]  }
 0x287   :  { %9219 = vmatpush1.bf16.msra.mxu1 %v15610_v26  ;;  %v15657_v26 = vld [vmem:[#allocation7 + $0x27dc] ss:$52 sps:$4 sm:$0xff]  }
 0x288   :  { %9590 = vmatpush1.bf16.msra.mxu0 %v15613_v29  ;;  %9220 = vmatprep.subr.bf16.mxu1 %v15618_v31  ;;  %v15655_v29 = vld [vmem:[#allocation7 + $0x27d8] ss:$52 sps:$4 sm:$0xff]   ;;  %v15660_v31 = vld [vmem:[#allocation7 + $0x283c] ss:$52 sps:$4 sm:$0xff]  }
 0x289   :  { %9591 = vmatprep.subr.bf16.mxu0 %v15621_v56  ;;  %v15658_v56 = vld [vmem:[#allocation7 + $0x2838] ss:$52 sps:$4 sm:$0xff]  }
 0x28b   :  { %9221 = vmatpush1.bf16.msra.mxu1 %v15616_v32  ;;  %v15663_v32 = vld [vmem:[#allocation7 + $0x2844] ss:$52 sps:$4 sm:$0xff]  }
 0x28c   :  { %9592 = vmatpush1.bf16.msra.mxu0 %v15619_v37  ;;  %9222 = vmatprep.subr.bf16.mxu1 %v15624_v38  ;;  %v15661_v37 = vld [vmem:[#allocation7 + $0x2840] ss:$52 sps:$4 sm:$0xff]  }
 0x28d   :  { %9593 = vmatprep.subr.bf16.mxu0 %v15627_v44  ;;  %v15666_v38 = vld [vmem:[#allocation7 + $0x14] ss:$52 sps:$4 sm:$0xff]   ;;  %v15664_v44 = vld [vmem:[#allocation7 + $0x10] ss:$52 sps:$4 sm:$0xff]  }
 0x28f   :  { %9223 = vmatpush1.bf16.msra.mxu1 %v15622_v45  ;;  %v15669_v45 = vld [vmem:[#allocation7 + $0x1c] ss:$52 sps:$4 sm:$0xff]  }
 0x290   :  { %9594 = vmatpush1.bf16.msra.mxu0 %v15625_v48  ;;  %9224 = vmatprep.subr.bf16.mxu1 %v15630_v58  ;;  %v15667_v48 = vld [vmem:[#allocation7 + $0x18] ss:$52 sps:$4 sm:$0xff]   ;;  %v15672_v58 = vld [vmem:[#allocation7 + $0x7c] ss:$52 sps:$4 sm:$0xff]  }
 0x291   :  { %9595 = vmatprep.subr.bf16.mxu0 %v15633_v52  ;;  %v15675_v52 = vld [vmem:[#allocation7 + $0x84] ss:$52 sps:$4 sm:$0xff]  }
 0x293   :  { %9225 = vmatpush1.bf16.msra.mxu1 %v15628_v4  ;;  %v15670_v4 = vld [vmem:[#allocation7 + $0x78] ss:$52 sps:$4 sm:$0xff]  }
 0x294   :  { %9596 = vmatpush1.bf16.msra.mxu0 %v15631_v54  ;;  %9226 = vmatprep.subr.bf16.mxu1 %v15636_v55  ;;  %v15673_v54 = vld [vmem:[#allocation7 + $0x80] ss:$52 sps:$4 sm:$0xff]   ;;  %v15678_v55 = vld [vmem:[#allocation7 + $0xe4] ss:$52 sps:$4 sm:$0xff]  }
 0x295   :  { %9597 = vmatprep.subr.bf16.mxu0 %v15639_v57  ;;  %v15681_v57 = vld [vmem:[#allocation7 + $0xec] ss:$52 sps:$4 sm:$0xff]  }
 0x297   :  { %9227 = vmatpush1.bf16.msra.mxu1 %v15634_v59  ;;  %v15676_v59 = vld [vmem:[#allocation7 + $0xe0] ss:$52 sps:$4 sm:$0xff]  }
 0x298   :  { %9598 = vmatpush1.bf16.msra.mxu0 %v15637_v61  ;;  %9249 = vmatprep.subr.bf16.mxu1 %v15642_v46  ;;  %v15679_v61 = vld [vmem:[#allocation7 + $0xe8] ss:$52 sps:$4 sm:$0xff]   ;;  %v15684_v46 = vld [vmem:[#allocation7 + $0x14c] ss:$52 sps:$4 sm:$0xff]  }
 0x299   :  { %9620 = vmatprep.subr.bf16.mxu0 %v15645_v50  ;;  %v15687_v50 = vld [vmem:[#allocation7 + $0x154] ss:$52 sps:$4 sm:$0xff]  }
 0x29a   :  { %9229 = vmatmul.mubr.bf16.vlgmr.msra.gmra.mrb[24].mxu1 %v17593_v2 }
 0x29b   :  { %9600 = vmatmul.mubr.bf16.vlgmr.msra.gmra.mrb[28].mxu0 %v17593_v2  ;;  %9238 = vmatprep.mubr.bf16.mxu1 %v17625_v53 }
 0x29c   :  { %9250 = vmatpush1.bf16.msra.mxu1 %v15640_v6  ;;  %9609 = vmatprep.mubr.bf16.mxu0 %v17625_v53  ;;  %v15682_v6 = vld [vmem:[#allocation7 + $0x148] ss:$52 sps:$4 sm:$0xff]  }
 0x29d   :  { %9621 = vmatpush1.bf16.msra.mxu0 %v15643_v12  ;;  %9251 = vmatprep.subr.bf16.mxu1 %v15648_v10  ;;  %v15685_v12 = vld [vmem:[#allocation7 + $0x150] ss:$52 sps:$4 sm:$0xff]   ;;  %v15690_v10 = vld [vmem:[#allocation7 + $0x1b4] ss:$52 sps:$4 sm:$0xff]  }
 0x29e   :  { %9622 = vmatprep.subr.bf16.mxu0 %v15651_v14  ;;  %v15688_v14 = vld [vmem:[#allocation7 + $0x1b0] ss:$52 sps:$4 sm:$0xff]  }
 0x2a0   :  { %9252 = vmatpush1.bf16.msra.mxu1 %v15646_v13  ;;  %v15693_v13 = vld [vmem:[#allocation7 + $0x1bc] ss:$52 sps:$4 sm:$0xff]  }
 0x2a1   :  { %9623 = vmatpush1.bf16.msra.mxu0 %v15649_v18  ;;  %9253 = vmatprep.subr.bf16.mxu1 %v15654_v20  ;;  %v15691_v18 = vld [vmem:[#allocation7 + $0x1b8] ss:$52 sps:$4 sm:$0xff]   ;;  %v15696_v20 = vld [vmem:[#allocation7 + $0x21c] ss:$52 sps:$4 sm:$0xff]  }
 0x2a2   :  { %9239 = vmatmul.mubr.bf16.gmra.mrb[28].mxu1 %v17623_v51  ;;  %9624 = vmatprep.subr.bf16.mxu0 %v15657_v26  ;;  %v15694_v26 = vld [vmem:[#allocation7 + $0x218] ss:$52 sps:$4 sm:$0xff]  }
 0x2a3   :  { %9610 = vmatmul.mubr.bf16.gmra.mrb[32].mxu0 %v17623_v51  ;;  %9281 = vmatprep.mubr.bf16.mxu1 %v18011_v0 }
 0x2a4   :  { %9254 = vmatpush1.bf16.msra.mxu1 %v15652_v25  ;;  %9652 = vmatprep.mubr.bf16.mxu0 %v18011_v0  ;;  %v15699_v25 = vld [vmem:[#allocation7 + $0x224] ss:$52 sps:$4 sm:$0xff]  }
 0x2a5   :  { %9625 = vmatpush1.bf16.msra.mxu0 %v15655_v29  ;;  %9255 = vmatprep.subr.bf16.mxu1 %v15660_v31  ;;  %v15697_v29 = vld [vmem:[#allocation7 + $0x220] ss:$52 sps:$4 sm:$0xff]   ;;  %v15702_v31 = vld [vmem:[#allocation7 + $0x284] ss:$52 sps:$4 sm:$0xff]  }
 0x2a6   :  { %9626 = vmatprep.subr.bf16.mxu0 %v15663_v32  ;;  %v15700_v32 = vld [vmem:[#allocation7 + $0x280] ss:$52 sps:$4 sm:$0xff]  }
 0x2a8   :  { %9256 = vmatpush1.bf16.msra.mxu1 %v15658_v56  ;;  %v15705_v56 = vld [vmem:[#allocation7 + $0x28c] ss:$52 sps:$4 sm:$0xff]  }
 0x2a9   :  { %9627 = vmatpush1.bf16.msra.mxu0 %v15661_v37  ;;  %9673 = vmatprep.subr.bf16.mxu1 %v15666_v38  ;;  %v15703_v37 = vld [vmem:[#allocation7 + $0x288] ss:$52 sps:$4 sm:$0xff]   ;;  %v15708_v38 = vld [vmem:[#allocation7 + $0x2ec] ss:$52 sps:$4 sm:$0xff]  }
 0x2aa   :  { %10044 = vmatprep.subr.bf16.mxu0 %v15669_v45  ;;  %v15706_v45 = vld [vmem:[#allocation7 + $0x2e8] ss:$52 sps:$4 sm:$0xff]  }
 0x2ab   :  { %14172 = vmatmul.mubr.msk.bf16.vlgmr.msra.gmra.mrb[24].mxu1 %vm789_vm1, %v17609_v62 }
 0x2ac   :  { %14174 = vmatmul.mubr.msk.bf16.vlgmr.msra.gmra.mrb[28].mxu0 %vm789_vm1, %v17609_v62  ;;  %9674 = vmatpush1.bf16.msra.mxu1 %v15664_v44  ;;  %v15711_v44 = vld [vmem:[#allocation7 + $0x2f4] ss:$52 sps:$4 sm:$0xff]  }
 0x2ad   :  { %10045 = vmatpush1.bf16.msra.mxu0 %v15667_v48  ;;  %9675 = vmatprep.subr.bf16.mxu1 %v15672_v58  ;;  %v15709_v48 = vld [vmem:[#allocation7 + $0x2f0] ss:$52 sps:$4 sm:$0xff]   ;;  %v15714_v58 = vld [vmem:[#allocation7 + $0x354] ss:$52 sps:$4 sm:$0xff]  }
 0x2ae   :  { %10046 = vmatprep.subr.bf16.mxu0 %v15675_v52  ;;  %9291 = vmatprep.mubr.bf16.mxu1 %v18011_v0  ;;  %v15717_v52 = vld [vmem:[#allocation7 + $0x35c] ss:$52 sps:$4 sm:$0xff]  }
 0x2af   :  { %9662 = vmatprep.mubr.bf16.mxu0 %v18011_v0 }
 0x2b0   :  { %9676 = vmatpush1.bf16.msra.mxu1 %v15670_v4  ;;  %v15712_v4 = vld [vmem:[#allocation7 + $0x350] ss:$52 sps:$4 sm:$0xff]  }
 0x2b1   :  { %10047 = vmatpush1.bf16.msra.mxu0 %v15673_v54  ;;  %9677 = vmatprep.subr.bf16.mxu1 %v15678_v55  ;;  %v15715_v54 = vld [vmem:[#allocation7 + $0x358] ss:$52 sps:$4 sm:$0xff]   ;;  %v15720_v55 = vld [vmem:[#allocation7 + $0x3bc] ss:$52 sps:$4 sm:$0xff]  }
 0x2b2   :  { %10048 = vmatprep.subr.bf16.mxu0 %v15681_v57  ;;  %v15723_v57 = vld [vmem:[#allocation7 + $0x3c4] ss:$52 sps:$4 sm:$0xff]  }
 0x2b3   :  { %14173 = vmatmul.mubr.msk.bf16.gmra.mrb[28].mxu1 %vm789_vm1, %v17606_v8 }
 0x2b4   :  { %14175 = vmatmul.mubr.msk.bf16.gmra.mrb[32].mxu0 %vm789_vm1, %v17606_v8  ;;  %9678 = vmatpush1.bf16.msra.mxu1 %v15676_v59  ;;  %v15718_v59 = vld [vmem:[#allocation7 + $0x3b8] ss:$52 sps:$4 sm:$0xff]  }
 0x2b5   :  { %9705 = vmatprep.mubr.bf16.mxu1 %v17472_v1  ;;  %10049 = vmatpush1.bf16.msra.mxu0 %v15679_v61  ;;  %v15721_v61 = vld [vmem:[#allocation7 + $0x3c0] ss:$52 sps:$4 sm:$0xff]  }
 0x2b6   :  { %10076 = vmatprep.mubr.bf16.mxu0 %v17472_v1  ;;  %9679 = vmatprep.subr.bf16.mxu1 %v15684_v46  ;;  %v15726_v46 = vld [vmem:[#allocation7 + $0x424] ss:$52 sps:$4 sm:$0xff]  }
 0x2b7   :  { %10050 = vmatprep.subr.bf16.mxu0 %v15687_v50  ;;  %v15729_v50 = vld [vmem:[#allocation7 + $0x42c] ss:$52 sps:$4 sm:$0xff]  }
 0x2b8   :  { %9680 = vmatpush1.bf16.msra.mxu1 %v15682_v6  ;;  %v15724_v6 = vld [vmem:[#allocation7 + $0x420] ss:$52 sps:$4 sm:$0xff]  }
 0x2b9   :  { %10051 = vmatpush1.bf16.msra.mxu0 %v15685_v12  ;;  %9681 = vmatprep.subr.bf16.mxu1 %v15690_v10  ;;  %v15727_v12 = vld [vmem:[#allocation7 + $0x428] ss:$52 sps:$4 sm:$0xff]   ;;  %v15732_v10 = vld [vmem:[#allocation7 + $0x48c] ss:$52 sps:$4 sm:$0xff]  }
 0x2ba   :  { %10052 = vmatprep.subr.bf16.mxu0 %v15693_v13  ;;  %v15735_v13 = vld [vmem:[#allocation7 + $0x494] ss:$52 sps:$4 sm:$0xff]  }
 0x2bc   :  { %9682 = vmatpush1.bf16.msra.mxu1 %v15688_v14  ;;  %v15730_v14 = vld [vmem:[#allocation7 + $0x488] ss:$52 sps:$4 sm:$0xff]  }
 0x2bd   :  { %10053 = vmatpush1.bf16.msra.mxu0 %v15691_v18  ;;  %9683 = vmatprep.subr.bf16.mxu1 %v15696_v20  ;;  %v15733_v18 = vld [vmem:[#allocation7 + $0x490] ss:$52 sps:$4 sm:$0xff]   ;;  %v15738_v20 = vld [vmem:[#allocation7 + $0x4f4] ss:$52 sps:$4 sm:$0xff]  }
 0x2be   :  { %10054 = vmatprep.subr.bf16.mxu0 %v15699_v25  ;;  %v15741_v25 = vld [vmem:[#allocation7 + $0x4fc] ss:$52 sps:$4 sm:$0xff]  }
 0x2c0   :  { %9684 = vmatpush1.bf16.msra.mxu1 %v15694_v26  ;;  %v15736_v26 = vld [vmem:[#allocation7 + $0x4f0] ss:$52 sps:$4 sm:$0xff]  }
 0x2c1   :  { %10055 = vmatpush1.bf16.msra.mxu0 %v15697_v29  ;;  %9685 = vmatprep.subr.bf16.mxu1 %v15702_v31  ;;  %v15739_v29 = vld [vmem:[#allocation7 + $0x4f8] ss:$52 sps:$4 sm:$0xff]   ;;  %v15744_v31 = vld [vmem:[#allocation7 + $0x55c] ss:$52 sps:$4 sm:$0xff]  }
 0x2c2   :  { %10056 = vmatprep.subr.bf16.mxu0 %v15705_v56  ;;  %v15747_v56 = vld [vmem:[#allocation7 + $0x564] ss:$52 sps:$4 sm:$0xff]  }
 0x2c4   :  { %9686 = vmatpush1.bf16.msra.mxu1 %v15700_v32  ;;  %v15742_v32 = vld [vmem:[#allocation7 + $0x558] ss:$52 sps:$4 sm:$0xff]  }
 0x2c5   :  { %10057 = vmatpush1.bf16.msra.mxu0 %v15703_v37  ;;  %9687 = vmatprep.subr.bf16.mxu1 %v15708_v38  ;;  %v15745_v37 = vld [vmem:[#allocation7 + $0x560] ss:$52 sps:$4 sm:$0xff]   ;;  %v15750_v38 = vld [vmem:[#allocation7 + $0x5c4] ss:$52 sps:$4 sm:$0xff]  }
 0x2c6   :  { %10058 = vmatprep.subr.bf16.mxu0 %v15711_v44  ;;  %v15753_v44 = vld [vmem:[#allocation7 + $0x5cc] ss:$52 sps:$4 sm:$0xff]  }
 0x2c8   :  { %9688 = vmatpush1.bf16.msra.mxu1 %v15706_v45  ;;  %v15748_v45 = vld [vmem:[#allocation7 + $0x5c0] ss:$52 sps:$4 sm:$0xff]  }
 0x2c9   :  { %10059 = vmatpush1.bf16.msra.mxu0 %v15709_v48  ;;  %9689 = vmatprep.subr.bf16.mxu1 %v15714_v58  ;;  %v15751_v48 = vld [vmem:[#allocation7 + $0x5c8] ss:$52 sps:$4 sm:$0xff]   ;;  %v15756_v58 = vld [vmem:[#allocation7 + $0x62c] ss:$52 sps:$4 sm:$0xff]  }
 0x2ca   :  { %10060 = vmatprep.subr.bf16.mxu0 %v15717_v52  ;;  %v15759_v52 = vld [vmem:[#allocation7 + $0x634] ss:$52 sps:$4 sm:$0xff]  }
 0x2cc   :  { %9690 = vmatpush1.bf16.msra.mxu1 %v15712_v4  ;;  %v15754_v4 = vld [vmem:[#allocation7 + $0x628] ss:$52 sps:$4 sm:$0xff]  }
 0x2cd   :  { %10061 = vmatpush1.bf16.msra.mxu0 %v15715_v54  ;;  %9691 = vmatprep.subr.bf16.mxu1 %v15720_v55  ;;  %v15757_v54 = vld [vmem:[#allocation7 + $0x630] ss:$52 sps:$4 sm:$0xff]   ;;  %v15762_v55 = vld [vmem:[#allocation7 + $0x694] ss:$52 sps:$4 sm:$0xff]  }
 0x2ce   :  { %10062 = vmatprep.subr.bf16.mxu0 %v15723_v57  ;;  %v15765_v57 = vld [vmem:[#allocation7 + $0x69c] ss:$52 sps:$4 sm:$0xff]  }
 0x2d0   :  { %9692 = vmatpush1.bf16.msra.mxu1 %v15718_v59  ;;  %v15760_v59 = vld [vmem:[#allocation7 + $0x690] ss:$52 sps:$4 sm:$0xff]  }
 0x2d1   :  { %10063 = vmatpush1.bf16.msra.mxu0 %v15721_v61  ;;  %9693 = vmatprep.subr.bf16.mxu1 %v15726_v46  ;;  %v15763_v61 = vld [vmem:[#allocation7 + $0x698] ss:$52 sps:$4 sm:$0xff]   ;;  %v15768_v46 = vld [vmem:[#allocation7 + $0x6fc] ss:$52 sps:$4 sm:$0xff]  }
 0x2d2   :  { %10064 = vmatprep.subr.bf16.mxu0 %v15729_v50  ;;  %v15771_v50 = vld [vmem:[#allocation7 + $0x704] ss:$52 sps:$4 sm:$0xff]  }
 0x2d4   :  { %9694 = vmatpush1.bf16.msra.mxu1 %v15724_v6  ;;  %v15766_v6 = vld [vmem:[#allocation7 + $0x6f8] ss:$52 sps:$4 sm:$0xff]  }
 0x2d5   :  { %10065 = vmatpush1.bf16.msra.mxu0 %v15727_v12  ;;  %9695 = vmatprep.subr.bf16.mxu1 %v15732_v10  ;;  %v15769_v12 = vld [vmem:[#allocation7 + $0x700] ss:$52 sps:$4 sm:$0xff]   ;;  %v15774_v10 = vld [vmem:[#allocation7 + $0x764] ss:$52 sps:$4 sm:$0xff]  }
 0x2d6   :  { %10066 = vmatprep.subr.bf16.mxu0 %v15735_v13  ;;  %v15777_v13 = vld [vmem:[#allocation7 + $0x76c] ss:$52 sps:$4 sm:$0xff]  }
 0x2d8   :  { %9696 = vmatpush1.bf16.msra.mxu1 %v15730_v14  ;;  %v15772_v14 = vld [vmem:[#allocation7 + $0x760] ss:$52 sps:$4 sm:$0xff]  }
 0x2d9   :  { %10067 = vmatpush1.bf16.msra.mxu0 %v15733_v18  ;;  %9697 = vmatprep.subr.bf16.mxu1 %v15738_v20  ;;  %v15775_v18 = vld [vmem:[#allocation7 + $0x768] ss:$52 sps:$4 sm:$0xff]   ;;  %v15780_v20 = vld [vmem:[#allocation7 + $0x7cc] ss:$52 sps:$4 sm:$0xff]  }
 0x2da   :  { %10068 = vmatprep.subr.bf16.mxu0 %v15741_v25  ;;  %v15783_v25 = vld [vmem:[#allocation7 + $0x7d4] ss:$52 sps:$4 sm:$0xff]  }
 0x2dc   :  { %9698 = vmatpush1.bf16.msra.mxu1 %v15736_v26  ;;  %v15778_v26 = vld [vmem:[#allocation7 + $0x7c8] ss:$52 sps:$4 sm:$0xff]  }
 0x2dd   :  { %10069 = vmatpush1.bf16.msra.mxu0 %v15739_v29  ;;  %9699 = vmatprep.subr.bf16.mxu1 %v15744_v31  ;;  %v15781_v29 = vld [vmem:[#allocation7 + $0x7d0] ss:$52 sps:$4 sm:$0xff]   ;;  %v15786_v31 = vld [vmem:[#allocation7 + $0x834] ss:$52 sps:$4 sm:$0xff]  }
 0x2de   :  { %10070 = vmatprep.subr.bf16.mxu0 %v15747_v56  ;;  %v15789_v56 = vld [vmem:[#allocation7 + $0x83c] ss:$52 sps:$4 sm:$0xff]  }
 0x2e0   :  { %9700 = vmatpush1.bf16.msra.mxu1 %v15742_v32  ;;  %v15784_v32 = vld [vmem:[#allocation7 + $0x830] ss:$52 sps:$4 sm:$0xff]  }
 0x2e1   :  { %10071 = vmatpush1.bf16.msra.mxu0 %v15745_v37  ;;  %9701 = vmatprep.subr.bf16.mxu1 %v15750_v38  ;;  %v15787_v37 = vld [vmem:[#allocation7 + $0x838] ss:$52 sps:$4 sm:$0xff]   ;;  %v15792_v38 = vld [vmem:[#allocation7 + $0x89c] ss:$52 sps:$4 sm:$0xff]  }
 0x2e2   :  { %10072 = vmatprep.subr.bf16.mxu0 %v15753_v44  ;;  %v15795_v44 = vld [vmem:[#allocation7 + $0x8a4] ss:$52 sps:$4 sm:$0xff]  }
 0x2e4   :  { %9702 = vmatpush1.bf16.msra.mxu1 %v15748_v45  ;;  %v15790_v45 = vld [vmem:[#allocation7 + $0x898] ss:$52 sps:$4 sm:$0xff]  }
 0x2e5   :  { %10073 = vmatpush1.bf16.msra.mxu0 %v15751_v48  ;;  %9703 = vmatprep.subr.bf16.mxu1 %v15756_v58  ;;  %v15793_v48 = vld [vmem:[#allocation7 + $0x8a0] ss:$52 sps:$4 sm:$0xff]   ;;  %v15798_v58 = vld [vmem:[#allocation7 + $0x904] ss:$52 sps:$4 sm:$0xff]  }
 0x2e6   :  { %10074 = vmatprep.subr.bf16.mxu0 %v15759_v52  ;;  %v15801_v52 = vld [vmem:[#allocation7 + $0x90c] ss:$52 sps:$4 sm:$0xff]  }
 0x2e8   :  { %9704 = vmatpush1.bf16.msra.mxu1 %v15754_v4  ;;  %v15796_v4 = vld [vmem:[#allocation7 + $0x900] ss:$52 sps:$4 sm:$0xff]  }
 0x2e9   :  { %10075 = vmatpush1.bf16.msra.mxu0 %v15757_v54  ;;  %9726 = vmatprep.subr.bf16.mxu1 %v15762_v55  ;;  %v15799_v54 = vld [vmem:[#allocation7 + $0x908] ss:$52 sps:$4 sm:$0xff]   ;;  %v15804_v55 = vld [vmem:[#allocation7 + $0x96c] ss:$52 sps:$4 sm:$0xff]  }
 0x2ea   :  { %10097 = vmatprep.subr.bf16.mxu0 %v15765_v57  ;;  %v15807_v57 = vld [vmem:[#allocation7 + $0x974] ss:$52 sps:$4 sm:$0xff]  }
 0x2eb   :  { %9706 = vmatmul.mubr.bf16.vlgmr.msra.gmra.mrb[32].mxu1 %v17469_v60 }
 0x2ec   :  { %10077 = vmatmul.mubr.bf16.vlgmr.msra.gmra.mrb[36].mxu0 %v17469_v60  ;;  %9715 = vmatprep.mubr.bf16.mxu1 %v17503_v49 }
 0x2ed   :  { %9727 = vmatpush1.bf16.msra.mxu1 %v15760_v59  ;;  %10086 = vmatprep.mubr.bf16.mxu0 %v17503_v49  ;;  %v15802_v59 = vld [vmem:[#allocation7 + $0x968] ss:$52 sps:$4 sm:$0xff]  }
 0x2ee   :  { %10098 = vmatpush1.bf16.msra.mxu0 %v15763_v61  ;;  %9728 = vmatprep.subr.bf16.mxu1 %v15768_v46  ;;  %v15805_v61 = vld [vmem:[#allocation7 + $0x970] ss:$52 sps:$4 sm:$0xff]   ;;  %v15810_v46 = vld [vmem:[#allocation7 + $0x9d4] ss:$52 sps:$4 sm:$0xff]  }
 0x2ef   :  { %10099 = vmatprep.subr.bf16.mxu0 %v15771_v50  ;;  %v15813_v50 = vld [vmem:[#allocation7 + $0x9dc] ss:$52 sps:$4 sm:$0xff]  }
 0x2f1   :  { %9729 = vmatpush1.bf16.msra.mxu1 %v15766_v6  ;;  %v15808_v6 = vld [vmem:[#allocation7 + $0x9d0] ss:$52 sps:$4 sm:$0xff]  }
 0x2f2   :  { %10100 = vmatpush1.bf16.msra.mxu0 %v15769_v12  ;;  %9730 = vmatprep.subr.bf16.mxu1 %v15774_v10  ;;  %v15811_v12 = vld [vmem:[#allocation7 + $0x9d8] ss:$52 sps:$4 sm:$0xff]   ;;  %v15816_v10 = vld [vmem:[#allocation7 + $0xa3c] ss:$52 sps:$4 sm:$0xff]  }
 0x2f3   :  { %9716 = vmatmul.mubr.bf16.gmra.mrb[36].mxu1 %v17499_v43  ;;  %10101 = vmatprep.subr.bf16.mxu0 %v15777_v13  ;;  %v15819_v13 = vld [vmem:[#allocation7 + $0xa44] ss:$52 sps:$4 sm:$0xff]  }
 0x2f4   :  { %10087 = vmatmul.mubr.bf16.gmra.mrb[40].mxu0 %v17499_v43  ;;  %9758 = vmatprep.mubr.bf16.mxu1 %v17486_v28 }
 0x2f5   :  { %9731 = vmatpush1.bf16.msra.mxu1 %v15772_v14  ;;  %10129 = vmatprep.mubr.bf16.mxu0 %v17486_v28  ;;  %v15814_v14 = vld [vmem:[#allocation7 + $0xa38] ss:$52 sps:$4 sm:$0xff]  }
 0x2f6   :  { %10102 = vmatpush1.bf16.msra.mxu0 %v15775_v18  ;;  %9732 = vmatprep.subr.bf16.mxu1 %v15780_v20  ;;  %v15817_v18 = vld [vmem:[#allocation7 + $0xa40] ss:$52 sps:$4 sm:$0xff]   ;;  %v15822_v20 = vld [vmem:[#allocation7 + $0xaa4] ss:$52 sps:$4 sm:$0xff]  }
 0x2f7   :  { %10103 = vmatprep.subr.bf16.mxu0 %v15783_v25  ;;  %v15825_v25 = vld [vmem:[#allocation7 + $0xaac] ss:$52 sps:$4 sm:$0xff]  }
 0x2f9   :  { %9733 = vmatpush1.bf16.msra.mxu1 %v15778_v26  ;;  %v15820_v26 = vld [vmem:[#allocation7 + $0xaa0] ss:$52 sps:$4 sm:$0xff]  }
 0x2fa   :  { %10104 = vmatpush1.bf16.msra.mxu0 %v15781_v29  ;;  %9734 = vmatprep.subr.bf16.mxu1 %v15786_v31  ;;  %v15823_v29 = vld [vmem:[#allocation7 + $0xaa8] ss:$52 sps:$4 sm:$0xff]   ;;  %v15828_v31 = vld [vmem:[#allocation7 + $0xb0c] ss:$52 sps:$4 sm:$0xff]  }
 0x2fb   :  { %10105 = vmatprep.subr.bf16.mxu0 %v15789_v56  ;;  %v15831_v56 = vld [vmem:[#allocation7 + $0xb14] ss:$52 sps:$4 sm:$0xff]  }
 0x2fd   :  { %9735 = vmatpush1.bf16.msra.mxu1 %v15784_v32  ;;  %v15826_v32 = vld [vmem:[#allocation7 + $0xb08] ss:$52 sps:$4 sm:$0xff]  }
 0x2fe   :  { %10106 = vmatpush1.bf16.msra.mxu0 %v15787_v37  ;;  %9736 = vmatprep.subr.bf16.mxu1 %v15792_v38  ;;  %v15829_v37 = vld [vmem:[#allocation7 + $0xb10] ss:$52 sps:$4 sm:$0xff]   ;;  %v15834_v38 = vld [vmem:[#allocation7 + $0xb74] ss:$52 sps:$4 sm:$0xff]  }
 0x2ff   :  { %10107 = vmatprep.subr.bf16.mxu0 %v15795_v44  ;;  %v15837_v44 = vld [vmem:[#allocation7 + $0xb7c] ss:$52 sps:$4 sm:$0xff]  }
 0x301   :  { %9737 = vmatpush1.bf16.msra.mxu1 %v15790_v45  ;;  %v15832_v45 = vld [vmem:[#allocation7 + $0xb70] ss:$52 sps:$4 sm:$0xff]  }
 0x302   :  { %10108 = vmatpush1.bf16.msra.mxu0 %v15793_v48  ;;  %9738 = vmatprep.subr.bf16.mxu1 %v15798_v58  ;;  %v15835_v48 = vld [vmem:[#allocation7 + $0xb78] ss:$52 sps:$4 sm:$0xff]   ;;  %v15840_v58 = vld [vmem:[#allocation7 + $0xbdc] ss:$52 sps:$4 sm:$0xff]  }
 0x303   :  { %10109 = vmatprep.subr.bf16.mxu0 %v15801_v52  ;;  %v15843_v52 = vld [vmem:[#allocation7 + $0xbe4] ss:$52 sps:$4 sm:$0xff]  }
 0x305   :  { %9739 = vmatpush1.bf16.msra.mxu1 %v15796_v4  ;;  %v15838_v4 = vld [vmem:[#allocation7 + $0xbd8] ss:$52 sps:$4 sm:$0xff]  }
 0x306   :  { %10110 = vmatpush1.bf16.msra.mxu0 %v15799_v54  ;;  %9740 = vmatprep.subr.bf16.mxu1 %v15804_v55  ;;  %v15841_v54 = vld [vmem:[#allocation7 + $0xbe0] ss:$52 sps:$4 sm:$0xff]   ;;  %v15846_v55 = vld [vmem:[#allocation7 + $0xc44] ss:$52 sps:$4 sm:$0xff]  }
 0x307   :  { %10111 = vmatprep.subr.bf16.mxu0 %v15807_v57  ;;  %v15849_v57 = vld [vmem:[#allocation7 + $0xc4c] ss:$52 sps:$4 sm:$0xff]  }
 0x309   :  { %9741 = vmatpush1.bf16.msra.mxu1 %v15802_v59  ;;  %v15844_v59 = vld [vmem:[#allocation7 + $0xc40] ss:$52 sps:$4 sm:$0xff]  }
 0x30a   :  { %10112 = vmatpush1.bf16.msra.mxu0 %v15805_v61  ;;  %9742 = vmatprep.subr.bf16.mxu1 %v15810_v46  ;;  %v15847_v61 = vld [vmem:[#allocation7 + $0xc48] ss:$52 sps:$4 sm:$0xff]   ;;  %v15852_v46 = vld [vmem:[#allocation7 + $0xcac] ss:$52 sps:$4 sm:$0xff]  }
 0x30b   :  { %10113 = vmatprep.subr.bf16.mxu0 %v15813_v50  ;;  %v15855_v50 = vld [vmem:[#allocation7 + $0xcb4] ss:$52 sps:$4 sm:$0xff]  }
 0x30d   :  { %9743 = vmatpush1.bf16.msra.mxu1 %v15808_v6  ;;  %v15850_v6 = vld [vmem:[#allocation7 + $0xca8] ss:$52 sps:$4 sm:$0xff]  }
 0x30e   :  { %10114 = vmatpush1.bf16.msra.mxu0 %v15811_v12  ;;  %9744 = vmatprep.subr.bf16.mxu1 %v15816_v10  ;;  %v15853_v12 = vld [vmem:[#allocation7 + $0xcb0] ss:$52 sps:$4 sm:$0xff]   ;;  %v15858_v10 = vld [vmem:[#allocation7 + $0xd14] ss:$52 sps:$4 sm:$0xff]  }
 0x30f   :  { %10115 = vmatprep.subr.bf16.mxu0 %v15819_v13  ;;  %v15861_v13 = vld [vmem:[#allocation7 + $0xd1c] ss:$52 sps:$4 sm:$0xff]  }
 0x311   :  { %9745 = vmatpush1.bf16.msra.mxu1 %v15814_v14  ;;  %v15856_v14 = vld [vmem:[#allocation7 + $0xd10] ss:$52 sps:$4 sm:$0xff]  }
 0x312   :  { %10116 = vmatpush1.bf16.msra.mxu0 %v15817_v18  ;;  %9746 = vmatprep.subr.bf16.mxu1 %v15822_v20  ;;  %v15859_v18 = vld [vmem:[#allocation7 + $0xd18] ss:$52 sps:$4 sm:$0xff]   ;;  %v15864_v20 = vld [vmem:[#allocation7 + $0xd7c] ss:$52 sps:$4 sm:$0xff]  }
 0x313   :  { %10117 = vmatprep.subr.bf16.mxu0 %v15825_v25  ;;  %v15867_v25 = vld [vmem:[#allocation7 + $0xd84] ss:$52 sps:$4 sm:$0xff]  }
 0x315   :  { %9747 = vmatpush1.bf16.msra.mxu1 %v15820_v26  ;;  %v15862_v26 = vld [vmem:[#allocation7 + $0xd78] ss:$52 sps:$4 sm:$0xff]  }
 0x316   :  { %10118 = vmatpush1.bf16.msra.mxu0 %v15823_v29  ;;  %9748 = vmatprep.subr.bf16.mxu1 %v15828_v31  ;;  %v15865_v29 = vld [vmem:[#allocation7 + $0xd80] ss:$52 sps:$4 sm:$0xff]   ;;  %v15870_v31 = vld [vmem:[#allocation7 + $0xde4] ss:$52 sps:$4 sm:$0xff]  }
 0x317   :  { %10119 = vmatprep.subr.bf16.mxu0 %v15831_v56  ;;  %v15873_v56 = vld [vmem:[#allocation7 + $0xdec] ss:$52 sps:$4 sm:$0xff]  }
 0x319   :  { %9749 = vmatpush1.bf16.msra.mxu1 %v15826_v32  ;;  %v15868_v32 = vld [vmem:[#allocation7 + $0xde0] ss:$52 sps:$4 sm:$0xff]  }
 0x31a   :  { %10120 = vmatpush1.bf16.msra.mxu0 %v15829_v37  ;;  %9750 = vmatprep.subr.bf16.mxu1 %v15834_v38  ;;  %v15871_v37 = vld [vmem:[#allocation7 + $0xde8] ss:$52 sps:$4 sm:$0xff]   ;;  %v15876_v38 = vld [vmem:[#allocation7 + $0xe4c] ss:$52 sps:$4 sm:$0xff]  }
 0x31b   :  { %10121 = vmatprep.subr.bf16.mxu0 %v15837_v44  ;;  %v15879_v44 = vld [vmem:[#allocation7 + $0xe54] ss:$52 sps:$4 sm:$0xff]  }
 0x31d   :  { %9751 = vmatpush1.bf16.msra.mxu1 %v15832_v45  ;;  %v15874_v45 = vld [vmem:[#allocation7 + $0xe48] ss:$52 sps:$4 sm:$0xff]  }
 0x31e   :  { %10122 = vmatpush1.bf16.msra.mxu0 %v15835_v48  ;;  %9752 = vmatprep.subr.bf16.mxu1 %v15840_v58  ;;  %v15877_v48 = vld [vmem:[#allocation7 + $0xe50] ss:$52 sps:$4 sm:$0xff]   ;;  %v15882_v58 = vld [vmem:[#allocation7 + $0xeb4] ss:$52 sps:$4 sm:$0xff]  }
 0x31f   :  { %10123 = vmatprep.subr.bf16.mxu0 %v15843_v52  ;;  %v15885_v52 = vld [vmem:[#allocation7 + $0xebc] ss:$52 sps:$4 sm:$0xff]  }
 0x321   :  { %9753 = vmatpush1.bf16.msra.mxu1 %v15838_v4  ;;  %v15880_v4 = vld [vmem:[#allocation7 + $0xeb0] ss:$52 sps:$4 sm:$0xff]  }
 0x322   :  { %10124 = vmatpush1.bf16.msra.mxu0 %v15841_v54  ;;  %9754 = vmatprep.subr.bf16.mxu1 %v15846_v55  ;;  %v15883_v54 = vld [vmem:[#allocation7 + $0xeb8] ss:$52 sps:$4 sm:$0xff]   ;;  %v15888_v55 = vld [vmem:[#allocation7 + $0xf1c] ss:$52 sps:$4 sm:$0xff]  }
 0x323   :  { %10125 = vmatprep.subr.bf16.mxu0 %v15849_v57  ;;  %v15891_v57 = vld [vmem:[#allocation7 + $0xf24] ss:$52 sps:$4 sm:$0xff]  }
 0x325   :  { %9755 = vmatpush1.bf16.msra.mxu1 %v15844_v59  ;;  %v15886_v59 = vld [vmem:[#allocation7 + $0xf18] ss:$52 sps:$4 sm:$0xff]  }
 0x326   :  { %10126 = vmatpush1.bf16.msra.mxu0 %v15847_v61  ;;  %9756 = vmatprep.subr.bf16.mxu1 %v15852_v46  ;;  %v15889_v61 = vld [vmem:[#allocation7 + $0xf20] ss:$52 sps:$4 sm:$0xff]   ;;  %v15894_v46 = vld [vmem:[#allocation7 + $0xf84] ss:$52 sps:$4 sm:$0xff]  }
 0x327   :  { %10127 = vmatprep.subr.bf16.mxu0 %v15855_v50  ;;  %v15897_v50 = vld [vmem:[#allocation7 + $0xf8c] ss:$52 sps:$4 sm:$0xff]  }
 0x329   :  { %9757 = vmatpush1.bf16.msra.mxu1 %v15850_v6  ;;  %v15892_v6 = vld [vmem:[#allocation7 + $0xf80] ss:$52 sps:$4 sm:$0xff]  }
 0x32a   :  { %10128 = vmatpush1.bf16.msra.mxu0 %v15853_v12  ;;  %9779 = vmatprep.subr.bf16.mxu1 %v15858_v10  ;;  %v15895_v12 = vld [vmem:[#allocation7 + $0xf88] ss:$52 sps:$4 sm:$0xff]   ;;  %v15900_v10 = vld [vmem:[#allocation7 + $0xfec] ss:$52 sps:$4 sm:$0xff]  }
 0x32b   :  { %10150 = vmatprep.subr.bf16.mxu0 %v15861_v13  ;;  %v15903_v13 = vld [vmem:[#allocation7 + $0xff4] ss:$52 sps:$4 sm:$0xff]  }
 0x32c   :  { %9759 = vmatmul.mubr.bf16.vlgmr.msra.gmra.mrb[32].mxu1 %v17484_v24 }
 0x32d   :  { %10130 = vmatmul.mubr.bf16.vlgmr.msra.gmra.mrb[36].mxu0 %v17484_v24  ;;  %9768 = vmatprep.mubr.bf16.mxu1 %v17527_v16 }
 0x32e   :  { %9780 = vmatpush1.bf16.msra.mxu1 %v15856_v14  ;;  %10139 = vmatprep.mubr.bf16.mxu0 %v17527_v16  ;;  %v15898_v14 = vld [vmem:[#allocation7 + $0xfe8] ss:$52 sps:$4 sm:$0xff]  }
 0x32f   :  { %10151 = vmatpush1.bf16.msra.mxu0 %v15859_v18  ;;  %9781 = vmatprep.subr.bf16.mxu1 %v15864_v20  ;;  %v15901_v18 = vld [vmem:[#allocation7 + $0xff0] ss:$52 sps:$4 sm:$0xff]   ;;  %v15906_v20 = vld [vmem:[#allocation7 + $0x1054] ss:$52 sps:$4 sm:$0xff]  }
 0x330   :  { %10152 = vmatprep.subr.bf16.mxu0 %v15867_v25  ;;  %v15909_v25 = vld [vmem:[#allocation7 + $0x105c] ss:$52 sps:$4 sm:$0xff]  }
 0x332   :  { %9782 = vmatpush1.bf16.msra.mxu1 %v15862_v26  ;;  %v15904_v26 = vld [vmem:[#allocation7 + $0x1050] ss:$52 sps:$4 sm:$0xff]  }
 0x333   :  { %10153 = vmatpush1.bf16.msra.mxu0 %v15865_v29  ;;  %9783 = vmatprep.subr.bf16.mxu1 %v15870_v31  ;;  %v15907_v29 = vld [vmem:[#allocation7 + $0x1058] ss:$52 sps:$4 sm:$0xff]   ;;  %v15912_v31 = vld [vmem:[#allocation7 + $0x10bc] ss:$52 sps:$4 sm:$0xff]  }
 0x334   :  { %9769 = vmatmul.mubr.bf16.gmra.mrb[36].mxu1 %v17524_v9  ;;  %10154 = vmatprep.subr.bf16.mxu0 %v15873_v56  ;;  %v15915_v56 = vld [vmem:[#allocation7 + $0x10c4] ss:$52 sps:$4 sm:$0xff]  }
 0x335   :  { %10140 = vmatmul.mubr.bf16.gmra.mrb[40].mxu0 %v17524_v9  ;;  %9811 = vmatprep.mubr.bf16.mxu1 %v17535_v27 }
 0x336   :  { %9784 = vmatpush1.bf16.msra.mxu1 %v15868_v32  ;;  %10182 = vmatprep.mubr.bf16.mxu0 %v17535_v27  ;;  %v15910_v32 = vld [vmem:[#allocation7 + $0x10b8] ss:$52 sps:$4 sm:$0xff]  }
 0x337   :  { %10155 = vmatpush1.bf16.msra.mxu0 %v15871_v37  ;;  %9785 = vmatprep.subr.bf16.mxu1 %v15876_v38  ;;  %v15913_v37 = vld [vmem:[#allocation7 + $0x10c0] ss:$52 sps:$4 sm:$0xff]   ;;  %v15918_v38 = vld [vmem:[#allocation7 + $0x1124] ss:$52 sps:$4 sm:$0xff]  }
 0x338   :  { %10156 = vmatprep.subr.bf16.mxu0 %v15879_v44  ;;  %v15921_v44 = vld [vmem:[#allocation7 + $0x112c] ss:$52 sps:$4 sm:$0xff]  }
 0x33a   :  { %9786 = vmatpush1.bf16.msra.mxu1 %v15874_v45  ;;  %v15916_v45 = vld [vmem:[#allocation7 + $0x1120] ss:$52 sps:$4 sm:$0xff]  }
 0x33b   :  { %10157 = vmatpush1.bf16.msra.mxu0 %v15877_v48  ;;  %9787 = vmatprep.subr.bf16.mxu1 %v15882_v58  ;;  %v15919_v48 = vld [vmem:[#allocation7 + $0x1128] ss:$52 sps:$4 sm:$0xff]   ;;  %v15924_v58 = vld [vmem:[#allocation7 + $0x118c] ss:$52 sps:$4 sm:$0xff]  }
 0x33c   :  { %10158 = vmatprep.subr.bf16.mxu0 %v15885_v52  ;;  %v15927_v52 = vld [vmem:[#allocation7 + $0x1194] ss:$52 sps:$4 sm:$0xff]  }
 0x33e   :  { %9788 = vmatpush1.bf16.msra.mxu1 %v15880_v4  ;;  %v15922_v4 = vld [vmem:[#allocation7 + $0x1188] ss:$52 sps:$4 sm:$0xff]  }
 0x33f   :  { %10159 = vmatpush1.bf16.msra.mxu0 %v15883_v54  ;;  %9789 = vmatprep.subr.bf16.mxu1 %v15888_v55  ;;  %v15925_v54 = vld [vmem:[#allocation7 + $0x1190] ss:$52 sps:$4 sm:$0xff]   ;;  %v15930_v55 = vld [vmem:[#allocation7 + $0x11f4] ss:$52 sps:$4 sm:$0xff]  }
 0x340   :  { %10160 = vmatprep.subr.bf16.mxu0 %v15891_v57  ;;  %v15933_v57 = vld [vmem:[#allocation7 + $0x11fc] ss:$52 sps:$4 sm:$0xff]  }
 0x342   :  { %9790 = vmatpush1.bf16.msra.mxu1 %v15886_v59  ;;  %v15928_v59 = vld [vmem:[#allocation7 + $0x11f0] ss:$52 sps:$4 sm:$0xff]  }
 0x343   :  { %10161 = vmatpush1.bf16.msra.mxu0 %v15889_v61  ;;  %9791 = vmatprep.subr.bf16.mxu1 %v15894_v46  ;;  %v15931_v61 = vld [vmem:[#allocation7 + $0x11f8] ss:$52 sps:$4 sm:$0xff]   ;;  %v15936_v46 = vld [vmem:[#allocation7 + $0x125c] ss:$52 sps:$4 sm:$0xff]  }
 0x344   :  { %10162 = vmatprep.subr.bf16.mxu0 %v15897_v50  ;;  %v15939_v50 = vld [vmem:[#allocation7 + $0x1264] ss:$52 sps:$4 sm:$0xff]  }
 0x346   :  { %9792 = vmatpush1.bf16.msra.mxu1 %v15892_v6  ;;  %v15934_v6 = vld [vmem:[#allocation7 + $0x1258] ss:$52 sps:$4 sm:$0xff]  }
 0x347   :  { %10163 = vmatpush1.bf16.msra.mxu0 %v15895_v12  ;;  %9793 = vmatprep.subr.bf16.mxu1 %v15900_v10  ;;  %v15937_v12 = vld [vmem:[#allocation7 + $0x1260] ss:$52 sps:$4 sm:$0xff]   ;;  %v15942_v10 = vld [vmem:[#allocation7 + $0x12c4] ss:$52 sps:$4 sm:$0xff]  }
 0x348   :  { %10164 = vmatprep.subr.bf16.mxu0 %v15903_v13  ;;  %v15945_v13 = vld [vmem:[#allocation7 + $0x12cc] ss:$52 sps:$4 sm:$0xff]  }
 0x34a   :  { %9794 = vmatpush1.bf16.msra.mxu1 %v15898_v14  ;;  %v15940_v14 = vld [vmem:[#allocation7 + $0x12c0] ss:$52 sps:$4 sm:$0xff]  }
 0x34b   :  { %10165 = vmatpush1.bf16.msra.mxu0 %v15901_v18  ;;  %9795 = vmatprep.subr.bf16.mxu1 %v15906_v20  ;;  %v15943_v18 = vld [vmem:[#allocation7 + $0x12c8] ss:$52 sps:$4 sm:$0xff]   ;;  %v15948_v20 = vld [vmem:[#allocation7 + $0x132c] ss:$52 sps:$4 sm:$0xff]  }
 0x34c   :  { %10166 = vmatprep.subr.bf16.mxu0 %v15909_v25  ;;  %v15951_v25 = vld [vmem:[#allocation7 + $0x1334] ss:$52 sps:$4 sm:$0xff]  }
 0x34e   :  { %9796 = vmatpush1.bf16.msra.mxu1 %v15904_v26  ;;  %v15946_v26 = vld [vmem:[#allocation7 + $0x1328] ss:$52 sps:$4 sm:$0xff]  }
 0x34f   :  { %10167 = vmatpush1.bf16.msra.mxu0 %v15907_v29  ;;  %9797 = vmatprep.subr.bf16.mxu1 %v15912_v31  ;;  %v15949_v29 = vld [vmem:[#allocation7 + $0x1330] ss:$52 sps:$4 sm:$0xff]   ;;  %v15954_v31 = vld [vmem:[#allocation7 + $0x1394] ss:$52 sps:$4 sm:$0xff]  }
 0x350   :  { %10168 = vmatprep.subr.bf16.mxu0 %v15915_v56  ;;  %v15957_v56 = vld [vmem:[#allocation7 + $0x139c] ss:$52 sps:$4 sm:$0xff]  }
 0x352   :  { %9798 = vmatpush1.bf16.msra.mxu1 %v15910_v32  ;;  %v15952_v32 = vld [vmem:[#allocation7 + $0x1390] ss:$52 sps:$4 sm:$0xff]  }
 0x353   :  { %10169 = vmatpush1.bf16.msra.mxu0 %v15913_v37  ;;  %9799 = vmatprep.subr.bf16.mxu1 %v15918_v38  ;;  %v15955_v37 = vld [vmem:[#allocation7 + $0x1398] ss:$52 sps:$4 sm:$0xff]   ;;  %v15960_v38 = vld [vmem:[#allocation7 + $0x13fc] ss:$52 sps:$4 sm:$0xff]  }
 0x354   :  { %10170 = vmatprep.subr.bf16.mxu0 %v15921_v44  ;;  %v15963_v44 = vld [vmem:[#allocation7 + $0x1404] ss:$52 sps:$4 sm:$0xff]  }
 0x356   :  { %9800 = vmatpush1.bf16.msra.mxu1 %v15916_v45  ;;  %v15958_v45 = vld [vmem:[#allocation7 + $0x13f8] ss:$52 sps:$4 sm:$0xff]  }
 0x357   :  { %10171 = vmatpush1.bf16.msra.mxu0 %v15919_v48  ;;  %9801 = vmatprep.subr.bf16.mxu1 %v15924_v58  ;;  %v15961_v48 = vld [vmem:[#allocation7 + $0x1400] ss:$52 sps:$4 sm:$0xff]   ;;  %v15966_v58 = vld [vmem:[#allocation7 + $0x1464] ss:$52 sps:$4 sm:$0xff]  }
 0x358   :  { %10172 = vmatprep.subr.bf16.mxu0 %v15927_v52  ;;  %v15969_v52 = vld [vmem:[#allocation7 + $0x146c] ss:$52 sps:$4 sm:$0xff]  }
 0x35a   :  { %9802 = vmatpush1.bf16.msra.mxu1 %v15922_v4  ;;  %v15964_v4 = vld [vmem:[#allocation7 + $0x1460] ss:$52 sps:$4 sm:$0xff]  }
 0x35b   :  { %10173 = vmatpush1.bf16.msra.mxu0 %v15925_v54  ;;  %9803 = vmatprep.subr.bf16.mxu1 %v15930_v55  ;;  %v15967_v54 = vld [vmem:[#allocation7 + $0x1468] ss:$52 sps:$4 sm:$0xff]   ;;  %v15972_v55 = vld [vmem:[#allocation7 + $0x14cc] ss:$52 sps:$4 sm:$0xff]  }
 0x35c   :  { %10174 = vmatprep.subr.bf16.mxu0 %v15933_v57  ;;  %v15975_v57 = vld [vmem:[#allocation7 + $0x14d4] ss:$52 sps:$4 sm:$0xff]  }
 0x35e   :  { %9804 = vmatpush1.bf16.msra.mxu1 %v15928_v59  ;;  %v15970_v59 = vld [vmem:[#allocation7 + $0x14c8] ss:$52 sps:$4 sm:$0xff]  }
 0x35f   :  { %10175 = vmatpush1.bf16.msra.mxu0 %v15931_v61  ;;  %9805 = vmatprep.subr.bf16.mxu1 %v15936_v46  ;;  %v15973_v61 = vld [vmem:[#allocation7 + $0x14d0] ss:$52 sps:$4 sm:$0xff]   ;;  %v15978_v46 = vld [vmem:[#allocation7 + $0x1534] ss:$52 sps:$4 sm:$0xff]  }
 0x360   :  { %10176 = vmatprep.subr.bf16.mxu0 %v15939_v50  ;;  %v15981_v50 = vld [vmem:[#allocation7 + $0x153c] ss:$52 sps:$4 sm:$0xff]  }
 0x362   :  { %9806 = vmatpush1.bf16.msra.mxu1 %v15934_v6  ;;  %v2256_v6 = vld [vmem:[#allocation8] sm:$0xff] }
 0x363   :  { %10177 = vmatpush1.bf16.msra.mxu0 %v15937_v12  ;;  %9807 = vmatprep.subr.bf16.mxu1 %v15942_v10  ;;  %v15976_v12 = vld [vmem:[#allocation7 + $0x1530] ss:$52 sps:$4 sm:$0xff]   ;;  %v15979_v10 = vld [vmem:[#allocation7 + $0x1538] ss:$52 sps:$4 sm:$0xff]  }
 0x364   :  { %10178 = vmatprep.subr.bf16.mxu0 %v15945_v13  ;;  %v15984_v13 = vld [vmem:[#allocation7 + $0x159c] ss:$52 sps:$4 sm:$0xff]  }
 0x366   :  { %9808 = vmatpush1.bf16.msra.mxu1 %v15940_v14  ;;  %v17696_v14 = vrot.slane %v2256_v6, %v17445_v35 }
 0x367   :  { %10179 = vmatpush1.bf16.msra.mxu0 %v15943_v18  ;;  %9809 = vmatprep.subr.bf16.mxu1 %v15948_v20  ;;  %v15987_v18 = vld [vmem:[#allocation7 + $0x15a4] ss:$52 sps:$4 sm:$0xff]   ;;  %v17699_v20 = vrot.slane %v2256_v6, %v17455_v39 }
 0x368   :  { %10180 = vmatprep.subr.bf16.mxu0 %v15951_v25  ;;  %v17702_v25 = vrot.slane %v2256_v6, %v17448_v36 }
 0x36a   :  { %9810 = vmatpush1.bf16.msra.mxu1 %v15946_v26  ;;  %v17705_v26 = vrot.slane %v2256_v6, %v17458_v40  ;;  %v16605_v40 = vld [vmem:[#allocation7 + $0x16ec] ss:$52 sps:$4 sm:$0xff]  }
 0x36b   :  { %10181 = vmatpush1.bf16.msra.mxu0 %v15949_v29  ;;  %9832 = vmatprep.subr.bf16.mxu1 %v15954_v31  ;;  %v15982_v31 = vld [vmem:[#allocation7 + $0x1598] ss:$52 sps:$4 sm:$0xff]  }
 0x36c   :  { %10203 = vmatprep.subr.bf16.mxu0 %v15957_v56  ;;  %v15985_v56 = vld [vmem:[#allocation7 + $0x15a0] ss:$52 sps:$4 sm:$0xff]  }
 0x36d   :  { %9812 = vmatmul.mubr.bf16.vlgmr.msra.gmra.mrb[32].mxu1 %v17532_v22 }
 0x36e   :  { %10183 = vmatmul.mubr.bf16.vlgmr.msra.gmra.mrb[36].mxu0 %v17532_v22  ;;  %9821 = vmatprep.mubr.bf16.mxu1 %v17561_v23 }
 0x36f   :  { %9833 = vmatpush1.bf16.msra.mxu1 %v15952_v32  ;;  %10192 = vmatprep.mubr.bf16.mxu0 %v17561_v23 }
 0x370   :  { %10204 = vmatpush1.bf16.msra.mxu0 %v15955_v37  ;;  %9834 = vmatprep.subr.bf16.mxu1 %v15960_v38 }
 0x371   :  { %10205 = vmatprep.subr.bf16.mxu0 %v15963_v44  ;;  %v15990_v44 = vld [vmem:[#allocation7 + $0x1604] ss:$52 sps:$4 sm:$0xff]  }
 0x373   :  { %9835 = vmatpush1.bf16.msra.mxu1 %v15958_v45  ;;  %v15993_v45 = vld [vmem:[#allocation7 + $0x160c] ss:$52 sps:$4 sm:$0xff]  }
 0x374   :  { %10206 = vmatpush1.bf16.msra.mxu0 %v15961_v48  ;;  %9836 = vmatprep.subr.bf16.mxu1 %v15966_v58 }
 0x375   :  { %9822 = vmatmul.mubr.bf16.gmra.mrb[36].mxu1 %v17558_v34  ;;  %10207 = vmatprep.subr.bf16.mxu0 %v15969_v52 }
 0x376   :  { %10193 = vmatmul.mubr.bf16.gmra.mrb[40].mxu0 %v17558_v34  ;;  %9864 = vmatprep.mubr.bf16.mxu1 %v17547_v30 }
 0x377   :  { %9837 = vmatpush1.bf16.msra.mxu1 %v15964_v4  ;;  %10235 = vmatprep.mubr.bf16.mxu0 %v17547_v30 }
 0x378   :  { %10208 = vmatpush1.bf16.msra.mxu0 %v15967_v54  ;;  %9838 = vmatprep.subr.bf16.mxu1 %v15972_v55 }
 0x379   :  { %10209 = vmatprep.subr.bf16.mxu0 %v15975_v57 }
 0x37b   :  { %9839 = vmatpush1.bf16.msra.mxu1 %v15970_v59 }
 0x37c   :  { %10210 = vmatpush1.bf16.msra.mxu0 %v15973_v61  ;;  %9840 = vmatprep.subr.bf16.mxu1 %v15978_v46 }
 0x37d   :  { %10211 = vmatprep.subr.bf16.mxu0 %v15981_v50 }
 0x37e   :  { %v9283_v29 = vpop.f32.mrb[24].mxu1 }
 0x37f   :  { %9841 = vmatpush1.bf16.msra.mxu1 %v15976_v12  ;;  %v14673_v32 = vadd.f32 %v9283_v29, %v17696_v14  ;;  %v9654_v37 = vpop.f32.mrb[28].mxu0  ;;  %v9285_v38 = vpop.f32.mrb[25].mxu1  ;;  %v15988_v29 = vld [vmem:[#allocation7 + $0x1600] ss:$52 sps:$4 sm:$0xff]  }
 0x380   :  { %10212 = vmatpush1.bf16.msra.mxu0 %v15979_v10  ;;  %v14681_v48 = vadd.f32 %v9654_v37, %v17699_v20  ;;  %v14674_v58 = vadd.f32 %v9285_v38, %v17702_v25  ;;  %v9656_v52 = vpop.f32.mrb[29].mxu0  ;;  %9842 = vmatprep.subr.bf16.mxu1 %v15984_v13  ;;  %v9287_v4 = vpop.f32.mrb[26].mxu1  ;;  %v15991_v38 = vld [vmem:[#allocation7 + $0x1608] ss:$52 sps:$4 sm:$0xff]  }
 0x381   :  { %v11500_v54 = vmax.f32 %v14673_v32, 0.0  ;;  %v14682_v55 = vadd.f32 %v9656_v52, %v17705_v26  ;;  %10213 = vmatprep.subr.bf16.mxu0 %v15987_v18  ;;  %v14675_v57 = vadd.f32 %v9287_v4, %v17696_v14  ;;  %v9658_v59 = vpop.f32.mrb[30].mxu0  ;;  %v9289_v61 = vpop.f32.mrb[27].mxu1  ;;  %v15996_v18 = vld [vmem:[#allocation7 + $0x166c] ss:$52 sps:$4 sm:$0xff]  }
 0x382   :  { %v11502_v46 = vmax.f32 %v14681_v48, 0.0  ;;  %v11501_v50 = vmax.f32 %v14674_v58, 0.0  ;;  %v14683_v6 = vadd.f32 %v9658_v59, %v17699_v20  ;;  %v14676_v12 = vadd.f32 %v9289_v61, %v17702_v25  ;;  %v9660_v10 = vpop.f32.mrb[31].mxu0  ;;  %v15999_v58 = vld [vmem:[#allocation7 + $0x1674] ss:$52 sps:$4 sm:$0xff]  }
 0x383   :  { %11552 = vst [vmem:[#allocation14] sm:$0xff] %v11500_v54  ;;  %v11503_v37 = vmax.f32 %v14682_v55, 0.0  ;;  %v11513_v13 = vmax.f32 %v14675_v57, 0.0  ;;  %9843 = vmatpush1.bf16.msra.mxu1 %v15982_v31  ;;  %v14684_v32 = vadd.f32 %v9660_v10, %v17705_v26  ;;  %v15994_v61 = vld [vmem:[#allocation7 + $0x1668] ss:$52 sps:$4 sm:$0xff]  }
 0x384   :  { %11554 = vst [vmem:[#allocation14 + $0x10] sm:$0xff] %v11502_v46  ;;  %11553 = vst [vmem:[#allocation14 + $0x8] sm:$0xff] %v11501_v50  ;;  %v11515_v52 = vmax.f32 %v14683_v6, 0.0  ;;  %10214 = vmatpush1.bf16.msra.mxu0 %v15985_v56  ;;  %v11514_v48 = vmax.f32 %v14676_v12, 0.0  ;;  %9844 = vmatprep.subr.bf16.mxu1 %v15990_v44  ;;  %v15997_v10 = vld [vmem:[#allocation7 + $0x1670] ss:$52 sps:$4 sm:$0xff]  }
 0x385   :  { %11555 = vst [vmem:[#allocation14 + $0x18] sm:$0xff] %v11503_v37  ;;  %11565 = vst [vmem:[#allocation14 + $0x68] sm:$0xff] %v11513_v13  ;;  %v17715_v4 = vpack.c.bf16 %v11513_v13, %v11500_v54  ;;  %v11516_v59 = vmax.f32 %v14684_v32, 0.0  ;;  %10215 = vmatprep.subr.bf16.mxu0 %v15993_v45  ;;  %v16002_v12 = vld [vmem:[#allocation7 + $0x16d4] ss:$52 sps:$4 sm:$0xff]  }
 0x386   :  { %11567 = vst [vmem:[#allocation14 + $0x78] sm:$0xff] %v11515_v52  ;;  %v17717_v55 = vpack.c.bf16 %v11515_v52, %v11502_v46  ;;  %11566 = vst [vmem:[#allocation14 + $0x70] sm:$0xff] %v11514_v48  ;;  %v17719_v31 = vpack.c.bf16 %v11514_v48, %v11501_v50  ;;  %v9293_v57 = vpop.f32.mrb[28].mxu1  ;;  %v16005_v13 = vld [vmem:[#allocation7 + $0x16dc] ss:$52 sps:$4 sm:$0xff]  }
 0x387   :  { %11568 = vst [vmem:[#allocation14 + $0x80] sm:$0xff] %v11516_v59  ;;  %v17721_v56 = vpack.c.bf16 %v11516_v59, %v11503_v37  ;;  %9845 = vmatpush1.bf16.msra.mxu1 %v15988_v29  ;;  %v14677_v44 = vadd.f32 %v9293_v57, %v17696_v14  ;;  %v9664_v6 = vpop.f32.mrb[32].mxu0  ;;  %v9295_v54 = vpop.f32.mrb[29].mxu1 }
 0x388   :  { %10216 = vmatpush1.bf16.msra.mxu0 %v15991_v38  ;;  %v14685_v45 = vadd.f32 %v9664_v6, %v17699_v20  ;;  %v14678_v46 = vadd.f32 %v9295_v54, %v17702_v25  ;;  %v9666_v50 = vpop.f32.mrb[33].mxu0  ;;  %9846 = vmatprep.subr.bf16.mxu1 %v15996_v18  ;;  %v9297_v32 = vpop.f32.mrb[30].mxu1 }
 0x389   :  { %v11526_v52 = vmax.f32 %v14677_v44, 0.0  ;;  %v14686_v48 = vadd.f32 %v9666_v50, %v17705_v26  ;;  %10217 = vmatprep.subr.bf16.mxu0 %v15999_v58  ;;  %v14679_v29 = vadd.f32 %v9297_v32, %v17696_v14  ;;  %v9668_v37 = vpop.f32.mrb[34].mxu0  ;;  %v9299_v59 = vpop.f32.mrb[31].mxu1  ;;  %v16003_v50 = vld [vmem:[#allocation7 + $0x16d8] ss:$52 sps:$4 sm:$0xff]  }
 0x38a   :  { %v11528_v57 = vmax.f32 %v14685_v45, 0.0  ;;  %v11527_v47 = vmax.f32 %v14678_v46, 0.0  ;;  %v14687_v15 = vadd.f32 %v9668_v37, %v17699_v20  ;;  %v14680_v38 = vadd.f32 %v9299_v59, %v17702_v25  ;;  %v9670_v6 = vpop.f32.mrb[35].mxu0  ;;  %v16008_v58 = vld [vmem:[#allocation7 + $0x173c] ss:$52 sps:$4 sm:$0xff]  }
 0x38b   :  { %11578 = vst [vmem:[#allocation14 + $0xd0] sm:$0xff] %v11526_v52  ;;  %v11529_v54 = vmax.f32 %v14686_v48, 0.0  ;;  %v11539_v18 = vmax.f32 %v14679_v29, 0.0  ;;  %9847 = vmatpush1.bf16.msra.mxu1 %v15994_v61  ;;  %v14688_v44 = vadd.f32 %v9670_v6, %v17705_v26  ;;  %v16011_v46 = vld [vmem:[#allocation7 + $0x1744] ss:$52 sps:$4 sm:$0xff]  }
 0x38c   :  { %11580 = vst [vmem:[#allocation14 + $0xe0] sm:$0xff] %v11528_v57  ;;  %11579 = vst [vmem:[#allocation14 + $0xd8] sm:$0xff] %v11527_v47  ;;  %v11541_v14 = vmax.f32 %v14687_v15, 0.0  ;;  %10218 = vmatpush1.bf16.msra.mxu0 %v15997_v10  ;;  %v11540_v45 = vmax.f32 %v14680_v38, 0.0  ;;  %9848 = vmatprep.subr.bf16.mxu1 %v16002_v12  ;;  %v16006_v61 = vld [vmem:[#allocation7 + $0x1738] ss:$52 sps:$4 sm:$0xff]  }
 0x38d   :  { %11581 = vst [vmem:[#allocation14 + $0xe8] sm:$0xff] %v11529_v54  ;;  %11591 = vst [vmem:[#allocation14 + $0x138] sm:$0xff] %v11539_v18  ;;  %v17731_v20 = vpack.c.bf16 %v11539_v18, %v11526_v52  ;;  %v11542_v25 = vmax.f32 %v14688_v44, 0.0  ;;  %10219 = vmatprep.subr.bf16.mxu0 %v16005_v13  ;;  %v16009_v48 = vld [vmem:[#allocation7 + $0x1740] ss:$52 sps:$4 sm:$0xff]  }
 0x38e   :  { %11593 = vst [vmem:[#allocation14 + $0x148] sm:$0xff] %v11541_v14  ;;  %v17733_v32 = vpack.c.bf16 %v11541_v14, %v11528_v57  ;;  %11592 = vst [vmem:[#allocation14 + $0x140] sm:$0xff] %v11540_v45  ;;  %v17735_v26 = vpack.c.bf16 %v11540_v45, %v11527_v47  ;;  %v16014_v29 = vld [vmem:[#allocation7 + $0x17a4] ss:$52 sps:$4 sm:$0xff]   ;;  %v16017_v10 = vld [vmem:[#allocation7 + $0x17ac] ss:$52 sps:$4 sm:$0xff]  }
 0x38f   :  { %11594 = vst [vmem:[#allocation14 + $0x150] sm:$0xff] %v11542_v25  ;;  %v17737_v15 = vpack.c.bf16 %v11542_v25, %v11529_v54  ;;  %9849 = vmatpush1.bf16.msra.mxu1 %v16000_v42  ;;  %v16012_v12 = vld [vmem:[#allocation7 + $0x17a0] ss:$52 sps:$4 sm:$0xff]   ;;  %v16015_v52 = vld [vmem:[#allocation7 + $0x17a8] ss:$52 sps:$4 sm:$0xff]  }
 0x390   :  { %10220 = vmatpush1.bf16.msra.mxu0 %v16003_v50  ;;  %9850 = vmatprep.subr.bf16.mxu1 %v16008_v58  ;;  %v16020_v13 = vld [vmem:[#allocation7 + $0x180c] ss:$52 sps:$4 sm:$0xff]   ;;  %v16023_v37 = vld [vmem:[#allocation7 + $0x1814] ss:$52 sps:$4 sm:$0xff]   ;;  %v16021_v59 = vld [vmem:[#allocation7 + $0x1810] ss:$52 sps:$4 sm:$0xff]  }
 0x391   :  { %10221 = vmatprep.subr.bf16.mxu0 %v16011_v46  ;;  %v16018_v47 = vld [vmem:[#allocation7 + $0x1808] ss:$52 sps:$4 sm:$0xff]   ;;  %v16024_v42 = vld [vmem:[#allocation7 + $0x1870] ss:$52 sps:$4 sm:$0xff]   ;;  %v16027_v6 = vld [vmem:[#allocation7 + $0x1878] ss:$52 sps:$4 sm:$0xff]  }
 0x392   :  { %v16026_v57 = vld [vmem:[#allocation7 + $0x1874] ss:$52 sps:$4 sm:$0xff]   ;;  %v16029_v38 = vld [vmem:[#allocation7 + $0x187c] ss:$52 sps:$4 sm:$0xff]   ;;  %v16035_v18 = vld [vmem:[#allocation7 + $0x18e4] ss:$52 sps:$4 sm:$0xff]  }
 0x393   :  { %9851 = vmatpush1.bf16.msra.mxu1 %v16006_v61  ;;  %v16032_v54 = vld [vmem:[#allocation7 + $0x18dc] ss:$52 sps:$4 sm:$0xff]   ;;  %v16030_v44 = vld [vmem:[#allocation7 + $0x18d8] ss:$52 sps:$4 sm:$0xff]   ;;  %v16033_v50 = vld [vmem:[#allocation7 + $0x18e0] ss:$52 sps:$4 sm:$0xff]  }
 0x394   :  { %10222 = vmatpush1.bf16.msra.mxu0 %v16009_v48  ;;  %9852 = vmatprep.subr.bf16.mxu1 %v16014_v29  ;;  %v16038_v58 = vld [vmem:[#allocation7 + $0x1944] ss:$52 sps:$4 sm:$0xff]   ;;  %v16041_v14 = vld [vmem:[#allocation7 + $0x194c] ss:$52 sps:$4 sm:$0xff]   ;;  %v16039_v46 = vld [vmem:[#allocation7 + $0x1948] ss:$52 sps:$4 sm:$0xff]  }
 0x395   :  { %10223 = vmatprep.subr.bf16.mxu0 %v16017_v10  ;;  %v16036_v45 = vld [vmem:[#allocation7 + $0x1940] ss:$52 sps:$4 sm:$0xff]   ;;  %v16042_v48 = vld [vmem:[#allocation7 + $0x19a8] ss:$52 sps:$4 sm:$0xff]   ;;  %v16045_v29 = vld [vmem:[#allocation7 + $0x19b0] ss:$52 sps:$4 sm:$0xff]  }
 0x396   :  { %v16044_v25 = vld [vmem:[#allocation7 + $0x19ac] ss:$52 sps:$4 sm:$0xff]   ;;  %v16047_v61 = vld [vmem:[#allocation7 + $0x19b4] ss:$52 sps:$4 sm:$0xff]  }
 0x397   :  { %9853 = vmatpush1.bf16.msra.mxu1 %v16012_v12  ;;  %v16050_v10 = vld [vmem:[#allocation7 + $0x1a14] ss:$52 sps:$4 sm:$0xff]   ;;  %v16053_v12 = vld [vmem:[#allocation7 + $0x1a1c] ss:$52 sps:$4 sm:$0xff]  }
 0x398   :  { %10224 = vmatpush1.bf16.msra.mxu0 %v16015_v52  ;;  %9854 = vmatprep.subr.bf16.mxu1 %v16020_v13  ;;  %v16048_v52 = vld [vmem:[#allocation7 + $0x1a10] ss:$52 sps:$4 sm:$0xff]   ;;  %v16051_v13 = vld [vmem:[#allocation7 + $0x1a18] ss:$52 sps:$4 sm:$0xff]  }
 0x399   :  { %10225 = vmatprep.subr.bf16.mxu0 %v16023_v37  ;;  %v16056_v37 = vld [vmem:[#allocation7 + $0x1a7c] ss:$52 sps:$4 sm:$0xff]  }
 0x39b   :  { %9855 = vmatpush1.bf16.msra.mxu1 %v16018_v47  ;;  %v16059_v47 = vld [vmem:[#allocation7 + $0x1a84] ss:$52 sps:$4 sm:$0xff]  }
 0x39c   :  { %10226 = vmatpush1.bf16.msra.mxu0 %v16021_v59  ;;  %9856 = vmatprep.subr.bf16.mxu1 %v16026_v57  ;;  %v16054_v59 = vld [vmem:[#allocation7 + $0x1a78] ss:$52 sps:$4 sm:$0xff]   ;;  %v16057_v57 = vld [vmem:[#allocation7 + $0x1a80] ss:$52 sps:$4 sm:$0xff]  }
 0x39d   :  { %10227 = vmatprep.subr.bf16.mxu0 %v16029_v38  ;;  %v16062_v38 = vld [vmem:[#allocation7 + $0x1ae4] ss:$52 sps:$4 sm:$0xff]  }
 0x39f   :  { %9857 = vmatpush1.bf16.msra.mxu1 %v16024_v42  ;;  %v16065_v42 = vld [vmem:[#allocation7 + $0x1aec] ss:$52 sps:$4 sm:$0xff]  }
 0x3a0   :  { %10228 = vmatpush1.bf16.msra.mxu0 %v16027_v6  ;;  %9858 = vmatprep.subr.bf16.mxu1 %v16032_v54  ;;  %v16060_v6 = vld [vmem:[#allocation7 + $0x1ae0] ss:$52 sps:$4 sm:$0xff]   ;;  %v16063_v54 = vld [vmem:[#allocation7 + $0x1ae8] ss:$52 sps:$4 sm:$0xff]  }
 0x3a1   :  { %10229 = vmatprep.subr.bf16.mxu0 %v16035_v18  ;;  %v16068_v18 = vld [vmem:[#allocation7 + $0x1b4c] ss:$52 sps:$4 sm:$0xff]  }
 0x3a3   :  { %9859 = vmatpush1.bf16.msra.mxu1 %v16030_v44  ;;  %v16071_v44 = vld [vmem:[#allocation7 + $0x1b54] ss:$52 sps:$4 sm:$0xff]  }
 0x3a4   :  { %10230 = vmatpush1.bf16.msra.mxu0 %v16033_v50  ;;  %9860 = vmatprep.subr.bf16.mxu1 %v16038_v58  ;;  %v16066_v50 = vld [vmem:[#allocation7 + $0x1b48] ss:$52 sps:$4 sm:$0xff]   ;;  %v16069_v58 = vld [vmem:[#allocation7 + $0x1b50] ss:$52 sps:$4 sm:$0xff]  }
 0x3a5   :  { %10231 = vmatprep.subr.bf16.mxu0 %v16041_v14  ;;  %v16074_v14 = vld [vmem:[#allocation7 + $0x1bb4] ss:$52 sps:$4 sm:$0xff]  }
 0x3a7   :  { %9861 = vmatpush1.bf16.msra.mxu1 %v16036_v45  ;;  %v16077_v45 = vld [vmem:[#allocation7 + $0x1bbc] ss:$52 sps:$4 sm:$0xff]  }
 0x3a8   :  { %10232 = vmatpush1.bf16.msra.mxu0 %v16039_v46  ;;  %9862 = vmatprep.subr.bf16.mxu1 %v16044_v25  ;;  %v16072_v46 = vld [vmem:[#allocation7 + $0x1bb0] ss:$52 sps:$4 sm:$0xff]   ;;  %v16075_v25 = vld [vmem:[#allocation7 + $0x1bb8] ss:$52 sps:$4 sm:$0xff]  }
 0x3a9   :  { %10233 = vmatprep.subr.bf16.mxu0 %v16047_v61  ;;  %v16080_v61 = vld [vmem:[#allocation7 + $0x1c1c] ss:$52 sps:$4 sm:$0xff]  }
 0x3ab   :  { %9863 = vmatpush1.bf16.msra.mxu1 %v16042_v48  ;;  %v16083_v48 = vld [vmem:[#allocation7 + $0x1c24] ss:$52 sps:$4 sm:$0xff]  }
 0x3ac   :  { %10234 = vmatpush1.bf16.msra.mxu0 %v16045_v29  ;;  %9885 = vmatprep.subr.bf16.mxu1 %v16050_v10  ;;  %v16078_v29 = vld [vmem:[#allocation7 + $0x1c18] ss:$52 sps:$4 sm:$0xff]   ;;  %v16081_v10 = vld [vmem:[#allocation7 + $0x1c20] ss:$52 sps:$4 sm:$0xff]  }
 0x3ad   :  { %10256 = vmatprep.subr.bf16.mxu0 %v16053_v12  ;;  %v16086_v12 = vld [vmem:[#allocation7 + $0x1c84] ss:$52 sps:$4 sm:$0xff]  }
 0x3ae   :  { %9865 = vmatmul.mubr.bf16.vlgmr.msra.gmra.mrb[32].mxu1 %v17545_v3 }
 0x3af   :  { %10236 = vmatmul.mubr.bf16.vlgmr.msra.gmra.mrb[36].mxu0 %v17545_v3  ;;  %9874 = vmatprep.mubr.bf16.mxu1 %v17579_v5 }
 0x3b0   :  { %9886 = vmatpush1.bf16.msra.mxu1 %v16048_v52  ;;  %10245 = vmatprep.mubr.bf16.mxu0 %v17579_v5  ;;  %v16089_v52 = vld [vmem:[#allocation7 + $0x1c8c] ss:$52 sps:$4 sm:$0xff]  }
 0x3b1   :  { %10257 = vmatpush1.bf16.msra.mxu0 %v16051_v13  ;;  %9887 = vmatprep.subr.bf16.mxu1 %v16056_v37  ;;  %v16084_v13 = vld [vmem:[#allocation7 + $0x1c80] ss:$52 sps:$4 sm:$0xff]   ;;  %v16087_v37 = vld [vmem:[#allocation7 + $0x1c88] ss:$52 sps:$4 sm:$0xff]  }
 0x3b2   :  { %10258 = vmatprep.subr.bf16.mxu0 %v16059_v47  ;;  %v16092_v47 = vld [vmem:[#allocation7 + $0x1cec] ss:$52 sps:$4 sm:$0xff]  }
 0x3b4   :  { %9888 = vmatpush1.bf16.msra.mxu1 %v16054_v59  ;;  %v16095_v59 = vld [vmem:[#allocation7 + $0x1cf4] ss:$52 sps:$4 sm:$0xff]  }
 0x3b5   :  { %10259 = vmatpush1.bf16.msra.mxu0 %v16057_v57  ;;  %9889 = vmatprep.subr.bf16.mxu1 %v16062_v38  ;;  %v16090_v57 = vld [vmem:[#allocation7 + $0x1ce8] ss:$52 sps:$4 sm:$0xff]   ;;  %v16093_v38 = vld [vmem:[#allocation7 + $0x1cf0] ss:$52 sps:$4 sm:$0xff]  }
 0x3b6   :  { %9875 = vmatmul.mubr.bf16.gmra.mrb[36].mxu1 %v17577_v63  ;;  %10260 = vmatprep.subr.bf16.mxu0 %v16065_v42  ;;  %v16098_v42 = vld [vmem:[#allocation7 + $0x1d54] ss:$52 sps:$4 sm:$0xff]  }
 0x3b7   :  { %10246 = vmatmul.mubr.bf16.gmra.mrb[40].mxu0 %v17577_v63  ;;  %9917 = vmatprep.mubr.bf16.mxu1 %v17585_v21 }
 0x3b8   :  { %9890 = vmatpush1.bf16.msra.mxu1 %v16060_v6  ;;  %10288 = vmatprep.mubr.bf16.mxu0 %v17585_v21  ;;  %v16101_v6 = vld [vmem:[#allocation7 + $0x1d5c] ss:$52 sps:$4 sm:$0xff]  }
 0x3b9   :  { %10261 = vmatpush1.bf16.msra.mxu0 %v16063_v54  ;;  %9891 = vmatprep.subr.bf16.mxu1 %v16068_v18  ;;  %v16096_v54 = vld [vmem:[#allocation7 + $0x1d50] ss:$52 sps:$4 sm:$0xff]   ;;  %v16099_v18 = vld [vmem:[#allocation7 + $0x1d58] ss:$52 sps:$4 sm:$0xff]  }
 0x3ba   :  { %10262 = vmatprep.subr.bf16.mxu0 %v16071_v44  ;;  %v16104_v44 = vld [vmem:[#allocation7 + $0x1dbc] ss:$52 sps:$4 sm:$0xff]  }
 0x3bc   :  { %9892 = vmatpush1.bf16.msra.mxu1 %v16066_v50  ;;  %v16107_v50 = vld [vmem:[#allocation7 + $0x1dc4] ss:$52 sps:$4 sm:$0xff]  }
 0x3bd   :  { %10263 = vmatpush1.bf16.msra.mxu0 %v16069_v58  ;;  %9893 = vmatprep.subr.bf16.mxu1 %v16074_v14  ;;  %v16102_v58 = vld [vmem:[#allocation7 + $0x1db8] ss:$52 sps:$4 sm:$0xff]   ;;  %v16105_v14 = vld [vmem:[#allocation7 + $0x1dc0] ss:$52 sps:$4 sm:$0xff]  }
 0x3be   :  { %10264 = vmatprep.subr.bf16.mxu0 %v16077_v45  ;;  %v16110_v45 = vld [vmem:[#allocation7 + $0x1e24] ss:$52 sps:$4 sm:$0xff]  }
 0x3c0   :  { %9894 = vmatpush1.bf16.msra.mxu1 %v16072_v46  ;;  %v16113_v46 = vld [vmem:[#allocation7 + $0x1e2c] ss:$52 sps:$4 sm:$0xff]  }
 0x3c1   :  { %10265 = vmatpush1.bf16.msra.mxu0 %v16075_v25  ;;  %9895 = vmatprep.subr.bf16.mxu1 %v16080_v61  ;;  %v16108_v25 = vld [vmem:[#allocation7 + $0x1e20] ss:$52 sps:$4 sm:$0xff]   ;;  %v16111_v61 = vld [vmem:[#allocation7 + $0x1e28] ss:$52 sps:$4 sm:$0xff]  }
 0x3c2   :  { %10266 = vmatprep.subr.bf16.mxu0 %v16083_v48  ;;  %v16116_v48 = vld [vmem:[#allocation7 + $0x1e8c] ss:$52 sps:$4 sm:$0xff]  }
 0x3c4   :  { %9896 = vmatpush1.bf16.msra.mxu1 %v16078_v29  ;;  %v16119_v29 = vld [vmem:[#allocation7 + $0x1e94] ss:$52 sps:$4 sm:$0xff]  }
 0x3c5   :  { %10267 = vmatpush1.bf16.msra.mxu0 %v16081_v10  ;;  %9897 = vmatprep.subr.bf16.mxu1 %v16086_v12  ;;  %v16114_v10 = vld [vmem:[#allocation7 + $0x1e88] ss:$52 sps:$4 sm:$0xff]   ;;  %v16117_v12 = vld [vmem:[#allocation7 + $0x1e90] ss:$52 sps:$4 sm:$0xff]  }
 0x3c6   :  { %10268 = vmatprep.subr.bf16.mxu0 %v16089_v52  ;;  %v16122_v52 = vld [vmem:[#allocation7 + $0x1ef4] ss:$52 sps:$4 sm:$0xff]  }
 0x3c8   :  { %9898 = vmatpush1.bf16.msra.mxu1 %v16084_v13  ;;  %v16125_v13 = vld [vmem:[#allocation7 + $0x1efc] ss:$52 sps:$4 sm:$0xff]  }
 0x3c9   :  { %10269 = vmatpush1.bf16.msra.mxu0 %v16087_v37  ;;  %9899 = vmatprep.subr.bf16.mxu1 %v16092_v47  ;;  %v16120_v37 = vld [vmem:[#allocation7 + $0x1ef0] ss:$52 sps:$4 sm:$0xff]   ;;  %v16123_v47 = vld [vmem:[#allocation7 + $0x1ef8] ss:$52 sps:$4 sm:$0xff]  }
 0x3ca   :  { %10270 = vmatprep.subr.bf16.mxu0 %v16095_v59  ;;  %v16128_v59 = vld [vmem:[#allocation7 + $0x1f5c] ss:$52 sps:$4 sm:$0xff]  }
 0x3cc   :  { %9900 = vmatpush1.bf16.msra.mxu1 %v16090_v57  ;;  %v16131_v57 = vld [vmem:[#allocation7 + $0x1f64] ss:$52 sps:$4 sm:$0xff]  }
 0x3cd   :  { %10271 = vmatpush1.bf16.msra.mxu0 %v16093_v38  ;;  %9901 = vmatprep.subr.bf16.mxu1 %v16098_v42  ;;  %v16126_v38 = vld [vmem:[#allocation7 + $0x1f58] ss:$52 sps:$4 sm:$0xff]   ;;  %v16129_v42 = vld [vmem:[#allocation7 + $0x1f60] ss:$52 sps:$4 sm:$0xff]  }
 0x3ce   :  { %10272 = vmatprep.subr.bf16.mxu0 %v16101_v6  ;;  %v16134_v6 = vld [vmem:[#allocation7 + $0x1fc4] ss:$52 sps:$4 sm:$0xff]  }
 0x3d0   :  { %9902 = vmatpush1.bf16.msra.mxu1 %v16096_v54  ;;  %v16137_v54 = vld [vmem:[#allocation7 + $0x1fcc] ss:$52 sps:$4 sm:$0xff]  }
 0x3d1   :  { %10273 = vmatpush1.bf16.msra.mxu0 %v16099_v18  ;;  %9903 = vmatprep.subr.bf16.mxu1 %v16104_v44  ;;  %v16132_v18 = vld [vmem:[#allocation7 + $0x1fc0] ss:$52 sps:$4 sm:$0xff]   ;;  %v16135_v44 = vld [vmem:[#allocation7 + $0x1fc8] ss:$52 sps:$4 sm:$0xff]  }
 0x3d2   :  { %10274 = vmatprep.subr.bf16.mxu0 %v16107_v50  ;;  %v16140_v50 = vld [vmem:[#allocation7 + $0x202c] ss:$52 sps:$4 sm:$0xff]  }
 0x3d4   :  { %9904 = vmatpush1.bf16.msra.mxu1 %v16102_v58  ;;  %v16143_v58 = vld [vmem:[#allocation7 + $0x2034] ss:$52 sps:$4 sm:$0xff]  }
 0x3d5   :  { %10275 = vmatpush1.bf16.msra.mxu0 %v16105_v14  ;;  %9905 = vmatprep.subr.bf16.mxu1 %v16110_v45  ;;  %v16138_v14 = vld [vmem:[#allocation7 + $0x2028] ss:$52 sps:$4 sm:$0xff]   ;;  %v16141_v45 = vld [vmem:[#allocation7 + $0x2030] ss:$52 sps:$4 sm:$0xff]  }
 0x3d6   :  { %10276 = vmatprep.subr.bf16.mxu0 %v16113_v46  ;;  %v16146_v46 = vld [vmem:[#allocation7 + $0x2094] ss:$52 sps:$4 sm:$0xff]  }
 0x3d8   :  { %9906 = vmatpush1.bf16.msra.mxu1 %v16108_v25  ;;  %v16149_v25 = vld [vmem:[#allocation7 + $0x209c] ss:$52 sps:$4 sm:$0xff]  }
 0x3d9   :  { %10277 = vmatpush1.bf16.msra.mxu0 %v16111_v61  ;;  %9907 = vmatprep.subr.bf16.mxu1 %v16116_v48  ;;  %v16144_v61 = vld [vmem:[#allocation7 + $0x2090] ss:$52 sps:$4 sm:$0xff]   ;;  %v16147_v48 = vld [vmem:[#allocation7 + $0x2098] ss:$52 sps:$4 sm:$0xff]  }
 0x3da   :  { %10278 = vmatprep.subr.bf16.mxu0 %v16119_v29  ;;  %v16152_v29 = vld [vmem:[#allocation7 + $0x20fc] ss:$52 sps:$4 sm:$0xff]  }
 0x3dc   :  { %9908 = vmatpush1.bf16.msra.mxu1 %v16114_v10  ;;  %v16155_v10 = vld [vmem:[#allocation7 + $0x2104] ss:$52 sps:$4 sm:$0xff]  }
 0x3dd   :  { %10279 = vmatpush1.bf16.msra.mxu0 %v16117_v12  ;;  %9909 = vmatprep.subr.bf16.mxu1 %v16122_v52  ;;  %v16150_v12 = vld [vmem:[#allocation7 + $0x20f8] ss:$52 sps:$4 sm:$0xff]   ;;  %v16153_v52 = vld [vmem:[#allocation7 + $0x2100] ss:$52 sps:$4 sm:$0xff]  }
 0x3de   :  { %10280 = vmatprep.subr.bf16.mxu0 %v16125_v13  ;;  %v16158_v13 = vld [vmem:[#allocation7 + $0x2164] ss:$52 sps:$4 sm:$0xff]  }
 0x3e0   :  { %9910 = vmatpush1.bf16.msra.mxu1 %v16120_v37  ;;  %v16161_v37 = vld [vmem:[#allocation7 + $0x216c] ss:$52 sps:$4 sm:$0xff]  }
 0x3e1   :  { %10281 = vmatpush1.bf16.msra.mxu0 %v16123_v47  ;;  %9911 = vmatprep.subr.bf16.mxu1 %v16128_v59  ;;  %v16156_v47 = vld [vmem:[#allocation7 + $0x2160] ss:$52 sps:$4 sm:$0xff]   ;;  %v16159_v59 = vld [vmem:[#allocation7 + $0x2168] ss:$52 sps:$4 sm:$0xff]  }
 0x3e2   :  { %10282 = vmatprep.subr.bf16.mxu0 %v16131_v57  ;;  %v16164_v57 = vld [vmem:[#allocation7 + $0x21cc] ss:$52 sps:$4 sm:$0xff]  }
 0x3e4   :  { %9912 = vmatpush1.bf16.msra.mxu1 %v16126_v38  ;;  %v16167_v38 = vld [vmem:[#allocation7 + $0x21d4] ss:$52 sps:$4 sm:$0xff]  }
 0x3e5   :  { %10283 = vmatpush1.bf16.msra.mxu0 %v16129_v42  ;;  %9913 = vmatprep.subr.bf16.mxu1 %v16134_v6  ;;  %v16162_v42 = vld [vmem:[#allocation7 + $0x21c8] ss:$52 sps:$4 sm:$0xff]   ;;  %v16165_v6 = vld [vmem:[#allocation7 + $0x21d0] ss:$52 sps:$4 sm:$0xff]  }
 0x3e6   :  { %10284 = vmatprep.subr.bf16.mxu0 %v16137_v54  ;;  %v16170_v54 = vld [vmem:[#allocation7 + $0x2234] ss:$52 sps:$4 sm:$0xff]  }
 0x3e8   :  { %9914 = vmatpush1.bf16.msra.mxu1 %v16132_v18  ;;  %v16173_v18 = vld [vmem:[#allocation7 + $0x223c] ss:$52 sps:$4 sm:$0xff]  }
 0x3e9   :  { %10285 = vmatpush1.bf16.msra.mxu0 %v16135_v44  ;;  %9915 = vmatprep.subr.bf16.mxu1 %v16140_v50  ;;  %v16168_v44 = vld [vmem:[#allocation7 + $0x2230] ss:$52 sps:$4 sm:$0xff]   ;;  %v16171_v50 = vld [vmem:[#allocation7 + $0x2238] ss:$52 sps:$4 sm:$0xff]  }
 0x3ea   :  { %10286 = vmatprep.subr.bf16.mxu0 %v16143_v58  ;;  %v16176_v58 = vld [vmem:[#allocation7 + $0x229c] ss:$52 sps:$4 sm:$0xff]  }
 0x3ec   :  { %9916 = vmatpush1.bf16.msra.mxu1 %v16138_v14  ;;  %v16179_v14 = vld [vmem:[#allocation7 + $0x22a4] ss:$52 sps:$4 sm:$0xff]  }
 0x3ed   :  { %10287 = vmatpush1.bf16.msra.mxu0 %v16141_v45  ;;  %9938 = vmatprep.subr.bf16.mxu1 %v16146_v46  ;;  %v16174_v45 = vld [vmem:[#allocation7 + $0x2298] ss:$52 sps:$4 sm:$0xff]   ;;  %v16177_v46 = vld [vmem:[#allocation7 + $0x22a0] ss:$52 sps:$4 sm:$0xff]  }
 0x3ee   :  { %10309 = vmatprep.subr.bf16.mxu0 %v16149_v25  ;;  %v16182_v25 = vld [vmem:[#allocation7 + $0x2304] ss:$52 sps:$4 sm:$0xff]  }
 0x3ef   :  { %9918 = vmatmul.mubr.bf16.vlgmr.msra.gmra.mrb[32].mxu1 %v17582_v17 }
 0x3f0   :  { %10289 = vmatmul.mubr.bf16.vlgmr.msra.gmra.mrb[36].mxu0 %v17582_v17  ;;  %9927 = vmatprep.mubr.bf16.mxu1 %v17601_v19 }
 0x3f1   :  { %9939 = vmatpush1.bf16.msra.mxu1 %v16144_v61  ;;  %10298 = vmatprep.mubr.bf16.mxu0 %v17601_v19  ;;  %v16185_v61 = vld [vmem:[#allocation7 + $0x230c] ss:$52 sps:$4 sm:$0xff]  }
 0x3f2   :  { %10310 = vmatpush1.bf16.msra.mxu0 %v16147_v48  ;;  %9940 = vmatprep.subr.bf16.mxu1 %v16152_v29  ;;  %v16180_v48 = vld [vmem:[#allocation7 + $0x2300] ss:$52 sps:$4 sm:$0xff]   ;;  %v16183_v29 = vld [vmem:[#allocation7 + $0x2308] ss:$52 sps:$4 sm:$0xff]  }
 0x3f3   :  { %10311 = vmatprep.subr.bf16.mxu0 %v16155_v10  ;;  %v16188_v10 = vld [vmem:[#allocation7 + $0x236c] ss:$52 sps:$4 sm:$0xff]  }
 0x3f5   :  { %9941 = vmatpush1.bf16.msra.mxu1 %v16150_v12  ;;  %v16191_v12 = vld [vmem:[#allocation7 + $0x2374] ss:$52 sps:$4 sm:$0xff]  }
 0x3f6   :  { %10312 = vmatpush1.bf16.msra.mxu0 %v16153_v52  ;;  %9942 = vmatprep.subr.bf16.mxu1 %v16158_v13  ;;  %v16186_v52 = vld [vmem:[#allocation7 + $0x2368] ss:$52 sps:$4 sm:$0xff]   ;;  %v16189_v13 = vld [vmem:[#allocation7 + $0x2370] ss:$52 sps:$4 sm:$0xff]  }
 0x3f7   :  { %9928 = vmatmul.mubr.bf16.gmra.mrb[36].mxu1 %v17599_v41  ;;  %10313 = vmatprep.subr.bf16.mxu0 %v16161_v37  ;;  %v16194_v37 = vld [vmem:[#allocation7 + $0x23d4] ss:$52 sps:$4 sm:$0xff]  }
 0x3f8   :  { %10299 = vmatmul.mubr.bf16.gmra.mrb[40].mxu0 %v17599_v41  ;;  %9970 = vmatprep.mubr.bf16.mxu1 %v17595_v7 }
 0x3f9   :  { %9943 = vmatpush1.bf16.msra.mxu1 %v16156_v47  ;;  %10341 = vmatprep.mubr.bf16.mxu0 %v17595_v7  ;;  %v16197_v47 = vld [vmem:[#allocation7 + $0x23dc] ss:$52 sps:$4 sm:$0xff]  }
 0x3fa   :  { %10314 = vmatpush1.bf16.msra.mxu0 %v16159_v59  ;;  %9944 = vmatprep.subr.bf16.mxu1 %v16164_v57  ;;  %v16192_v59 = vld [vmem:[#allocation7 + $0x23d0] ss:$52 sps:$4 sm:$0xff]   ;;  %v16195_v57 = vld [vmem:[#allocation7 + $0x23d8] ss:$52 sps:$4 sm:$0xff]  }
 0x3fb   :  { %10315 = vmatprep.subr.bf16.mxu0 %v16167_v38  ;;  %v16200_v38 = vld [vmem:[#allocation7 + $0x243c] ss:$52 sps:$4 sm:$0xff]  }
 0x3fd   :  { %9945 = vmatpush1.bf16.msra.mxu1 %v16162_v42  ;;  %v16203_v42 = vld [vmem:[#allocation7 + $0x2444] ss:$52 sps:$4 sm:$0xff]  }
 0x3fe   :  { %10316 = vmatpush1.bf16.msra.mxu0 %v16165_v6  ;;  %9946 = vmatprep.subr.bf16.mxu1 %v16170_v54  ;;  %v16198_v6 = vld [vmem:[#allocation7 + $0x2438] ss:$52 sps:$4 sm:$0xff]   ;;  %v16201_v54 = vld [vmem:[#allocation7 + $0x2440] ss:$52 sps:$4 sm:$0xff]  }
 0x3ff   :  { %10317 = vmatprep.subr.bf16.mxu0 %v16173_v18  ;;  %v16206_v18 = vld [vmem:[#allocation7 + $0x24a4] ss:$52 sps:$4 sm:$0xff]  }
 0x401   :  { %9947 = vmatpush1.bf16.msra.mxu1 %v16168_v44  ;;  %v16209_v44 = vld [vmem:[#allocation7 + $0x24ac] ss:$52 sps:$4 sm:$0xff]  }
 0x402   :  { %10318 = vmatpush1.bf16.msra.mxu0 %v16171_v50  ;;  %9948 = vmatprep.subr.bf16.mxu1 %v16176_v58  ;;  %v16204_v50 = vld [vmem:[#allocation7 + $0x24a0] ss:$52 sps:$4 sm:$0xff]   ;;  %v16207_v58 = vld [vmem:[#allocation7 + $0x24a8] ss:$52 sps:$4 sm:$0xff]  }
 0x403   :  { %10319 = vmatprep.subr.bf16.mxu0 %v16179_v14  ;;  %v16212_v14 = vld [vmem:[#allocation7 + $0x250c] ss:$52 sps:$4 sm:$0xff]  }
 0x405   :  { %9949 = vmatpush1.bf16.msra.mxu1 %v16174_v45  ;;  %v16215_v45 = vld [vmem:[#allocation7 + $0x2514] ss:$52 sps:$4 sm:$0xff]  }
 0x406   :  { %10320 = vmatpush1.bf16.msra.mxu0 %v16177_v46  ;;  %9950 = vmatprep.subr.bf16.mxu1 %v16182_v25  ;;  %v16210_v46 = vld [vmem:[#allocation7 + $0x2508] ss:$52 sps:$4 sm:$0xff]   ;;  %v16213_v25 = vld [vmem:[#allocation7 + $0x2510] ss:$52 sps:$4 sm:$0xff]  }
 0x407   :  { %10321 = vmatprep.subr.bf16.mxu0 %v16185_v61  ;;  %v16218_v61 = vld [vmem:[#allocation7 + $0x2574] ss:$52 sps:$4 sm:$0xff]  }
 0x409   :  { %9951 = vmatpush1.bf16.msra.mxu1 %v16180_v48  ;;  %v16221_v48 = vld [vmem:[#allocation7 + $0x257c] ss:$52 sps:$4 sm:$0xff]  }
 0x40a   :  { %10322 = vmatpush1.bf16.msra.mxu0 %v16183_v29  ;;  %9952 = vmatprep.subr.bf16.mxu1 %v16188_v10  ;;  %v16216_v29 = vld [vmem:[#allocation7 + $0x2570] ss:$52 sps:$4 sm:$0xff]   ;;  %v16219_v10 = vld [vmem:[#allocation7 + $0x2578] ss:$52 sps:$4 sm:$0xff]  }
 0x40b   :  { %10323 = vmatprep.subr.bf16.mxu0 %v16191_v12  ;;  %v16224_v12 = vld [vmem:[#allocation7 + $0x25dc] ss:$52 sps:$4 sm:$0xff]  }
 0x40d   :  { %9953 = vmatpush1.bf16.msra.mxu1 %v16186_v52  ;;  %v16227_v52 = vld [vmem:[#allocation7 + $0x25e4] ss:$52 sps:$4 sm:$0xff]  }
 0x40e   :  { %10324 = vmatpush1.bf16.msra.mxu0 %v16189_v13  ;;  %9954 = vmatprep.subr.bf16.mxu1 %v16194_v37  ;;  %v16222_v13 = vld [vmem:[#allocation7 + $0x25d8] ss:$52 sps:$4 sm:$0xff]   ;;  %v16225_v37 = vld [vmem:[#allocation7 + $0x25e0] ss:$52 sps:$4 sm:$0xff]  }
 0x40f   :  { %10325 = vmatprep.subr.bf16.mxu0 %v16197_v47  ;;  %v16230_v47 = vld [vmem:[#allocation7 + $0x2644] ss:$52 sps:$4 sm:$0xff]  }
 0x411   :  { %9955 = vmatpush1.bf16.msra.mxu1 %v16192_v59  ;;  %v16233_v59 = vld [vmem:[#allocation7 + $0x264c] ss:$52 sps:$4 sm:$0xff]  }
 0x412   :  { %10326 = vmatpush1.bf16.msra.mxu0 %v16195_v57  ;;  %9956 = vmatprep.subr.bf16.mxu1 %v16200_v38  ;;  %v16228_v57 = vld [vmem:[#allocation7 + $0x2640] ss:$52 sps:$4 sm:$0xff]   ;;  %v16231_v38 = vld [vmem:[#allocation7 + $0x2648] ss:$52 sps:$4 sm:$0xff]  }
 0x413   :  { %10327 = vmatprep.subr.bf16.mxu0 %v16203_v42  ;;  %v16236_v42 = vld [vmem:[#allocation7 + $0x26ac] ss:$52 sps:$4 sm:$0xff]  }
 0x415   :  { %9957 = vmatpush1.bf16.msra.mxu1 %v16198_v6  ;;  %v16239_v6 = vld [vmem:[#allocation7 + $0x26b4] ss:$52 sps:$4 sm:$0xff]  }
 0x416   :  { %10328 = vmatpush1.bf16.msra.mxu0 %v16201_v54  ;;  %9958 = vmatprep.subr.bf16.mxu1 %v16206_v18  ;;  %v16234_v54 = vld [vmem:[#allocation7 + $0x26a8] ss:$52 sps:$4 sm:$0xff]   ;;  %v16237_v18 = vld [vmem:[#allocation7 + $0x26b0] ss:$52 sps:$4 sm:$0xff]  }
 0x417   :  { %10329 = vmatprep.subr.bf16.mxu0 %v16209_v44  ;;  %v16242_v44 = vld [vmem:[#allocation7 + $0x2714] ss:$52 sps:$4 sm:$0xff]  }
 0x419   :  { %9959 = vmatpush1.bf16.msra.mxu1 %v16204_v50  ;;  %v16245_v50 = vld [vmem:[#allocation7 + $0x271c] ss:$52 sps:$4 sm:$0xff]  }
 0x41a   :  { %10330 = vmatpush1.bf16.msra.mxu0 %v16207_v58  ;;  %9960 = vmatprep.subr.bf16.mxu1 %v16212_v14  ;;  %v16240_v58 = vld [vmem:[#allocation7 + $0x2710] ss:$52 sps:$4 sm:$0xff]   ;;  %v16243_v14 = vld [vmem:[#allocation7 + $0x2718] ss:$52 sps:$4 sm:$0xff]  }
 0x41b   :  { %10331 = vmatprep.subr.bf16.mxu0 %v16215_v45  ;;  %v16248_v45 = vld [vmem:[#allocation7 + $0x277c] ss:$52 sps:$4 sm:$0xff]  }
 0x41d   :  { %9961 = vmatpush1.bf16.msra.mxu1 %v16210_v46  ;;  %v16251_v46 = vld [vmem:[#allocation7 + $0x2784] ss:$52 sps:$4 sm:$0xff]  }
 0x41e   :  { %10332 = vmatpush1.bf16.msra.mxu0 %v16213_v25  ;;  %9962 = vmatprep.subr.bf16.mxu1 %v16218_v61  ;;  %v16246_v25 = vld [vmem:[#allocation7 + $0x2778] ss:$52 sps:$4 sm:$0xff]   ;;  %v16249_v61 = vld [vmem:[#allocation7 + $0x2780] ss:$52 sps:$4 sm:$0xff]  }
 0x41f   :  { %10333 = vmatprep.subr.bf16.mxu0 %v16221_v48  ;;  %v16254_v48 = vld [vmem:[#allocation7 + $0x27e4] ss:$52 sps:$4 sm:$0xff]  }
 0x421   :  { %9963 = vmatpush1.bf16.msra.mxu1 %v16216_v29  ;;  %v16257_v29 = vld [vmem:[#allocation7 + $0x27ec] ss:$52 sps:$4 sm:$0xff]  }
 0x422   :  { %10334 = vmatpush1.bf16.msra.mxu0 %v16219_v10  ;;  %9964 = vmatprep.subr.bf16.mxu1 %v16224_v12  ;;  %v16252_v10 = vld [vmem:[#allocation7 + $0x27e0] ss:$52 sps:$4 sm:$0xff]   ;;  %v16255_v12 = vld [vmem:[#allocation7 + $0x27e8] ss:$52 sps:$4 sm:$0xff]  }
 0x423   :  { %10335 = vmatprep.subr.bf16.mxu0 %v16227_v52  ;;  %v16260_v52 = vld [vmem:[#allocation7 + $0x284c] ss:$52 sps:$4 sm:$0xff]  }
 0x425   :  { %9965 = vmatpush1.bf16.msra.mxu1 %v16222_v13  ;;  %v16263_v13 = vld [vmem:[#allocation7 + $0x2854] ss:$52 sps:$4 sm:$0xff]  }
 0x426   :  { %10336 = vmatpush1.bf16.msra.mxu0 %v16225_v37  ;;  %9966 = vmatprep.subr.bf16.mxu1 %v16230_v47  ;;  %v16258_v37 = vld [vmem:[#allocation7 + $0x2848] ss:$52 sps:$4 sm:$0xff]   ;;  %v16261_v47 = vld [vmem:[#allocation7 + $0x2850] ss:$52 sps:$4 sm:$0xff]  }
 0x427   :  { %10337 = vmatprep.subr.bf16.mxu0 %v16233_v59  ;;  %v16266_v59 = vld [vmem:[#allocation7 + $0x24] ss:$52 sps:$4 sm:$0xff]  }
 0x429   :  { %9967 = vmatpush1.bf16.msra.mxu1 %v16228_v57  ;;  %v16269_v57 = vld [vmem:[#allocation7 + $0x2c] ss:$52 sps:$4 sm:$0xff]  }
 0x42a   :  { %10338 = vmatpush1.bf16.msra.mxu0 %v16231_v38  ;;  %9968 = vmatprep.subr.bf16.mxu1 %v16236_v42  ;;  %v16264_v38 = vld [vmem:[#allocation7 + $0x20] ss:$52 sps:$4 sm:$0xff]   ;;  %v16267_v42 = vld [vmem:[#allocation7 + $0x28] ss:$52 sps:$4 sm:$0xff]  }
 0x42b   :  { %10339 = vmatprep.subr.bf16.mxu0 %v16239_v6  ;;  %v16272_v6 = vld [vmem:[#allocation7 + $0x8c] ss:$52 sps:$4 sm:$0xff]  }
 0x42d   :  { %9969 = vmatpush1.bf16.msra.mxu1 %v16234_v54  ;;  %v16275_v54 = vld [vmem:[#allocation7 + $0x94] ss:$52 sps:$4 sm:$0xff]  }
 0x42e   :  { %10340 = vmatpush1.bf16.msra.mxu0 %v16237_v18  ;;  %9991 = vmatprep.subr.bf16.mxu1 %v16242_v44  ;;  %v16270_v18 = vld [vmem:[#allocation7 + $0x88] ss:$52 sps:$4 sm:$0xff]   ;;  %v16273_v44 = vld [vmem:[#allocation7 + $0x90] ss:$52 sps:$4 sm:$0xff]  }
 0x42f   :  { %10362 = vmatprep.subr.bf16.mxu0 %v16245_v50  ;;  %v16278_v50 = vld [vmem:[#allocation7 + $0xf4] ss:$52 sps:$4 sm:$0xff]  }
 0x430   :  { %9971 = vmatmul.mubr.bf16.vlgmr.msra.gmra.mrb[32].mxu1 %v17593_v2 }
 0x431   :  { %10342 = vmatmul.mubr.bf16.vlgmr.msra.gmra.mrb[36].mxu0 %v17593_v2  ;;  %9980 = vmatprep.mubr.bf16.mxu1 %v17625_v53 }
 0x432   :  { %9992 = vmatpush1.bf16.msra.mxu1 %v16240_v58  ;;  %10351 = vmatprep.mubr.bf16.mxu0 %v17625_v53  ;;  %v16281_v58 = vld [vmem:[#allocation7 + $0xfc] ss:$52 sps:$4 sm:$0xff]  }
 0x433   :  { %10363 = vmatpush1.bf16.msra.mxu0 %v16243_v14  ;;  %9993 = vmatprep.subr.bf16.mxu1 %v16248_v45  ;;  %v16276_v14 = vld [vmem:[#allocation7 + $0xf0] ss:$52 sps:$4 sm:$0xff]   ;;  %v16279_v45 = vld [vmem:[#allocation7 + $0xf8] ss:$52 sps:$4 sm:$0xff]  }
 0x434   :  { %10364 = vmatprep.subr.bf16.mxu0 %v16251_v46  ;;  %v16284_v46 = vld [vmem:[#allocation7 + $0x15c] ss:$52 sps:$4 sm:$0xff]  }
 0x436   :  { %9994 = vmatpush1.bf16.msra.mxu1 %v16246_v25  ;;  %v16287_v25 = vld [vmem:[#allocation7 + $0x164] ss:$52 sps:$4 sm:$0xff]  }
 0x437   :  { %10365 = vmatpush1.bf16.msra.mxu0 %v16249_v61  ;;  %9995 = vmatprep.subr.bf16.mxu1 %v16254_v48  ;;  %v16282_v61 = vld [vmem:[#allocation7 + $0x158] ss:$52 sps:$4 sm:$0xff]   ;;  %v16285_v48 = vld [vmem:[#allocation7 + $0x160] ss:$52 sps:$4 sm:$0xff]  }
 0x438   :  { %9981 = vmatmul.mubr.bf16.gmra.mrb[36].mxu1 %v17623_v51  ;;  %10366 = vmatprep.subr.bf16.mxu0 %v16257_v29  ;;  %v16290_v29 = vld [vmem:[#allocation7 + $0x1c4] ss:$52 sps:$4 sm:$0xff]  }
 0x439   :  { %10352 = vmatmul.mubr.bf16.gmra.mrb[40].mxu0 %v17623_v51  ;;  %10023 = vmatprep.mubr.bf16.mxu1 %v18011_v0 }
 0x43a   :  { %9996 = vmatpush1.bf16.msra.mxu1 %v16252_v10  ;;  %10394 = vmatprep.mubr.bf16.mxu0 %v18011_v0  ;;  %v16293_v10 = vld [vmem:[#allocation7 + $0x1cc] ss:$52 sps:$4 sm:$0xff]  }
 0x43b   :  { %10367 = vmatpush1.bf16.msra.mxu0 %v16255_v12  ;;  %9997 = vmatprep.subr.bf16.mxu1 %v16260_v52  ;;  %v16288_v12 = vld [vmem:[#allocation7 + $0x1c0] ss:$52 sps:$4 sm:$0xff]   ;;  %v16291_v52 = vld [vmem:[#allocation7 + $0x1c8] ss:$52 sps:$4 sm:$0xff]  }
 0x43c   :  { %10368 = vmatprep.subr.bf16.mxu0 %v16263_v13  ;;  %v16296_v13 = vld [vmem:[#allocation7 + $0x22c] ss:$52 sps:$4 sm:$0xff]  }
 0x43e   :  { %9998 = vmatpush1.bf16.msra.mxu1 %v16258_v37  ;;  %v16299_v37 = vld [vmem:[#allocation7 + $0x234] ss:$52 sps:$4 sm:$0xff]  }
 0x43f   :  { %10369 = vmatpush1.bf16.msra.mxu0 %v16261_v47  ;;  %10415 = vmatprep.subr.bf16.mxu1 %v16266_v59  ;;  %v16294_v47 = vld [vmem:[#allocation7 + $0x228] ss:$52 sps:$4 sm:$0xff]   ;;  %v16297_v59 = vld [vmem:[#allocation7 + $0x230] ss:$52 sps:$4 sm:$0xff]  }
 0x440   :  { %10786 = vmatprep.subr.bf16.mxu0 %v16269_v57  ;;  %v16302_v57 = vld [vmem:[#allocation7 + $0x294] ss:$52 sps:$4 sm:$0xff]  }
 0x441   :  { %14176 = vmatmul.mubr.msk.bf16.vlgmr.msra.gmra.mrb[32].mxu1 %vm789_vm1, %v17609_v62 }
 0x442   :  { %14178 = vmatmul.mubr.msk.bf16.vlgmr.msra.gmra.mrb[36].mxu0 %vm789_vm1, %v17609_v62  ;;  %10416 = vmatpush1.bf16.msra.mxu1 %v16264_v38  ;;  %v16305_v38 = vld [vmem:[#allocation7 + $0x29c] ss:$52 sps:$4 sm:$0xff]  }
 0x443   :  { %10787 = vmatpush1.bf16.msra.mxu0 %v16267_v42  ;;  %10417 = vmatprep.subr.bf16.mxu1 %v16272_v6  ;;  %v16300_v42 = vld [vmem:[#allocation7 + $0x290] ss:$52 sps:$4 sm:$0xff]   ;;  %v16303_v6 = vld [vmem:[#allocation7 + $0x298] ss:$52 sps:$4 sm:$0xff]  }
 0x444   :  { %10788 = vmatprep.subr.bf16.mxu0 %v16275_v54  ;;  %10033 = vmatprep.mubr.bf16.mxu1 %v18011_v0  ;;  %v16308_v54 = vld [vmem:[#allocation7 + $0x2fc] ss:$52 sps:$4 sm:$0xff]  }
 0x445   :  { %10404 = vmatprep.mubr.bf16.mxu0 %v18011_v0 }
 0x446   :  { %10418 = vmatpush1.bf16.msra.mxu1 %v16270_v18  ;;  %v16311_v18 = vld [vmem:[#allocation7 + $0x304] ss:$52 sps:$4 sm:$0xff]  }
 0x447   :  { %10789 = vmatpush1.bf16.msra.mxu0 %v16273_v44  ;;  %10419 = vmatprep.subr.bf16.mxu1 %v16278_v50  ;;  %v16306_v44 = vld [vmem:[#allocation7 + $0x2f8] ss:$52 sps:$4 sm:$0xff]   ;;  %v16309_v50 = vld [vmem:[#allocation7 + $0x300] ss:$52 sps:$4 sm:$0xff]  }
 0x448   :  { %10790 = vmatprep.subr.bf16.mxu0 %v16281_v58  ;;  %v16314_v58 = vld [vmem:[#allocation7 + $0x364] ss:$52 sps:$4 sm:$0xff]  }
 0x449   :  { %14177 = vmatmul.mubr.msk.bf16.gmra.mrb[36].mxu1 %vm789_vm1, %v17606_v8 }
 0x44a   :  { %14179 = vmatmul.mubr.msk.bf16.gmra.mrb[40].mxu0 %vm789_vm1, %v17606_v8  ;;  %10420 = vmatpush1.bf16.msra.mxu1 %v16276_v14  ;;  %v16317_v14 = vld [vmem:[#allocation7 + $0x36c] ss:$52 sps:$4 sm:$0xff]  }
 0x44b   :  { %10447 = vmatprep.mubr.bf16.mxu1 %v17472_v1  ;;  %10791 = vmatpush1.bf16.msra.mxu0 %v16279_v45  ;;  %v16312_v45 = vld [vmem:[#allocation7 + $0x360] ss:$52 sps:$4 sm:$0xff]  }
 0x44c   :  { %10818 = vmatprep.mubr.bf16.mxu0 %v17472_v1  ;;  %10421 = vmatprep.subr.bf16.mxu1 %v16284_v46  ;;  %v16315_v46 = vld [vmem:[#allocation7 + $0x368] ss:$52 sps:$4 sm:$0xff]  }
 0x44d   :  { %10792 = vmatprep.subr.bf16.mxu0 %v16287_v25  ;;  %v16320_v25 = vld [vmem:[#allocation7 + $0x3cc] ss:$52 sps:$4 sm:$0xff]  }
 0x44e   :  { %10422 = vmatpush1.bf16.msra.mxu1 %v16282_v61  ;;  %v16323_v61 = vld [vmem:[#allocation7 + $0x3d4] ss:$52 sps:$4 sm:$0xff]  }
 0x44f   :  { %10793 = vmatpush1.bf16.msra.mxu0 %v16285_v48  ;;  %10423 = vmatprep.subr.bf16.mxu1 %v16290_v29  ;;  %v16318_v48 = vld [vmem:[#allocation7 + $0x3c8] ss:$52 sps:$4 sm:$0xff]   ;;  %v16321_v29 = vld [vmem:[#allocation7 + $0x3d0] ss:$52 sps:$4 sm:$0xff]  }
 0x450   :  { %10794 = vmatprep.subr.bf16.mxu0 %v16293_v10  ;;  %v16326_v10 = vld [vmem:[#allocation7 + $0x434] ss:$52 sps:$4 sm:$0xff]  }
 0x452   :  { %10424 = vmatpush1.bf16.msra.mxu1 %v16288_v12  ;;  %v16329_v12 = vld [vmem:[#allocation7 + $0x43c] ss:$52 sps:$4 sm:$0xff]  }
 0x453   :  { %10795 = vmatpush1.bf16.msra.mxu0 %v16291_v52  ;;  %10425 = vmatprep.subr.bf16.mxu1 %v16296_v13  ;;  %v16324_v52 = vld [vmem:[#allocation7 + $0x430] ss:$52 sps:$4 sm:$0xff]   ;;  %v16327_v13 = vld [vmem:[#allocation7 + $0x438] ss:$52 sps:$4 sm:$0xff]  }
 0x454   :  { %10796 = vmatprep.subr.bf16.mxu0 %v16299_v37  ;;  %v16332_v37 = vld [vmem:[#allocation7 + $0x49c] ss:$52 sps:$4 sm:$0xff]  }
 0x456   :  { %10426 = vmatpush1.bf16.msra.mxu1 %v16294_v47  ;;  %v16335_v47 = vld [vmem:[#allocation7 + $0x4a4] ss:$52 sps:$4 sm:$0xff]  }
 0x457   :  { %10797 = vmatpush1.bf16.msra.mxu0 %v16297_v59  ;;  %10427 = vmatprep.subr.bf16.mxu1 %v16302_v57  ;;  %v16330_v59 = vld [vmem:[#allocation7 + $0x498] ss:$52 sps:$4 sm:$0xff]   ;;  %v16333_v57 = vld [vmem:[#allocation7 + $0x4a0] ss:$52 sps:$4 sm:$0xff]  }
 0x458   :  { %10798 = vmatprep.subr.bf16.mxu0 %v16305_v38  ;;  %v16338_v38 = vld [vmem:[#allocation7 + $0x504] ss:$52 sps:$4 sm:$0xff]  }
 0x45a   :  { %10428 = vmatpush1.bf16.msra.mxu1 %v16300_v42  ;;  %v16341_v42 = vld [vmem:[#allocation7 + $0x50c] ss:$52 sps:$4 sm:$0xff]  }
 0x45b   :  { %10799 = vmatpush1.bf16.msra.mxu0 %v16303_v6  ;;  %10429 = vmatprep.subr.bf16.mxu1 %v16308_v54  ;;  %v16336_v6 = vld [vmem:[#allocation7 + $0x500] ss:$52 sps:$4 sm:$0xff]   ;;  %v16339_v54 = vld [vmem:[#allocation7 + $0x508] ss:$52 sps:$4 sm:$0xff]  }
 0x45c   :  { %10800 = vmatprep.subr.bf16.mxu0 %v16311_v18  ;;  %v16344_v18 = vld [vmem:[#allocation7 + $0x56c] ss:$52 sps:$4 sm:$0xff]  }
 0x45e   :  { %10430 = vmatpush1.bf16.msra.mxu1 %v16306_v44  ;;  %v16347_v44 = vld [vmem:[#allocation7 + $0x574] ss:$52 sps:$4 sm:$0xff]  }
 0x45f   :  { %10801 = vmatpush1.bf16.msra.mxu0 %v16309_v50  ;;  %10431 = vmatprep.subr.bf16.mxu1 %v16314_v58  ;;  %v16342_v50 = vld [vmem:[#allocation7 + $0x568] ss:$52 sps:$4 sm:$0xff]   ;;  %v16345_v58 = vld [vmem:[#allocation7 + $0x570] ss:$52 sps:$4 sm:$0xff]  }
 0x460   :  { %10802 = vmatprep.subr.bf16.mxu0 %v16317_v14  ;;  %v16350_v14 = vld [vmem:[#allocation7 + $0x5d4] ss:$52 sps:$4 sm:$0xff]  }
 0x462   :  { %10432 = vmatpush1.bf16.msra.mxu1 %v16312_v45  ;;  %v16353_v45 = vld [vmem:[#allocation7 + $0x5dc] ss:$52 sps:$4 sm:$0xff]  }
 0x463   :  { %10803 = vmatpush1.bf16.msra.mxu0 %v16315_v46  ;;  %10433 = vmatprep.subr.bf16.mxu1 %v16320_v25  ;;  %v16348_v46 = vld [vmem:[#allocation7 + $0x5d0] ss:$52 sps:$4 sm:$0xff]   ;;  %v16351_v25 = vld [vmem:[#allocation7 + $0x5d8] ss:$52 sps:$4 sm:$0xff]  }
 0x464   :  { %10804 = vmatprep.subr.bf16.mxu0 %v16323_v61  ;;  %v16356_v61 = vld [vmem:[#allocation7 + $0x63c] ss:$52 sps:$4 sm:$0xff]  }
 0x466   :  { %10434 = vmatpush1.bf16.msra.mxu1 %v16318_v48  ;;  %v16359_v48 = vld [vmem:[#allocation7 + $0x644] ss:$52 sps:$4 sm:$0xff]  }
 0x467   :  { %10805 = vmatpush1.bf16.msra.mxu0 %v16321_v29  ;;  %10435 = vmatprep.subr.bf16.mxu1 %v16326_v10  ;;  %v16354_v29 = vld [vmem:[#allocation7 + $0x638] ss:$52 sps:$4 sm:$0xff]   ;;  %v16357_v10 = vld [vmem:[#allocation7 + $0x640] ss:$52 sps:$4 sm:$0xff]  }
 0x468   :  { %10806 = vmatprep.subr.bf16.mxu0 %v16329_v12  ;;  %v16362_v12 = vld [vmem:[#allocation7 + $0x6a4] ss:$52 sps:$4 sm:$0xff]  }
 0x46a   :  { %10436 = vmatpush1.bf16.msra.mxu1 %v16324_v52  ;;  %v16365_v52 = vld [vmem:[#allocation7 + $0x6ac] ss:$52 sps:$4 sm:$0xff]  }
 0x46b   :  { %10807 = vmatpush1.bf16.msra.mxu0 %v16327_v13  ;;  %10437 = vmatprep.subr.bf16.mxu1 %v16332_v37  ;;  %v16360_v13 = vld [vmem:[#allocation7 + $0x6a0] ss:$52 sps:$4 sm:$0xff]   ;;  %v16363_v37 = vld [vmem:[#allocation7 + $0x6a8] ss:$52 sps:$4 sm:$0xff]  }
 0x46c   :  { %10808 = vmatprep.subr.bf16.mxu0 %v16335_v47  ;;  %v16368_v47 = vld [vmem:[#allocation7 + $0x70c] ss:$52 sps:$4 sm:$0xff]  }
 0x46e   :  { %10438 = vmatpush1.bf16.msra.mxu1 %v16330_v59  ;;  %v16371_v59 = vld [vmem:[#allocation7 + $0x714] ss:$52 sps:$4 sm:$0xff]  }
 0x46f   :  { %10809 = vmatpush1.bf16.msra.mxu0 %v16333_v57  ;;  %10439 = vmatprep.subr.bf16.mxu1 %v16338_v38  ;;  %v16366_v57 = vld [vmem:[#allocation7 + $0x708] ss:$52 sps:$4 sm:$0xff]   ;;  %v16369_v38 = vld [vmem:[#allocation7 + $0x710] ss:$52 sps:$4 sm:$0xff]  }
 0x470   :  { %10810 = vmatprep.subr.bf16.mxu0 %v16341_v42  ;;  %v16374_v42 = vld [vmem:[#allocation7 + $0x774] ss:$52 sps:$4 sm:$0xff]  }
 0x472   :  { %10440 = vmatpush1.bf16.msra.mxu1 %v16336_v6  ;;  %v16377_v6 = vld [vmem:[#allocation7 + $0x77c] ss:$52 sps:$4 sm:$0xff]  }
 0x473   :  { %10811 = vmatpush1.bf16.msra.mxu0 %v16339_v54  ;;  %10441 = vmatprep.subr.bf16.mxu1 %v16344_v18  ;;  %v16372_v54 = vld [vmem:[#allocation7 + $0x770] ss:$52 sps:$4 sm:$0xff]   ;;  %v16375_v18 = vld [vmem:[#allocation7 + $0x778] ss:$52 sps:$4 sm:$0xff]  }
 0x474   :  { %10812 = vmatprep.subr.bf16.mxu0 %v16347_v44  ;;  %v16380_v44 = vld [vmem:[#allocation7 + $0x7dc] ss:$52 sps:$4 sm:$0xff]  }
 0x476   :  { %10442 = vmatpush1.bf16.msra.mxu1 %v16342_v50  ;;  %v16383_v50 = vld [vmem:[#allocation7 + $0x7e4] ss:$52 sps:$4 sm:$0xff]  }
 0x477   :  { %10813 = vmatpush1.bf16.msra.mxu0 %v16345_v58  ;;  %10443 = vmatprep.subr.bf16.mxu1 %v16350_v14  ;;  %v16378_v58 = vld [vmem:[#allocation7 + $0x7d8] ss:$52 sps:$4 sm:$0xff]   ;;  %v16381_v14 = vld [vmem:[#allocation7 + $0x7e0] ss:$52 sps:$4 sm:$0xff]  }
 0x478   :  { %10814 = vmatprep.subr.bf16.mxu0 %v16353_v45  ;;  %v16386_v45 = vld [vmem:[#allocation7 + $0x844] ss:$52 sps:$4 sm:$0xff]  }
 0x47a   :  { %10444 = vmatpush1.bf16.msra.mxu1 %v16348_v46  ;;  %v16389_v46 = vld [vmem:[#allocation7 + $0x84c] ss:$52 sps:$4 sm:$0xff]  }
 0x47b   :  { %10815 = vmatpush1.bf16.msra.mxu0 %v16351_v25  ;;  %10445 = vmatprep.subr.bf16.mxu1 %v16356_v61  ;;  %v16384_v25 = vld [vmem:[#allocation7 + $0x840] ss:$52 sps:$4 sm:$0xff]   ;;  %v16387_v61 = vld [vmem:[#allocation7 + $0x848] ss:$52 sps:$4 sm:$0xff]  }
 0x47c   :  { %10816 = vmatprep.subr.bf16.mxu0 %v16359_v48  ;;  %v16392_v48 = vld [vmem:[#allocation7 + $0x8ac] ss:$52 sps:$4 sm:$0xff]  }
 0x47e   :  { %10446 = vmatpush1.bf16.msra.mxu1 %v16354_v29  ;;  %v16395_v29 = vld [vmem:[#allocation7 + $0x8b4] ss:$52 sps:$4 sm:$0xff]  }
 0x47f   :  { %10817 = vmatpush1.bf16.msra.mxu0 %v16357_v10  ;;  %10468 = vmatprep.subr.bf16.mxu1 %v16362_v12  ;;  %v16390_v10 = vld [vmem:[#allocation7 + $0x8a8] ss:$52 sps:$4 sm:$0xff]   ;;  %v16393_v12 = vld [vmem:[#allocation7 + $0x8b0] ss:$52 sps:$4 sm:$0xff]  }
 0x480   :  { %10839 = vmatprep.subr.bf16.mxu0 %v16365_v52  ;;  %v16398_v52 = vld [vmem:[#allocation7 + $0x914] ss:$52 sps:$4 sm:$0xff]  }
 0x481   :  { %10448 = vmatmul.mubr.bf16.vlgmr.msra.gmra.mrb[40].mxu1 %v17469_v60 }
 0x482   :  { %10819 = vmatmul.mubr.bf16.vlgmr.msra.gmra.mrb[44].mxu0 %v17469_v60  ;;  %10457 = vmatprep.mubr.bf16.mxu1 %v17503_v49 }
 0x483   :  { %10469 = vmatpush1.bf16.msra.mxu1 %v16360_v13  ;;  %10828 = vmatprep.mubr.bf16.mxu0 %v17503_v49  ;;  %v16401_v13 = vld [vmem:[#allocation7 + $0x91c] ss:$52 sps:$4 sm:$0xff]  }
 0x484   :  { %10840 = vmatpush1.bf16.msra.mxu0 %v16363_v37  ;;  %10470 = vmatprep.subr.bf16.mxu1 %v16368_v47  ;;  %v16396_v37 = vld [vmem:[#allocation7 + $0x910] ss:$52 sps:$4 sm:$0xff]   ;;  %v16399_v47 = vld [vmem:[#allocation7 + $0x918] ss:$52 sps:$4 sm:$0xff]  }
 0x485   :  { %10841 = vmatprep.subr.bf16.mxu0 %v16371_v59  ;;  %v16404_v59 = vld [vmem:[#allocation7 + $0x97c] ss:$52 sps:$4 sm:$0xff]  }
 0x487   :  { %10471 = vmatpush1.bf16.msra.mxu1 %v16366_v57  ;;  %v16407_v57 = vld [vmem:[#allocation7 + $0x984] ss:$52 sps:$4 sm:$0xff]  }
 0x488   :  { %10842 = vmatpush1.bf16.msra.mxu0 %v16369_v38  ;;  %10472 = vmatprep.subr.bf16.mxu1 %v16374_v42  ;;  %v16402_v38 = vld [vmem:[#allocation7 + $0x978] ss:$52 sps:$4 sm:$0xff]   ;;  %v16405_v42 = vld [vmem:[#allocation7 + $0x980] ss:$52 sps:$4 sm:$0xff]  }
 0x489   :  { %10458 = vmatmul.mubr.bf16.gmra.mrb[44].mxu1 %v17499_v43  ;;  %10843 = vmatprep.subr.bf16.mxu0 %v16377_v6  ;;  %v16410_v6 = vld [vmem:[#allocation7 + $0x9e4] ss:$52 sps:$4 sm:$0xff]  }
 0x48a   :  { %10829 = vmatmul.mubr.bf16.gmra.mrb[48].mxu0 %v17499_v43  ;;  %10500 = vmatprep.mubr.bf16.mxu1 %v17486_v28 }
 0x48b   :  { %10473 = vmatpush1.bf16.msra.mxu1 %v16372_v54  ;;  %10871 = vmatprep.mubr.bf16.mxu0 %v17486_v28  ;;  %v16413_v54 = vld [vmem:[#allocation7 + $0x9ec] ss:$52 sps:$4 sm:$0xff]  }
 0x48c   :  { %10844 = vmatpush1.bf16.msra.mxu0 %v16375_v18  ;;  %10474 = vmatprep.subr.bf16.mxu1 %v16380_v44  ;;  %v16408_v18 = vld [vmem:[#allocation7 + $0x9e0] ss:$52 sps:$4 sm:$0xff]   ;;  %v16411_v44 = vld [vmem:[#allocation7 + $0x9e8] ss:$52 sps:$4 sm:$0xff]  }
 0x48d   :  { %10845 = vmatprep.subr.bf16.mxu0 %v16383_v50  ;;  %v16416_v50 = vld [vmem:[#allocation7 + $0xa4c] ss:$52 sps:$4 sm:$0xff]  }
 0x48f   :  { %10475 = vmatpush1.bf16.msra.mxu1 %v16378_v58  ;;  %v16419_v58 = vld [vmem:[#allocation7 + $0xa54] ss:$52 sps:$4 sm:$0xff]  }
 0x490   :  { %10846 = vmatpush1.bf16.msra.mxu0 %v16381_v14  ;;  %10476 = vmatprep.subr.bf16.mxu1 %v16386_v45  ;;  %v16414_v14 = vld [vmem:[#allocation7 + $0xa48] ss:$52 sps:$4 sm:$0xff]   ;;  %v16417_v45 = vld [vmem:[#allocation7 + $0xa50] ss:$52 sps:$4 sm:$0xff]  }
 0x491   :  { %10847 = vmatprep.subr.bf16.mxu0 %v16389_v46  ;;  %v16422_v46 = vld [vmem:[#allocation7 + $0xab4] ss:$52 sps:$4 sm:$0xff]  }
 0x493   :  { %10477 = vmatpush1.bf16.msra.mxu1 %v16384_v25  ;;  %v16425_v25 = vld [vmem:[#allocation7 + $0xabc] ss:$52 sps:$4 sm:$0xff]  }
 0x494   :  { %10848 = vmatpush1.bf16.msra.mxu0 %v16387_v61  ;;  %10478 = vmatprep.subr.bf16.mxu1 %v16392_v48  ;;  %v16420_v61 = vld [vmem:[#allocation7 + $0xab0] ss:$52 sps:$4 sm:$0xff]   ;;  %v16423_v48 = vld [vmem:[#allocation7 + $0xab8] ss:$52 sps:$4 sm:$0xff]  }
 0x495   :  { %10849 = vmatprep.subr.bf16.mxu0 %v16395_v29  ;;  %v16428_v29 = vld [vmem:[#allocation7 + $0xb1c] ss:$52 sps:$4 sm:$0xff]  }
 0x497   :  { %10479 = vmatpush1.bf16.msra.mxu1 %v16390_v10  ;;  %v16431_v10 = vld [vmem:[#allocation7 + $0xb24] ss:$52 sps:$4 sm:$0xff]  }
 0x498   :  { %10850 = vmatpush1.bf16.msra.mxu0 %v16393_v12  ;;  %10480 = vmatprep.subr.bf16.mxu1 %v16398_v52  ;;  %v16426_v12 = vld [vmem:[#allocation7 + $0xb18] ss:$52 sps:$4 sm:$0xff]   ;;  %v16429_v52 = vld [vmem:[#allocation7 + $0xb20] ss:$52 sps:$4 sm:$0xff]  }
 0x499   :  { %10851 = vmatprep.subr.bf16.mxu0 %v16401_v13  ;;  %v16434_v13 = vld [vmem:[#allocation7 + $0xb84] ss:$52 sps:$4 sm:$0xff]  }
 0x49b   :  { %10481 = vmatpush1.bf16.msra.mxu1 %v16396_v37  ;;  %v16437_v37 = vld [vmem:[#allocation7 + $0xb8c] ss:$52 sps:$4 sm:$0xff]  }
 0x49c   :  { %10852 = vmatpush1.bf16.msra.mxu0 %v16399_v47  ;;  %10482 = vmatprep.subr.bf16.mxu1 %v16404_v59  ;;  %v16432_v47 = vld [vmem:[#allocation7 + $0xb80] ss:$52 sps:$4 sm:$0xff]   ;;  %v16435_v59 = vld [vmem:[#allocation7 + $0xb88] ss:$52 sps:$4 sm:$0xff]  }
 0x49d   :  { %10853 = vmatprep.subr.bf16.mxu0 %v16407_v57  ;;  %v16440_v57 = vld [vmem:[#allocation7 + $0xbec] ss:$52 sps:$4 sm:$0xff]  }
 0x49f   :  { %10483 = vmatpush1.bf16.msra.mxu1 %v16402_v38  ;;  %v16443_v38 = vld [vmem:[#allocation7 + $0xbf4] ss:$52 sps:$4 sm:$0xff]  }
 0x4a0   :  { %10854 = vmatpush1.bf16.msra.mxu0 %v16405_v42  ;;  %10484 = vmatprep.subr.bf16.mxu1 %v16410_v6  ;;  %v16438_v42 = vld [vmem:[#allocation7 + $0xbe8] ss:$52 sps:$4 sm:$0xff]   ;;  %v16441_v6 = vld [vmem:[#allocation7 + $0xbf0] ss:$52 sps:$4 sm:$0xff]  }
 0x4a1   :  { %10855 = vmatprep.subr.bf16.mxu0 %v16413_v54  ;;  %v16446_v54 = vld [vmem:[#allocation7 + $0xc54] ss:$52 sps:$4 sm:$0xff]  }
 0x4a3   :  { %10485 = vmatpush1.bf16.msra.mxu1 %v16408_v18  ;;  %v16449_v18 = vld [vmem:[#allocation7 + $0xc5c] ss:$52 sps:$4 sm:$0xff]  }
 0x4a4   :  { %10856 = vmatpush1.bf16.msra.mxu0 %v16411_v44  ;;  %10486 = vmatprep.subr.bf16.mxu1 %v16416_v50  ;;  %v16444_v44 = vld [vmem:[#allocation7 + $0xc50] ss:$52 sps:$4 sm:$0xff]   ;;  %v16447_v50 = vld [vmem:[#allocation7 + $0xc58] ss:$52 sps:$4 sm:$0xff]  }
 0x4a5   :  { %10857 = vmatprep.subr.bf16.mxu0 %v16419_v58  ;;  %v16452_v58 = vld [vmem:[#allocation7 + $0xcbc] ss:$52 sps:$4 sm:$0xff]  }
 0x4a7   :  { %10487 = vmatpush1.bf16.msra.mxu1 %v16414_v14  ;;  %v16455_v14 = vld [vmem:[#allocation7 + $0xcc4] ss:$52 sps:$4 sm:$0xff]  }
 0x4a8   :  { %10858 = vmatpush1.bf16.msra.mxu0 %v16417_v45  ;;  %10488 = vmatprep.subr.bf16.mxu1 %v16422_v46  ;;  %v16450_v45 = vld [vmem:[#allocation7 + $0xcb8] ss:$52 sps:$4 sm:$0xff]   ;;  %v16453_v46 = vld [vmem:[#allocation7 + $0xcc0] ss:$52 sps:$4 sm:$0xff]  }
 0x4a9   :  { %10859 = vmatprep.subr.bf16.mxu0 %v16425_v25  ;;  %v16458_v25 = vld [vmem:[#allocation7 + $0xd24] ss:$52 sps:$4 sm:$0xff]  }
 0x4ab   :  { %10489 = vmatpush1.bf16.msra.mxu1 %v16420_v61  ;;  %v16461_v61 = vld [vmem:[#allocation7 + $0xd2c] ss:$52 sps:$4 sm:$0xff]  }
 0x4ac   :  { %10860 = vmatpush1.bf16.msra.mxu0 %v16423_v48  ;;  %10490 = vmatprep.subr.bf16.mxu1 %v16428_v29  ;;  %v16456_v48 = vld [vmem:[#allocation7 + $0xd20] ss:$52 sps:$4 sm:$0xff]   ;;  %v16459_v29 = vld [vmem:[#allocation7 + $0xd28] ss:$52 sps:$4 sm:$0xff]  }
 0x4ad   :  { %10861 = vmatprep.subr.bf16.mxu0 %v16431_v10  ;;  %v16464_v10 = vld [vmem:[#allocation7 + $0xd8c] ss:$52 sps:$4 sm:$0xff]  }
 0x4af   :  { %10491 = vmatpush1.bf16.msra.mxu1 %v16426_v12  ;;  %v16467_v12 = vld [vmem:[#allocation7 + $0xd94] ss:$52 sps:$4 sm:$0xff]  }
 0x4b0   :  { %10862 = vmatpush1.bf16.msra.mxu0 %v16429_v52  ;;  %10492 = vmatprep.subr.bf16.mxu1 %v16434_v13  ;;  %v16462_v52 = vld [vmem:[#allocation7 + $0xd88] ss:$52 sps:$4 sm:$0xff]   ;;  %v16465_v13 = vld [vmem:[#allocation7 + $0xd90] ss:$52 sps:$4 sm:$0xff]  }
 0x4b1   :  { %10863 = vmatprep.subr.bf16.mxu0 %v16437_v37  ;;  %v16470_v37 = vld [vmem:[#allocation7 + $0xdf4] ss:$52 sps:$4 sm:$0xff]  }
 0x4b3   :  { %10493 = vmatpush1.bf16.msra.mxu1 %v16432_v47  ;;  %v16473_v47 = vld [vmem:[#allocation7 + $0xdfc] ss:$52 sps:$4 sm:$0xff]  }
 0x4b4   :  { %10864 = vmatpush1.bf16.msra.mxu0 %v16435_v59  ;;  %10494 = vmatprep.subr.bf16.mxu1 %v16440_v57  ;;  %v16468_v59 = vld [vmem:[#allocation7 + $0xdf0] ss:$52 sps:$4 sm:$0xff]   ;;  %v16471_v57 = vld [vmem:[#allocation7 + $0xdf8] ss:$52 sps:$4 sm:$0xff]  }
 0x4b5   :  { %10865 = vmatprep.subr.bf16.mxu0 %v16443_v38  ;;  %v16476_v38 = vld [vmem:[#allocation7 + $0xe5c] ss:$52 sps:$4 sm:$0xff]  }
 0x4b7   :  { %10495 = vmatpush1.bf16.msra.mxu1 %v16438_v42  ;;  %v16479_v42 = vld [vmem:[#allocation7 + $0xe64] ss:$52 sps:$4 sm:$0xff]  }
 0x4b8   :  { %10866 = vmatpush1.bf16.msra.mxu0 %v16441_v6  ;;  %10496 = vmatprep.subr.bf16.mxu1 %v16446_v54  ;;  %v16474_v6 = vld [vmem:[#allocation7 + $0xe58] ss:$52 sps:$4 sm:$0xff]   ;;  %v16477_v54 = vld [vmem:[#allocation7 + $0xe60] ss:$52 sps:$4 sm:$0xff]  }
 0x4b9   :  { %10867 = vmatprep.subr.bf16.mxu0 %v16449_v18  ;;  %v16482_v18 = vld [vmem:[#allocation7 + $0xec4] ss:$52 sps:$4 sm:$0xff]  }
 0x4bb   :  { %10497 = vmatpush1.bf16.msra.mxu1 %v16444_v44  ;;  %v16485_v44 = vld [vmem:[#allocation7 + $0xecc] ss:$52 sps:$4 sm:$0xff]  }
 0x4bc   :  { %10868 = vmatpush1.bf16.msra.mxu0 %v16447_v50  ;;  %10498 = vmatprep.subr.bf16.mxu1 %v16452_v58  ;;  %v16480_v50 = vld [vmem:[#allocation7 + $0xec0] ss:$52 sps:$4 sm:$0xff]   ;;  %v16483_v58 = vld [vmem:[#allocation7 + $0xec8] ss:$52 sps:$4 sm:$0xff]  }
 0x4bd   :  { %10869 = vmatprep.subr.bf16.mxu0 %v16455_v14  ;;  %v16488_v14 = vld [vmem:[#allocation7 + $0xf2c] ss:$52 sps:$4 sm:$0xff]  }
 0x4bf   :  { %10499 = vmatpush1.bf16.msra.mxu1 %v16450_v45  ;;  %v16491_v45 = vld [vmem:[#allocation7 + $0xf34] ss:$52 sps:$4 sm:$0xff]  }
 0x4c0   :  { %10870 = vmatpush1.bf16.msra.mxu0 %v16453_v46  ;;  %10521 = vmatprep.subr.bf16.mxu1 %v16458_v25  ;;  %v16486_v46 = vld [vmem:[#allocation7 + $0xf28] ss:$52 sps:$4 sm:$0xff]   ;;  %v16489_v25 = vld [vmem:[#allocation7 + $0xf30] ss:$52 sps:$4 sm:$0xff]  }
 0x4c1   :  { %10892 = vmatprep.subr.bf16.mxu0 %v16461_v61  ;;  %v16494_v61 = vld [vmem:[#allocation7 + $0xf94] ss:$52 sps:$4 sm:$0xff]  }
 0x4c2   :  { %10501 = vmatmul.mubr.bf16.vlgmr.msra.gmra.mrb[40].mxu1 %v17484_v24 }
 0x4c3   :  { %10872 = vmatmul.mubr.bf16.vlgmr.msra.gmra.mrb[44].mxu0 %v17484_v24  ;;  %10510 = vmatprep.mubr.bf16.mxu1 %v17527_v16 }
 0x4c4   :  { %10522 = vmatpush1.bf16.msra.mxu1 %v16456_v48  ;;  %10881 = vmatprep.mubr.bf16.mxu0 %v17527_v16  ;;  %v16497_v48 = vld [vmem:[#allocation7 + $0xf9c] ss:$52 sps:$4 sm:$0xff]  }
 0x4c5   :  { %10893 = vmatpush1.bf16.msra.mxu0 %v16459_v29  ;;  %10523 = vmatprep.subr.bf16.mxu1 %v16464_v10  ;;  %v16492_v29 = vld [vmem:[#allocation7 + $0xf90] ss:$52 sps:$4 sm:$0xff]   ;;  %v16495_v10 = vld [vmem:[#allocation7 + $0xf98] ss:$52 sps:$4 sm:$0xff]  }
 0x4c6   :  { %10894 = vmatprep.subr.bf16.mxu0 %v16467_v12  ;;  %v16500_v12 = vld [vmem:[#allocation7 + $0xffc] ss:$52 sps:$4 sm:$0xff]  }
 0x4c8   :  { %10524 = vmatpush1.bf16.msra.mxu1 %v16462_v52  ;;  %v16503_v52 = vld [vmem:[#allocation7 + $0x1004] ss:$52 sps:$4 sm:$0xff]  }
 0x4c9   :  { %10895 = vmatpush1.bf16.msra.mxu0 %v16465_v13  ;;  %10525 = vmatprep.subr.bf16.mxu1 %v16470_v37  ;;  %v16498_v13 = vld [vmem:[#allocation7 + $0xff8] ss:$52 sps:$4 sm:$0xff]   ;;  %v16501_v37 = vld [vmem:[#allocation7 + $0x1000] ss:$52 sps:$4 sm:$0xff]  }
 0x4ca   :  { %10511 = vmatmul.mubr.bf16.gmra.mrb[44].mxu1 %v17524_v9  ;;  %10896 = vmatprep.subr.bf16.mxu0 %v16473_v47  ;;  %v16506_v47 = vld [vmem:[#allocation7 + $0x1064] ss:$52 sps:$4 sm:$0xff]  }
 0x4cb   :  { %10882 = vmatmul.mubr.bf16.gmra.mrb[48].mxu0 %v17524_v9  ;;  %10553 = vmatprep.mubr.bf16.mxu1 %v17535_v27 }
 0x4cc   :  { %10526 = vmatpush1.bf16.msra.mxu1 %v16468_v59  ;;  %10924 = vmatprep.mubr.bf16.mxu0 %v17535_v27  ;;  %v16509_v59 = vld [vmem:[#allocation7 + $0x106c] ss:$52 sps:$4 sm:$0xff]  }
 0x4cd   :  { %10897 = vmatpush1.bf16.msra.mxu0 %v16471_v57  ;;  %10527 = vmatprep.subr.bf16.mxu1 %v16476_v38  ;;  %v16504_v57 = vld [vmem:[#allocation7 + $0x1060] ss:$52 sps:$4 sm:$0xff]   ;;  %v16507_v38 = vld [vmem:[#allocation7 + $0x1068] ss:$52 sps:$4 sm:$0xff]  }
 0x4ce   :  { %10898 = vmatprep.subr.bf16.mxu0 %v16479_v42  ;;  %v16512_v42 = vld [vmem:[#allocation7 + $0x10cc] ss:$52 sps:$4 sm:$0xff]  }
 0x4d0   :  { %10528 = vmatpush1.bf16.msra.mxu1 %v16474_v6  ;;  %v16515_v6 = vld [vmem:[#allocation7 + $0x10d4] ss:$52 sps:$4 sm:$0xff]  }
 0x4d1   :  { %10899 = vmatpush1.bf16.msra.mxu0 %v16477_v54  ;;  %10529 = vmatprep.subr.bf16.mxu1 %v16482_v18  ;;  %v16510_v54 = vld [vmem:[#allocation7 + $0x10c8] ss:$52 sps:$4 sm:$0xff]   ;;  %v16513_v18 = vld [vmem:[#allocation7 + $0x10d0] ss:$52 sps:$4 sm:$0xff]  }
 0x4d2   :  { %10900 = vmatprep.subr.bf16.mxu0 %v16485_v44  ;;  %v16518_v44 = vld [vmem:[#allocation7 + $0x1134] ss:$52 sps:$4 sm:$0xff]  }
 0x4d4   :  { %10530 = vmatpush1.bf16.msra.mxu1 %v16480_v50  ;;  %v16521_v50 = vld [vmem:[#allocation7 + $0x113c] ss:$52 sps:$4 sm:$0xff]  }
 0x4d5   :  { %10901 = vmatpush1.bf16.msra.mxu0 %v16483_v58  ;;  %10531 = vmatprep.subr.bf16.mxu1 %v16488_v14  ;;  %v16516_v58 = vld [vmem:[#allocation7 + $0x1130] ss:$52 sps:$4 sm:$0xff]   ;;  %v16519_v14 = vld [vmem:[#allocation7 + $0x1138] ss:$52 sps:$4 sm:$0xff]  }
 0x4d6   :  { %10902 = vmatprep.subr.bf16.mxu0 %v16491_v45  ;;  %v16524_v45 = vld [vmem:[#allocation7 + $0x119c] ss:$52 sps:$4 sm:$0xff]  }
 0x4d8   :  { %10532 = vmatpush1.bf16.msra.mxu1 %v16486_v46  ;;  %v16527_v46 = vld [vmem:[#allocation7 + $0x11a4] ss:$52 sps:$4 sm:$0xff]  }
 0x4d9   :  { %10903 = vmatpush1.bf16.msra.mxu0 %v16489_v25  ;;  %10533 = vmatprep.subr.bf16.mxu1 %v16494_v61  ;;  %v16522_v25 = vld [vmem:[#allocation7 + $0x1198] ss:$52 sps:$4 sm:$0xff]   ;;  %v16525_v61 = vld [vmem:[#allocation7 + $0x11a0] ss:$52 sps:$4 sm:$0xff]  }
 0x4da   :  { %10904 = vmatprep.subr.bf16.mxu0 %v16497_v48  ;;  %v16530_v48 = vld [vmem:[#allocation7 + $0x1204] ss:$52 sps:$4 sm:$0xff]  }
 0x4dc   :  { %10534 = vmatpush1.bf16.msra.mxu1 %v16492_v29  ;;  %v16533_v29 = vld [vmem:[#allocation7 + $0x120c] ss:$52 sps:$4 sm:$0xff]  }
 0x4dd   :  { %10905 = vmatpush1.bf16.msra.mxu0 %v16495_v10  ;;  %10535 = vmatprep.subr.bf16.mxu1 %v16500_v12  ;;  %v16528_v10 = vld [vmem:[#allocation7 + $0x1200] ss:$52 sps:$4 sm:$0xff]   ;;  %v16531_v12 = vld [vmem:[#allocation7 + $0x1208] ss:$52 sps:$4 sm:$0xff]  }
 0x4de   :  { %10906 = vmatprep.subr.bf16.mxu0 %v16503_v52  ;;  %v16536_v52 = vld [vmem:[#allocation7 + $0x126c] ss:$52 sps:$4 sm:$0xff]  }
 0x4e0   :  { %10536 = vmatpush1.bf16.msra.mxu1 %v16498_v13  ;;  %v16539_v13 = vld [vmem:[#allocation7 + $0x1274] ss:$52 sps:$4 sm:$0xff]  }
 0x4e1   :  { %10907 = vmatpush1.bf16.msra.mxu0 %v16501_v37  ;;  %10537 = vmatprep.subr.bf16.mxu1 %v16506_v47  ;;  %v16534_v37 = vld [vmem:[#allocation7 + $0x1268] ss:$52 sps:$4 sm:$0xff]   ;;  %v16537_v47 = vld [vmem:[#allocation7 + $0x1270] ss:$52 sps:$4 sm:$0xff]  }
 0x4e2   :  { %10908 = vmatprep.subr.bf16.mxu0 %v16509_v59  ;;  %v16542_v59 = vld [vmem:[#allocation7 + $0x12d4] ss:$52 sps:$4 sm:$0xff]  }
 0x4e4   :  { %10538 = vmatpush1.bf16.msra.mxu1 %v16504_v57  ;;  %v16545_v57 = vld [vmem:[#allocation7 + $0x12dc] ss:$52 sps:$4 sm:$0xff]  }
 0x4e5   :  { %10909 = vmatpush1.bf16.msra.mxu0 %v16507_v38  ;;  %10539 = vmatprep.subr.bf16.mxu1 %v16512_v42  ;;  %v16540_v38 = vld [vmem:[#allocation7 + $0x12d0] ss:$52 sps:$4 sm:$0xff]   ;;  %v16543_v42 = vld [vmem:[#allocation7 + $0x12d8] ss:$52 sps:$4 sm:$0xff]  }
 0x4e6   :  { %10910 = vmatprep.subr.bf16.mxu0 %v16515_v6  ;;  %v16548_v6 = vld [vmem:[#allocation7 + $0x133c] ss:$52 sps:$4 sm:$0xff]  }
 0x4e8   :  { %10540 = vmatpush1.bf16.msra.mxu1 %v16510_v54  ;;  %v16551_v54 = vld [vmem:[#allocation7 + $0x1344] ss:$52 sps:$4 sm:$0xff]  }
 0x4e9   :  { %10911 = vmatpush1.bf16.msra.mxu0 %v16513_v18  ;;  %10541 = vmatprep.subr.bf16.mxu1 %v16518_v44  ;;  %v16546_v18 = vld [vmem:[#allocation7 + $0x1338] ss:$52 sps:$4 sm:$0xff]   ;;  %v16549_v44 = vld [vmem:[#allocation7 + $0x1340] ss:$52 sps:$4 sm:$0xff]  }
 0x4ea   :  { %10912 = vmatprep.subr.bf16.mxu0 %v16521_v50  ;;  %v16554_v50 = vld [vmem:[#allocation7 + $0x13a4] ss:$52 sps:$4 sm:$0xff]  }
 0x4ec   :  { %10542 = vmatpush1.bf16.msra.mxu1 %v16516_v58  ;;  %v16557_v58 = vld [vmem:[#allocation7 + $0x13ac] ss:$52 sps:$4 sm:$0xff]  }
 0x4ed   :  { %10913 = vmatpush1.bf16.msra.mxu0 %v16519_v14  ;;  %10543 = vmatprep.subr.bf16.mxu1 %v16524_v45  ;;  %v16552_v14 = vld [vmem:[#allocation7 + $0x13a0] ss:$52 sps:$4 sm:$0xff]   ;;  %v16555_v45 = vld [vmem:[#allocation7 + $0x13a8] ss:$52 sps:$4 sm:$0xff]  }
 0x4ee   :  { %10914 = vmatprep.subr.bf16.mxu0 %v16527_v46  ;;  %v16560_v46 = vld [vmem:[#allocation7 + $0x140c] ss:$52 sps:$4 sm:$0xff]  }
 0x4f0   :  { %10544 = vmatpush1.bf16.msra.mxu1 %v16522_v25  ;;  %v16563_v25 = vld [vmem:[#allocation7 + $0x1414] ss:$52 sps:$4 sm:$0xff]  }
 0x4f1   :  { %10915 = vmatpush1.bf16.msra.mxu0 %v16525_v61  ;;  %10545 = vmatprep.subr.bf16.mxu1 %v16530_v48  ;;  %v16558_v61 = vld [vmem:[#allocation7 + $0x1408] ss:$52 sps:$4 sm:$0xff]   ;;  %v16561_v48 = vld [vmem:[#allocation7 + $0x1410] ss:$52 sps:$4 sm:$0xff]  }
 0x4f2   :  { %10916 = vmatprep.subr.bf16.mxu0 %v16533_v29  ;;  %v16566_v29 = vld [vmem:[#allocation7 + $0x1474] ss:$52 sps:$4 sm:$0xff]  }
 0x4f4   :  { %10546 = vmatpush1.bf16.msra.mxu1 %v16528_v10  ;;  %v16569_v10 = vld [vmem:[#allocation7 + $0x147c] ss:$52 sps:$4 sm:$0xff]  }
 0x4f5   :  { %10917 = vmatpush1.bf16.msra.mxu0 %v16531_v12  ;;  %10547 = vmatprep.subr.bf16.mxu1 %v16536_v52  ;;  %v16564_v12 = vld [vmem:[#allocation7 + $0x1470] ss:$52 sps:$4 sm:$0xff]   ;;  %v16567_v52 = vld [vmem:[#allocation7 + $0x1478] ss:$52 sps:$4 sm:$0xff]  }
 0x4f6   :  { %10918 = vmatprep.subr.bf16.mxu0 %v16539_v13  ;;  %v16572_v13 = vld [vmem:[#allocation7 + $0x14dc] ss:$52 sps:$4 sm:$0xff]  }
 0x4f8   :  { %10548 = vmatpush1.bf16.msra.mxu1 %v16534_v37  ;;  %v16575_v37 = vld [vmem:[#allocation7 + $0x14e4] ss:$52 sps:$4 sm:$0xff]  }
 0x4f9   :  { %10919 = vmatpush1.bf16.msra.mxu0 %v16537_v47  ;;  %10549 = vmatprep.subr.bf16.mxu1 %v16542_v59  ;;  %v16570_v47 = vld [vmem:[#allocation7 + $0x14d8] ss:$52 sps:$4 sm:$0xff]   ;;  %v16573_v59 = vld [vmem:[#allocation7 + $0x14e0] ss:$52 sps:$4 sm:$0xff]  }
 0x4fa   :  { %10920 = vmatprep.subr.bf16.mxu0 %v16545_v57  ;;  %v16578_v57 = vld [vmem:[#allocation7 + $0x1544] ss:$52 sps:$4 sm:$0xff]  }
 0x4fc   :  { %10550 = vmatpush1.bf16.msra.mxu1 %v16540_v38  ;;  %v16581_v38 = vld [vmem:[#allocation7 + $0x154c] ss:$52 sps:$4 sm:$0xff]  }
 0x4fd   :  { %10921 = vmatpush1.bf16.msra.mxu0 %v16543_v42  ;;  %10551 = vmatprep.subr.bf16.mxu1 %v16548_v6  ;;  %v16576_v42 = vld [vmem:[#allocation7 + $0x1540] ss:$52 sps:$4 sm:$0xff]  }
 0x4fe   :  { %10922 = vmatprep.subr.bf16.mxu0 %v16551_v54  ;;  %v17064_v6 = vld [vmem:[#allocation8] sm:$0xff] }
 0x4ff   :  { %v17800_v54 = vrot.slane %v17064_v6, %v17477_v11 }
 0x500   :  { %10552 = vmatpush1.bf16.msra.mxu1 %v16546_v18  ;;  %v16579_v18 = vld [vmem:[#allocation7 + $0x1548] ss:$52 sps:$4 sm:$0xff]  }
 0x501   :  { %10923 = vmatpush1.bf16.msra.mxu0 %v16549_v44  ;;  %10574 = vmatprep.subr.bf16.mxu1 %v16554_v50  ;;  %v18023_v44 = vsub.s32 6, %v17440_v33 }
 0x502   :  { %10945 = vmatprep.subr.bf16.mxu0 %v16557_v58  ;;  %v18024_v58 = vsub.s32 5, %v17440_v33 }
 0x503   :  { %10554 = vmatmul.mubr.bf16.vlgmr.msra.gmra.mrb[40].mxu1 %v17532_v22  ;;  %v17804_v50 = vrot.slane %v17064_v6, %v18023_v44 }
 0x504   :  { %10925 = vmatmul.mubr.bf16.vlgmr.msra.gmra.mrb[44].mxu0 %v17532_v22  ;;  %10563 = vmatprep.mubr.bf16.mxu1 %v17561_v23 }
 0x505   :  { %10575 = vmatpush1.bf16.msra.mxu1 %v16552_v14  ;;  %10934 = vmatprep.mubr.bf16.mxu0 %v17561_v23  ;;  %v17808_v14 = vrot.slane %v17064_v6, %v18024_v58 }
 0x506   :  { %10946 = vmatpush1.bf16.msra.mxu0 %v16555_v45  ;;  %10576 = vmatprep.subr.bf16.mxu1 %v16560_v46  ;;  %v16584_v45 = vld [vmem:[#allocation7 + $0x15ac] ss:$52 sps:$4 sm:$0xff]   ;;  %v18025_v46 = vsub.s32 7, %v17440_v33  ;;  %v16590_v33 = vld [vmem:[#allocation7 + $0x1614] ss:$52 sps:$4 sm:$0xff]  }
 0x507   :  { %10947 = vmatprep.subr.bf16.mxu0 %v16563_v25 }
 0x508   :  { %v17812_v25 = vrot.slane %v17064_v6, %v18025_v46  ;;  %v16593_v46 = vld [vmem:[#allocation7 + $0x161c] ss:$52 sps:$4 sm:$0xff]  }
 0x509   :  { %10577 = vmatpush1.bf16.msra.mxu1 %v16558_v61  ;;  %v16587_v61 = vld [vmem:[#allocation7 + $0x15b4] ss:$52 sps:$4 sm:$0xff]  }
 0x50a   :  { %10948 = vmatpush1.bf16.msra.mxu0 %v16561_v48  ;;  %10578 = vmatprep.subr.bf16.mxu1 %v16566_v29 }
 0x50b   :  { %10564 = vmatmul.mubr.bf16.gmra.mrb[44].mxu1 %v17558_v34  ;;  %10949 = vmatprep.subr.bf16.mxu0 %v16569_v10 }
 0x50c   :  { %10935 = vmatmul.mubr.bf16.gmra.mrb[48].mxu0 %v17558_v34  ;;  %10606 = vmatprep.mubr.bf16.mxu1 %v17547_v30 }
 0x50d   :  { %10579 = vmatpush1.bf16.msra.mxu1 %v16564_v12  ;;  %10977 = vmatprep.mubr.bf16.mxu0 %v17547_v30 }
 0x50e   :  { %10950 = vmatpush1.bf16.msra.mxu0 %v16567_v52  ;;  %10580 = vmatprep.subr.bf16.mxu1 %v16572_v13  ;;  %v16582_v52 = vld [vmem:[#allocation7 + $0x15a8] ss:$52 sps:$4 sm:$0xff]  }
 0x50f   :  { %10951 = vmatprep.subr.bf16.mxu0 %v16575_v37 }
 0x511   :  { %10581 = vmatpush1.bf16.msra.mxu1 %v16570_v47 }
 0x512   :  { %10952 = vmatpush1.bf16.msra.mxu0 %v16573_v59  ;;  %10582 = vmatprep.subr.bf16.mxu1 %v16578_v57  ;;  %v16585_v59 = vld [vmem:[#allocation7 + $0x15b0] ss:$52 sps:$4 sm:$0xff]  }
 0x513   :  { %10953 = vmatprep.subr.bf16.mxu0 %v16581_v38 }
 0x514   :  { %v10025_v48 = vpop.f32.mrb[32].mxu1 }
 0x515   :  { %10583 = vmatpush1.bf16.msra.mxu1 %v16576_v42  ;;  %v14689_v29 = vadd.f32 %v10025_v48, %v17800_v54  ;;  %v10396_v10 = vpop.f32.mrb[36].mxu0  ;;  %v10027_v12 = vpop.f32.mrb[33].mxu1 }
 0x516   :  { %10954 = vmatpush1.bf16.msra.mxu0 %v16579_v18  ;;  %v14697_v13 = vadd.f32 %v10396_v10, %v17804_v50  ;;  %v14690_v37 = vadd.f32 %v10027_v12, %v17808_v14  ;;  %v10398_v47 = vpop.f32.mrb[37].mxu0  ;;  %10584 = vmatprep.subr.bf16.mxu1 %v16584_v45  ;;  %v10029_v57 = vpop.f32.mrb[34].mxu1 }
 0x517   :  { %v11504_v38 = vmax.f32 %v14689_v29, 0.0  ;;  %v14698_v6 = vadd.f32 %v10398_v47, %v17812_v25  ;;  %10955 = vmatprep.subr.bf16.mxu0 %v16587_v61  ;;  %v14691_v42 = vadd.f32 %v10029_v57, %v17800_v54  ;;  %v10400_v44 = vpop.f32.mrb[38].mxu0  ;;  %v10031_v58 = vpop.f32.mrb[35].mxu1  ;;  %v16588_v47 = vld [vmem:[#allocation7 + $0x1610] ss:$52 sps:$4 sm:$0xff]  }
 0x518   :  { %v11506_v48 = vmax.f32 %v14697_v13, 0.0  ;;  %v11505_v18 = vmax.f32 %v14690_v37, 0.0  ;;  %v14699_v10 = vadd.f32 %v10400_v44, %v17804_v50  ;;  %v14692_v12 = vadd.f32 %v10031_v58, %v17808_v14  ;;  %v10402_v0 = vpop.f32.mrb[39].mxu0  ;;  %v16591_v13 = vld [vmem:[#allocation7 + $0x1618] ss:$52 sps:$4 sm:$0xff]  }
 0x519   :  { %11556 = vst [vmem:[#allocation14 + $0x20] sm:$0xff] %v11504_v38  ;;  %v11507_v45 = vmax.f32 %v14698_v6, 0.0  ;;  %v11517_v11 = vmax.f32 %v14691_v42, 0.0  ;;  %10585 = vmatpush1.bf16.msra.mxu1 %v16582_v52  ;;  %v14700_v29 = vadd.f32 %v10402_v0, %v17812_v25  ;;  %v16596_v37 = vld [vmem:[#allocation7 + $0x167c] ss:$52 sps:$4 sm:$0xff]  }
 0x51a   :  { %11558 = vst [vmem:[#allocation14 + $0x30] sm:$0xff] %v11506_v48  ;;  %11557 = vst [vmem:[#allocation14 + $0x28] sm:$0xff] %v11505_v18  ;;  %v11519_v61 = vmax.f32 %v14699_v10, 0.0  ;;  %10956 = vmatpush1.bf16.msra.mxu0 %v16585_v59  ;;  %v11518_v57 = vmax.f32 %v14692_v12, 0.0  ;;  %10586 = vmatprep.subr.bf16.mxu1 %v16590_v33  ;;  %v16599_v6 = vld [vmem:[#allocation7 + $0x1684] ss:$52 sps:$4 sm:$0xff]  }
 0x51b   :  { %11559 = vst [vmem:[#allocation14 + $0x38] sm:$0xff] %v11507_v45  ;;  %11569 = vst [vmem:[#allocation14 + $0x88] sm:$0xff] %v11517_v11  ;;  %v17822_v44 = vpack.c.bf16 %v11517_v11, %v11504_v38  ;;  %v11520_v58 = vmax.f32 %v14700_v29, 0.0  ;;  %10957 = vmatprep.subr.bf16.mxu0 %v16593_v46  ;;  %v16594_v11 = vld [vmem:[#allocation7 + $0x1678] ss:$52 sps:$4 sm:$0xff]  }
 0x51c   :  { %11571 = vst [vmem:[#allocation14 + $0x98] sm:$0xff] %v11519_v61  ;;  %v17824_v52 = vpack.c.bf16 %v11519_v61, %v11506_v48  ;;  %11570 = vst [vmem:[#allocation14 + $0x90] sm:$0xff] %v11518_v57  ;;  %v17826_v0 = vpack.c.bf16 %v11518_v57, %v11505_v18  ;;  %v10035_v42 = vpop.f32.mrb[36].mxu1  ;;  %v16597_v29 = vld [vmem:[#allocation7 + $0x1680] ss:$52 sps:$4 sm:$0xff]  }
 0x51d   :  { %11572 = vst [vmem:[#allocation14 + $0xa0] sm:$0xff] %v11520_v58  ;;  %v17828_v59 = vpack.c.bf16 %v11520_v58, %v11507_v45  ;;  %10587 = vmatpush1.bf16.msra.mxu1 %v16588_v47  ;;  %v14693_v33 = vadd.f32 %v10035_v42, %v17800_v54  ;;  %v10406_v10 = vpop.f32.mrb[40].mxu0  ;;  %v10037_v12 = vpop.f32.mrb[37].mxu1  ;;  %v16602_v61 = vld [vmem:[#allocation7 + $0x16e4] ss:$52 sps:$4 sm:$0xff]  }
 0x51e   :  { %10958 = vmatpush1.bf16.msra.mxu0 %v16591_v13  ;;  %v14701_v38 = vadd.f32 %v10406_v10, %v17804_v50  ;;  %v14694_v46 = vadd.f32 %v10037_v12, %v17808_v14  ;;  %v10408_v48 = vpop.f32.mrb[41].mxu0  ;;  %10588 = vmatprep.subr.bf16.mxu1 %v16596_v37  ;;  %v10039_v18 = vpop.f32.mrb[38].mxu1 }
 0x51f   :  { %v11530_v57 = vmax.f32 %v14693_v33, 0.0  ;;  %v14702_v45 = vadd.f32 %v10408_v48, %v17812_v25  ;;  %10959 = vmatprep.subr.bf16.mxu0 %v16599_v6  ;;  %v14695_v47 = vadd.f32 %v10039_v18, %v17800_v54  ;;  %v10410_v58 = vpop.f32.mrb[42].mxu0  ;;  %v10041_v42 = vpop.f32.mrb[39].mxu1  ;;  %v16600_v48 = vld [vmem:[#allocation7 + $0x16e0] ss:$52 sps:$4 sm:$0xff]  }
 0x520   :  { %v11532_v36 = vmax.f32 %v14701_v38, 0.0  ;;  %v11531_v13 = vmax.f32 %v14694_v46, 0.0  ;;  %v14703_v10 = vadd.f32 %v10410_v58, %v17804_v50  ;;  %v14696_v12 = vadd.f32 %v10041_v42, %v17808_v14  ;;  %v10412_v39 = vpop.f32.mrb[43].mxu0  ;;  %v16603_v38 = vld [vmem:[#allocation7 + $0x16e8] ss:$52 sps:$4 sm:$0xff]  }
 0x521   :  { %11582 = vst [vmem:[#allocation14 + $0xf0] sm:$0xff] %v11530_v57  ;;  %v11533_v37 = vmax.f32 %v14702_v45, 0.0  ;;  %v11543_v35 = vmax.f32 %v14695_v47, 0.0  ;;  %10589 = vmatpush1.bf16.msra.mxu1 %v16594_v11  ;;  %v14704_v33 = vadd.f32 %v10412_v39, %v17812_v25  ;;  %v16608_v46 = vld [vmem:[#allocation7 + $0x174c] ss:$52 sps:$4 sm:$0xff]  }
 0x522   :  { %11584 = vst [vmem:[#allocation14 + $0x100] sm:$0xff] %v11532_v36  ;;  %11583 = vst [vmem:[#allocation14 + $0xf8] sm:$0xff] %v11531_v13  ;;  %v11545_v54 = vmax.f32 %v14703_v10, 0.0  ;;  %10960 = vmatpush1.bf16.msra.mxu0 %v16597_v29  ;;  %v11544_v6 = vmax.f32 %v14696_v12, 0.0  ;;  %10590 = vmatprep.subr.bf16.mxu1 %v16602_v61  ;;  %v16611_v18 = vld [vmem:[#allocation7 + $0x1754] ss:$52 sps:$4 sm:$0xff]  }
 0x523   :  { %11585 = vst [vmem:[#allocation14 + $0x108] sm:$0xff] %v11533_v37  ;;  %11595 = vst [vmem:[#allocation14 + $0x158] sm:$0xff] %v11543_v35  ;;  %v17838_v50 = vpack.c.bf16 %v11543_v35, %v11530_v57  ;;  %v11546_v14 = vmax.f32 %v14704_v33, 0.0  ;;  %10961 = vmatprep.subr.bf16.mxu0 %v16605_v40  ;;  %v16606_v29 = vld [vmem:[#allocation7 + $0x1748] ss:$52 sps:$4 sm:$0xff]  }
 0x524   :  { %11597 = vst [vmem:[#allocation14 + $0x168] sm:$0xff] %v11545_v54  ;;  %v17840_v11 = vpack.c.bf16 %v11545_v54, %v11532_v36  ;;  %11596 = vst [vmem:[#allocation14 + $0x160] sm:$0xff] %v11544_v6  ;;  %v17842_v39 = vpack.c.bf16 %v11544_v6, %v11531_v13  ;;  %v16609_v61 = vld [vmem:[#allocation7 + $0x1750] ss:$52 sps:$4 sm:$0xff]   ;;  %v16614_v45 = vld [vmem:[#allocation7 + $0x17b4] ss:$52 sps:$4 sm:$0xff]  }
 0x525   :  { %11598 = vst [vmem:[#allocation14 + $0x170] sm:$0xff] %v11546_v14  ;;  %v17844_v25 = vpack.c.bf16 %v11546_v14, %v11533_v37  ;;  %10591 = vmatpush1.bf16.msra.mxu1 %v16600_v48  ;;  %v16617_v35 = vld [vmem:[#allocation7 + $0x17bc] ss:$52 sps:$4 sm:$0xff]   ;;  %v16615_v36 = vld [vmem:[#allocation7 + $0x17b8] ss:$52 sps:$4 sm:$0xff]  }
 0x526   :  { %10962 = vmatpush1.bf16.msra.mxu0 %v16603_v38  ;;  %10592 = vmatprep.subr.bf16.mxu1 %v16608_v46  ;;  %v16612_v40 = vld [vmem:[#allocation7 + $0x17b0] ss:$52 sps:$4 sm:$0xff]   ;;  %v16618_v58 = vld [vmem:[#allocation7 + $0x1818] ss:$52 sps:$4 sm:$0xff]   ;;  %v16621_v42 = vld [vmem:[#allocation7 + $0x1820] ss:$52 sps:$4 sm:$0xff]  }
 0x527   :  { %10963 = vmatprep.subr.bf16.mxu0 %v16611_v18  ;;  %v16620_v57 = vld [vmem:[#allocation7 + $0x181c] ss:$52 sps:$4 sm:$0xff]   ;;  %v16623_v47 = vld [vmem:[#allocation7 + $0x1824] ss:$52 sps:$4 sm:$0xff]   ;;  %v16629_v10 = vld [vmem:[#allocation7 + $0x188c] ss:$52 sps:$4 sm:$0xff]  }
 0x528   :  { %v16626_v13 = vld [vmem:[#allocation7 + $0x1884] ss:$52 sps:$4 sm:$0xff]   ;;  %v16624_v12 = vld [vmem:[#allocation7 + $0x1880] ss:$52 sps:$4 sm:$0xff]   ;;  %v16627_v37 = vld [vmem:[#allocation7 + $0x1888] ss:$52 sps:$4 sm:$0xff]  }
 0x529   :  { %10593 = vmatpush1.bf16.msra.mxu1 %v16606_v29  ;;  %v16632_v33 = vld [vmem:[#allocation7 + $0x18ec] ss:$52 sps:$4 sm:$0xff]   ;;  %v16635_v48 = vld [vmem:[#allocation7 + $0x18f4] ss:$52 sps:$4 sm:$0xff]   ;;  %v16633_v6 = vld [vmem:[#allocation7 + $0x18f0] ss:$52 sps:$4 sm:$0xff]  }
 0x52a   :  { %10964 = vmatpush1.bf16.msra.mxu0 %v16609_v61  ;;  %10594 = vmatprep.subr.bf16.mxu1 %v16614_v45  ;;  %v16630_v54 = vld [vmem:[#allocation7 + $0x18e8] ss:$52 sps:$4 sm:$0xff]   ;;  %v16636_v14 = vld [vmem:[#allocation7 + $0x1950] ss:$52 sps:$4 sm:$0xff]   ;;  %v16639_v18 = vld [vmem:[#allocation7 + $0x1958] ss:$52 sps:$4 sm:$0xff]  }
 0x52b   :  { %10965 = vmatprep.subr.bf16.mxu0 %v16617_v35  ;;  %v16638_v38 = vld [vmem:[#allocation7 + $0x1954] ss:$52 sps:$4 sm:$0xff]   ;;  %v16641_v46 = vld [vmem:[#allocation7 + $0x195c] ss:$52 sps:$4 sm:$0xff]   ;;  %v16647_v61 = vld [vmem:[#allocation7 + $0x19c4] ss:$52 sps:$4 sm:$0xff]  }
 0x52c   :  { %v16644_v29 = vld [vmem:[#allocation7 + $0x19bc] ss:$52 sps:$4 sm:$0xff]   ;;  %v16642_v45 = vld [vmem:[#allocation7 + $0x19b8] ss:$52 sps:$4 sm:$0xff]   ;;  %v16645_v35 = vld [vmem:[#allocation7 + $0x19c0] ss:$52 sps:$4 sm:$0xff]  }
 0x52d   :  { %10595 = vmatpush1.bf16.msra.mxu1 %v16612_v40  ;;  %v16650_v40 = vld [vmem:[#allocation7 + $0x1a24] ss:$52 sps:$4 sm:$0xff]  }
 0x52e   :  { %10966 = vmatpush1.bf16.msra.mxu0 %v16615_v36  ;;  %10596 = vmatprep.subr.bf16.mxu1 %v16620_v57  ;;  %v16653_v36 = vld [vmem:[#allocation7 + $0x1a2c] ss:$52 sps:$4 sm:$0xff]  }
 0x52f   :  { %10967 = vmatprep.subr.bf16.mxu0 %v16623_v47  ;;  %v16648_v57 = vld [vmem:[#allocation7 + $0x1a20] ss:$52 sps:$4 sm:$0xff]   ;;  %v16651_v47 = vld [vmem:[#allocation7 + $0x1a28] ss:$52 sps:$4 sm:$0xff]  }
 0x531   :  { %10597 = vmatpush1.bf16.msra.mxu1 %v16618_v58  ;;  %v16656_v58 = vld [vmem:[#allocation7 + $0x1a8c] ss:$52 sps:$4 sm:$0xff]  }
 0x532   :  { %10968 = vmatpush1.bf16.msra.mxu0 %v16621_v42  ;;  %10598 = vmatprep.subr.bf16.mxu1 %v16626_v13  ;;  %v16659_v42 = vld [vmem:[#allocation7 + $0x1a94] ss:$52 sps:$4 sm:$0xff]  }
 0x533   :  { %10969 = vmatprep.subr.bf16.mxu0 %v16629_v10  ;;  %v16654_v13 = vld [vmem:[#allocation7 + $0x1a88] ss:$52 sps:$4 sm:$0xff]   ;;  %v16657_v10 = vld [vmem:[#allocation7 + $0x1a90] ss:$52 sps:$4 sm:$0xff]  }
 0x535   :  { %10599 = vmatpush1.bf16.msra.mxu1 %v16624_v12  ;;  %v16662_v12 = vld [vmem:[#allocation7 + $0x1af4] ss:$52 sps:$4 sm:$0xff]  }
 0x536   :  { %10970 = vmatpush1.bf16.msra.mxu0 %v16627_v37  ;;  %10600 = vmatprep.subr.bf16.mxu1 %v16632_v33  ;;  %v16665_v37 = vld [vmem:[#allocation7 + $0x1afc] ss:$52 sps:$4 sm:$0xff]  }
 0x537   :  { %10971 = vmatprep.subr.bf16.mxu0 %v16635_v48  ;;  %v16660_v33 = vld [vmem:[#allocation7 + $0x1af0] ss:$52 sps:$4 sm:$0xff]   ;;  %v16663_v48 = vld [vmem:[#allocation7 + $0x1af8] ss:$52 sps:$4 sm:$0xff]  }
 0x539   :  { %10601 = vmatpush1.bf16.msra.mxu1 %v16630_v54  ;;  %v16668_v54 = vld [vmem:[#allocation7 + $0x1b5c] ss:$52 sps:$4 sm:$0xff]  }
 0x53a   :  { %10972 = vmatpush1.bf16.msra.mxu0 %v16633_v6  ;;  %10602 = vmatprep.subr.bf16.mxu1 %v16638_v38  ;;  %v16671_v6 = vld [vmem:[#allocation7 + $0x1b64] ss:$52 sps:$4 sm:$0xff]  }
 0x53b   :  { %10973 = vmatprep.subr.bf16.mxu0 %v16641_v46  ;;  %v16666_v38 = vld [vmem:[#allocation7 + $0x1b58] ss:$52 sps:$4 sm:$0xff]   ;;  %v16669_v46 = vld [vmem:[#allocation7 + $0x1b60] ss:$52 sps:$4 sm:$0xff]  }
 0x53d   :  { %10603 = vmatpush1.bf16.msra.mxu1 %v16636_v14  ;;  %v16674_v14 = vld [vmem:[#allocation7 + $0x1bc4] ss:$52 sps:$4 sm:$0xff]  }
 0x53e   :  { %10974 = vmatpush1.bf16.msra.mxu0 %v16639_v18  ;;  %10604 = vmatprep.subr.bf16.mxu1 %v16644_v29  ;;  %v16677_v18 = vld [vmem:[#allocation7 + $0x1bcc] ss:$52 sps:$4 sm:$0xff]  }
 0x53f   :  { %10975 = vmatprep.subr.bf16.mxu0 %v16647_v61  ;;  %v16672_v29 = vld [vmem:[#allocation7 + $0x1bc0] ss:$52 sps:$4 sm:$0xff]   ;;  %v16675_v61 = vld [vmem:[#allocation7 + $0x1bc8] ss:$52 sps:$4 sm:$0xff]  }
 0x541   :  { %10605 = vmatpush1.bf16.msra.mxu1 %v16642_v45  ;;  %v16680_v45 = vld [vmem:[#allocation7 + $0x1c2c] ss:$52 sps:$4 sm:$0xff]  }
 0x542   :  { %10976 = vmatpush1.bf16.msra.mxu0 %v16645_v35  ;;  %10627 = vmatprep.subr.bf16.mxu1 %v16650_v40  ;;  %v16683_v35 = vld [vmem:[#allocation7 + $0x1c34] ss:$52 sps:$4 sm:$0xff]  }
 0x543   :  { %10998 = vmatprep.subr.bf16.mxu0 %v16653_v36  ;;  %v16678_v40 = vld [vmem:[#allocation7 + $0x1c28] ss:$52 sps:$4 sm:$0xff]   ;;  %v16681_v36 = vld [vmem:[#allocation7 + $0x1c30] ss:$52 sps:$4 sm:$0xff]  }
 0x544   :  { %10607 = vmatmul.mubr.bf16.vlgmr.msra.gmra.mrb[40].mxu1 %v17545_v3 }
 0x545   :  { %10978 = vmatmul.mubr.bf16.vlgmr.msra.gmra.mrb[44].mxu0 %v17545_v3  ;;  %10616 = vmatprep.mubr.bf16.mxu1 %v17579_v5 }
 0x546   :  { %10628 = vmatpush1.bf16.msra.mxu1 %v16648_v57  ;;  %10987 = vmatprep.mubr.bf16.mxu0 %v17579_v5  ;;  %v16686_v57 = vld [vmem:[#allocation7 + $0x1c94] ss:$52 sps:$4 sm:$0xff]  }
 0x547   :  { %10999 = vmatpush1.bf16.msra.mxu0 %v16651_v47  ;;  %10629 = vmatprep.subr.bf16.mxu1 %v16656_v58  ;;  %v16689_v47 = vld [vmem:[#allocation7 + $0x1c9c] ss:$52 sps:$4 sm:$0xff]  }
 0x548   :  { %11000 = vmatprep.subr.bf16.mxu0 %v16659_v42  ;;  %v16684_v58 = vld [vmem:[#allocation7 + $0x1c90] ss:$52 sps:$4 sm:$0xff]   ;;  %v16687_v42 = vld [vmem:[#allocation7 + $0x1c98] ss:$52 sps:$4 sm:$0xff]  }
 0x54a   :  { %10630 = vmatpush1.bf16.msra.mxu1 %v16654_v13  ;;  %v16692_v13 = vld [vmem:[#allocation7 + $0x1cfc] ss:$52 sps:$4 sm:$0xff]  }
 0x54b   :  { %11001 = vmatpush1.bf16.msra.mxu0 %v16657_v10  ;;  %10631 = vmatprep.subr.bf16.mxu1 %v16662_v12  ;;  %v16695_v10 = vld [vmem:[#allocation7 + $0x1d04] ss:$52 sps:$4 sm:$0xff]  }
 0x54c   :  { %10617 = vmatmul.mubr.bf16.gmra.mrb[44].mxu1 %v17577_v63  ;;  %11002 = vmatprep.subr.bf16.mxu0 %v16665_v37  ;;  %v16690_v12 = vld [vmem:[#allocation7 + $0x1cf8] ss:$52 sps:$4 sm:$0xff]   ;;  %v16693_v37 = vld [vmem:[#allocation7 + $0x1d00] ss:$52 sps:$4 sm:$0xff]  }
 0x54d   :  { %10988 = vmatmul.mubr.bf16.gmra.mrb[48].mxu0 %v17577_v63  ;;  %10659 = vmatprep.mubr.bf16.mxu1 %v17585_v21 }
 0x54e   :  { %10632 = vmatpush1.bf16.msra.mxu1 %v16660_v33  ;;  %11030 = vmatprep.mubr.bf16.mxu0 %v17585_v21  ;;  %v16698_v33 = vld [vmem:[#allocation7 + $0x1d64] ss:$52 sps:$4 sm:$0xff]  }
 0x54f   :  { %11003 = vmatpush1.bf16.msra.mxu0 %v16663_v48  ;;  %10633 = vmatprep.subr.bf16.mxu1 %v16668_v54  ;;  %v16701_v48 = vld [vmem:[#allocation7 + $0x1d6c] ss:$52 sps:$4 sm:$0xff]  }
 0x550   :  { %11004 = vmatprep.subr.bf16.mxu0 %v16671_v6  ;;  %v16696_v54 = vld [vmem:[#allocation7 + $0x1d60] ss:$52 sps:$4 sm:$0xff]   ;;  %v16699_v6 = vld [vmem:[#allocation7 + $0x1d68] ss:$52 sps:$4 sm:$0xff]  }
 0x552   :  { %10634 = vmatpush1.bf16.msra.mxu1 %v16666_v38  ;;  %v16704_v38 = vld [vmem:[#allocation7 + $0x1dcc] ss:$52 sps:$4 sm:$0xff]  }
 0x553   :  { %11005 = vmatpush1.bf16.msra.mxu0 %v16669_v46  ;;  %10635 = vmatprep.subr.bf16.mxu1 %v16674_v14  ;;  %v16707_v46 = vld [vmem:[#allocation7 + $0x1dd4] ss:$52 sps:$4 sm:$0xff]  }
 0x554   :  { %11006 = vmatprep.subr.bf16.mxu0 %v16677_v18  ;;  %v16702_v14 = vld [vmem:[#allocation7 + $0x1dc8] ss:$52 sps:$4 sm:$0xff]   ;;  %v16705_v18 = vld [vmem:[#allocation7 + $0x1dd0] ss:$52 sps:$4 sm:$0xff]  }
 0x556   :  { %10636 = vmatpush1.bf16.msra.mxu1 %v16672_v29  ;;  %v16710_v29 = vld [vmem:[#allocation7 + $0x1e34] ss:$52 sps:$4 sm:$0xff]  }
 0x557   :  { %11007 = vmatpush1.bf16.msra.mxu0 %v16675_v61  ;;  %10637 = vmatprep.subr.bf16.mxu1 %v16680_v45  ;;  %v16713_v61 = vld [vmem:[#allocation7 + $0x1e3c] ss:$52 sps:$4 sm:$0xff]  }
 0x558   :  { %11008 = vmatprep.subr.bf16.mxu0 %v16683_v35  ;;  %v16708_v45 = vld [vmem:[#allocation7 + $0x1e30] ss:$52 sps:$4 sm:$0xff]   ;;  %v16711_v35 = vld [vmem:[#allocation7 + $0x1e38] ss:$52 sps:$4 sm:$0xff]  }
 0x55a   :  { %10638 = vmatpush1.bf16.msra.mxu1 %v16678_v40  ;;  %v16716_v40 = vld [vmem:[#allocation7 + $0x1e9c] ss:$52 sps:$4 sm:$0xff]  }
 0x55b   :  { %11009 = vmatpush1.bf16.msra.mxu0 %v16681_v36  ;;  %10639 = vmatprep.subr.bf16.mxu1 %v16686_v57  ;;  %v16719_v36 = vld [vmem:[#allocation7 + $0x1ea4] ss:$52 sps:$4 sm:$0xff]  }
 0x55c   :  { %11010 = vmatprep.subr.bf16.mxu0 %v16689_v47  ;;  %v16714_v57 = vld [vmem:[#allocation7 + $0x1e98] ss:$52 sps:$4 sm:$0xff]   ;;  %v16717_v47 = vld [vmem:[#allocation7 + $0x1ea0] ss:$52 sps:$4 sm:$0xff]  }
 0x55e   :  { %10640 = vmatpush1.bf16.msra.mxu1 %v16684_v58  ;;  %v16722_v58 = vld [vmem:[#allocation7 + $0x1f04] ss:$52 sps:$4 sm:$0xff]  }
 0x55f   :  { %11011 = vmatpush1.bf16.msra.mxu0 %v16687_v42  ;;  %10641 = vmatprep.subr.bf16.mxu1 %v16692_v13  ;;  %v16725_v42 = vld [vmem:[#allocation7 + $0x1f0c] ss:$52 sps:$4 sm:$0xff]  }
 0x560   :  { %11012 = vmatprep.subr.bf16.mxu0 %v16695_v10  ;;  %v16720_v13 = vld [vmem:[#allocation7 + $0x1f00] ss:$52 sps:$4 sm:$0xff]   ;;  %v16723_v10 = vld [vmem:[#allocation7 + $0x1f08] ss:$52 sps:$4 sm:$0xff]  }
 0x562   :  { %10642 = vmatpush1.bf16.msra.mxu1 %v16690_v12  ;;  %v16728_v12 = vld [vmem:[#allocation7 + $0x1f6c] ss:$52 sps:$4 sm:$0xff]  }
 0x563   :  { %11013 = vmatpush1.bf16.msra.mxu0 %v16693_v37  ;;  %10643 = vmatprep.subr.bf16.mxu1 %v16698_v33  ;;  %v16731_v37 = vld [vmem:[#allocation7 + $0x1f74] ss:$52 sps:$4 sm:$0xff]  }
 0x564   :  { %11014 = vmatprep.subr.bf16.mxu0 %v16701_v48  ;;  %v16726_v33 = vld [vmem:[#allocation7 + $0x1f68] ss:$52 sps:$4 sm:$0xff]   ;;  %v16729_v48 = vld [vmem:[#allocation7 + $0x1f70] ss:$52 sps:$4 sm:$0xff]  }
 0x566   :  { %10644 = vmatpush1.bf16.msra.mxu1 %v16696_v54  ;;  %v16734_v54 = vld [vmem:[#allocation7 + $0x1fd4] ss:$52 sps:$4 sm:$0xff]  }
 0x567   :  { %11015 = vmatpush1.bf16.msra.mxu0 %v16699_v6  ;;  %10645 = vmatprep.subr.bf16.mxu1 %v16704_v38  ;;  %v16737_v6 = vld [vmem:[#allocation7 + $0x1fdc] ss:$52 sps:$4 sm:$0xff]  }
 0x568   :  { %11016 = vmatprep.subr.bf16.mxu0 %v16707_v46  ;;  %v16732_v38 = vld [vmem:[#allocation7 + $0x1fd0] ss:$52 sps:$4 sm:$0xff]   ;;  %v16735_v46 = vld [vmem:[#allocation7 + $0x1fd8] ss:$52 sps:$4 sm:$0xff]  }
 0x56a   :  { %10646 = vmatpush1.bf16.msra.mxu1 %v16702_v14  ;;  %v16740_v14 = vld [vmem:[#allocation7 + $0x203c] ss:$52 sps:$4 sm:$0xff]  }
 0x56b   :  { %11017 = vmatpush1.bf16.msra.mxu0 %v16705_v18  ;;  %10647 = vmatprep.subr.bf16.mxu1 %v16710_v29  ;;  %v16743_v18 = vld [vmem:[#allocation7 + $0x2044] ss:$52 sps:$4 sm:$0xff]  }
 0x56c   :  { %11018 = vmatprep.subr.bf16.mxu0 %v16713_v61  ;;  %v16738_v29 = vld [vmem:[#allocation7 + $0x2038] ss:$52 sps:$4 sm:$0xff]   ;;  %v16741_v61 = vld [vmem:[#allocation7 + $0x2040] ss:$52 sps:$4 sm:$0xff]  }
 0x56e   :  { %10648 = vmatpush1.bf16.msra.mxu1 %v16708_v45  ;;  %v16746_v45 = vld [vmem:[#allocation7 + $0x20a4] ss:$52 sps:$4 sm:$0xff]  }
 0x56f   :  { %11019 = vmatpush1.bf16.msra.mxu0 %v16711_v35  ;;  %10649 = vmatprep.subr.bf16.mxu1 %v16716_v40  ;;  %v16749_v35 = vld [vmem:[#allocation7 + $0x20ac] ss:$52 sps:$4 sm:$0xff]  }
 0x570   :  { %11020 = vmatprep.subr.bf16.mxu0 %v16719_v36  ;;  %v16744_v40 = vld [vmem:[#allocation7 + $0x20a0] ss:$52 sps:$4 sm:$0xff]   ;;  %v16747_v36 = vld [vmem:[#allocation7 + $0x20a8] ss:$52 sps:$4 sm:$0xff]  }
 0x572   :  { %10650 = vmatpush1.bf16.msra.mxu1 %v16714_v57  ;;  %v16752_v57 = vld [vmem:[#allocation7 + $0x210c] ss:$52 sps:$4 sm:$0xff]  }
 0x573   :  { %11021 = vmatpush1.bf16.msra.mxu0 %v16717_v47  ;;  %10651 = vmatprep.subr.bf16.mxu1 %v16722_v58  ;;  %v16755_v47 = vld [vmem:[#allocation7 + $0x2114] ss:$52 sps:$4 sm:$0xff]  }
 0x574   :  { %11022 = vmatprep.subr.bf16.mxu0 %v16725_v42  ;;  %v16750_v58 = vld [vmem:[#allocation7 + $0x2108] ss:$52 sps:$4 sm:$0xff]   ;;  %v16753_v42 = vld [vmem:[#allocation7 + $0x2110] ss:$52 sps:$4 sm:$0xff]  }
 0x576   :  { %10652 = vmatpush1.bf16.msra.mxu1 %v16720_v13  ;;  %v16758_v13 = vld [vmem:[#allocation7 + $0x2174] ss:$52 sps:$4 sm:$0xff]  }
 0x577   :  { %11023 = vmatpush1.bf16.msra.mxu0 %v16723_v10  ;;  %10653 = vmatprep.subr.bf16.mxu1 %v16728_v12  ;;  %v16761_v10 = vld [vmem:[#allocation7 + $0x217c] ss:$52 sps:$4 sm:$0xff]  }
 0x578   :  { %11024 = vmatprep.subr.bf16.mxu0 %v16731_v37  ;;  %v16756_v12 = vld [vmem:[#allocation7 + $0x2170] ss:$52 sps:$4 sm:$0xff]   ;;  %v16759_v37 = vld [vmem:[#allocation7 + $0x2178] ss:$52 sps:$4 sm:$0xff]  }
 0x57a   :  { %10654 = vmatpush1.bf16.msra.mxu1 %v16726_v33  ;;  %v16764_v33 = vld [vmem:[#allocation7 + $0x21dc] ss:$52 sps:$4 sm:$0xff]  }
 0x57b   :  { %11025 = vmatpush1.bf16.msra.mxu0 %v16729_v48  ;;  %10655 = vmatprep.subr.bf16.mxu1 %v16734_v54  ;;  %v16767_v48 = vld [vmem:[#allocation7 + $0x21e4] ss:$52 sps:$4 sm:$0xff]  }
 0x57c   :  { %11026 = vmatprep.subr.bf16.mxu0 %v16737_v6  ;;  %v16762_v54 = vld [vmem:[#allocation7 + $0x21d8] ss:$52 sps:$4 sm:$0xff]   ;;  %v16765_v6 = vld [vmem:[#allocation7 + $0x21e0] ss:$52 sps:$4 sm:$0xff]  }
 0x57e   :  { %10656 = vmatpush1.bf16.msra.mxu1 %v16732_v38  ;;  %v16770_v38 = vld [vmem:[#allocation7 + $0x2244] ss:$52 sps:$4 sm:$0xff]  }
 0x57f   :  { %11027 = vmatpush1.bf16.msra.mxu0 %v16735_v46  ;;  %10657 = vmatprep.subr.bf16.mxu1 %v16740_v14  ;;  %v16773_v46 = vld [vmem:[#allocation7 + $0x224c] ss:$52 sps:$4 sm:$0xff]  }
 0x580   :  { %11028 = vmatprep.subr.bf16.mxu0 %v16743_v18  ;;  %v16768_v14 = vld [vmem:[#allocation7 + $0x2240] ss:$52 sps:$4 sm:$0xff]   ;;  %v16771_v18 = vld [vmem:[#allocation7 + $0x2248] ss:$52 sps:$4 sm:$0xff]  }
 0x582   :  { %10658 = vmatpush1.bf16.msra.mxu1 %v16738_v29  ;;  %v16776_v29 = vld [vmem:[#allocation7 + $0x22ac] ss:$52 sps:$4 sm:$0xff]  }
 0x583   :  { %11029 = vmatpush1.bf16.msra.mxu0 %v16741_v61  ;;  %10680 = vmatprep.subr.bf16.mxu1 %v16746_v45  ;;  %v16779_v61 = vld [vmem:[#allocation7 + $0x22b4] ss:$52 sps:$4 sm:$0xff]  }
 0x584   :  { %11051 = vmatprep.subr.bf16.mxu0 %v16749_v35  ;;  %v16774_v45 = vld [vmem:[#allocation7 + $0x22a8] ss:$52 sps:$4 sm:$0xff]   ;;  %v16777_v35 = vld [vmem:[#allocation7 + $0x22b0] ss:$52 sps:$4 sm:$0xff]  }
 0x585   :  { %10660 = vmatmul.mubr.bf16.vlgmr.msra.gmra.mrb[40].mxu1 %v17582_v17 }
 0x586   :  { %11031 = vmatmul.mubr.bf16.vlgmr.msra.gmra.mrb[44].mxu0 %v17582_v17  ;;  %10669 = vmatprep.mubr.bf16.mxu1 %v17601_v19 }
 0x587   :  { %10681 = vmatpush1.bf16.msra.mxu1 %v16744_v40  ;;  %11040 = vmatprep.mubr.bf16.mxu0 %v17601_v19  ;;  %v16782_v40 = vld [vmem:[#allocation7 + $0x2314] ss:$52 sps:$4 sm:$0xff]  }
 0x588   :  { %11052 = vmatpush1.bf16.msra.mxu0 %v16747_v36  ;;  %10682 = vmatprep.subr.bf16.mxu1 %v16752_v57  ;;  %v16785_v36 = vld [vmem:[#allocation7 + $0x231c] ss:$52 sps:$4 sm:$0xff]  }
 0x589   :  { %11053 = vmatprep.subr.bf16.mxu0 %v16755_v47  ;;  %v16780_v57 = vld [vmem:[#allocation7 + $0x2310] ss:$52 sps:$4 sm:$0xff]   ;;  %v16783_v47 = vld [vmem:[#allocation7 + $0x2318] ss:$52 sps:$4 sm:$0xff]  }
 0x58b   :  { %10683 = vmatpush1.bf16.msra.mxu1 %v16750_v58  ;;  %v16788_v58 = vld [vmem:[#allocation7 + $0x237c] ss:$52 sps:$4 sm:$0xff]  }
 0x58c   :  { %11054 = vmatpush1.bf16.msra.mxu0 %v16753_v42  ;;  %10684 = vmatprep.subr.bf16.mxu1 %v16758_v13  ;;  %v16791_v42 = vld [vmem:[#allocation7 + $0x2384] ss:$52 sps:$4 sm:$0xff]  }
 0x58d   :  { %10670 = vmatmul.mubr.bf16.gmra.mrb[44].mxu1 %v17599_v41  ;;  %11055 = vmatprep.subr.bf16.mxu0 %v16761_v10  ;;  %v16786_v13 = vld [vmem:[#allocation7 + $0x2378] ss:$52 sps:$4 sm:$0xff]   ;;  %v16789_v10 = vld [vmem:[#allocation7 + $0x2380] ss:$52 sps:$4 sm:$0xff]  }
 0x58e   :  { %11041 = vmatmul.mubr.bf16.gmra.mrb[48].mxu0 %v17599_v41  ;;  %10712 = vmatprep.mubr.bf16.mxu1 %v17595_v7 }
 0x58f   :  { %10685 = vmatpush1.bf16.msra.mxu1 %v16756_v12  ;;  %11083 = vmatprep.mubr.bf16.mxu0 %v17595_v7  ;;  %v16794_v12 = vld [vmem:[#allocation7 + $0x23e4] ss:$52 sps:$4 sm:$0xff]  }
 0x590   :  { %11056 = vmatpush1.bf16.msra.mxu0 %v16759_v37  ;;  %10686 = vmatprep.subr.bf16.mxu1 %v16764_v33  ;;  %v16797_v37 = vld [vmem:[#allocation7 + $0x23ec] ss:$52 sps:$4 sm:$0xff]  }
 0x591   :  { %11057 = vmatprep.subr.bf16.mxu0 %v16767_v48  ;;  %v16792_v33 = vld [vmem:[#allocation7 + $0x23e0] ss:$52 sps:$4 sm:$0xff]   ;;  %v16795_v48 = vld [vmem:[#allocation7 + $0x23e8] ss:$52 sps:$4 sm:$0xff]  }
 0x593   :  { %10687 = vmatpush1.bf16.msra.mxu1 %v16762_v54  ;;  %v16800_v54 = vld [vmem:[#allocation7 + $0x244c] ss:$52 sps:$4 sm:$0xff]  }
 0x594   :  { %11058 = vmatpush1.bf16.msra.mxu0 %v16765_v6  ;;  %10688 = vmatprep.subr.bf16.mxu1 %v16770_v38  ;;  %v16803_v6 = vld [vmem:[#allocation7 + $0x2454] ss:$52 sps:$4 sm:$0xff]  }
 0x595   :  { %11059 = vmatprep.subr.bf16.mxu0 %v16773_v46  ;;  %v16798_v38 = vld [vmem:[#allocation7 + $0x2448] ss:$52 sps:$4 sm:$0xff]   ;;  %v16801_v46 = vld [vmem:[#allocation7 + $0x2450] ss:$52 sps:$4 sm:$0xff]  }
 0x597   :  { %10689 = vmatpush1.bf16.msra.mxu1 %v16768_v14  ;;  %v16806_v14 = vld [vmem:[#allocation7 + $0x24b4] ss:$52 sps:$4 sm:$0xff]  }
 0x598   :  { %11060 = vmatpush1.bf16.msra.mxu0 %v16771_v18  ;;  %10690 = vmatprep.subr.bf16.mxu1 %v16776_v29  ;;  %v16809_v18 = vld [vmem:[#allocation7 + $0x24bc] ss:$52 sps:$4 sm:$0xff]  }
 0x599   :  { %11061 = vmatprep.subr.bf16.mxu0 %v16779_v61  ;;  %v16804_v29 = vld [vmem:[#allocation7 + $0x24b0] ss:$52 sps:$4 sm:$0xff]   ;;  %v16807_v61 = vld [vmem:[#allocation7 + $0x24b8] ss:$52 sps:$4 sm:$0xff]  }
 0x59b   :  { %10691 = vmatpush1.bf16.msra.mxu1 %v16774_v45  ;;  %v16812_v45 = vld [vmem:[#allocation7 + $0x251c] ss:$52 sps:$4 sm:$0xff]  }
 0x59c   :  { %11062 = vmatpush1.bf16.msra.mxu0 %v16777_v35  ;;  %10692 = vmatprep.subr.bf16.mxu1 %v16782_v40  ;;  %v16815_v35 = vld [vmem:[#allocation7 + $0x2524] ss:$52 sps:$4 sm:$0xff]  }
 0x59d   :  { %11063 = vmatprep.subr.bf16.mxu0 %v16785_v36  ;;  %v16810_v40 = vld [vmem:[#allocation7 + $0x2518] ss:$52 sps:$4 sm:$0xff]   ;;  %v16813_v36 = vld [vmem:[#allocation7 + $0x2520] ss:$52 sps:$4 sm:$0xff]  }
 0x59f   :  { %10693 = vmatpush1.bf16.msra.mxu1 %v16780_v57  ;;  %v16818_v57 = vld [vmem:[#allocation7 + $0x2584] ss:$52 sps:$4 sm:$0xff]  }
 0x5a0   :  { %11064 = vmatpush1.bf16.msra.mxu0 %v16783_v47  ;;  %10694 = vmatprep.subr.bf16.mxu1 %v16788_v58  ;;  %v16821_v47 = vld [vmem:[#allocation7 + $0x258c] ss:$52 sps:$4 sm:$0xff]  }
 0x5a1   :  { %11065 = vmatprep.subr.bf16.mxu0 %v16791_v42  ;;  %v16816_v58 = vld [vmem:[#allocation7 + $0x2580] ss:$52 sps:$4 sm:$0xff]   ;;  %v16819_v42 = vld [vmem:[#allocation7 + $0x2588] ss:$52 sps:$4 sm:$0xff]  }
 0x5a3   :  { %10695 = vmatpush1.bf16.msra.mxu1 %v16786_v13  ;;  %v16824_v13 = vld [vmem:[#allocation7 + $0x25ec] ss:$52 sps:$4 sm:$0xff]  }
 0x5a4   :  { %11066 = vmatpush1.bf16.msra.mxu0 %v16789_v10  ;;  %10696 = vmatprep.subr.bf16.mxu1 %v16794_v12  ;;  %v16827_v10 = vld [vmem:[#allocation7 + $0x25f4] ss:$52 sps:$4 sm:$0xff]  }
 0x5a5   :  { %11067 = vmatprep.subr.bf16.mxu0 %v16797_v37  ;;  %v16822_v12 = vld [vmem:[#allocation7 + $0x25e8] ss:$52 sps:$4 sm:$0xff]   ;;  %v16825_v37 = vld [vmem:[#allocation7 + $0x25f0] ss:$52 sps:$4 sm:$0xff]  }
 0x5a7   :  { %10697 = vmatpush1.bf16.msra.mxu1 %v16792_v33  ;;  %v16830_v33 = vld [vmem:[#allocation7 + $0x2654] ss:$52 sps:$4 sm:$0xff]  }
 0x5a8   :  { %11068 = vmatpush1.bf16.msra.mxu0 %v16795_v48  ;;  %10698 = vmatprep.subr.bf16.mxu1 %v16800_v54  ;;  %v16833_v48 = vld [vmem:[#allocation7 + $0x265c] ss:$52 sps:$4 sm:$0xff]  }
 0x5a9   :  { %11069 = vmatprep.subr.bf16.mxu0 %v16803_v6  ;;  %v16828_v54 = vld [vmem:[#allocation7 + $0x2650] ss:$52 sps:$4 sm:$0xff]   ;;  %v16831_v6 = vld [vmem:[#allocation7 + $0x2658] ss:$52 sps:$4 sm:$0xff]  }
 0x5ab   :  { %10699 = vmatpush1.bf16.msra.mxu1 %v16798_v38  ;;  %v16836_v38 = vld [vmem:[#allocation7 + $0x26bc] ss:$52 sps:$4 sm:$0xff]  }
 0x5ac   :  { %11070 = vmatpush1.bf16.msra.mxu0 %v16801_v46  ;;  %10700 = vmatprep.subr.bf16.mxu1 %v16806_v14  ;;  %v16839_v46 = vld [vmem:[#allocation7 + $0x26c4] ss:$52 sps:$4 sm:$0xff]  }
 0x5ad   :  { %11071 = vmatprep.subr.bf16.mxu0 %v16809_v18  ;;  %v16834_v14 = vld [vmem:[#allocation7 + $0x26b8] ss:$52 sps:$4 sm:$0xff]   ;;  %v16837_v18 = vld [vmem:[#allocation7 + $0x26c0] ss:$52 sps:$4 sm:$0xff]  }
 0x5af   :  { %10701 = vmatpush1.bf16.msra.mxu1 %v16804_v29  ;;  %v16842_v29 = vld [vmem:[#allocation7 + $0x2724] ss:$52 sps:$4 sm:$0xff]  }
 0x5b0   :  { %11072 = vmatpush1.bf16.msra.mxu0 %v16807_v61  ;;  %10702 = vmatprep.subr.bf16.mxu1 %v16812_v45  ;;  %v16845_v61 = vld [vmem:[#allocation7 + $0x272c] ss:$52 sps:$4 sm:$0xff]  }
 0x5b1   :  { %11073 = vmatprep.subr.bf16.mxu0 %v16815_v35  ;;  %v16840_v45 = vld [vmem:[#allocation7 + $0x2720] ss:$52 sps:$4 sm:$0xff]   ;;  %v16843_v35 = vld [vmem:[#allocation7 + $0x2728] ss:$52 sps:$4 sm:$0xff]  }
 0x5b3   :  { %10703 = vmatpush1.bf16.msra.mxu1 %v16810_v40  ;;  %v16848_v40 = vld [vmem:[#allocation7 + $0x278c] ss:$52 sps:$4 sm:$0xff]  }
 0x5b4   :  { %11074 = vmatpush1.bf16.msra.mxu0 %v16813_v36  ;;  %10704 = vmatprep.subr.bf16.mxu1 %v16818_v57  ;;  %v16851_v36 = vld [vmem:[#allocation7 + $0x2794] ss:$52 sps:$4 sm:$0xff]  }
 0x5b5   :  { %11075 = vmatprep.subr.bf16.mxu0 %v16821_v47  ;;  %v16846_v57 = vld [vmem:[#allocation7 + $0x2788] ss:$52 sps:$4 sm:$0xff]   ;;  %v16849_v47 = vld [vmem:[#allocation7 + $0x2790] ss:$52 sps:$4 sm:$0xff]  }
 0x5b7   :  { %10705 = vmatpush1.bf16.msra.mxu1 %v16816_v58  ;;  %v16854_v58 = vld [vmem:[#allocation7 + $0x27f4] ss:$52 sps:$4 sm:$0xff]  }
 0x5b8   :  { %11076 = vmatpush1.bf16.msra.mxu0 %v16819_v42  ;;  %10706 = vmatprep.subr.bf16.mxu1 %v16824_v13  ;;  %v16857_v42 = vld [vmem:[#allocation7 + $0x27fc] ss:$52 sps:$4 sm:$0xff]  }
 0x5b9   :  { %11077 = vmatprep.subr.bf16.mxu0 %v16827_v10  ;;  %v16852_v13 = vld [vmem:[#allocation7 + $0x27f0] ss:$52 sps:$4 sm:$0xff]   ;;  %v16855_v10 = vld [vmem:[#allocation7 + $0x27f8] ss:$52 sps:$4 sm:$0xff]  }
 0x5bb   :  { %10707 = vmatpush1.bf16.msra.mxu1 %v16822_v12  ;;  %v16860_v12 = vld [vmem:[#allocation7 + $0x285c] ss:$52 sps:$4 sm:$0xff]  }
 0x5bc   :  { %11078 = vmatpush1.bf16.msra.mxu0 %v16825_v37  ;;  %10708 = vmatprep.subr.bf16.mxu1 %v16830_v33  ;;  %v16863_v37 = vld [vmem:[#allocation7 + $0x2864] ss:$52 sps:$4 sm:$0xff]   ;;  %v18026_v33 = vmov 0  }
 0x5bd   :  { %11079 = vmatprep.subr.bf16.mxu0 %v16833_v48  ;;  %v16858_v48 = vld [vmem:[#allocation7 + $0x2858] ss:$52 sps:$4 sm:$0xff]  }
 0x5bf   :  { %10709 = vmatpush1.bf16.msra.mxu1 %v16828_v54  ;;  %v16861_v54 = vld [vmem:[#allocation7 + $0x2860] ss:$52 sps:$4 sm:$0xff]  }
 0x5c0   :  { %11080 = vmatpush1.bf16.msra.mxu0 %v16831_v6  ;;  %10710 = vmatprep.subr.bf16.mxu1 %v16836_v38  ;;  %v16864_v6 = vld [vmem:[#allocation7 + $0x370] ss:$52 sps:$4 sm:$0xff]  }
 0x5c1   :  { %11081 = vmatprep.subr.bf16.mxu0 %v16839_v46  ;;  %v16865_v38 = vld [vmem:[#allocation7 + $0x9f0] ss:$52 sps:$4 sm:$0xff]  }
 0x5c2   :  { %v16866_v46 = vld [vmem:[#allocation7 + $0x30] ss:$52 sps:$4 sm:$0xff]  }
 0x5c3   :  { %10711 = vmatpush1.bf16.msra.mxu1 %v16834_v14  ;;  %v16867_v14 = vld [vmem:[#allocation7 + $0x6b0] ss:$52 sps:$4 sm:$0xff]  }
 0x5c4   :  { %11082 = vmatpush1.bf16.msra.mxu0 %v16837_v18  ;;  %10733 = vmatprep.subr.bf16.mxu1 %v16842_v29  ;;  %v16868_v18 = vld [vmem:[#allocation7 + $0x3d8] ss:$52 sps:$4 sm:$0xff]  }
 0x5c5   :  { %11104 = vmatprep.subr.bf16.mxu0 %v16845_v61  ;;  %v16869_v29 = vld [vmem:[#allocation7 + $0xa58] ss:$52 sps:$4 sm:$0xff]  }
 0x5c6   :  { %10713 = vmatmul.mubr.bf16.vlgmr.msra.gmra.mrb[40].mxu1 %v17593_v2  ;;  %v16870_v61 = vld [vmem:[#allocation7 + $0x98] ss:$52 sps:$4 sm:$0xff]  }
 0x5c7   :  { %11084 = vmatmul.mubr.bf16.vlgmr.msra.gmra.mrb[44].mxu0 %v17593_v2  ;;  %10722 = vmatprep.mubr.bf16.mxu1 %v17625_v53 }
 0x5c8   :  { %10734 = vmatpush1.bf16.msra.mxu1 %v16840_v45  ;;  %11093 = vmatprep.mubr.bf16.mxu0 %v17625_v53  ;;  %v16871_v45 = vld [vmem:[#allocation7 + $0x718] ss:$52 sps:$4 sm:$0xff]  }
 0x5c9   :  { %11105 = vmatpush1.bf16.msra.mxu0 %v16843_v35  ;;  %10735 = vmatprep.subr.bf16.mxu1 %v16848_v40  ;;  %v16872_v35 = vld [vmem:[#allocation7 + $0x440] ss:$52 sps:$4 sm:$0xff]  }
 0x5ca   :  { %11106 = vmatprep.subr.bf16.mxu0 %v16851_v36  ;;  %v16873_v40 = vld [vmem:[#allocation7 + $0xac0] ss:$52 sps:$4 sm:$0xff]  }
 0x5cb   :  { %v16874_v36 = vld [vmem:[#allocation7 + $0x100] ss:$52 sps:$4 sm:$0xff]  }
 0x5cc   :  { %10736 = vmatpush1.bf16.msra.mxu1 %v16846_v57  ;;  %v16875_v57 = vld [vmem:[#allocation7 + $0x780] ss:$52 sps:$4 sm:$0xff]  }
 0x5cd   :  { %11107 = vmatpush1.bf16.msra.mxu0 %v16849_v47  ;;  %10737 = vmatprep.subr.bf16.mxu1 %v16854_v58  ;;  %v16876_v47 = vld [vmem:[#allocation7 + $0x4a8] ss:$52 sps:$4 sm:$0xff]  }
 0x5ce   :  { %10723 = vmatmul.mubr.bf16.gmra.mrb[44].mxu1 %v17623_v51  ;;  %11108 = vmatprep.subr.bf16.mxu0 %v16857_v42  ;;  %v16877_v58 = vld [vmem:[#allocation7 + $0xb28] ss:$52 sps:$4 sm:$0xff]  }
 0x5cf   :  { %11094 = vmatmul.mubr.bf16.gmra.mrb[48].mxu0 %v17623_v51  ;;  %10765 = vmatprep.mubr.bf16.mxu1 %v18026_v33  ;;  %v16878_v42 = vld [vmem:[#allocation7 + $0x168] ss:$52 sps:$4 sm:$0xff]  }
 0x5d0   :  { %10738 = vmatpush1.bf16.msra.mxu1 %v16852_v13  ;;  %11136 = vmatprep.mubr.bf16.mxu0 %v18026_v33  ;;  %v16879_v13 = vld [vmem:[#allocation7 + $0x7e8] ss:$52 sps:$4 sm:$0xff]  }
 0x5d1   :  { %11109 = vmatpush1.bf16.msra.mxu0 %v16855_v10  ;;  %10739 = vmatprep.subr.bf16.mxu1 %v16860_v12  ;;  %v16880_v10 = vld [vmem:[#allocation7 + $0x510] ss:$52 sps:$4 sm:$0xff]  }
 0x5d2   :  { %11110 = vmatprep.subr.bf16.mxu0 %v16863_v37  ;;  %v16881_v12 = vld [vmem:[#allocation7 + $0xb90] ss:$52 sps:$4 sm:$0xff]  }
 0x5d3   :  { %v16882_v37 = vld [vmem:[#allocation7 + $0x1d0] ss:$52 sps:$4 sm:$0xff]  }
 0x5d4   :  { %10740 = vmatpush1.bf16.msra.mxu1 %v16858_v48  ;;  %v16884_v48 = vld [vmem:[#allocation7 + $0x578] ss:$52 sps:$4 sm:$0xff]  }
 0x5d5   :  { %11111 = vmatpush1.bf16.msra.mxu0 %v16861_v54  ;;  %14293 = vmatprep.subr.bf16.mxu1 %v16864_v6  ;;  %v16885_v54 = vld [vmem:[#allocation7 + $0xbf8] ss:$52 sps:$4 sm:$0xff]  }
 0x5d6   :  { %14321 = vmatprep.subr.bf16.mxu0 %v16865_v38  ;;  %v16886_v6 = vld [vmem:[#allocation7 + $0x238] ss:$52 sps:$4 sm:$0xff]   ;;  %v16888_v38 = vld [vmem:[#allocation7 + $0x5e0] ss:$52 sps:$4 sm:$0xff]  }
 0x5d7   :  { %14180 = vmatmul.mubr.msk.bf16.vlgmr.msra.gmra.mrb[40].mxu1 %vm789_vm1, %v17609_v62 }
 0x5d8   :  { %14182 = vmatmul.mubr.msk.bf16.vlgmr.msra.gmra.mrb[44].mxu0 %vm789_vm1, %v17609_v62  ;;  %14294 = vmatpush3.bf16.msra.mxu1 %v16866_v46  ;;  %v16889_v46 = vld [vmem:[#allocation7 + $0xc60] ss:$52 sps:$4 sm:$0xff]  }
 0x5d9   :  { %14322 = vmatpush3.bf16.msra.mxu0 %v16867_v14  ;;  %14295 = vmatprep.subr.bf16.mxu1 %v16868_v18  ;;  %v16891_v14 = vld [vmem:[#allocation7 + $0x920] ss:$52 sps:$4 sm:$0xff]   ;;  %v16892_v18 = vld [vmem:[#allocation7 + $0x648] ss:$52 sps:$4 sm:$0xff]  }
 0x5da   :  { %14323 = vmatprep.subr.bf16.mxu0 %v16869_v29  ;;  %10775 = vmatprep.mubr.bf16.mxu1 %v18026_v33  ;;  %v16893_v29 = vld [vmem:[#allocation7 + $0xcc8] ss:$52 sps:$4 sm:$0xff]  }
 0x5db   :  { %11146 = vmatprep.mubr.bf16.mxu0 %v18026_v33  ;;  %v16883_v33 = vld [vmem:[#allocation7 + $0x850] ss:$52 sps:$4 sm:$0xff]  }
 0x5dc   :  { %14296 = vmatpush3.bf16.msra.mxu1 %v16870_v61  ;;  %v16894_v61 = vld [vmem:[#allocation7 + $0x308] ss:$52 sps:$4 sm:$0xff]  }
 0x5dd   :  { %14324 = vmatpush3.bf16.msra.mxu0 %v16871_v45  ;;  %14297 = vmatprep.subr.bf16.mxu1 %v16872_v35  ;;  %v16895_v45 = vld [vmem:[#allocation7 + $0x988] ss:$52 sps:$4 sm:$0xff]   ;;  %v16896_v35 = vld [vmem:[#allocation7 + $0x1070] ss:$52 sps:$4 sm:$0xff]  }
 0x5de   :  { %14325 = vmatprep.subr.bf16.mxu0 %v16873_v40  ;;  %v16897_v40 = vld [vmem:[#allocation7 + $0x16f0] ss:$52 sps:$4 sm:$0xff]  }
 0x5df   :  { %14181 = vmatmul.mubr.msk.bf16.gmra.mrb[44].mxu1 %vm789_vm1, %v17606_v8 }
 0x5e0   :  { %14183 = vmatmul.mubr.msk.bf16.gmra.mrb[48].mxu0 %vm789_vm1, %v17606_v8  ;;  %14298 = vmatpush3.bf16.msra.mxu1 %v16874_v36  ;;  %v16898_v36 = vld [vmem:[#allocation7 + $0xd30] ss:$52 sps:$4 sm:$0xff]  }
 0x5e1   :  { %11189 = vmatprep.mubr.bf16.mxu1 %v17472_v1  ;;  %14326 = vmatpush3.bf16.msra.mxu0 %v16875_v57  ;;  %v16887_v1 = vld [vmem:[#allocation7 + $0x8b8] ss:$52 sps:$4 sm:$0xff]   ;;  %v16899_v57 = vld [vmem:[#allocation7 + $0x13b0] ss:$52 sps:$4 sm:$0xff]  }
 0x5e2   :  { %11238 = vmatprep.mubr.bf16.mxu0 %v17486_v28  ;;  %14299 = vmatprep.subr.bf16.mxu1 %v16876_v47  ;;  %v16890_v28 = vld [vmem:[#allocation7 + $0x2a0] ss:$52 sps:$4 sm:$0xff]   ;;  %v16900_v47 = vld [vmem:[#allocation7 + $0x10d8] ss:$52 sps:$4 sm:$0xff]  }
 0x5e3   :  { %14327 = vmatprep.subr.bf16.mxu0 %v16877_v58  ;;  %v16901_v58 = vld [vmem:[#allocation7 + $0x1758] ss:$52 sps:$4 sm:$0xff]  }
 0x5e4   :  { %14300 = vmatpush3.bf16.msra.mxu1 %v16878_v42  ;;  %v16902_v42 = vld [vmem:[#allocation7 + $0xd98] ss:$52 sps:$4 sm:$0xff]  }
 0x5e5   :  { %14328 = vmatpush3.bf16.msra.mxu0 %v16879_v13  ;;  %14301 = vmatprep.subr.bf16.mxu1 %v16880_v10  ;;  %v16903_v13 = vld [vmem:[#allocation7 + $0x1418] ss:$52 sps:$4 sm:$0xff]   ;;  %v16904_v10 = vld [vmem:[#allocation7 + $0x1140] ss:$52 sps:$4 sm:$0xff]  }
 0x5e6   :  { %14329 = vmatprep.subr.bf16.mxu0 %v16881_v12  ;;  %v16905_v12 = vld [vmem:[#allocation7 + $0x17c0] ss:$52 sps:$4 sm:$0xff]  }
 0x5e8   :  { %14302 = vmatpush3.bf16.msra.mxu1 %v16882_v37  ;;  %v16906_v37 = vld [vmem:[#allocation7 + $0xe00] ss:$52 sps:$4 sm:$0xff]  }
 0x5e9   :  { %14330 = vmatpush3.bf16.msra.mxu0 %v16883_v33  ;;  %14303 = vmatprep.subr.bf16.mxu1 %v16884_v48  ;;  %v16908_v33 = vld [vmem:[#allocation7 + $0x11a8] ss:$52 sps:$4 sm:$0xff]   ;;  %v16912_v48 = vld [vmem:[#allocation7 + $0x1210] ss:$52 sps:$4 sm:$0xff]  }
 0x5ea   :  { %14331 = vmatprep.subr.bf16.mxu0 %v16885_v54  ;;  %v16913_v54 = vld [vmem:[#allocation7 + $0x1890] ss:$52 sps:$4 sm:$0xff]  }
 0x5ec   :  { %14304 = vmatpush3.bf16.msra.mxu1 %v16886_v6  ;;  %v16914_v6 = vld [vmem:[#allocation7 + $0xed0] ss:$52 sps:$4 sm:$0xff]  }
 0x5ed   :  { %14332 = vmatpush3.bf16.msra.mxu0 %v16887_v1  ;;  %14305 = vmatprep.subr.bf16.mxu1 %v16888_v38  ;;  %v16916_v1 = vld [vmem:[#allocation7 + $0x1278] ss:$52 sps:$4 sm:$0xff]   ;;  %v16920_v38 = vld [vmem:[#allocation7 + $0x12e0] ss:$52 sps:$4 sm:$0xff]  }
 0x5ee   :  { %14333 = vmatprep.subr.bf16.mxu0 %v16889_v46  ;;  %v16921_v46 = vld [vmem:[#allocation7 + $0x1960] ss:$52 sps:$4 sm:$0xff]  }
 0x5f0   :  { %14306 = vmatpush3.bf16.msra.mxu1 %v16890_v28  ;;  %v16922_v28 = vld [vmem:[#allocation7 + $0xfa0] ss:$52 sps:$4 sm:$0xff]  }
 0x5f1   :  { %14334 = vmatpush3.bf16.msra.mxu0 %v16891_v14  ;;  %14307 = vmatprep.subr.bf16.mxu1 %v16892_v18  ;;  %v16923_v14 = vld [vmem:[#allocation7 + $0x1620] ss:$52 sps:$4 sm:$0xff]   ;;  %v16924_v18 = vld [vmem:[#allocation7 + $0x1348] ss:$52 sps:$4 sm:$0xff]  }
 0x5f2   :  { %14335 = vmatprep.subr.bf16.mxu0 %v16893_v29  ;;  %v16925_v29 = vld [vmem:[#allocation7 + $0x19c8] ss:$52 sps:$4 sm:$0xff]  }
 0x5f4   :  { %14308 = vmatpush3.bf16.msra.mxu1 %v16894_v61  ;;  %v16926_v61 = vld [vmem:[#allocation7 + $0x1008] ss:$52 sps:$4 sm:$0xff]  }
 0x5f5   :  { %14336 = vmatpush3.bf16.msra.mxu0 %v16895_v45  ;;  %14349 = vmatprep.subr.bf16.mxu1 %v16896_v35  ;;  %v16927_v45 = vld [vmem:[#allocation7 + $0x1688] ss:$52 sps:$4 sm:$0xff]   ;;  %v16928_v35 = vld [vmem:[#allocation7 + $0x1d70] ss:$52 sps:$4 sm:$0xff]  }
 0x5f6   :  { %14377 = vmatprep.subr.bf16.mxu0 %v16897_v40  ;;  %v16929_v40 = vld [vmem:[#allocation7 + $0x23f0] ss:$52 sps:$4 sm:$0xff]  }
 0x5f7   :  { %11190 = vmatmul.mubr.bf16.vlgmr.msra.gmra.mrb[48].mxu1 %v17469_v60  ;;  %v16907_v60 = vld [vmem:[#allocation7 + $0x1480] ss:$52 sps:$4 sm:$0xff]  }
 0x5f8   :  { %11239 = vmatmul.mubr.bf16.vlgmr.msra.gmra.mrb[52].mxu0 %v17484_v24  ;;  %11197 = vmatprep.mubr.bf16.mxu1 %v17503_v49  ;;  %v16909_v24 = vld [vmem:[#allocation7 + $0x1828] ss:$52 sps:$4 sm:$0xff]  }
 0x5f9   :  { %11246 = vmatprep.mubr.bf16.mxu0 %v17527_v16  ;;  %14350 = vmatpush3.bf16.msra.mxu1 %v16898_v36  ;;  %v16910_v49 = vld [vmem:[#allocation7 + $0xe68] ss:$52 sps:$4 sm:$0xff]   ;;  %v16930_v36 = vld [vmem:[#allocation7 + $0x1a30] ss:$52 sps:$4 sm:$0xff]  }
 0x5fa   :  { %14378 = vmatpush3.bf16.msra.mxu0 %v16899_v57  ;;  %14351 = vmatprep.subr.bf16.mxu1 %v16900_v47  ;;  %v16911_v16 = vld [vmem:[#allocation7 + $0x14e8] ss:$52 sps:$4 sm:$0xff]   ;;  %v16931_v57 = vld [vmem:[#allocation7 + $0x20b0] ss:$52 sps:$4 sm:$0xff]   ;;  %v16932_v47 = vld [vmem:[#allocation7 + $0x1dd8] ss:$52 sps:$4 sm:$0xff]  }
 0x5fb   :  { %14379 = vmatprep.subr.bf16.mxu0 %v16901_v58  ;;  %v16933_v58 = vld [vmem:[#allocation7 + $0x2458] ss:$52 sps:$4 sm:$0xff]  }
 0x5fd   :  { %14352 = vmatpush3.bf16.msra.mxu1 %v16902_v42  ;;  %v16934_v42 = vld [vmem:[#allocation7 + $0x1a98] ss:$52 sps:$4 sm:$0xff]  }
 0x5fe   :  { %14380 = vmatpush3.bf16.msra.mxu0 %v16903_v13  ;;  %14353 = vmatprep.subr.bf16.mxu1 %v16904_v10  ;;  %v16935_v13 = vld [vmem:[#allocation7 + $0x2118] ss:$52 sps:$4 sm:$0xff]   ;;  %v16936_v10 = vld [vmem:[#allocation7 + $0x1e40] ss:$52 sps:$4 sm:$0xff]  }
 0x5ff   :  { %11198 = vmatmul.mubr.bf16.gmra.mrb[52].mxu1 %v17499_v43  ;;  %14381 = vmatprep.subr.bf16.mxu0 %v16905_v12  ;;  %v16915_v43 = vld [vmem:[#allocation7 + $0x1550] ss:$52 sps:$4 sm:$0xff]   ;;  %v16937_v12 = vld [vmem:[#allocation7 + $0x24c0] ss:$52 sps:$4 sm:$0xff]  }
 0x600   :  { %11247 = vmatmul.mubr.bf16.gmra.mrb[56].mxu0 %v17524_v9  ;;  %11287 = vmatprep.mubr.bf16.mxu1 %v17535_v27  ;;  %v16917_v9 = vld [vmem:[#allocation7 + $0x18f8] ss:$52 sps:$4 sm:$0xff]  }
 0x601   :  { %14354 = vmatpush3.bf16.msra.mxu1 %v16906_v37  ;;  %11336 = vmatprep.mubr.bf16.mxu0 %v17547_v30  ;;  %v16918_v27 = vld [vmem:[#allocation7 + $0xf38] ss:$52 sps:$4 sm:$0xff]   ;;  %v16938_v37 = vld [vmem:[#allocation7 + $0x1b00] ss:$52 sps:$4 sm:$0xff]  }
 0x602   :  { %14382 = vmatpush3.bf16.msra.mxu0 %v16907_v60  ;;  %14355 = vmatprep.subr.bf16.mxu1 %v16908_v33  ;;  %v16919_v30 = vld [vmem:[#allocation7 + $0x15b8] ss:$52 sps:$4 sm:$0xff]   ;;  %v16940_v60 = vld [vmem:[#allocation7 + $0x1ea8] ss:$52 sps:$4 sm:$0xff]   ;;  %v16944_v33 = vld [vmem:[#allocation7 + $0x1f10] ss:$52 sps:$4 sm:$0xff]  }
 0x603   :  { %14383 = vmatprep.subr.bf16.mxu0 %v16909_v24  ;;  %v16945_v24 = vld [vmem:[#allocation7 + $0x2590] ss:$52 sps:$4 sm:$0xff]  }
 0x605   :  { %14356 = vmatpush3.bf16.msra.mxu1 %v16910_v49  ;;  %v16946_v49 = vld [vmem:[#allocation7 + $0x1bd0] ss:$52 sps:$4 sm:$0xff]  }
 0x606   :  { %14384 = vmatpush3.bf16.msra.mxu0 %v16911_v16  ;;  %14357 = vmatprep.subr.bf16.mxu1 %v16912_v48  ;;  %v16948_v16 = vld [vmem:[#allocation7 + $0x1f78] ss:$52 sps:$4 sm:$0xff]   ;;  %v16952_v48 = vld [vmem:[#allocation7 + $0x1fe0] ss:$52 sps:$4 sm:$0xff]  }
 0x607   :  { %14385 = vmatprep.subr.bf16.mxu0 %v16913_v54  ;;  %v16953_v54 = vld [vmem:[#allocation7 + $0x2660] ss:$52 sps:$4 sm:$0xff]  }
 0x609   :  { %14358 = vmatpush3.bf16.msra.mxu1 %v16914_v6  ;;  %v16954_v6 = vld [vmem:[#allocation7 + $0x1ca0] ss:$52 sps:$4 sm:$0xff]  }
 0x60a   :  { %14386 = vmatpush3.bf16.msra.mxu0 %v16915_v43  ;;  %14359 = vmatprep.subr.bf16.mxu1 %v16916_v1  ;;  %v16955_v43 = vld [vmem:[#allocation7 + $0x2320] ss:$52 sps:$4 sm:$0xff]   ;;  %v16956_v1 = vld [vmem:[#allocation7 + $0x2048] ss:$52 sps:$4 sm:$0xff]  }
 0x60b   :  { %14387 = vmatprep.subr.bf16.mxu0 %v16917_v9  ;;  %v16957_v9 = vld [vmem:[#allocation7 + $0x26c8] ss:$52 sps:$4 sm:$0xff]  }
 0x60d   :  { %14360 = vmatpush3.bf16.msra.mxu1 %v16918_v27  ;;  %v16958_v27 = vld [vmem:[#allocation7 + $0x1d08] ss:$52 sps:$4 sm:$0xff]  }
 0x60e   :  { %14388 = vmatpush3.bf16.msra.mxu0 %v16919_v30  ;;  %14361 = vmatprep.subr.bf16.mxu1 %v16920_v38  ;;  %v16959_v30 = vld [vmem:[#allocation7 + $0x2388] ss:$52 sps:$4 sm:$0xff]   ;;  %v16960_v38 = vld [vmem:[#allocation7 + $0x2730] ss:$52 sps:$4 sm:$0xff]  }
 0x60f   :  { %14389 = vmatprep.subr.bf16.mxu0 %v16921_v46  ;;  %v16961_v46 = vld [vmem:[#allocation10 + $0x40] sm:$0xff]  }
 0x611   :  { %14362 = vmatpush3.bf16.msra.mxu1 %v16922_v28  ;;  %v16962_v28 = vld [vmem:[#allocation10] sm:$0xff]  }
 0x612   :  { %14390 = vmatpush3.bf16.msra.mxu0 %v16923_v14  ;;  %14363 = vmatprep.subr.bf16.mxu1 %v16924_v18  ;;  %v16963_v14 = vld [vmem:[#allocation7 + $0x2798] ss:$52 sps:$4 sm:$0xff]  }
 0x613   :  { %14391 = vmatprep.subr.bf16.mxu0 %v16925_v29  ;;  %v16964_v18 = vld [vmem:[#allocation10 + $0x48] sm:$0xff]  }
 0x614   :  { %v16965_v29 = vld [vmem:[#allocation10 + $0x8] sm:$0xff]  }
 0x615   :  { %14364 = vmatpush3.bf16.msra.mxu1 %v16926_v61  ;;  %v16966_v61 = vld [vmem:[#allocation7 + $0x2800] ss:$52 sps:$4 sm:$0xff]  }
 0x616   :  { %14392 = vmatpush3.bf16.msra.mxu0 %v16927_v45  ;;  %14405 = vmatprep.subr.bf16.mxu1 %v16928_v35  ;;  %v16967_v45 = vld [vmem:[#allocation10 + $0x50] sm:$0xff]  }
 0x617   :  { %14433 = vmatprep.subr.bf16.mxu0 %v16929_v40  ;;  %v16968_v35 = vld [vmem:[#allocation10 + $0x10] sm:$0xff]  }
 0x618   :  { %11288 = vmatmul.mubr.bf16.vlgmr.msra.gmra.mrb[56].mxu1 %v17532_v22  ;;  %v16939_v22 = vld [vmem:[#allocation7 + $0x2180] ss:$52 sps:$4 sm:$0xff]   ;;  %v16969_v40 = vld [vmem:[#allocation7 + $0x2868] ss:$52 sps:$4 sm:$0xff]  }
 0x619   :  { %11337 = vmatmul.mubr.bf16.vlgmr.msra.gmra.mrb[60].mxu0 %v17545_v3  ;;  %11295 = vmatprep.mubr.bf16.mxu1 %v17561_v23  ;;  %v16941_v3 = vld [vmem:[#allocation7 + $0x2528] ss:$52 sps:$4 sm:$0xff]  }
 0x61a   :  { %11344 = vmatprep.mubr.bf16.mxu0 %v17579_v5  ;;  %14406 = vmatpush3.bf16.msra.mxu1 %v16930_v36  ;;  %v16942_v23 = vld [vmem:[#allocation7 + $0x1b68] ss:$52 sps:$4 sm:$0xff]   ;;  %v16975_v36 = vld [vmem:[#allocation10 + $0x80] sm:$0xff]  }
 0x61b   :  { %14434 = vmatpush3.bf16.msra.mxu0 %v16931_v57  ;;  %14407 = vmatprep.subr.bf16.mxu1 %v16932_v47  ;;  %v16943_v5 = vld [vmem:[#allocation7 + $0x21e8] ss:$52 sps:$4 sm:$0xff]  }
 0x61c   :  { %14435 = vmatprep.subr.bf16.mxu0 %v16933_v58  ;;  %v16977_v57 = vld [vmem:[#allocation10 + $0xc8] sm:$0xff]   ;;  %v16981_v47 = vld [vmem:[#allocation10 + $0xd0] sm:$0xff]  }
 0x61d   :  { %v16980_v58 = vld [vmem:[#allocation10 + $0x70] sm:$0xff]  }
 0x61e   :  { %14408 = vmatpush3.bf16.msra.mxu1 %v16934_v42  ;;  %v16983_v42 = vld [vmem:[#allocation10 + $0x90] sm:$0xff]  }
 0x61f   :  { %14436 = vmatpush3.bf16.msra.mxu0 %v16935_v13  ;;  %14409 = vmatprep.subr.bf16.mxu1 %v16936_v10  ;;  %v16982_v13 = vld [vmem:[#allocation10 + $0x30] sm:$0xff]   ;;  %v16985_v10 = vld [vmem:[#allocation10 + $0xd8] sm:$0xff]  }
 0x620   :  { %11296 = vmatmul.mubr.bf16.gmra.mrb[60].mxu1 %v17558_v34  ;;  %14437 = vmatprep.subr.bf16.mxu0 %v16937_v12  ;;  %v16947_v34 = vld [vmem:[#allocation7 + $0x2250] ss:$52 sps:$4 sm:$0xff]  }
 0x621   :  { %11345 = vmatmul.mubr.bf16.gmra.mrb[64].mxu0 %v17577_v63  ;;  %11385 = vmatprep.mubr.bf16.mxu1 %v17585_v21  ;;  %v16949_v63 = vld [vmem:[#allocation7 + $0x25f8] ss:$52 sps:$4 sm:$0xff]  }
 0x622   :  { %14410 = vmatpush3.bf16.msra.mxu1 %v16938_v37  ;;  %11434 = vmatprep.mubr.bf16.mxu0 %v17595_v7  ;;  %v16950_v21 = vld [vmem:[#allocation7 + $0x1c38] ss:$52 sps:$4 sm:$0xff]  }
 0x623   :  { %14438 = vmatpush3.bf16.msra.mxu0 %v16939_v22  ;;  %14411 = vmatprep.subr.bf16.mxu1 %v16940_v60  ;;  %v16951_v7 = vld [vmem:[#allocation7 + $0x22b8] ss:$52 sps:$4 sm:$0xff]  }
 0x624   :  { %14439 = vmatprep.subr.bf16.mxu0 %v16941_v3  ;;  %v16984_v12 = vld [vmem:[#allocation10 + $0x78] sm:$0xff]   ;;  %v16988_v37 = vld [vmem:[#allocation10 + $0xe0] sm:$0xff]  }
 0x625   :  { %v16989_v22 = vld [vmem:[#allocation10 + $0x140] sm:$0xff]  }
 0x626   :  { %14412 = vmatpush3.bf16.msra.mxu1 %v16942_v23  ;;  %v16990_v60 = vld [vmem:[#allocation10 + $0xa0] sm:$0xff]   ;;  %v16992_v23 = vld [vmem:[#allocation10 + $0xe8] sm:$0xff]  }
 0x627   :  { %14440 = vmatpush3.bf16.msra.mxu0 %v16943_v5  ;;  %14413 = vmatprep.subr.bf16.mxu1 %v16944_v33  ;;  %v16991_v3 = vld [vmem:[#allocation10 + $0x100] sm:$0xff]   ;;  %v16993_v5 = vld [vmem:[#allocation10 + $0x148] sm:$0xff]  }
 0x628   :  { %14441 = vmatprep.subr.bf16.mxu0 %v16945_v24  ;;  %v16994_v33 = vld [vmem:[#allocation10 + $0xa8] sm:$0xff]  }
 0x629   :  { %v16995_v24 = vld [vmem:[#allocation10 + $0x108] sm:$0xff]  }
 0x62a   :  { %14414 = vmatpush3.bf16.msra.mxu1 %v16946_v49  ;;  %v16996_v49 = vld [vmem:[#allocation10 + $0xf0] sm:$0xff]  }
 0x62b   :  { %14442 = vmatpush3.bf16.msra.mxu0 %v16947_v34  ;;  %14415 = vmatprep.subr.bf16.mxu1 %v16948_v16  ;;  %v16997_v34 = vld [vmem:[#allocation10 + $0x150] sm:$0xff]  }
 0x62c   :  { %14443 = vmatprep.subr.bf16.mxu0 %v16949_v63  ;;  %v16998_v16 = vld [vmem:[#allocation10 + $0xb0] sm:$0xff]  }
 0x62d   :  { %v16999_v63 = vld [vmem:[#allocation10 + $0x110] sm:$0xff]  }
 0x62e   :  { %14416 = vmatpush3.bf16.msra.mxu1 %v16950_v21  ;;  %v17000_v21 = vld [vmem:[#allocation10 + $0xf8] sm:$0xff]  }
 0x62f   :  { %14444 = vmatpush3.bf16.msra.mxu0 %v16951_v7  ;;  %14417 = vmatprep.subr.bf16.mxu1 %v16952_v48  ;;  %v17001_v7 = vld [vmem:[#allocation10 + $0x158] sm:$0xff]   ;;  %v17005_v48 = vld [vmem:[#allocation10 + $0x1c0] sm:$0xff]  }
 0x630   :  { %14445 = vmatprep.subr.bf16.mxu0 %v16953_v54  ;;  %v17004_v54 = vld [vmem:[#allocation10 + $0x160] sm:$0xff]  }
 0x632   :  { %14418 = vmatpush3.bf16.msra.mxu1 %v16954_v6  ;;  %v17007_v6 = vld [vmem:[#allocation10 + $0x180] sm:$0xff]  }
 0x633   :  { %14446 = vmatpush3.bf16.msra.mxu0 %v16955_v43  ;;  %14419 = vmatprep.subr.bf16.mxu1 %v16956_v1  ;;  %v17006_v43 = vld [vmem:[#allocation10 + $0x120] sm:$0xff]   ;;  %v17009_v1 = vld [vmem:[#allocation10 + $0x1c8] sm:$0xff]  }
 0x634   :  { %14447 = vmatprep.subr.bf16.mxu0 %v16957_v9  ;;  %v17008_v9 = vld [vmem:[#allocation10 + $0x168] sm:$0xff]  }
 0x636   :  { %14420 = vmatpush3.bf16.msra.mxu1 %v16958_v27  ;;  %v17013_v27 = vld [vmem:[#allocation10 + $0x1d0] sm:$0xff]  }
 0x637   :  { %14448 = vmatpush3.bf16.msra.mxu0 %v16959_v30  ;;  %14649 = vmatprep.subr.bf16.mxu1 %v16960_v38  ;;  %v17012_v30 = vld [vmem:[#allocation10 + $0x170] sm:$0xff]  }
 0x638   :  { %14467 = vmatprep.subr.bf16.mxu0 %v16961_v46  ;;  %v17014_v46 = vld [vmem:[#allocation10 + $0x130] sm:$0xff]  }
 0x639   :  { %11386 = vmatmul.mubr.bf16.vlgmr.msra.gmra.mrb[64].mxu1 %v17582_v17  ;;  %v16970_v17 = vld [vmem:[#allocation10 + $0x58] sm:$0xff]  }
 0x63a   :  { %11435 = vmatmul.mubr.bf16.vlgmr.msra.gmra.mrb[68].mxu0 %v17593_v2  ;;  %11393 = vmatprep.mubr.bf16.mxu1 %v17601_v19  ;;  %v16971_v2 = vld [vmem:[#allocation10 + $0x18] sm:$0xff]   ;;  %v16973_v19 = vld [vmem:[#allocation10 + $0xc0] sm:$0xff]  }
 0x63b   :  { %11442 = vmatprep.mubr.bf16.mxu0 %v17625_v53  ;;  %14650 = vmatpush3.bf16.msra.mxu1 %v16960_v38  ;;  %v16972_v53 = vld [vmem:[#allocation10 + $0x60] sm:$0xff]   ;;  %v17015_v38 = vld [vmem:[#allocation10 + $0x190] sm:$0xff]  }
 0x63c   :  { %14468 = vmatpush3.bf16.msra.mxu0 %v16962_v28  ;;  %14651 = vmatprep.subr.bf16.mxu1 %v16963_v14  ;;  %v17017_v28 = vld [vmem:[#allocation10 + $0x1d8] sm:$0xff]  }
 0x63d   :  { %14469 = vmatprep.subr.bf16.mxu0 %v16964_v18  ;;  %v17020_v18 = vld [vmem:[#allocation10 + $0x1e0] sm:$0xff]  }
 0x63f   :  { %14652 = vmatpush3.bf16.msra.mxu1 %v16963_v14  ;;  %v17016_v14 = vld [vmem:[#allocation10 + $0x178] sm:$0xff]  }
 0x640   :  { %14470 = vmatpush3.bf16.msra.mxu0 %v16965_v29  ;;  %14653 = vmatprep.subr.bf16.mxu1 %v16966_v61  ;;  %v17028_v29 = vld [vmem:[#allocation10 + $0x240] sm:$0xff]  }
 0x641   :  { %11394 = vmatmul.mubr.bf16.gmra.mrb[68].mxu1 %v17599_v41  ;;  %14471 = vmatprep.subr.bf16.mxu0 %v16967_v45  ;;  %v16974_v41 = vld [vmem:[#allocation10 + $0x20] sm:$0xff]   ;;  %v17022_v45 = vld [vmem:[#allocation10 + $0x1e8] sm:$0xff]  }
 0x642   :  { %11443 = vmatmul.mubr.bf16.gmra.mrb[72].mxu0 %v17623_v51  ;;  %14657 = vmatprep.mubr.msk.bf16.mxu1 %vm789_vm1, %v17609_v62  ;;  %v16976_v51 = vld [vmem:[#allocation10 + $0x68] sm:$0xff]  }
 0x643   :  { %14654 = vmatpush3.bf16.msra.mxu1 %v16966_v61  ;;  %12475 = vmatprep.mubr.bf16.mxu0 %v17719_v31  ;;  %v16979_v62 = vld [vmem:[#allocation10 + $0x88] sm:$0xff]   ;;  %v17021_v61 = vld [vmem:[#allocation10 + $0x1a0] sm:$0xff]  }
 0x644   :  { %14472 = vmatpush3.bf16.msra.mxu0 %v16968_v35  ;;  %14655 = vmatprep.subr.bf16.mxu1 %v16969_v40  ;;  %v16978_v31 = vld [vmem:[#allocation10 + $0x28] sm:$0xff]   ;;  %v17030_v35 = vld [vmem:[#allocation10 + $0x200] sm:$0xff]  }
 0x645   :  { %14473 = vmatprep.subr.bf16.mxu0 %v16970_v17  ;;  %v17034_v17 = vld [vmem:[#allocation10 + $0x208] sm:$0xff]  }
 0x647   :  { %14656 = vmatpush3.bf16.msra.mxu1 %v16969_v40  ;;  %v17032_v40 = vld [vmem:[#allocation10 + $0x248] sm:$0xff]  }
 0x648   :  { %14474 = vmatpush3.bf16.msra.mxu0 %v16971_v2  ;;  %14495 = vmatprep.subr.bf16.mxu1 %v16973_v19  ;;  %v17036_v2 = vld [vmem:[#allocation10 + $0x250] sm:$0xff]  }
 0x649   :  { %14475 = vmatprep.subr.bf16.mxu0 %v16972_v53  ;;  %v17025_v19 = vld [vmem:[#allocation10 + $0x1b0] sm:$0xff]   ;;  %v17026_v53 = vld [vmem:[#allocation10 + $0x1f8] sm:$0xff]  }
 0x64a   :  { %14658 = vmatmul.mubr.msk.bf16.vlgmr.msra.gmra.mrb[72].mxu1 %vm789_vm1, %v17606_v8  ;;  %v16987_v8 = vld [vmem:[#allocation10 + $0x98] sm:$0xff]  }
 0x64b   :  { %14496 = vmatpush3.bf16.msra.mxu1 %v16975_v36  ;;  %12524 = vmatprep.mubr.bf16.mxu1 %v17721_v56  ;;  %v16986_v56 = vld [vmem:[#allocation10 + $0x38] sm:$0xff]   ;;  %v17038_v36 = vld [vmem:[#allocation10 + $0x210] sm:$0xff]  }
 0x64c   :  { %14476 = vmatpush3.bf16.msra.mxu0 %v16974_v41  ;;  %14497 = vmatprep.subr.bf16.mxu1 %v16977_v57  ;;  %v17040_v41 = vld [vmem:[#allocation10 + $0x258] sm:$0xff]  }
 0x64d   :  { %14477 = vmatprep.subr.bf16.mxu0 %v16976_v51  ;;  %v17042_v57 = vld [vmem:[#allocation10 + $0x218] sm:$0xff]   ;;  %v17044_v51 = vld [vmem:[#allocation10 + $0x260] sm:$0xff]  }
 0x64f   :  { %14498 = vmatpush3.bf16.msra.mxu1 %v16979_v62  ;;  %v17031_v62 = vld [vmem:[#allocation10 + $0x280] sm:$0xff]  }
 0x650   :  { %14478 = vmatpush3.bf16.msra.mxu0 %v16978_v31  ;;  %14499 = vmatprep.subr.bf16.mxu1 %v16981_v47  ;;  %v17033_v31 = vld [vmem:[#allocation10 + $0x2c8] sm:$0xff]   ;;  %v17046_v47 = vld [vmem:[#allocation10 + $0x220] sm:$0xff]  }
 0x651   :  { %14479 = vmatprep.subr.bf16.mxu0 %v16980_v58  ;;  %v17048_v58 = vld [vmem:[#allocation10 + $0x268] sm:$0xff]  }
 0x653   :  { %14500 = vmatpush3.bf16.msra.mxu1 %v16983_v42  ;;  %v17037_v42 = vld [vmem:[#allocation10 + $0x2d0] sm:$0xff]  }
 0x654   :  { %14480 = vmatpush3.bf16.msra.mxu0 %v16982_v13  ;;  %14501 = vmatprep.subr.bf16.mxu1 %v16985_v10  ;;  %v17050_v13 = vld [vmem:[#allocation10 + $0x228] sm:$0xff]   ;;  %v17052_v10 = vld [vmem:[#allocation10 + $0x270] sm:$0xff]  }
 0x655   :  { %14481 = vmatprep.subr.bf16.mxu0 %v16984_v12  ;;  %v17039_v12 = vld [vmem:[#allocation10 + $0x290] sm:$0xff]  }
 0x657   :  { %14502 = vmatpush3.bf16.msra.mxu1 %v16987_v8  ;;  %v17041_v8 = vld [vmem:[#allocation10 + $0x2d8] sm:$0xff]  }
 0x658   :  { %14482 = vmatpush3.bf16.msra.mxu0 %v16986_v56  ;;  %14503 = vmatprep.subr.bf16.mxu1 %v16988_v37  ;;  %v17054_v56 = vld [vmem:[#allocation10 + $0x230] sm:$0xff]   ;;  %v17045_v37 = vld [vmem:[#allocation10 + $0x2e0] sm:$0xff]  }
 0x659   :  { %14523 = vmatprep.subr.bf16.mxu0 %v16989_v22  ;;  %v17058_v22 = vld [vmem:[#allocation10 + $0x238] sm:$0xff]  }
 0x65b   :  { %12476 = vmatmul.mubr.bf16.vlgmr.msra.gmra.mrb[76].mxu0 %v17715_v4  ;;  %14504 = vmatpush3.bf16.msra.mxu1 %v16990_v60  ;;  %v17002_v4 = vld [vmem:[#allocation10 + $0xb8] sm:$0xff]   ;;  %v17047_v60 = vld [vmem:[#allocation10 + $0x2a0] sm:$0xff]  }
 0x65c   :  { %12483 = vmatprep.mubr.bf16.mxu0 %v17735_v26  ;;  %14524 = vmatpush3.bf16.msra.mxu0 %v16991_v3  ;;  %v17003_v26 = vld [vmem:[#allocation10 + $0x118] sm:$0xff]   ;;  %v17924_v3 = vld [vmem:[#allocation10 + $0x300] sm:$0xff]  }
 0x65d   :  { %14505 = vmatprep.subr.bf16.mxu1 %v16992_v23  ;;  %14525 = vmatprep.subr.bf16.mxu0 %v16993_v5  ;;  %v17049_v23 = vld [vmem:[#allocation10 + $0x2e8] sm:$0xff]   ;;  %v17053_v5 = vld [vmem:[#allocation10 + $0x2f0] sm:$0xff]  }
 0x65f   :  { %14506 = vmatpush3.bf16.msra.mxu1 %v16994_v33  ;;  %v17055_v33 = vld [vmem:[#allocation10 + $0x2b0] sm:$0xff]  }
 0x660   :  { %14526 = vmatpush3.bf16.msra.mxu0 %v16995_v24  ;;  %14507 = vmatprep.subr.bf16.mxu1 %v16996_v49  ;;  %v17057_v24 = vld [vmem:[#allocation10 + $0x2f8] sm:$0xff]  }
 0x661   :  { %14527 = vmatprep.subr.bf16.mxu0 %v16997_v34  ;;  %v17059_v49 = vld [vmem:[#allocation10 + $0x2b8] sm:$0xff]  }
 0x662   :  { %v17927_v34 = vld [vmem:[#allocation8 + $0x8] sm:$0x1f] }
 0x663   :  { %12484 = vmatmul.mubr.bf16.gmra.mrb[80].mxu0 %v17731_v20  ;;  %14508 = vmatpush3.bf16.msra.mxu1 %v16998_v16  ;;  %v17011_v20 = vld [vmem:[#allocation10 + $0x188] sm:$0xff]  }
 0x664   :  { %14528 = vmatpush3.bf16.msra.mxu0 %v16999_v63  ;;  %12573 = vmatprep.mubr.bf16.mxu0 %v17826_v0  ;;  %v17010_v0 = vld [vmem:[#allocation10 + $0x128] sm:$0xff]  }
 0x665   :  { %14509 = vmatprep.subr.bf16.mxu1 %v17000_v21  ;;  %14529 = vmatprep.subr.bf16.mxu0 %v17001_v7  ;;  %v18027_v16 = vld [vmem:[#allocation22_spill] sm:$0xff]  ;;  %v18028_v21 = vld [vmem:[#allocation24_spill] sm:$0xff] }
 0x666   :  { %v2295_v63 = vrot.slane %v17927_v34, %v18027_v16  ;;  %v2303_v7 = vrot.slane %v17927_v34, %v18028_v21 }
 0x667   :  { %14510 = vmatpush3.bf16.msra.mxu1 %v17002_v4  ;;  %v18029_v4 = vld [vmem:[#allocation23_spill] sm:$0xff] }
 0x668   :  { %14530 = vmatpush3.bf16.msra.mxu0 %v17003_v26  ;;  %14551 = vmatprep.subr.bf16.mxu1 %v17005_v48  ;;  %v2299_v26 = vrot.slane %v17927_v34, %v18029_v4  ;;  %v18030_v48 = vld [vmem:[#allocation25_spill] sm:$0xff] }
 0x669   :  { %14531 = vmatprep.subr.bf16.mxu0 %v17004_v54  ;;  %v17937_v54 = vrot.slane %v17927_v34, %v18030_v48 }
 0x66a   :  { %12525 = vmatmul.mubr.bf16.vlgmr.msra.gmra.mrb[76].mxu1 %v17717_v55  ;;  %v17019_v55 = vld [vmem:[#allocation10 + $0x198] sm:$0xff]  }
 0x66b   :  { %12532 = vmatprep.mubr.bf16.mxu1 %v17737_v15  ;;  %14552 = vmatpush3.bf16.msra.mxu1 %v17007_v6  ;;  %v17018_v15 = vld [vmem:[#allocation10 + $0x138] sm:$0xff]  }
 0x66c   :  { %14532 = vmatpush3.bf16.msra.mxu0 %v17006_v43  ;;  %14553 = vmatprep.subr.bf16.mxu1 %v17009_v1 }
 0x66d   :  { %14533 = vmatprep.subr.bf16.mxu0 %v17008_v9 }
 0x66f   :  { %14554 = vmatpush3.bf16.msra.mxu1 %v17011_v20 }
 0x670   :  { %14534 = vmatpush3.bf16.msra.mxu0 %v17010_v0  ;;  %14555 = vmatprep.subr.bf16.mxu1 %v17013_v27 }
 0x671   :  { %14535 = vmatprep.subr.bf16.mxu0 %v17012_v30 }
 0x672   :  { %12533 = vmatmul.mubr.bf16.gmra.mrb[80].mxu1 %v17733_v32  ;;  %v17023_v32 = vld [vmem:[#allocation10 + $0x1a8] sm:$0xff]  }
 0x673   :  { %14556 = vmatpush3.bf16.msra.mxu1 %v17015_v38  ;;  %12622 = vmatprep.mubr.bf16.mxu1 %v17828_v59  ;;  %v17024_v59 = vld [vmem:[#allocation10 + $0x1f0] sm:$0xff]  }
 0x674   :  { %14536 = vmatpush3.bf16.msra.mxu0 %v17014_v46  ;;  %14557 = vmatprep.subr.bf16.mxu1 %v17017_v28 }
 0x675   :  { %14537 = vmatprep.subr.bf16.mxu0 %v17016_v14 }
 0x677   :  { %14558 = vmatpush3.bf16.msra.mxu1 %v17019_v55 }
 0x678   :  { %14538 = vmatpush3.bf16.msra.mxu0 %v17018_v15  ;;  %14559 = vmatprep.subr.bf16.mxu1 %v17020_v18 }
 0x679   :  { %14579 = vmatprep.subr.bf16.mxu0 %v17028_v29 }
 0x67b   :  { %12574 = vmatmul.mubr.bf16.vlgmr.msra.gmra.mrb[84].mxu0 %v17822_v44  ;;  %14560 = vmatpush3.bf16.msra.mxu1 %v17021_v61  ;;  %v17027_v44 = vld [vmem:[#allocation10 + $0x1b8] sm:$0xff]  }
 0x67c   :  { %12581 = vmatprep.mubr.bf16.mxu0 %v17842_v39  ;;  %14561 = vmatprep.subr.bf16.mxu1 %v17022_v45  ;;  %v17029_v39 = vld [vmem:[#allocation10 + $0x2c0] sm:$0xff]  }
 0x67d   :  { %14580 = vmatpush3.bf16.msra.mxu0 %v17030_v35 }
 0x67e   :  { %14581 = vmatprep.subr.bf16.mxu0 %v17032_v40 }
 0x67f   :  { %14562 = vmatpush3.bf16.msra.mxu1 %v17023_v32 }
 0x680   :  { %14563 = vmatprep.subr.bf16.mxu1 %v17024_v59 }
 0x681   :  { %14582 = vmatpush3.bf16.msra.mxu0 %v17034_v17 }
 0x682   :  { %14583 = vmatprep.subr.bf16.mxu0 %v17036_v2 }
 0x683   :  { %12582 = vmatmul.mubr.bf16.gmra.mrb[88].mxu0 %v17838_v50  ;;  %14564 = vmatpush3.bf16.msra.mxu1 %v17025_v19  ;;  %v17035_v50 = vld [vmem:[#allocation10 + $0x288] sm:$0xff]  }
 0x684   :  { %14565 = vmatprep.subr.bf16.mxu1 %v17026_v53 }
 0x685   :  { %14584 = vmatpush3.bf16.msra.mxu0 %v17038_v36 }
 0x686   :  { %14585 = vmatprep.subr.bf16.mxu0 %v17040_v41 }
 0x687   :  { %14566 = vmatpush3.bf16.msra.mxu1 %v17027_v44 }
 0x688   :  { %14607 = vmatprep.subr.bf16.mxu1 %v17029_v39 }
 0x689   :  { %14586 = vmatpush3.bf16.msra.mxu0 %v17042_v57 }
 0x68a   :  { %12623 = vmatmul.mubr.bf16.vlgmr.msra.gmra.mrb[84].mxu1 %v17824_v52  ;;  %14587 = vmatprep.subr.bf16.mxu0 %v17044_v51  ;;  %v17056_v52 = vld [vmem:[#allocation10 + $0x278] sm:$0xff]  }
 0x68b   :  { %12630 = vmatprep.mubr.bf16.mxu1 %v17844_v25  ;;  %14608 = vmatpush3.bf16.msra.mxu1 %v17031_v62  ;;  %v17043_v25 = vld [vmem:[#allocation10 + $0x298] sm:$0xff]   ;;  %v17061_v62 = vld [vmem:[#allocation10 + $0x308] sm:$0xff]  }
 0x68c   :  { %14609 = vmatprep.subr.bf16.mxu1 %v17033_v31 }
 0x68d   :  { %14588 = vmatpush3.bf16.msra.mxu0 %v17046_v47 }
 0x68e   :  { %14589 = vmatprep.subr.bf16.mxu0 %v17048_v58 }
 0x68f   :  { %14610 = vmatpush3.bf16.msra.mxu1 %v17035_v50 }
 0x690   :  { %14611 = vmatprep.subr.bf16.mxu1 %v17037_v42 }
 0x691   :  { %14590 = vmatpush3.bf16.msra.mxu0 %v17050_v13 }
 0x692   :  { %12631 = vmatmul.mubr.bf16.gmra.mrb[88].mxu1 %v17840_v11  ;;  %14591 = vmatprep.subr.bf16.mxu0 %v17052_v10  ;;  %v17051_v11 = vld [vmem:[#allocation10 + $0x2a8] sm:$0xff]  }
 0x693   :  { %14612 = vmatpush3.bf16.msra.mxu1 %v17039_v12 }
 0x694   :  { %14613 = vmatprep.subr.bf16.mxu1 %v17041_v8 }
 0x695   :  { %14592 = vmatpush3.bf16.msra.mxu0 %v17054_v56 }
 0x696   :  { %14593 = vmatprep.subr.bf16.mxu0 %v17056_v52 }
 0x697   :  { %14614 = vmatpush3.bf16.msra.mxu1 %v17043_v25 }
 0x698   :  { %14615 = vmatprep.subr.bf16.mxu1 %v17045_v37 }
 0x699   :  { %14594 = vmatpush3.bf16.msra.mxu0 %v17058_v22 }
 0x69a   :  { %14661 = vmatprep.subr.bf16.mxu0 %v17924_v3 }
 0x69b   :  { %14616 = vmatpush3.bf16.msra.mxu1 %v17047_v60 }
 0x69c   :  { %14617 = vmatprep.subr.bf16.mxu1 %v17049_v23 }
 0x69f   :  { %14618 = vmatpush3.bf16.msra.mxu1 %v17051_v11 }
 0x6a0   :  { %14619 = vmatprep.subr.bf16.mxu1 %v17053_v5  ;;  %v17062_v5 = vld [vmem:[#allocation10 + $0x310] sm:$0xff]  }
 0x6a3   :  { %14620 = vmatpush3.bf16.msra.mxu1 %v17055_v33 }
 0x6a4   :  { %14621 = vmatprep.subr.bf16.mxu1 %v17057_v24 }
 0x6a7   :  { %14622 = vmatpush3.bf16.msra.mxu1 %v17059_v49 }
 0x6aa   :  { %v10767_v6 = vpop.f32.mrb[40].mxu1 }
 0x6ab   :  { %v14705_v43 = vadd.f32 %v10767_v6, %v2295_v63  ;;  %v11138_v1 = vpop.f32.mrb[44].mxu0  ;;  %v10769_v9 = vpop.f32.mrb[41].mxu1 }
 0x6ac   :  { %v14713_v20 = vadd.f32 %v11138_v1, %v2303_v7  ;;  %v14706_v0 = vadd.f32 %v10769_v9, %v2299_v26  ;;  %v11140_v27 = vpop.f32.mrb[45].mxu0  ;;  %v10771_v30 = vpop.f32.mrb[42].mxu1 }
 0x6ad   :  { %v11508_v38 = vmax.f32 %v14705_v43, 0.0  ;;  %v14714_v46 = vadd.f32 %v11140_v27, %v17937_v54  ;;  %v14707_v28 = vadd.f32 %v10771_v30, %v2295_v63  ;;  %v11142_v14 = vpop.f32.mrb[46].mxu0  ;;  %v10773_v55 = vpop.f32.mrb[43].mxu1 }
 0x6ae   :  { %v11510_v15 = vmax.f32 %v14713_v20, 0.0  ;;  %v11509_v18 = vmax.f32 %v14706_v0, 0.0  ;;  %v14715_v29 = vadd.f32 %v11142_v14, %v2303_v7  ;;  %v14708_v61 = vadd.f32 %v10773_v55, %v2299_v26  ;;  %v11144_v45 = vpop.f32.mrb[47].mxu0 }
 0x6af   :  { %11560 = vst [vmem:[#allocation14 + $0x40] sm:$0xff] %v11508_v38  ;;  %v11511_v35 = vmax.f32 %v14714_v46, 0.0  ;;  %v11521_v40 = vmax.f32 %v14707_v28, 0.0  ;;  %v14716_v32 = vadd.f32 %v11144_v45, %v17937_v54 }
 0x6b0   :  { %11562 = vst [vmem:[#allocation14 + $0x50] sm:$0xff] %v11510_v15  ;;  %11561 = vst [vmem:[#allocation14 + $0x48] sm:$0xff] %v11509_v18  ;;  %v11523_v59 = vmax.f32 %v14715_v29, 0.0  ;;  %v11522_v17 = vmax.f32 %v14708_v61, 0.0 }
 0x6b1   :  { %11563 = vst [vmem:[#allocation14 + $0x58] sm:$0xff] %v11511_v35  ;;  %11573 = vst [vmem:[#allocation14 + $0xa8] sm:$0xff] %v11521_v40  ;;  %v11612_v2 = vpack.c.bf16 %v11521_v40, %v11508_v38  ;;  %v11524_v19 = vmax.f32 %v14716_v32, 0.0 }
 0x6b2   :  { %11575 = vst [vmem:[#allocation14 + $0xb8] sm:$0xff] %v11523_v59  ;;  %v11614_v53 = vpack.c.bf16 %v11523_v59, %v11510_v15  ;;  %11574 = vst [vmem:[#allocation14 + $0xb0] sm:$0xff] %v11522_v17  ;;  %v11613_v36 = vpack.c.bf16 %v11522_v17, %v11509_v18  ;;  %v10777_v41 = vpop.f32.mrb[44].mxu1 }
 0x6b3   :  { %11576 = vst [vmem:[#allocation14 + $0xc0] sm:$0xff] %v11524_v19  ;;  %v11615_v44 = vpack.c.bf16 %v11524_v19, %v11511_v35  ;;  %v14709_v39 = vadd.f32 %v10777_v41, %v2295_v63  ;;  %v11148_v57 = vpop.f32.mrb[48].mxu0  ;;  %v10779_v51 = vpop.f32.mrb[45].mxu1 }
 0x6b4   :  { %v14717_v31 = vadd.f32 %v11148_v57, %v2303_v7  ;;  %v14710_v47 = vadd.f32 %v10779_v51, %v2299_v26  ;;  %v11150_v58 = vpop.f32.mrb[49].mxu0  ;;  %v10781_v50 = vpop.f32.mrb[46].mxu1  ;;  %12671 = vmatprep.mubr.bf16.mxu0 %v11613_v36 }
 0x6b5   :  { %v11534_v42 = vmax.f32 %v14709_v39, 0.0  ;;  %v14718_v13 = vadd.f32 %v11150_v58, %v17937_v54  ;;  %v14711_v10 = vadd.f32 %v10781_v50, %v2295_v63  ;;  %v11152_v12 = vpop.f32.mrb[50].mxu0  ;;  %12720 = vmatprep.mubr.bf16.mxu1 %v11615_v44  ;;  %v10783_v8 = vpop.f32.mrb[47].mxu1  ;;  %12672 = vmatmul.mubr.bf16.vlgmr.msra.gmra.mrb[92].mxu0 %v11612_v2 }
 0x6b6   :  { %v11536_v56 = vmax.f32 %v14717_v31, 0.0  ;;  %v11535_v52 = vmax.f32 %v14710_v47, 0.0  ;;  %v14719_v25 = vadd.f32 %v11152_v12, %v2303_v7  ;;  %v14712_v37 = vadd.f32 %v10783_v8, %v2299_v26  ;;  %v11154_v22 = vpop.f32.mrb[51].mxu0  ;;  %12721 = vmatmul.mubr.bf16.vlgmr.msra.gmra.mrb[92].mxu1 %v11614_v53  ;;  %14662 = vmatpush3.bf16.msra.mxu0 %v17924_v3  ;;  %v17063_v7 = vld [vmem:[#allocation10 + $0x318] sm:$0xff]   ;;  %v18031_v26 = vld [vmem:[#allocation26_spill] sm:$0xff] }
 0x6b7   :  { %11586 = vst [vmem:[#allocation14 + $0x110] sm:$0xff] %v11534_v42  ;;  %v11537_v60 = vmax.f32 %v14718_v13, 0.0  ;;  %v11547_v23 = vmax.f32 %v14711_v10, 0.0  ;;  %v14720_v11 = vadd.f32 %v11154_v22, %v17937_v54  ;;  %14663 = vmatprep.subr.bf16.mxu0 %v17061_v62  ;;  %v2311_v48 = vrot.slane %v17927_v34, %v18031_v26 }
 0x6b8   :  { %11588 = vst [vmem:[#allocation14 + $0x120] sm:$0xff] %v11536_v56  ;;  %11587 = vst [vmem:[#allocation14 + $0x118] sm:$0xff] %v11535_v52  ;;  %v11549_v33 = vmax.f32 %v14719_v25, 0.0  ;;  %v11548_v24 = vmax.f32 %v14712_v37, 0.0 }
 0x6b9   :  { %11589 = vst [vmem:[#allocation14 + $0x128] sm:$0xff] %v11537_v60  ;;  %11599 = vst [vmem:[#allocation14 + $0x178] sm:$0xff] %v11547_v23  ;;  %v11625_v49 = vpack.c.bf16 %v11547_v23, %v11534_v42  ;;  %v11550_v16 = vmax.f32 %v14720_v11, 0.0 }
 0x6ba   :  { %11601 = vst [vmem:[#allocation14 + $0x188] sm:$0xff] %v11549_v33  ;;  %v11627_v63 = vpack.c.bf16 %v11549_v33, %v11536_v56  ;;  %11600 = vst [vmem:[#allocation14 + $0x180] sm:$0xff] %v11548_v24  ;;  %v11626_v21 = vpack.c.bf16 %v11548_v24, %v11535_v52  ;;  %14664 = vmatpush3.bf16.msra.mxu0 %v17061_v62 }
 0x6bb   :  { %11602 = vst [vmem:[#allocation14 + $0x190] sm:$0xff] %v11550_v16  ;;  %v11628_v3 = vpack.c.bf16 %v11550_v16, %v11537_v60  ;;  %14665 = vmatprep.subr.bf16.mxu0 %v17062_v5 }
 0x6bc   :  { %12679 = vmatprep.mubr.bf16.mxu0 %v11626_v21 }
 0x6bd   :  { %12728 = vmatprep.mubr.bf16.mxu1 %v11628_v3  ;;  %12680 = vmatmul.mubr.bf16.gmra.mrb[96].mxu0 %v11625_v49 }
 0x6be   :  { %12729 = vmatmul.mubr.bf16.gmra.mrb[96].mxu1 %v11627_v63  ;;  %14666 = vmatpush3.bf16.msra.mxu0 %v17062_v5 }
 0x6bf   :  { %14667 = vmatprep.subr.bf16.mxu0 %v17063_v7 }
 0x6c2   :  { %14668 = vmatpush3.bf16.msra.mxu0 %v17063_v7 }
 0x6ca   :  { %v14309_v4 = vpop.f32.mrb[48].mxu1 }
 0x6cb   :  { %v14337_v54 = vpop.f32.mrb[52].mxu0  ;;  %v14310_v6 = vpop.f32.mrb[49].mxu1 }
 0x6cc   :  { %v14311_v43 = vadd.f32 %v14310_v6, %v14309_v4  ;;  %v14338_v1 = vpop.f32.mrb[53].mxu0  ;;  %v14312_v9 = vpop.f32.mrb[50].mxu1 }
 0x6cd   :  { %v14339_v20 = vadd.f32 %v14338_v1, %v14337_v54  ;;  %v14340_v0 = vpop.f32.mrb[54].mxu0  ;;  %v14313_v27 = vpop.f32.mrb[51].mxu1 }
 0x6ce   :  { %v11192_v30 = vadd.f32 %v14311_v43, %v2311_v48  ;;  %v14314_v38 = vadd.f32 %v14313_v27, %v14312_v9  ;;  %v14341_v46 = vpop.f32.mrb[55].mxu0 }
 0x6cf   :  { %v14342_v28 = vadd.f32 %v14341_v46, %v14340_v0 }
 0x6d0   :  { %v11241_v14 = vadd.f32 %v14339_v20, %v11192_v30  ;;  %v11195_v55 = vadd.f32 %v14314_v38, %v2311_v48 }
 0x6d2   :  { %v11244_v15 = vadd.f32 %v14342_v28, %v11195_v55  ;;  %v14315_v18 = vpop.f32.mrb[52].mxu1 }
 0x6d3   :  { %v14343_v29 = vpop.f32.mrb[56].mxu0  ;;  %v14316_v61 = vpop.f32.mrb[53].mxu1 }
 0x6d4   :  { %v14317_v45 = vadd.f32 %v14316_v61, %v14315_v18  ;;  %v14344_v34 = vpop.f32.mrb[57].mxu0  ;;  %v14318_v35 = vpop.f32.mrb[54].mxu1 }
 0x6d5   :  { %v14345_v40 = vadd.f32 %v14344_v34, %v14343_v29  ;;  %v14346_v32 = vpop.f32.mrb[58].mxu0  ;;  %v14319_v59 = vpop.f32.mrb[55].mxu1 }
 0x6d6   :  { %v11200_v17 = vadd.f32 %v14317_v45, %v2311_v48  ;;  %v14320_v2 = vadd.f32 %v14319_v59, %v14318_v35  ;;  %v14347_v19 = vpop.f32.mrb[59].mxu0 }
 0x6d7   :  { %v14348_v53 = vadd.f32 %v14347_v19, %v14346_v32 }
 0x6d8   :  { %v11249_v36 = vadd.f32 %v14345_v40, %v11200_v17  ;;  %v11203_v41 = vadd.f32 %v14320_v2, %v2311_v48 }
 0x6da   :  { %v11252_v44 = vadd.f32 %v14348_v53, %v11203_v41 }
 0x6eb   :  { %v14365_v39 = vpop.f32.mrb[56].mxu1 }
 0x6ec   :  { %v14393_v57 = vpop.f32.mrb[60].mxu0  ;;  %v14366_v51 = vpop.f32.mrb[57].mxu1 }
 0x6ed   :  { %v14367_v62 = vadd.f32 %v14366_v51, %v14365_v39  ;;  %v14394_v31 = vpop.f32.mrb[61].mxu0  ;;  %v14368_v47 = vpop.f32.mrb[58].mxu1 }
 0x6ee   :  { %v14395_v58 = vadd.f32 %v14394_v31, %v14393_v57  ;;  %v14396_v50 = vpop.f32.mrb[62].mxu0  ;;  %v14369_v42 = vpop.f32.mrb[59].mxu1 }
 0x6ef   :  { %v11290_v13 = vadd.f32 %v14367_v62, %v11241_v14  ;;  %v14370_v10 = vadd.f32 %v14369_v42, %v14368_v47  ;;  %v14397_v12 = vpop.f32.mrb[63].mxu0 }
 0x6f0   :  { %v14398_v8 = vadd.f32 %v14397_v12, %v14396_v50 }
 0x6f1   :  { %v11339_v56 = vadd.f32 %v14395_v58, %v11290_v13  ;;  %v11293_v52 = vadd.f32 %v14370_v10, %v11244_v15 }
 0x6f3   :  { %v11342_v25 = vadd.f32 %v14398_v8, %v11293_v52  ;;  %v14371_v37 = vpop.f32.mrb[60].mxu1 }
 0x6f4   :  { %v14399_v22 = vpop.f32.mrb[64].mxu0  ;;  %v14372_v60 = vpop.f32.mrb[61].mxu1 }
 0x6f5   :  { %v14373_v23 = vadd.f32 %v14372_v60, %v14371_v37  ;;  %v14400_v11 = vpop.f32.mrb[65].mxu0  ;;  %v14374_v5 = vpop.f32.mrb[62].mxu1 }
 0x6f6   :  { %v14401_v33 = vadd.f32 %v14400_v11, %v14399_v22  ;;  %v14402_v24 = vpop.f32.mrb[66].mxu0  ;;  %v14375_v49 = vpop.f32.mrb[63].mxu1 }
 0x6f7   :  { %v11298_v16 = vadd.f32 %v14373_v23, %v11249_v36  ;;  %v14376_v63 = vadd.f32 %v14375_v49, %v14374_v5  ;;  %v14403_v21 = vpop.f32.mrb[67].mxu0 }
 0x6f8   :  { %v14404_v3 = vadd.f32 %v14403_v21, %v14402_v24 }
 0x6f9   :  { %v11347_v7 = vadd.f32 %v14401_v33, %v11298_v16  ;;  %v11301_v4 = vadd.f32 %v14376_v63, %v11252_v44  ;;  %v14186_v63 = vld [vmem:[#allocation11] ss:$0 sm:$0xff] }
 0x6fb   :  { %v11350_v26 = vadd.f32 %v14404_v3, %v11301_v4 }
 0x70c   :  { %v14421_v48 = vpop.f32.mrb[64].mxu1 }
 0x70d   :  { %v14449_v54 = vpop.f32.mrb[68].mxu0  ;;  %v14422_v6 = vpop.f32.mrb[65].mxu1 }
 0x70e   :  { %v14423_v43 = vadd.f32 %v14422_v6, %v14421_v48  ;;  %v14450_v1 = vpop.f32.mrb[69].mxu0  ;;  %v14424_v9 = vpop.f32.mrb[66].mxu1 }
 0x70f   :  { %v14451_v20 = vadd.f32 %v14450_v1, %v14449_v54  ;;  %v14452_v0 = vpop.f32.mrb[70].mxu0  ;;  %v14425_v27 = vpop.f32.mrb[67].mxu1 }
 0x710   :  { %v11388_v30 = vadd.f32 %v14423_v43, %v11339_v56  ;;  %v14426_v38 = vadd.f32 %v14425_v27, %v14424_v9  ;;  %v14453_v46 = vpop.f32.mrb[71].mxu0 }
 0x711   :  { %v14454_v28 = vadd.f32 %v14453_v46, %v14452_v0 }
 0x712   :  { %v11391_v14 = vadd.f32 %v14426_v38, %v11342_v25  ;;  %v11437_v55 = vadd.f32 %v14451_v20, %v11388_v30 }
 0x714   :  { %v14427_v15 = vpop.f32.mrb[68].mxu1  ;;  %v11440_v18 = vadd.f32 %v14454_v28, %v11391_v14 }
 0x715   :  { %v14455_v29 = vpop.f32.mrb[72].mxu0  ;;  %v14428_v61 = vpop.f32.mrb[69].mxu1 }
 0x716   :  { %v14429_v45 = vadd.f32 %v14428_v61, %v14427_v15  ;;  %v14456_v34 = vpop.f32.mrb[73].mxu0  ;;  %v14430_v35 = vpop.f32.mrb[70].mxu1 }
 0x717   :  { %v14457_v40 = vadd.f32 %v14456_v34, %v14455_v29  ;;  %v14458_v32 = vpop.f32.mrb[74].mxu0  ;;  %v14431_v59 = vpop.f32.mrb[71].mxu1 }
 0x718   :  { %v11396_v17 = vadd.f32 %v14429_v45, %v11347_v7  ;;  %v14432_v2 = vadd.f32 %v14431_v59, %v14430_v35  ;;  %v14459_v19 = vpop.f32.mrb[75].mxu0 }
 0x719   :  { %v14460_v53 = vadd.f32 %v14459_v19, %v14458_v32 }
 0x71a   :  { %v11399_v36 = vadd.f32 %v14432_v2, %v11350_v26  ;;  %v11445_v41 = vadd.f32 %v14457_v40, %v11396_v17 }
 0x71c   :  { %v11448_v44 = vadd.f32 %v14460_v53, %v11399_v36 }
 0x71d   :  { %v14659_v39 = vpop.f32.mrb[72].mxu1 }
 0x71e   :  { %v11494_v57 = vadd.f32 %v14659_v39, %v11445_v41  ;;  %v11485_v51 = vpop.f32.mrb[73].mxu1 }
 0x71f   :  { %v11486_v62 = vadd.f32 %v11485_v51, %v11437_v55  ;;  %v14660_v31 = vpop.f32.mrb[74].mxu1 }
 0x720   :  { %v11538_v47 = vmax.f32 %v11494_v57, 0.0  ;;  %v11497_v58 = vadd.f32 %v14660_v31, %v11448_v44  ;;  %v11488_v50 = vpop.f32.mrb[75].mxu1 }
 0x721   :  { %v11512_v42 = vmax.f32 %v11486_v62, 0.0  ;;  %v11489_v13 = vadd.f32 %v11488_v50, %v11440_v18 }
 0x722   :  { %11590 = vst.msk [vmem:[#allocation14 + $0x130] sm:$0xff] %vm789_vm1, %v11538_v47  ;;  %v11551_v10 = vmax.f32 %v11497_v58, 0.0 }
 0x723   :  { %11564 = vst.msk [vmem:[#allocation14 + $0x60] sm:$0xff] %vm789_vm1, %v11512_v42  ;;  %v11525_v12 = vmax.f32 %v11489_v13, 0.0 }
 0x724   :  { %11603 = vst.msk [vmem:[#allocation14 + $0x198] sm:$0xff] %vm789_vm1, %v11551_v10  ;;  %v11629_v8 = vpack.c.bf16 %v11551_v10, %v11538_v47 }
 0x725   :  { %11577 = vst.msk [vmem:[#allocation14 + $0xc8] sm:$0xff] %vm789_vm1, %v11525_v12  ;;  %v11616_v56 = vpack.c.bf16 %v11525_v12, %v11512_v42 }
 0x727   :  { %14669 = vmatprep.mubr.msk.bf16.mxu0 %vm789_vm1, %v11616_v56 }
 0x728   :  { %14670 = vmatmul.mubr.msk.bf16.vlgmr.msra.gmra.mrb[100].mxu0 %vm789_vm1, %v11629_v8 }
 0x72e   :  { %v14483_v52 = vpop.f32.mrb[76].mxu0 }
 0x72f   :  { %v14484_v25 = vpop.f32.mrb[77].mxu0 }
 0x730   :  { %v14485_v37 = vadd.f32 %v14484_v25, %v14483_v52  ;;  %v14486_v22 = vpop.f32.mrb[78].mxu0 }
 0x731   :  { %v14487_v60 = vpop.f32.mrb[79].mxu0 }
 0x732   :  { %v14488_v23 = vadd.f32 %v14487_v60, %v14486_v22  ;;  %v12478_v7 = vadd.f32 %v14485_v37, %v14186_v63 }
 0x734   :  { %v12481_v54 = vadd.f32 %v14488_v23, %v14186_v63 }
 0x736   :  { %v14489_v11 = vpop.f32.mrb[80].mxu0 }
 0x737   :  { %v14490_v5 = vpop.f32.mrb[81].mxu0 }
 0x738   :  { %v14491_v33 = vadd.f32 %v14490_v5, %v14489_v11  ;;  %v14492_v24 = vpop.f32.mrb[82].mxu0 }
 0x739   :  { %v14493_v49 = vpop.f32.mrb[83].mxu0 }
 0x73a   :  { %v14494_v16 = vadd.f32 %v14493_v49, %v14492_v24  ;;  %v12486_v0 = vadd.f32 %v14491_v33, %v14186_v63 }
 0x73c   :  { %v12489_v46 = vadd.f32 %v14494_v16, %v14186_v63 }
 0x73d   :  { %v14511_v21 = vpop.f32.mrb[76].mxu1 }
 0x73e   :  { %v14512_v3 = vpop.f32.mrb[77].mxu1 }
 0x73f   :  { %v14513_v4 = vadd.f32 %v14512_v3, %v14511_v21  ;;  %v14514_v26 = vpop.f32.mrb[78].mxu1 }
 0x740   :  { %v14515_v48 = vpop.f32.mrb[79].mxu1 }
 0x741   :  { %v12527_v6 = vadd.f32 %v14513_v4, %v12478_v7  ;;  %v14516_v43 = vadd.f32 %v14515_v48, %v14514_v26 }
 0x743   :  { %v12530_v1 = vadd.f32 %v14516_v43, %v12481_v54 }
 0x745   :  { %v14517_v9 = vpop.f32.mrb[80].mxu1 }
 0x746   :  { %v14518_v20 = vpop.f32.mrb[81].mxu1 }
 0x747   :  { %v14519_v27 = vadd.f32 %v14518_v20, %v14517_v9  ;;  %v14520_v30 = vpop.f32.mrb[82].mxu1 }
 0x748   :  { %v14521_v38 = vpop.f32.mrb[83].mxu1 }
 0x749   :  { %v12535_v28 = vadd.f32 %v14519_v27, %v12486_v0  ;;  %v14522_v14 = vadd.f32 %v14521_v38, %v14520_v30 }
 0x74b   :  { %v12538_v55 = vadd.f32 %v14522_v14, %v12489_v46 }
 0x74e   :  { %v14539_v15 = vpop.f32.mrb[84].mxu0 }
 0x74f   :  { %v14540_v18 = vpop.f32.mrb[85].mxu0 }
 0x750   :  { %v14541_v29 = vadd.f32 %v14540_v18, %v14539_v15  ;;  %v14542_v61 = vpop.f32.mrb[86].mxu0 }
 0x751   :  { %v14543_v45 = vpop.f32.mrb[87].mxu0 }
 0x752   :  { %v12576_v34 = vadd.f32 %v14541_v29, %v12527_v6  ;;  %v14544_v35 = vadd.f32 %v14543_v45, %v14542_v61 }
 0x754   :  { %v12579_v40 = vadd.f32 %v14544_v35, %v12530_v1 }
 0x756   :  { %v14545_v32 = vpop.f32.mrb[88].mxu0 }
 0x757   :  { %v14546_v59 = vpop.f32.mrb[89].mxu0 }
 0x758   :  { %v14547_v17 = vadd.f32 %v14546_v59, %v14545_v32  ;;  %v14548_v2 = vpop.f32.mrb[90].mxu0 }
 0x759   :  { %v14549_v19 = vpop.f32.mrb[91].mxu0 }
 0x75a   :  { %v12584_v53 = vadd.f32 %v14547_v17, %v12535_v28  ;;  %v14550_v36 = vadd.f32 %v14549_v19, %v14548_v2 }
 0x75c   :  { %v12587_v41 = vadd.f32 %v14550_v36, %v12538_v55 }
 0x75d   :  { %v14567_v44 = vpop.f32.mrb[84].mxu1 }
 0x75e   :  { %v14568_v39 = vpop.f32.mrb[85].mxu1 }
 0x75f   :  { %v14569_v57 = vadd.f32 %v14568_v39, %v14567_v44  ;;  %v14570_v51 = vpop.f32.mrb[86].mxu1 }
 0x760   :  { %v14571_v62 = vpop.f32.mrb[87].mxu1 }
 0x761   :  { %v12625_v31 = vadd.f32 %v14569_v57, %v12576_v34  ;;  %v14572_v47 = vadd.f32 %v14571_v62, %v14570_v51 }
 0x763   :  { %v12628_v58 = vadd.f32 %v14572_v47, %v12579_v40 }
 0x765   :  { %v14573_v50 = vpop.f32.mrb[88].mxu1 }
 0x766   :  { %v14574_v42 = vpop.f32.mrb[89].mxu1 }
 0x767   :  { %v14575_v13 = vadd.f32 %v14574_v42, %v14573_v50  ;;  %v14576_v10 = vpop.f32.mrb[90].mxu1 }
 0x768   :  { %v14577_v12 = vpop.f32.mrb[91].mxu1 }
 0x769   :  { %v12633_v8 = vadd.f32 %v14575_v13, %v12584_v53  ;;  %v14578_v56 = vadd.f32 %v14577_v12, %v14576_v10 }
 0x76b   :  { %v17952_v52 = vadd.f32 %v14578_v56, %v12587_v41 }
 0x76c   :  { %17208 = shalt.err (!%p17205_p10)
}
 0x76d   :  { %s17209_s3 = scalar_lea.hbm %s18005_s7, 6656 }
 0x76e   :  { %p17210_p11 = scmp.ne.s32.totalorder %s18005_s7, %s17209_s3  ;;  %p17213_p12 = scmp.lt.u32.totalorder %s17209_s3, %s18005_s7 }
 0x770   :  { %p17215_p13 = pnand %p17213_p12, %p17210_p11 }
 0x772   :  { %17218 = shalt.err (!%p17215_p13)
}
 0x773   :  { %s17266_s28 = smov 1664   ;;  %s17267_s30 = smov 104  }
 0x774   :  { %12801 = dma.vmem_to_hbm [thread:$0]  %s12796_s20, 6656, %s18005_s7, [#allocation4], %s17266_s28, %s17266_s28, %s17267_s30  }
 0x775   :  { %s17219_s2 = scalar_lea.vmem %s17954_s22, 6656  ;;  %p17224_p1 = scmp.lt.s32.totalorder %s17954_s22, %s17954_s22 }
 0x776   :  { %p17220_p0 = scmp.ne.s32.totalorder %s17954_s22, %s17219_s2  ;;  %p17225_p2 = scmp.lt.s32.totalorder %s17219_s2, %s17219_s2 }
 0x778   :  { %p17226_p3 = por %p17225_p2, %p17224_p1 }
 0x77a   :  { %p17227_p4 = pnand %p17226_p3, %p17220_p0 }
 0x77c   :  { %17230 = shalt.err (!%p17227_p4)
}
 0x77d   :  { %s17231_s16 = scalar_lea.hbm %s18006_s8, 6656 }
 0x77e   :  { %p17232_p5 = scmp.ne.s32.totalorder %s18006_s8, %s17231_s16  ;;  %p17235_p6 = scmp.lt.u32.totalorder %s17231_s16, %s18006_s8 }
 0x780   :  { %p17237_p7 = pnand %p17235_p6, %p17232_p5 }
 0x782   :  { %17240 = shalt.err (!%p17237_p7)
}
 0x783   :  { %12813 = dma.vmem_to_hbm [thread:$0]  %s17954_s22, 6656, %s18006_s8, [#allocation15], %s17266_s28, %s17266_s28, %s17267_s30  }
 0x788   :  { %v14595_v25 = vpop.f32.mrb[92].mxu0 }
 0x789   :  { %v14623_v37 = vpop.f32.mrb[92].mxu1  ;;  %v14596_v22 = vpop.f32.mrb[93].mxu0 }
 0x78a   :  { %v14597_v60 = vadd.f32 %v14596_v22, %v14595_v25  ;;  %v14624_v23 = vpop.f32.mrb[93].mxu1  ;;  %v14598_v11 = vpop.f32.mrb[94].mxu0 }
 0x78b   :  { %v14625_v5 = vadd.f32 %v14624_v23, %v14623_v37  ;;  %v14626_v33 = vpop.f32.mrb[94].mxu1  ;;  %v14599_v24 = vpop.f32.mrb[95].mxu0 }
 0x78c   :  { %v12674_v49 = vadd.f32 %v14597_v60, %v12625_v31  ;;  %v14600_v16 = vadd.f32 %v14599_v24, %v14598_v11  ;;  %v14627_v63 = vpop.f32.mrb[95].mxu1 }
 0x78d   :  { %v14628_v21 = vadd.f32 %v14627_v63, %v14626_v33 }
 0x78e   :  { %v12677_v3 = vadd.f32 %v14600_v16, %v12628_v58  ;;  %v12723_v7 = vadd.f32 %v14625_v5, %v12674_v49 }
 0x790   :  { %v14601_v4 = vpop.f32.mrb[96].mxu0  ;;  %v12726_v26 = vadd.f32 %v14628_v21, %v12677_v3 }
 0x791   :  { %v14629_v48 = vpop.f32.mrb[96].mxu1  ;;  %v14602_v54 = vpop.f32.mrb[97].mxu0 }
 0x792   :  { %v14603_v6 = vadd.f32 %v14602_v54, %v14601_v4  ;;  %v14630_v43 = vpop.f32.mrb[97].mxu1  ;;  %v14604_v1 = vpop.f32.mrb[98].mxu0 }
 0x793   :  { %v14631_v9 = vadd.f32 %v14630_v43, %v14629_v48  ;;  %v14632_v20 = vpop.f32.mrb[98].mxu1  ;;  %v14605_v0 = vpop.f32.mrb[99].mxu0 }
 0x794   :  { %v12682_v27 = vadd.f32 %v14603_v6, %v12633_v8  ;;  %v14606_v30 = vadd.f32 %v14605_v0, %v14604_v1  ;;  %v14633_v38 = vpop.f32.mrb[99].mxu1 }
 0x795   :  { %v14634_v46 = vadd.f32 %v14633_v38, %v14632_v20 }
 0x796   :  { %v12685_v28 = vadd.f32 %v14606_v30, %v17952_v52  ;;  %v12731_v14 = vadd.f32 %v14631_v9, %v12682_v27 }
 0x798   :  { %v12734_v55 = vadd.f32 %v14634_v46, %v12685_v28 }
 0x7fb   :  { %v14671_v15 = vpop.f32.mrb[100].mxu0 }
 0x7fc   :  { %v12780_v18 = vadd.f32 %v14671_v15, %v12731_v14  ;;  %v12771_v29 = vpop.f32.mrb[101].mxu0 }
 0x7fd   :  { %v12772_v61 = vadd.f32 %v12771_v29, %v12723_v7  ;;  %v14672_v45 = vpop.f32.mrb[102].mxu0 }
 0x7fe   :  { %12788 = vst [vmem:[%s18007_s9 + $0x10] sm:$0xff] %v12780_v18  ;;  %v12783_v34 = vadd.f32 %v14672_v45, %v12734_v55  ;;  %v12774_v35 = vpop.f32.mrb[103].mxu0 }
 0x7ff   :  { %12786 = vst [vmem:[%s18007_s9] sm:$0xff] %v12772_v61  ;;  %v12775_v40 = vadd.f32 %v12774_v35, %v12726_v26 }
 0x800   :  { %12789 = vst [vmem:[%s18007_s9 + $0x18] sm:$0xff] %v12783_v34 }
 0x801   :  { %12787 = vst [vmem:[%s18007_s9 + $0x8] sm:$0xff] %v12775_v40 }
 0x802   :  { %17249 = dma.done.wait [#allocation4], 6656  }
 0x803   :  { %17250 = vsyncadd [#allocation4], 4294960640 }
 0x804   :  { %17251 = dma.done.wait [#allocation15], 6656  }
 0x805   :  { %17252 = vsyncadd [#allocation15], 4294960640 }
 0x806   :  { %12824 = vsyncpa [#allocation3], 1 }
 0x807   :  { %12825 = vsyncpa [#allocation6], 1 }
 0x808   :  { %12826 = vsyncpa [#allocation9], 1 }
 0x809   :  { %12827 = vsyncpa [#allocation12], 1 }
 0x80a   :  { %12828 = vsyncpa [#allocation4], 1 }
 0x80b   :  { %12829 = vsyncpa [#allocation15], 1 }

</bundles_post_ra>
